<compile_context>
chip_gen: v7x
topology: tpu7x:2x2x1
jax: 0.10.0
libtpu: 0.0.40
codegen_flags: <defaults>
</compile_context>

<pallas_src>
import jax
import jax.numpy as jnp
from jax.experimental import pallas as pl
from jax.experimental.pallas import tpu as pltpu

EPS = 1e-5          # nn.BatchNorm3d default eps
_TM = 256           # output-voxel rows per grid tile
_LANE = 128
_SENT = -1e30       # sentinel for spatial padding (acts as -inf for the maxpool path)

_CPARAMS = pltpu.CompilerParams(
    dimension_semantics=("parallel",),       # tiles independent -> megacore on v7x
    vmem_limit_bytes=48 * 1024 * 1024,       # headroom under v7x's 64 MiB VMEM
)


def _round_up(a, b):
    return (a + b - 1) // b * b


# ----------------------------------------------------------------------------
# Pallas kernels
# ----------------------------------------------------------------------------
def _conv_stats_pool_kernel(xcol_ref, w_ref, out_ref, res_ref, stats_ref):
    """conv1 tile: bf16 MXU matmul (f32 acc) + per-tile BN stats + maxpool residual.

    xcol: (TM, K1p) bf16 im2col rows; spatial-pad taps hold the -1e30 sentinel.
    """
    cin = res_ref.shape[-1]
    x = xcol_ref[...]                                             # (TM, K1p) bf16
    # zero the spatial-pad sentinels for the convolution path
    xz = jnp.where(x < jnp.asarray(-1e29, x.dtype), jnp.zeros_like(x), x)
    acc = jnp.dot(xz, w_ref[...], preferred_element_type=jnp.float32)  # (TM, Cp)
    out_ref[...] = acc

    # per-tile per-channel sum / sum-of-squares (finalized across tiles on the host)
    s = jnp.sum(acc, axis=0, keepdims=True)
    s2 = jnp.sum(acc * acc, axis=0, keepdims=True)
    rows = jax.lax.broadcasted_iota(jnp.int32, (8, acc.shape[1]), 0)
    stats_ref[...] = jnp.where(rows == 0, s, jnp.where(rows == 1, s2, 0.0))

    # MaxPool3d(3, stride 2, pad 1) residual: running max over the 27 taps that are
    # already in VMEM (sentinel taps never win against real data).
    xf = x.astype(jnp.float32)
    r = xf[:, 0:cin]
    for t in range(1, 27):
        r = jnp.maximum(r, xf[:, t * cin:(t + 1) * cin])
    res_ref[...] = r


def _conv_stats_kernel(xcol_ref, w_ref, out_ref, stats_ref):
    """conv2 tile: bf16 MXU matmul (f32 acc) + per-tile BN stats."""
    acc = jnp.dot(xcol_ref[...], w_ref[...], preferred_element_type=jnp.float32)
    out_ref[...] = acc
    s = jnp.sum(acc, axis=0, keepdims=True)
    s2 = jnp.sum(acc * acc, axis=0, keepdims=True)
    rows = jax.lax.broadcasted_iota(jnp.int32, (8, acc.shape[1]), 0)
    stats_ref[...] = jnp.where(rows == 0, s, jnp.where(rows == 1, s2, 0.0))


def _bn_relu_kernel(y_ref, scale_ref, shift_ref, o_ref):
    """h1 = relu(conv1 * scale + shift); emit only the real C channels, in bf16."""
    c = o_ref.shape[-1]
    y = jnp.maximum(y_ref[...] * scale_ref[...] + shift_ref[...], 0.0)
    o_ref[...] = y[:, 0:c].astype(o_ref.dtype)


def _bn_res_relu_kernel(y_ref, scale_ref, shift_ref, res_ref, o_ref):
    """out = relu(bn2(conv2) + cat(residual, residual)) without a lane concat."""
    cin = res_ref.shape[-1]
    y = y_ref[...] * scale_ref[...] + shift_ref[...]              # (TM, Cp) f32
    r = res_ref[...]                                              # (TM, Cin) f32
    o_ref[...] = jnp.maximum(y, 0.0)                              # dense, lane-full store
    o_ref[:, 0:cin] = jnp.maximum(y[:, 0:cin] + r, 0.0)           # add residual to half 1
    o_ref[:, cin:2 * cin] = jnp.maximum(y[:, cin:2 * cin] + r, 0.0)  # and half 2


# ----------------------------------------------------------------------------
# Host-side glue (packing / im2col / BN finalize)
# ----------------------------------------------------------------------------
def _im2col(x_padded, out_spatial, stride, k_pad, m_pad):
    """(N, Dp, Hp, Wp, C) -> (Mp, k_pad), tap-major rows; zero pad on K and M."""
    n, ch = x_padded.shape[0], x_padded.shape[-1]
    do, ho, wo = out_spatial
    taps = []
    for kd in range(3):
        for kh in range(3):
            for kw in range(3):
                taps.append(x_padded[:,
                                     kd:kd + (do - 1) * stride + 1:stride,
                                     kh:kh + (ho - 1) * stride + 1:stride,
                                     kw:kw + (wo - 1) * stride + 1:stride, :])
    m = n * do * ho * wo
    col = jnp.stack(taps, axis=4).reshape(m, 27 * ch)
    return jnp.pad(col, ((0, m_pad - m), (0, k_pad - 27 * ch)))


def _pack_weight(w_oidhw, k_pad, cpad):
    """PyTorch (Cout, Cin, 3, 3, 3) -> (k_pad, cpad) bf16, matching _im2col order."""
    cout, cin = w_oidhw.shape[0], w_oidhw.shape[1]
    wk = jnp.transpose(w_oidhw, (2, 3, 4, 1, 0)).reshape(27 * cin, cout)
    wk = jnp.pad(wk, ((0, k_pad - 27 * cin), (0, cpad - cout)))
    return wk.astype(jnp.bfloat16)


def _bn_affine(stats, m_true, gamma, beta, cpad):
    """Combine per-tile (sum, sumsq) rows into BN scale/shift (training batch stats)."""
    s = jnp.sum(stats[0::8], axis=0)                  # (Cp,) sum
    s2 = jnp.sum(stats[1::8], axis=0)                 # (Cp,) sum of squares
    mean = s / m_true
    var = jnp.maximum(s2 / m_true - mean * mean, 0.0)  # biased var, as BN uses
    g = jnp.pad(gamma.astype(jnp.float32), (0, cpad - gamma.shape[0]))
    b = jnp.pad(beta.astype(jnp.float32), (0, cpad - beta.shape[0]))
    scale = g * jax.lax.rsqrt(var + EPS)
    shift = b - mean * scale
    return scale.reshape(1, cpad), shift.reshape(1, cpad)


# ----------------------------------------------------------------------------
# Forward pass
# ----------------------------------------------------------------------------
@jax.jit
def downsample_block(x_ncdhw, params):
    x = jnp.transpose(x_ncdhw, (0, 2, 3, 4, 1)).astype(jnp.float32)   # NDHWC
    n, d, h, w, cin = x.shape
    c = params["w1"].shape[0]
    assert c == 2 * cin, "torch.cat((residual, residual), 1) needs channel == 2*channel_in"
    do, ho, wo = (d - 1) // 2 + 1, (h - 1) // 2 + 1, (w - 1) // 2 + 1
    m = n * do * ho * wo

    tm = min(_TM, _round_up(m, 8))
    mp = _round_up(m, tm)
    nt = mp // tm
    cpad = _round_up(c, _LANE)
    k1p = _round_up(27 * cin, _LANE)
    k2p = _round_up(27 * c, _LANE)

    # ---- stage 1: conv1 (s2, p1) + bn1 stats + maxpool residual ------------
    # NOTE: the conv biases are dropped on purpose: a per-channel bias added before
    # training-mode BatchNorm is exactly cancelled by the mean subtraction.
    x_pad = jnp.pad(x, ((0, 0), (1, 1), (1, 1), (1, 1), (0, 0)),
                    constant_values=_SENT).astype(jnp.bfloat16)
    xcol1 = _im2col(x_pad, (do, ho, wo), 2, k1p, mp)                  # (Mp, K1p) bf16
    w1 = _pack_weight(params["w1"], k1p, cpad)                        # (K1p, Cp)  bf16

    conv1, res1, stats1 = pl.pallas_call(
        _conv_stats_pool_kernel,
        grid=(nt,),
        in_specs=[pl.BlockSpec((tm, k1p), lambda i: (i, 0)),
                  pl.BlockSpec((k1p, cpad), lambda i: (0, 0))],
        out_specs=[pl.BlockSpec((tm, cpad), lambda i: (i, 0)),
                   pl.BlockSpec((tm, cin), lambda i: (i, 0)),
                   pl.BlockSpec((8, cpad), lambda i: (i, 0))],
        out_shape=[jax.ShapeDtypeStruct((mp, cpad), jnp.float32),
                   jax.ShapeDtypeStruct((mp, cin), jnp.float32),
                   jax.ShapeDtypeStruct((8 * nt, cpad), jnp.float32)],
        compiler_params=_CPARAMS,
    )(xcol1, w1)

    scale1, shift1 = _bn_affine(stats1, m, params["gamma1"], params["beta1"], cpad)

    h1 = pl.pallas_call(
        _bn_relu_kernel,
        grid=(nt,),
        in_specs=[pl.BlockSpec((tm, cpad), lambda i: (i, 0)),
                  pl.BlockSpec((1, cpad), lambda i: (0, 0)),
                  pl.BlockSpec((1, cpad), lambda i: (0, 0))],
        out_specs=pl.BlockSpec((tm, c), lambda i: (i, 0)),
        out_shape=jax.ShapeDtypeStruct((mp, c), jnp.bfloat16),
        compiler_params=_CPARAMS,
    )(conv1, scale1, shift1)

    # ---- stage 2: conv2 (s1, p1) + bn2 + residual add + relu ---------------
    h1_pad = jnp.pad(h1[:m].reshape(n, do, ho, wo, c),
                     ((0, 0), (1, 1), (1, 1), (1, 1), (0, 0)))
    xcol2 = _im2col(h1_pad, (do, ho, wo), 1, k2p, mp)                 # (Mp, K2p) bf16
    w2 = _pack_weight(params["w2"], k2p, cpad)                        # (K2p, Cp)  bf16

    conv2, stats2 = pl.pallas_call(
        _conv_stats_kernel,
        grid=(nt,),
        in_specs=[pl.BlockSpec((tm, k2p), lambda i: (i, 0)),
                  pl.BlockSpec((k2p, cpad), lambda i: (0, 0))],
        out_specs=[pl.BlockSpec((tm, cpad), lambda i: (i, 0)),
                   pl.BlockSpec((8, cpad), lambda i: (i, 0))],
        out_shape=[jax.ShapeDtypeStruct((mp, cpad), jnp.float32),
                   jax.ShapeDtypeStruct((8 * nt, cpad), jnp.float32)],
        compiler_params=_CPARAMS,
    )(xcol2, w2)

    scale2, shift2 = _bn_affine(stats2, m, params["gamma2"], params["beta2"], cpad)

    out = pl.pallas_call(
        _bn_res_relu_kernel,
        grid=(nt,),
        in_specs=[pl.BlockSpec((tm, cpad), lambda i: (i, 0)),
                  pl.BlockSpec((1, cpad), lambda i: (0, 0)),
                  pl.BlockSpec((1, cpad), lambda i: (0, 0)),
                  pl.BlockSpec((tm, cin), lambda i: (i, 0))],
        out_specs=pl.BlockSpec((tm, cpad), lambda i: (i, 0)),
        out_shape=jax.ShapeDtypeStruct((mp, cpad), jnp.float32),
        compiler_params=_CPARAMS,
    )(conv2, scale2, shift2, res1)

    out = out[:m, :c].reshape(n, do, ho, wo, c)                       # drop lane/M pad
    return jnp.transpose(out, (0, 4, 1, 2, 3))                        # back to NCDHW


# ----------------------------------------------------------------------------
# Pure-JAX reference (f32, for verification only)
# ----------------------------------------------------------------------------
def _bn_ref(y, gamma, beta):
    mean = y.mean(axis=(0, 2, 3, 4), keepdims=True)
    var = ((y - mean) ** 2).mean(axis=(0, 2, 3, 4), keepdims=True)
    return ((y - mean) * jax.lax.rsqrt(var + EPS)
            * gamma.reshape(1, -1, 1, 1, 1) + beta.reshape(1, -1, 1, 1, 1))


def downsample_block_ref(x, p):
    dn = ("NCDHW", "OIDHW", "NCDHW")
    out = jax.lax.conv_general_dilated(x, p["w1"], (2, 2, 2), [(1, 1)] * 3,
                                       dimension_numbers=dn)
    out = out + p["b1"].reshape(1, -1, 1, 1, 1)
    out = jnp.maximum(_bn_ref(out, p["gamma1"], p["beta1"]), 0.0)
    out = jax.lax.conv_general_dilated(out, p["w2"], (1, 1, 1), [(1, 1)] * 3,
                                       dimension_numbers=dn)
    out = out + p["b2"].reshape(1, -1, 1, 1, 1)
    out = _bn_ref(out, p["gamma2"], p["beta2"])
    residual = jax.lax.reduce_window(
        x, -jnp.inf, jax.lax.max,
        window_dimensions=(1, 1, 3, 3, 3), window_strides=(1, 1, 2, 2, 2),
        padding=[(0, 0), (0, 0), (1, 1), (1, 1), (1, 1)])
    out = out + jnp.concatenate([residual, residual], axis=1)
    return jnp.maximum(out, 0.0)


# ----------------------------------------------------------------------------
if __name__ == "__main__":
    CHANNEL_IN, CHANNEL = 4, 8          # channel must be 2 * channel_in
    N, D, H, W = 2, 16, 16, 16          # -> M = 2*8*8*8 = 1024 rows, 4 grid tiles

    key = jax.random.PRNGKey(0)
    kx, kw1, kb1, kw2, kb2 = jax.random.split(key, 5)
    x = jax.random.normal(kx, (N, CHANNEL_IN, D, H, W), jnp.float32)

    params = {
        "w1": jax.random.normal(kw1, (CHANNEL, CHANNEL_IN, 3, 3, 3), jnp.float32) * 0.1,
        "b1": jax.random.normal(kb1, (CHANNEL,), jnp.float32) * 0.1,
        "gamma1": jnp.ones((CHANNEL,), jnp.float32),    # nn.BatchNorm3d default init
        "beta1": jnp.zeros((CHANNEL,), jnp.float32),
        "w2": jax.random.normal(kw2, (CHANNEL, CHANNEL, 3, 3, 3), jnp.float32) * 0.1,
        "b2": jax.random.normal(kb2, (CHANNEL,), jnp.float32) * 0.1,
        "gamma2": jnp.ones((CHANNEL,), jnp.float32),
        "beta2": jnp.zeros((CHANNEL,), jnp.float32),
    }

    out = jax.block_until_ready(downsample_block(x, params))
    ref = jax.block_until_ready(downsample_block_ref(x, params))

    assert out.shape == (N, CHANNEL, D // 2, H // 2, W // 2), out.shape
    err = float(jnp.max(jnp.abs(out - ref)))
    scale = float(jnp.max(jnp.abs(ref)))
    # bf16 matmul operands (f32 accumulation) -> compare at a bf16-appropriate tolerance
    assert err <= 3e-2 * max(scale, 1.0), (err, scale)
    print("KERNEL_OK")
</pallas_src>

<mosaic_0001>
module attributes {stable_mosaic.version = 11 : i64} {
  func.func @_conv_stats_pool_kernel(%arg0: i32, %arg1: memref<256x128xbf16, #tpu.memory_space<vmem>>, %arg2: memref<128x128xbf16, #tpu.memory_space<vmem>>, %arg3: memref<256x128xf32, #tpu.memory_space<vmem>>, %arg4: memref<256x4xf32, #tpu.memory_space<vmem>>, %arg5: memref<8x128xf32, #tpu.memory_space<vmem>>) attributes {dimension_semantics = [#tpu.dimension_semantics<parallel>], iteration_bounds = array<i64: 4>, scalar_prefetch = 0 : i64, scratch_operands = 0 : i64, tpu.core_type = #tpu.core_type<tc>, window_params = [{transform_indices = @transform_0, window_bounds = array<i64: 256, 128>}, {pipeline_mode = #tpu.pipeline_mode<synchronous>, transform_indices = @transform_1, window_bounds = array<i64: 128, 128>}, {transform_indices = @transform_2, window_bounds = array<i64: 256, 128>}, {transform_indices = @transform_3, window_bounds = array<i64: 256, 4>}, {transform_indices = @transform_4, window_bounds = array<i64: 8, 128>}]} {
    %c0 = arith.constant 0 : index
    %c0_0 = arith.constant 0 : index
    %0 = vector.load %arg1[%c0, %c0_0] : memref<256x128xbf16, #tpu.memory_space<vmem>>, vector<256x128xbf16>
    %cst = arith.constant -1.002730e+29 : bf16
    %1 = vector.broadcast %cst : bf16 to vector<256x128xbf16>
    %2 = arith.cmpf olt, %0, %1 : vector<256x128xbf16>
    %cst_1 = arith.constant 0.000000e+00 : bf16
    %3 = vector.broadcast %cst_1 : bf16 to vector<256x128xbf16>
    %4 = arith.select %2, %3, %0 : vector<256x128xi1>, vector<256x128xbf16>
    %c0_2 = arith.constant 0 : index
    %c0_3 = arith.constant 0 : index
    %5 = vector.load %arg2[%c0_2, %c0_3] : memref<128x128xbf16, #tpu.memory_space<vmem>>, vector<128x128xbf16>
    %cst_4 = arith.constant dense<0.000000e+00> : vector<256x128xf32>
    %6 = tpu.matmul %4, %5, %cst_4 {dimension_numbers = #tpu.dot_dimension_numbers<[1], [0], [0], [1], [0, 0, 1, 1], [], []>} : vector<256x128xbf16>, vector<128x128xbf16>, vector<256x128xf32> -> vector<256x128xf32>
    %c0_5 = arith.constant 0 : index
    %c0_6 = arith.constant 0 : index
    %7 = vector.load %arg3[%c0_5, %c0_6] : memref<256x128xf32, #tpu.memory_space<vmem>>, vector<256x128xf32>
    tpu.vector_store %arg3[%c0_5, %c0_6], %6 {strides = array<i32>} : memref<256x128xf32, #tpu.memory_space<vmem>>, vector<256x128xf32>,
    %cst_7 = arith.constant dense<0.000000e+00> : vector<128xf32>
    %8 = vector.multi_reduction <add>, %6, %cst_7 [0] : vector<256x128xf32> to vector<128xf32>
    %9 = vector.shape_cast %8 : vector<128xf32> to vector<1x128xf32>
    %10 = arith.mulf %6, %6 : vector<256x128xf32>
    %cst_8 = arith.constant dense<0.000000e+00> : vector<128xf32>
    %11 = vector.multi_reduction <add>, %10, %cst_8 [0] : vector<256x128xf32> to vector<128xf32>
    %12 = vector.shape_cast %11 : vector<128xf32> to vector<1x128xf32>
    %13 = tpu.iota {dimensions = array<i32: 0>} : vector<8x128xi32>
    %c0_i32 = arith.constant 0 : i32
    %14 = vector.broadcast %c0_i32 : i32 to vector<8x128xi32>
    %15 = arith.cmpi eq, %13, %14 : vector<8x128xi32>
    %c1_i32 = arith.constant 1 : i32
    %16 = vector.broadcast %c1_i32 : i32 to vector<8x128xi32>
    %17 = arith.cmpi eq, %13, %16 : vector<8x128xi32>
    %cst_9 = arith.constant 0.000000e+00 : f32
    %18 = vector.shape_cast %12 : vector<1x128xf32> to vector<1x128xf32>
    %19 = vector.broadcast %18 : vector<1x128xf32> to vector<8x128xf32>
    %20 = vector.broadcast %cst_9 : f32 to vector<8x128xf32>
    %21 = arith.select %17, %19, %20 : vector<8x128xi1>, vector<8x128xf32>
    %22 = vector.shape_cast %9 : vector<1x128xf32> to vector<1x128xf32>
    %23 = vector.broadcast %22 : vector<1x128xf32> to vector<8x128xf32>
    %24 = arith.select %15, %23, %21 : vector<8x128xi1>, vector<8x128xf32>
    %c0_10 = arith.constant 0 : index
    %c0_11 = arith.constant 0 : index
    %25 = vector.load %arg5[%c0_10, %c0_11] : memref<8x128xf32, #tpu.memory_space<vmem>>, vector<8x128xf32>
    tpu.vector_store %arg5[%c0_10, %c0_11], %24 {strides = array<i32>} : memref<8x128xf32, #tpu.memory_space<vmem>>, vector<8x128xf32>,
    %26 = arith.extf %0 : vector<256x128xbf16> to vector<256x128xf32>
    %27 = vector.extract_strided_slice %26 {offsets = [0, 0], sizes = [256, 4], strides = [1, 1]} : vector<256x128xf32> to vector<256x4xf32>
    %28 = vector.extract_strided_slice %26 {offsets = [0, 4], sizes = [256, 4], strides = [1, 1]} : vector<256x128xf32> to vector<256x4xf32>
    %29 = arith.maximumf %27, %28 : vector<256x4xf32>
    %30 = vector.extract_strided_slice %26 {offsets = [0, 8], sizes = [256, 4], strides = [1, 1]} : vector<256x128xf32> to vector<256x4xf32>
    %31 = arith.maximumf %29, %30 : vector<256x4xf32>
    %32 = vector.extract_strided_slice %26 {offsets = [0, 12], sizes = [256, 4], strides = [1, 1]} : vector<256x128xf32> to vector<256x4xf32>
    %33 = arith.maximumf %31, %32 : vector<256x4xf32>
    %34 = vector.extract_strided_slice %26 {offsets = [0, 16], sizes = [256, 4], strides = [1, 1]} : vector<256x128xf32> to vector<256x4xf32>
    %35 = arith.maximumf %33, %34 : vector<256x4xf32>
    %36 = vector.extract_strided_slice %26 {offsets = [0, 20], sizes = [256, 4], strides = [1, 1]} : vector<256x128xf32> to vector<256x4xf32>
    %37 = arith.maximumf %35, %36 : vector<256x4xf32>
    %38 = vector.extract_strided_slice %26 {offsets = [0, 24], sizes = [256, 4], strides = [1, 1]} : vector<256x128xf32> to vector<256x4xf32>
    %39 = arith.maximumf %37, %38 : vector<256x4xf32>
    %40 = vector.extract_strided_slice %26 {offsets = [0, 28], sizes = [256, 4], strides = [1, 1]} : vector<256x128xf32> to vector<256x4xf32>
    %41 = arith.maximumf %39, %40 : vector<256x4xf32>
    %42 = vector.extract_strided_slice %26 {offsets = [0, 32], sizes = [256, 4], strides = [1, 1]} : vector<256x128xf32> to vector<256x4xf32>
    %43 = arith.maximumf %41, %42 : vector<256x4xf32>
    %44 = vector.extract_strided_slice %26 {offsets = [0, 36], sizes = [256, 4], strides = [1, 1]} : vector<256x128xf32> to vector<256x4xf32>
    %45 = arith.maximumf %43, %44 : vector<256x4xf32>
    %46 = vector.extract_strided_slice %26 {offsets = [0, 40], sizes = [256, 4], strides = [1, 1]} : vector<256x128xf32> to vector<256x4xf32>
    %47 = arith.maximumf %45, %46 : vector<256x4xf32>
    %48 = vector.extract_strided_slice %26 {offsets = [0, 44], sizes = [256, 4], strides = [1, 1]} : vector<256x128xf32> to vector<256x4xf32>
    %49 = arith.maximumf %47, %48 : vector<256x4xf32>
    %50 = vector.extract_strided_slice %26 {offsets = [0, 48], sizes = [256, 4], strides = [1, 1]} : vector<256x128xf32> to vector<256x4xf32>
    %51 = arith.maximumf %49, %50 : vector<256x4xf32>
    %52 = vector.extract_strided_slice %26 {offsets = [0, 52], sizes = [256, 4], strides = [1, 1]} : vector<256x128xf32> to vector<256x4xf32>
    %53 = arith.maximumf %51, %52 : vector<256x4xf32>
    %54 = vector.extract_strided_slice %26 {offsets = [0, 56], sizes = [256, 4], strides = [1, 1]} : vector<256x128xf32> to vector<256x4xf32>
    %55 = arith.maximumf %53, %54 : vector<256x4xf32>
    %56 = vector.extract_strided_slice %26 {offsets = [0, 60], sizes = [256, 4], strides = [1, 1]} : vector<256x128xf32> to vector<256x4xf32>
    %57 = arith.maximumf %55, %56 : vector<256x4xf32>
    %58 = vector.extract_strided_slice %26 {offsets = [0, 64], sizes = [256, 4], strides = [1, 1]} : vector<256x128xf32> to vector<256x4xf32>
    %59 = arith.maximumf %57, %58 : vector<256x4xf32>
    %60 = vector.extract_strided_slice %26 {offsets = [0, 68], sizes = [256, 4], strides = [1, 1]} : vector<256x128xf32> to vector<256x4xf32>
    %61 = arith.maximumf %59, %60 : vector<256x4xf32>
    %62 = vector.extract_strided_slice %26 {offsets = [0, 72], sizes = [256, 4], strides = [1, 1]} : vector<256x128xf32> to vector<256x4xf32>
    %63 = arith.maximumf %61, %62 : vector<256x4xf32>
    %64 = vector.extract_strided_slice %26 {offsets = [0, 76], sizes = [256, 4], strides = [1, 1]} : vector<256x128xf32> to vector<256x4xf32>
    %65 = arith.maximumf %63, %64 : vector<256x4xf32>
    %66 = vector.extract_strided_slice %26 {offsets = [0, 80], sizes = [256, 4], strides = [1, 1]} : vector<256x128xf32> to vector<256x4xf32>
    %67 = arith.maximumf %65, %66 : vector<256x4xf32>
    %68 = vector.extract_strided_slice %26 {offsets = [0, 84], sizes = [256, 4], strides = [1, 1]} : vector<256x128xf32> to vector<256x4xf32>
    %69 = arith.maximumf %67, %68 : vector<256x4xf32>
    %70 = vector.extract_strided_slice %26 {offsets = [0, 88], sizes = [256, 4], strides = [1, 1]} : vector<256x128xf32> to vector<256x4xf32>
    %71 = arith.maximumf %69, %70 : vector<256x4xf32>
    %72 = vector.extract_strided_slice %26 {offsets = [0, 92], sizes = [256, 4], strides = [1, 1]} : vector<256x128xf32> to vector<256x4xf32>
    %73 = arith.maximumf %71, %72 : vector<256x4xf32>
    %74 = vector.extract_strided_slice %26 {offsets = [0, 96], sizes = [256, 4], strides = [1, 1]} : vector<256x128xf32> to vector<256x4xf32>
    %75 = arith.maximumf %73, %74 : vector<256x4xf32>
    %76 = vector.extract_strided_slice %26 {offsets = [0, 100], sizes = [256, 4], strides = [1, 1]} : vector<256x128xf32> to vector<256x4xf32>
    %77 = arith.maximumf %75, %76 : vector<256x4xf32>
    %78 = vector.extract_strided_slice %26 {offsets = [0, 104], sizes = [256, 4], strides = [1, 1]} : vector<256x128xf32> to vector<256x4xf32>
    %79 = arith.maximumf %77, %78 : vector<256x4xf32>
    %c0_12 = arith.constant 0 : index
    %c0_13 = arith.constant 0 : index
    %80 = vector.load %arg4[%c0_12, %c0_13] : memref<256x4xf32, #tpu.memory_space<vmem>>, vector<256x4xf32>
    tpu.vector_store %arg4[%c0_12, %c0_13], %79 {strides = array<i32>} : memref<256x4xf32, #tpu.memory_space<vmem>>, vector<256x4xf32>,
    return
  }
  func.func @transform_0(%arg0: i32) -> (i32, i32) {
    %c0_i32 = arith.constant 0 : i32
    %c0_i32_0 = arith.constant 0 : i32
    return %arg0, %c0_i32 : i32, i32
  }
  func.func @transform_1(%arg0: i32) -> (i32, i32) {
    %c0_i32 = arith.constant 0 : i32
    %c0_i32_0 = arith.constant 0 : i32
    %c0_i32_1 = arith.constant 0 : i32
    return %c0_i32, %c0_i32_0 : i32, i32
  }
  func.func @transform_2(%arg0: i32) -> (i32, i32) {
    %c0_i32 = arith.constant 0 : i32
    %c0_i32_0 = arith.constant 0 : i32
    return %arg0, %c0_i32 : i32, i32
  }
  func.func @transform_3(%arg0: i32) -> (i32, i32) {
    %c0_i32 = arith.constant 0 : i32
    %c0_i32_0 = arith.constant 0 : i32
    return %arg0, %c0_i32 : i32, i32
  }
  func.func @transform_4(%arg0: i32) -> (i32, i32) {
    %c0_i32 = arith.constant 0 : i32
    %c0_i32_0 = arith.constant 0 : i32
    return %arg0, %c0_i32 : i32, i32
  }
}

module attributes {stable_mosaic.version = 11 : i64} {
  func.func @_bn_relu_kernel(%arg0: i32, %arg1: memref<256x128xf32, #tpu.memory_space<vmem>>, %arg2: memref<1x128xf32, #tpu.memory_space<vmem>>, %arg3: memref<1x128xf32, #tpu.memory_space<vmem>>, %arg4: memref<256x8xbf16, #tpu.memory_space<vmem>>) attributes {dimension_semantics = [#tpu.dimension_semantics<parallel>], iteration_bounds = array<i64: 4>, scalar_prefetch = 0 : i64, scratch_operands = 0 : i64, tpu.core_type = #tpu.core_type<tc>, window_params = [{transform_indices = @transform_0, window_bounds = array<i64: 256, 128>}, {pipeline_mode = #tpu.pipeline_mode<synchronous>, transform_indices = @transform_1, window_bounds = array<i64: 1, 128>}, {pipeline_mode = #tpu.pipeline_mode<synchronous>, transform_indices = @transform_2, window_bounds = array<i64: 1, 128>}, {transform_indices = @transform_3, window_bounds = array<i64: 256, 8>}]} {
    %c0 = arith.constant 0 : index
    %c0_0 = arith.constant 0 : index
    %0 = vector.load %arg1[%c0, %c0_0] : memref<256x128xf32, #tpu.memory_space<vmem>>, vector<256x128xf32>
    %c0_1 = arith.constant 0 : index
    %c0_2 = arith.constant 0 : index
    %1 = vector.load %arg2[%c0_1, %c0_2] : memref<1x128xf32, #tpu.memory_space<vmem>>, vector<1x128xf32>
    %2 = vector.broadcast %1 : vector<1x128xf32> to vector<256x128xf32>
    %3 = arith.mulf %0, %2 : vector<256x128xf32>
    %c0_3 = arith.constant 0 : index
    %c0_4 = arith.constant 0 : index
    %4 = vector.load %arg3[%c0_3, %c0_4] : memref<1x128xf32, #tpu.memory_space<vmem>>, vector<1x128xf32>
    %5 = vector.broadcast %4 : vector<1x128xf32> to vector<256x128xf32>
    %6 = arith.addf %3, %5 : vector<256x128xf32>
    %cst = arith.constant 0.000000e+00 : f32
    %7 = vector.broadcast %cst : f32 to vector<256x128xf32>
    %8 = arith.maximumf %6, %7 : vector<256x128xf32>
    %9 = vector.extract_strided_slice %8 {offsets = [0, 0], sizes = [256, 8], strides = [1, 1]} : vector<256x128xf32> to vector<256x8xf32>
    %10 = arith.truncf %9 : vector<256x8xf32> to vector<256x8xbf16>
    %c0_5 = arith.constant 0 : index
    %c0_6 = arith.constant 0 : index
    %11 = vector.load %arg4[%c0_5, %c0_6] : memref<256x8xbf16, #tpu.memory_space<vmem>>, vector<256x8xbf16>
    tpu.vector_store %arg4[%c0_5, %c0_6], %10 {strides = array<i32>} : memref<256x8xbf16, #tpu.memory_space<vmem>>, vector<256x8xbf16>,
    return
  }
  func.func @transform_0(%arg0: i32) -> (i32, i32) {
    %c0_i32 = arith.constant 0 : i32
    %c0_i32_0 = arith.constant 0 : i32
    return %arg0, %c0_i32 : i32, i32
  }
  func.func @transform_1(%arg0: i32) -> (i32, i32) {
    %c0_i32 = arith.constant 0 : i32
    %c0_i32_0 = arith.constant 0 : i32
    %c0_i32_1 = arith.constant 0 : i32
    return %c0_i32, %c0_i32_0 : i32, i32
  }
  func.func @transform_2(%arg0: i32) -> (i32, i32) {
    %c0_i32 = arith.constant 0 : i32
    %c0_i32_0 = arith.constant 0 : i32
    %c0_i32_1 = arith.constant 0 : i32
    return %c0_i32, %c0_i32_0 : i32, i32
  }
  func.func @transform_3(%arg0: i32) -> (i32, i32) {
    %c0_i32 = arith.constant 0 : i32
    %c0_i32_0 = arith.constant 0 : i32
    return %arg0, %c0_i32 : i32, i32
  }
}

module attributes {stable_mosaic.version = 11 : i64} {
  func.func @_conv_stats_kernel(%arg0: i32, %arg1: memref<256x256xbf16, #tpu.memory_space<vmem>>, %arg2: memref<256x128xbf16, #tpu.memory_space<vmem>>, %arg3: memref<256x128xf32, #tpu.memory_space<vmem>>, %arg4: memref<8x128xf32, #tpu.memory_space<vmem>>) attributes {dimension_semantics = [#tpu.dimension_semantics<parallel>], iteration_bounds = array<i64: 4>, scalar_prefetch = 0 : i64, scratch_operands = 0 : i64, tpu.core_type = #tpu.core_type<tc>, window_params = [{transform_indices = @transform_0, window_bounds = array<i64: 256, 256>}, {pipeline_mode = #tpu.pipeline_mode<synchronous>, transform_indices = @transform_1, window_bounds = array<i64: 256, 128>}, {transform_indices = @transform_2, window_bounds = array<i64: 256, 128>}, {transform_indices = @transform_3, window_bounds = array<i64: 8, 128>}]} {
    %c0 = arith.constant 0 : index
    %c0_0 = arith.constant 0 : index
    %0 = vector.load %arg1[%c0, %c0_0] : memref<256x256xbf16, #tpu.memory_space<vmem>>, vector<256x256xbf16>
    %c0_1 = arith.constant 0 : index
    %c0_2 = arith.constant 0 : index
    %1 = vector.load %arg2[%c0_1, %c0_2] : memref<256x128xbf16, #tpu.memory_space<vmem>>, vector<256x128xbf16>
    %cst = arith.constant dense<0.000000e+00> : vector<256x128xf32>
    %2 = tpu.matmul %0, %1, %cst {dimension_numbers = #tpu.dot_dimension_numbers<[1], [0], [0], [1], [0, 0, 1, 1], [], []>} : vector<256x256xbf16>, vector<256x128xbf16>, vector<256x128xf32> -> vector<256x128xf32>
    %c0_3 = arith.constant 0 : index
    %c0_4 = arith.constant 0 : index
    %3 = vector.load %arg3[%c0_3, %c0_4] : memref<256x128xf32, #tpu.memory_space<vmem>>, vector<256x128xf32>
    tpu.vector_store %arg3[%c0_3, %c0_4], %2 {strides = array<i32>} : memref<256x128xf32, #tpu.memory_space<vmem>>, vector<256x128xf32>,
    %cst_5 = arith.constant dense<0.000000e+00> : vector<128xf32>
    %4 = vector.multi_reduction <add>, %2, %cst_5 [0] : vector<256x128xf32> to vector<128xf32>
    %5 = vector.shape_cast %4 : vector<128xf32> to vector<1x128xf32>
    %6 = arith.mulf %2, %2 : vector<256x128xf32>
    %cst_6 = arith.constant dense<0.000000e+00> : vector<128xf32>
    %7 = vector.multi_reduction <add>, %6, %cst_6 [0] : vector<256x128xf32> to vector<128xf32>
    %8 = vector.shape_cast %7 : vector<128xf32> to vector<1x128xf32>
    %9 = tpu.iota {dimensions = array<i32: 0>} : vector<8x128xi32>
    %c0_i32 = arith.constant 0 : i32
    %10 = vector.broadcast %c0_i32 : i32 to vector<8x128xi32>
    %11 = arith.cmpi eq, %9, %10 : vector<8x128xi32>
    %c1_i32 = arith.constant 1 : i32
    %12 = vector.broadcast %c1_i32 : i32 to vector<8x128xi32>
    %13 = arith.cmpi eq, %9, %12 : vector<8x128xi32>
    %cst_7 = arith.constant 0.000000e+00 : f32
    %14 = vector.shape_cast %8 : vector<1x128xf32> to vector<1x128xf32>
    %15 = vector.broadcast %14 : vector<1x128xf32> to vector<8x128xf32>
    %16 = vector.broadcast %cst_7 : f32 to vector<8x128xf32>
    %17 = arith.select %13, %15, %16 : vector<8x128xi1>, vector<8x128xf32>
    %18 = vector.shape_cast %5 : vector<1x128xf32> to vector<1x128xf32>
    %19 = vector.broadcast %18 : vector<1x128xf32> to vector<8x128xf32>
    %20 = arith.select %11, %19, %17 : vector<8x128xi1>, vector<8x128xf32>
    %c0_8 = arith.constant 0 : index
    %c0_9 = arith.constant 0 : index
    %21 = vector.load %arg4[%c0_8, %c0_9] : memref<8x128xf32, #tpu.memory_space<vmem>>, vector<8x128xf32>
    tpu.vector_store %arg4[%c0_8, %c0_9], %20 {strides = array<i32>} : memref<8x128xf32, #tpu.memory_space<vmem>>, vector<8x128xf32>,
    return
  }
  func.func @transform_0(%arg0: i32) -> (i32, i32) {
    %c0_i32 = arith.constant 0 : i32
    %c0_i32_0 = arith.constant 0 : i32
    return %arg0, %c0_i32 : i32, i32
  }
  func.func @transform_1(%arg0: i32) -> (i32, i32) {
    %c0_i32 = arith.constant 0 : i32
    %c0_i32_0 = arith.constant 0 : i32
    %c0_i32_1 = arith.constant 0 : i32
    return %c0_i32, %c0_i32_0 : i32, i32
  }
  func.func @transform_2(%arg0: i32) -> (i32, i32) {
    %c0_i32 = arith.constant 0 : i32
    %c0_i32_0 = arith.constant 0 : i32
    return %arg0, %c0_i32 : i32, i32
  }
  func.func @transform_3(%arg0: i32) -> (i32, i32) {
    %c0_i32 = arith.constant 0 : i32
    %c0_i32_0 = arith.constant 0 : i32
    return %arg0, %c0_i32 : i32, i32
  }
}

module attributes {stable_mosaic.version = 11 : i64} {
  func.func @_bn_res_relu_kernel(%arg0: i32, %arg1: memref<256x128xf32, #tpu.memory_space<vmem>>, %arg2: memref<1x128xf32, #tpu.memory_space<vmem>>, %arg3: memref<1x128xf32, #tpu.memory_space<vmem>>, %arg4: memref<256x4xf32, #tpu.memory_space<vmem>>, %arg5: memref<256x128xf32, #tpu.memory_space<vmem>>) attributes {dimension_semantics = [#tpu.dimension_semantics<parallel>], iteration_bounds = array<i64: 4>, scalar_prefetch = 0 : i64, scratch_operands = 0 : i64, tpu.core_type = #tpu.core_type<tc>, window_params = [{transform_indices = @transform_0, window_bounds = array<i64: 256, 128>}, {pipeline_mode = #tpu.pipeline_mode<synchronous>, transform_indices = @transform_1, window_bounds = array<i64: 1, 128>}, {pipeline_mode = #tpu.pipeline_mode<synchronous>, transform_indices = @transform_2, window_bounds = array<i64: 1, 128>}, {transform_indices = @transform_3, window_bounds = array<i64: 256, 4>}, {transform_indices = @transform_4, window_bounds = array<i64: 256, 128>}]} {
    %c0 = arith.constant 0 : index
    %c0_0 = arith.constant 0 : index
    %0 = vector.load %arg1[%c0, %c0_0] : memref<256x128xf32, #tpu.memory_space<vmem>>, vector<256x128xf32>
    %c0_1 = arith.constant 0 : index
    %c0_2 = arith.constant 0 : index
    %1 = vector.load %arg2[%c0_1, %c0_2] : memref<1x128xf32, #tpu.memory_space<vmem>>, vector<1x128xf32>
    %2 = vector.broadcast %1 : vector<1x128xf32> to vector<256x128xf32>
    %3 = arith.mulf %0, %2 : vector<256x128xf32>
    %c0_3 = arith.constant 0 : index
    %c0_4 = arith.constant 0 : index
    %4 = vector.load %arg3[%c0_3, %c0_4] : memref<1x128xf32, #tpu.memory_space<vmem>>, vector<1x128xf32>
    %5 = vector.broadcast %4 : vector<1x128xf32> to vector<256x128xf32>
    %6 = arith.addf %3, %5 : vector<256x128xf32>
    %c0_5 = arith.constant 0 : index
    %c0_6 = arith.constant 0 : index
    %7 = vector.load %arg4[%c0_5, %c0_6] : memref<256x4xf32, #tpu.memory_space<vmem>>, vector<256x4xf32>
    %cst = arith.constant 0.000000e+00 : f32
    %8 = vector.broadcast %cst : f32 to vector<256x128xf32>
    %9 = arith.maximumf %6, %8 : vector<256x128xf32>
    %c0_7 = arith.constant 0 : index
    %c0_8 = arith.constant 0 : index
    %10 = vector.load %arg5[%c0_7, %c0_8] : memref<256x128xf32, #tpu.memory_space<vmem>>, vector<256x128xf32>
    tpu.vector_store %arg5[%c0_7, %c0_8], %9 {strides = array<i32>} : memref<256x128xf32, #tpu.memory_space<vmem>>, vector<256x128xf32>,
    %11 = vector.extract_strided_slice %6 {offsets = [0, 0], sizes = [256, 4], strides = [1, 1]} : vector<256x128xf32> to vector<256x4xf32>
    %12 = arith.addf %11, %7 : vector<256x4xf32>
    %cst_9 = arith.constant 0.000000e+00 : f32
    %13 = vector.broadcast %cst_9 : f32 to vector<256x4xf32>
    %14 = arith.maximumf %12, %13 : vector<256x4xf32>
    %c0_10 = arith.constant 0 : index
    %c0_11 = arith.constant 0 : index
    %15 = vector.load %arg5[%c0_10, %c0_11] : memref<256x128xf32, #tpu.memory_space<vmem>>, vector<256x4xf32>
    tpu.vector_store %arg5[%c0_10, %c0_11], %14 {strides = array<i32>} : memref<256x128xf32, #tpu.memory_space<vmem>>, vector<256x4xf32>,
    %16 = vector.extract_strided_slice %6 {offsets = [0, 4], sizes = [256, 4], strides = [1, 1]} : vector<256x128xf32> to vector<256x4xf32>
    %17 = arith.addf %16, %7 : vector<256x4xf32>
    %cst_12 = arith.constant 0.000000e+00 : f32
    %18 = vector.broadcast %cst_12 : f32 to vector<256x4xf32>
    %19 = arith.maximumf %17, %18 : vector<256x4xf32>
    %c0_13 = arith.constant 0 : index
    %c4 = arith.constant 4 : index
    %20 = vector.load %arg5[%c0_13, %c4] : memref<256x128xf32, #tpu.memory_space<vmem>>, vector<256x4xf32>
    tpu.vector_store %arg5[%c0_13, %c4], %19 {strides = array<i32>} : memref<256x128xf32, #tpu.memory_space<vmem>>, vector<256x4xf32>,
    return
  }
  func.func @transform_0(%arg0: i32) -> (i32, i32) {
    %c0_i32 = arith.constant 0 : i32
    %c0_i32_0 = arith.constant 0 : i32
    return %arg0, %c0_i32 : i32, i32
  }
  func.func @transform_1(%arg0: i32) -> (i32, i32) {
    %c0_i32 = arith.constant 0 : i32
    %c0_i32_0 = arith.constant 0 : i32
    %c0_i32_1 = arith.constant 0 : i32
    return %c0_i32, %c0_i32_0 : i32, i32
  }
  func.func @transform_2(%arg0: i32) -> (i32, i32) {
    %c0_i32 = arith.constant 0 : i32
    %c0_i32_0 = arith.constant 0 : i32
    %c0_i32_1 = arith.constant 0 : i32
    return %c0_i32, %c0_i32_0 : i32, i32
  }
  func.func @transform_3(%arg0: i32) -> (i32, i32) {
    %c0_i32 = arith.constant 0 : i32
    %c0_i32_0 = arith.constant 0 : i32
    return %arg0, %c0_i32 : i32, i32
  }
  func.func @transform_4(%arg0: i32) -> (i32, i32) {
    %c0_i32 = arith.constant 0 : i32
    %c0_i32_0 = arith.constant 0 : i32
    return %arg0, %c0_i32 : i32, i32
  }
}

</mosaic_0001>

<bundles_post_ra>
// kernel: downsample_block.5
= control target key start
LH: loop header
LB: loop body
LE: loop exit
PB: predicated region body
PF: predicated region fallthrough
CT: control target
= control target key end

     0   :  { %s646_s12 = smov 0   ;;  %s841_s0 = inlined_call_operand.vmem [shape: f32[1024,128], index: 0, kind: input, shape index: {}]   ;;  %s842_s1 = inlined_call_operand.vmem [shape: f32[1,128], index: 1, kind: input, shape index: {}]   ;;  %s843_s2 = inlined_call_operand.vmem [shape: f32[1,128], index: 2, kind: input, shape index: {}]   ;;  %s844_s3 = inlined_call_operand.vmem [shape: bf16[1024,8], index: 3, kind: output, shape index: {}]  }
   0x1 LB: > { %s533_s13 = sadd.s32 4294967295, %s624_s12   ;;  %p537_p0 = scmp.ge.s32.totalorder %s624_s12, 1  ;;  %s624_s12 = sphi %s646_s12, %s13_s12  }
   0x2   : > { %p138_p1 = scmp.lt.s32.totalorder %s624_s12, 5 }
   0x4   : > { %p139_p2 = pnand %p537_p0, %p138_p1 }
   0x5   : > { %s538_s14 = sshll.u32 (!%p139_p2), %s533_s13, 5  ;;  %v660_v0 = vld [vmem:[%s842_s1] ss:$0 sm:$0xff] (!%p139_p2)  ;;  %vm444_vm0 = vcmask (!%p139_p2), 60416  }
   0x6   : > { %142 = sbr.rel (%p139_p2) target bundleno = 56 (0x38), region = 32  ;;  %p163_p3 = scmp.lt.s32.totalorder (!%p139_p2), %s538_s14, 127  ;;  %v670_v1 = vld [vmem:[%s843_s2] ss:$0 sm:$0xff] (!%p139_p2) }
   0xd   : > { %s846_s14 = smov (!%p163_p3, %s538_s14), 127 }
   0xe   : > { %s539_s15 = sshll.u32 %s846_s14, 3  ;;  %s541_s23 = sshll.u32 %s846_s14, 2 }
   0xf   : > { %s665_s20 = scalar_lea.vmem %s841_s0, %s539_s15  ;;  %s699_s26 = scalar_lea.vmem %s844_s3, %s541_s23 }
  0x10   : > { %v174_v2 = vld [vmem:[%s665_s20] sm:$0xff]  ;;  %v175_v3 = vld [vmem:[%s665_s20 + $0x8] sm:$0xff]  ;;  %v176_v4 = vld [vmem:[%s665_s20 + $0x10] sm:$0xff] }
  0x11   : > { %v213_v5 = vmul.f32 %v660_v0, %v174_v2  ;;  %v214_v6 = vmul.f32 %v660_v0, %v175_v3  ;;  %v215_v7 = vmul.f32 %v660_v0, %v176_v4  ;;  %v177_v8 = vld [vmem:[%s665_s20 + $0x18] sm:$0xff]  ;;  %v178_v9 = vld [vmem:[%s665_s20 + $0x20] sm:$0xff]  ;;  %v179_v10 = vld [vmem:[%s665_s20 + $0x28] sm:$0xff] }
  0x12   : > { %v216_v11 = vmul.f32 %v660_v0, %v177_v8  ;;  %v217_v12 = vmul.f32 %v660_v0, %v178_v9  ;;  %v218_v13 = vmul.f32 %v660_v0, %v179_v10  ;;  %v180_v14 = vld [vmem:[%s665_s20 + $0x30] sm:$0xff]  ;;  %v181_v15 = vld [vmem:[%s665_s20 + $0x38] sm:$0xff]  ;;  %v182_v32 = vld [vmem:[%s665_s20 + $0x40] sm:$0xff] }
  0x13   : > { %v252_v16 = vadd.f32 %v670_v1, %v213_v5  ;;  %v253_v17 = vadd.f32 %v670_v1, %v214_v6  ;;  %v254_v18 = vadd.f32 %v670_v1, %v215_v7  ;;  %v219_v19 = vmul.f32 %v660_v0, %v180_v14  ;;  %v183_v33 = vld [vmem:[%s665_s20 + $0x48] sm:$0xff]  ;;  %v184_v34 = vld [vmem:[%s665_s20 + $0x50] sm:$0xff]  ;;  %v185_v39 = vld [vmem:[%s665_s20 + $0x58] sm:$0xff] }
  0x14   : > { %v255_v20 = vadd.f32 %v670_v1, %v216_v11  ;;  %v256_v21 = vadd.f32 %v670_v1, %v217_v12  ;;  %v257_v22 = vadd.f32 %v670_v1, %v218_v13  ;;  %v220_v23 = vmul.f32 %v660_v0, %v181_v15  ;;  %v186_v40 = vld [vmem:[%s665_s20 + $0x60] sm:$0xff]  ;;  %v187_v41 = vld [vmem:[%s665_s20 + $0x68] sm:$0xff]  ;;  %v188_v46 = vld [vmem:[%s665_s20 + $0x70] sm:$0xff] }
  0x15   : > { %v284_v24 = vmax.f32 %v252_v16, 0.0  ;;  %v285_v25 = vmax.f32 %v253_v17, 0.0  ;;  %v286_v26 = vmax.f32 %v254_v18, 0.0  ;;  %v258_v27 = vadd.f32 %v670_v1, %v219_v19  ;;  %v189_v51 = vld [vmem:[%s665_s20 + $0x78] sm:$0xff]  ;;  %v190_v10 = vld [vmem:[%s665_s20 + $0x80] sm:$0xff]  ;;  %v191_v11 = vld [vmem:[%s665_s20 + $0x88] sm:$0xff] }
  0x16   : > { %v287_v28 = vmax.f32 %v255_v20, 0.0  ;;  %v288_v29 = vmax.f32 %v256_v21, 0.0  ;;  %v289_v30 = vmax.f32 %v257_v22, 0.0  ;;  %v259_v31 = vadd.f32 %v670_v1, %v220_v23  ;;  %v192_v12 = vld [vmem:[%s665_s20 + $0x90] sm:$0xff]  ;;  %v193_v17 = vld [vmem:[%s665_s20 + $0x98] sm:$0xff]  ;;  %v194_v18 = vld [vmem:[%s665_s20 + $0xa0] sm:$0xff] }
  0x17   : > { %v578_v35 = vpack.c.bf16 %v284_v24, %v284_v24  ;;  %v579_v36 = vpack.c.bf16 %v285_v25, %v285_v25  ;;  %v580_v37 = vpack.c.bf16 %v286_v26, %v286_v26  ;;  %v290_v38 = vmax.f32 %v258_v27, 0.0  ;;  %v195_v19 = vld [vmem:[%s665_s20 + $0xa8] sm:$0xff]  ;;  %v196_v24 = vld [vmem:[%s665_s20 + $0xb0] sm:$0xff] }
  0x18   : > { %v581_v42 = vpack.c.bf16 %v287_v28, %v287_v28  ;;  %v582_v43 = vpack.c.bf16 %v288_v29, %v288_v29  ;;  %v583_v44 = vpack.c.bf16 %v289_v30, %v289_v30  ;;  %v291_v45 = vmax.f32 %v259_v31, 0.0  ;;  %v197_v29 = vld [vmem:[%s665_s20 + $0xb8] sm:$0xff] }
  0x19   : > { %445 = vst.msk [vmem:[%s699_s26] sm:$0xf] %vm444_vm0, %v578_v35  ;;  %446 = vst.msk [vmem:[%s699_s26 + $0x4] sm:$0xf] %vm444_vm0, %v579_v36  ;;  %v584_v47 = vpack.c.bf16 %v290_v38, %v290_v38  ;;  %v221_v48 = vmul.f32 %v660_v0, %v182_v32  ;;  %v222_v49 = vmul.f32 %v660_v0, %v183_v33 }
  0x1a   : > { %447 = vst.msk [vmem:[%s699_s26 + $0x8] sm:$0xf] %vm444_vm0, %v580_v37  ;;  %v223_v50 = vmul.f32 %v660_v0, %v184_v34  ;;  %448 = vst.msk [vmem:[%s699_s26 + $0xc] sm:$0xf] %vm444_vm0, %v581_v42  ;;  %v585_v52 = vpack.c.bf16 %v291_v45, %v291_v45  ;;  %v224_v53 = vmul.f32 %v660_v0, %v185_v39 }
  0x1b   : > { %449 = vst.msk [vmem:[%s699_s26 + $0x10] sm:$0xf] %vm444_vm0, %v582_v43  ;;  %450 = vst.msk [vmem:[%s699_s26 + $0x14] sm:$0xf] %vm444_vm0, %v583_v44  ;;  %v225_v54 = vmul.f32 %v660_v0, %v186_v40  ;;  %v226_v55 = vmul.f32 %v660_v0, %v187_v41  ;;  %v260_v56 = vadd.f32 %v670_v1, %v221_v48 }
  0x1c   : > { %451 = vst.msk [vmem:[%s699_s26 + $0x18] sm:$0xf] %vm444_vm0, %v584_v47  ;;  %v261_v57 = vadd.f32 %v670_v1, %v222_v49  ;;  %v262_v58 = vadd.f32 %v670_v1, %v223_v50  ;;  %v227_v59 = vmul.f32 %v660_v0, %v188_v46  ;;  %452 = vst.msk [vmem:[%s699_s26 + $0x1c] sm:$0xf] %vm444_vm0, %v585_v52  ;;  %v198_v50 = vld [vmem:[%s665_s20 + $0xc0] sm:$0xff]  ;;  %v200_v52 = vld [vmem:[%s665_s20 + $0xd0] sm:$0xff] }
  0x1d   : > { %v263_v60 = vadd.f32 %v670_v1, %v224_v53  ;;  %v264_v61 = vadd.f32 %v670_v1, %v225_v54  ;;  %v265_v62 = vadd.f32 %v670_v1, %v226_v55  ;;  %v228_v63 = vmul.f32 %v660_v0, %v189_v51  ;;  %v199_v51 = vld [vmem:[%s665_s20 + $0xc8] sm:$0xff] }
  0x1e   : > { %v292_v2 = vmax.f32 %v260_v56, 0.0  ;;  %v293_v3 = vmax.f32 %v261_v57, 0.0  ;;  %v294_v4 = vmax.f32 %v262_v58, 0.0  ;;  %v266_v5 = vadd.f32 %v670_v1, %v227_v59  ;;  %v201_v57 = vld [vmem:[%s665_s20 + $0xd8] sm:$0xff]  ;;  %v202_v58 = vld [vmem:[%s665_s20 + $0xe0] sm:$0xff]  ;;  %v203_v59 = vld [vmem:[%s665_s20 + $0xe8] sm:$0xff] }
  0x1f   : > { %v295_v6 = vmax.f32 %v263_v60, 0.0  ;;  %v296_v7 = vmax.f32 %v264_v61, 0.0  ;;  %v297_v8 = vmax.f32 %v265_v62, 0.0  ;;  %v267_v9 = vadd.f32 %v670_v1, %v228_v63 }
  0x20   : > { %v586_v13 = vpack.c.bf16 %v292_v2, %v292_v2  ;;  %v587_v14 = vpack.c.bf16 %v293_v3, %v293_v3  ;;  %v588_v15 = vpack.c.bf16 %v294_v4, %v294_v4  ;;  %v298_v16 = vmax.f32 %v266_v5, 0.0  ;;  %v204_v2 = vld [vmem:[%s665_s20 + $0xf0] sm:$0xff] }
  0x21   : > { %v589_v20 = vpack.c.bf16 %v295_v6, %v295_v6  ;;  %v590_v21 = vpack.c.bf16 %v296_v7, %v296_v7  ;;  %v591_v22 = vpack.c.bf16 %v297_v8, %v297_v8  ;;  %v299_v23 = vmax.f32 %v267_v9, 0.0  ;;  %v205_v7 = vld [vmem:[%s665_s20 + $0xf8] sm:$0xff] }
  0x22   : > { %453 = vst.msk [vmem:[%s699_s26 + $0x20] sm:$0xf] %vm444_vm0, %v586_v13  ;;  %454 = vst.msk [vmem:[%s699_s26 + $0x24] sm:$0xf] %vm444_vm0, %v587_v14  ;;  %v592_v25 = vpack.c.bf16 %v298_v16, %v298_v16  ;;  %v229_v26 = vmul.f32 %v660_v0, %v190_v10  ;;  %v230_v27 = vmul.f32 %v660_v0, %v191_v11 }
  0x23   : > { %455 = vst.msk [vmem:[%s699_s26 + $0x28] sm:$0xf] %vm444_vm0, %v588_v15  ;;  %v231_v28 = vmul.f32 %v660_v0, %v192_v12  ;;  %456 = vst.msk [vmem:[%s699_s26 + $0x2c] sm:$0xf] %vm444_vm0, %v589_v20  ;;  %v593_v30 = vpack.c.bf16 %v299_v23, %v299_v23  ;;  %v232_v31 = vmul.f32 %v660_v0, %v193_v17 }
  0x24   : > { %457 = vst.msk [vmem:[%s699_s26 + $0x30] sm:$0xf] %vm444_vm0, %v590_v21  ;;  %458 = vst.msk [vmem:[%s699_s26 + $0x34] sm:$0xf] %vm444_vm0, %v591_v22  ;;  %v233_v32 = vmul.f32 %v660_v0, %v194_v18  ;;  %v234_v33 = vmul.f32 %v660_v0, %v195_v19  ;;  %v268_v34 = vadd.f32 %v670_v1, %v229_v26 }
  0x25   : > { %459 = vst.msk [vmem:[%s699_s26 + $0x38] sm:$0xf] %vm444_vm0, %v592_v25  ;;  %v269_v35 = vadd.f32 %v670_v1, %v230_v27  ;;  %v270_v36 = vadd.f32 %v670_v1, %v231_v28  ;;  %v235_v37 = vmul.f32 %v660_v0, %v196_v24  ;;  %460 = vst.msk [vmem:[%s699_s26 + $0x3c] sm:$0xf] %vm444_vm0, %v593_v30 }
  0x26   : > { %v271_v38 = vadd.f32 %v670_v1, %v232_v31  ;;  %v272_v39 = vadd.f32 %v670_v1, %v233_v32  ;;  %v273_v40 = vadd.f32 %v670_v1, %v234_v33  ;;  %v236_v41 = vmul.f32 %v660_v0, %v197_v29 }
  0x27   : > { %v300_v42 = vmax.f32 %v268_v34, 0.0  ;;  %v301_v43 = vmax.f32 %v269_v35, 0.0  ;;  %v302_v44 = vmax.f32 %v270_v36, 0.0  ;;  %v274_v45 = vadd.f32 %v670_v1, %v235_v37 }
  0x28   : > { %v303_v46 = vmax.f32 %v271_v38, 0.0  ;;  %v304_v47 = vmax.f32 %v272_v39, 0.0  ;;  %v305_v48 = vmax.f32 %v273_v40, 0.0  ;;  %v275_v49 = vadd.f32 %v670_v1, %v236_v41 }
  0x29   : > { %v594_v53 = vpack.c.bf16 %v300_v42, %v300_v42  ;;  %v595_v54 = vpack.c.bf16 %v301_v43, %v301_v43  ;;  %v596_v55 = vpack.c.bf16 %v302_v44, %v302_v44  ;;  %v306_v56 = vmax.f32 %v274_v45, 0.0 }
  0x2a   : > { %v597_v60 = vpack.c.bf16 %v303_v46, %v303_v46  ;;  %v598_v61 = vpack.c.bf16 %v304_v47, %v304_v47  ;;  %v599_v62 = vpack.c.bf16 %v305_v48, %v305_v48  ;;  %v307_v63 = vmax.f32 %v275_v49, 0.0 }
  0x2b   : > { %461 = vst.msk [vmem:[%s699_s26 + $0x40] sm:$0xf] %vm444_vm0, %v594_v53  ;;  %462 = vst.msk [vmem:[%s699_s26 + $0x44] sm:$0xf] %vm444_vm0, %v595_v54  ;;  %v600_v3 = vpack.c.bf16 %v306_v56, %v306_v56  ;;  %v237_v4 = vmul.f32 %v660_v0, %v198_v50  ;;  %v238_v5 = vmul.f32 %v660_v0, %v199_v51 }
  0x2c   : > { %463 = vst.msk [vmem:[%s699_s26 + $0x48] sm:$0xf] %vm444_vm0, %v596_v55  ;;  %v239_v6 = vmul.f32 %v660_v0, %v200_v52  ;;  %464 = vst.msk [vmem:[%s699_s26 + $0x4c] sm:$0xf] %vm444_vm0, %v597_v60  ;;  %v601_v8 = vpack.c.bf16 %v307_v63, %v307_v63  ;;  %v240_v9 = vmul.f32 %v660_v0, %v201_v57 }
  0x2d   : > { %465 = vst.msk [vmem:[%s699_s26 + $0x50] sm:$0xf] %vm444_vm0, %v598_v61  ;;  %466 = vst.msk [vmem:[%s699_s26 + $0x54] sm:$0xf] %vm444_vm0, %v599_v62  ;;  %v241_v10 = vmul.f32 %v660_v0, %v202_v58  ;;  %v242_v11 = vmul.f32 %v660_v0, %v203_v59  ;;  %v276_v12 = vadd.f32 %v670_v1, %v237_v4 }
  0x2e   : > { %467 = vst.msk [vmem:[%s699_s26 + $0x58] sm:$0xf] %vm444_vm0, %v600_v3  ;;  %v277_v13 = vadd.f32 %v670_v1, %v238_v5  ;;  %v278_v14 = vadd.f32 %v670_v1, %v239_v6  ;;  %v243_v15 = vmul.f32 %v660_v0, %v204_v2  ;;  %468 = vst.msk [vmem:[%s699_s26 + $0x5c] sm:$0xf] %vm444_vm0, %v601_v8 }
  0x2f   : > { %v279_v16 = vadd.f32 %v670_v1, %v240_v9  ;;  %v280_v17 = vadd.f32 %v670_v1, %v241_v10  ;;  %v281_v18 = vadd.f32 %v670_v1, %v242_v11  ;;  %v244_v19 = vmul.f32 %v660_v0, %v205_v7 }
  0x30   : > { %v308_v20 = vmax.f32 %v276_v12, 0.0  ;;  %v309_v21 = vmax.f32 %v277_v13, 0.0  ;;  %v310_v22 = vmax.f32 %v278_v14, 0.0  ;;  %v282_v23 = vadd.f32 %v670_v1, %v243_v15 }
  0x31   : > { %v311_v24 = vmax.f32 %v279_v16, 0.0  ;;  %v312_v25 = vmax.f32 %v280_v17, 0.0  ;;  %v313_v26 = vmax.f32 %v281_v18, 0.0  ;;  %v283_v27 = vadd.f32 %v670_v1, %v244_v19 }
  0x32   : > { %v602_v28 = vpack.c.bf16 %v308_v20, %v308_v20  ;;  %v603_v29 = vpack.c.bf16 %v309_v21, %v309_v21  ;;  %v604_v0 = vpack.c.bf16 %v310_v22, %v310_v22  ;;  %v314_v30 = vmax.f32 %v282_v23, 0.0 }
  0x33   : > { %v605_v31 = vpack.c.bf16 %v311_v24, %v311_v24  ;;  %v606_v32 = vpack.c.bf16 %v312_v25, %v312_v25  ;;  %v607_v33 = vpack.c.bf16 %v313_v26, %v313_v26  ;;  %v315_v34 = vmax.f32 %v283_v27, 0.0 }
  0x34   : > { %469 = vst.msk [vmem:[%s699_s26 + $0x60] sm:$0xf] %vm444_vm0, %v602_v28  ;;  %470 = vst.msk [vmem:[%s699_s26 + $0x64] sm:$0xf] %vm444_vm0, %v603_v29  ;;  %v608_v35 = vpack.c.bf16 %v314_v30, %v314_v30 }
  0x35   : > { %471 = vst.msk [vmem:[%s699_s26 + $0x68] sm:$0xf] %vm444_vm0, %v604_v0  ;;  %472 = vst.msk [vmem:[%s699_s26 + $0x6c] sm:$0xf] %vm444_vm0, %v605_v31  ;;  %v609_v1 = vpack.c.bf16 %v315_v34, %v315_v34 }
  0x36   : > { %473 = vst.msk [vmem:[%s699_s26 + $0x70] sm:$0xf] %vm444_vm0, %v606_v32  ;;  %474 = vst.msk [vmem:[%s699_s26 + $0x74] sm:$0xf] %vm444_vm0, %v607_v33 }
  0x37   : > { %475 = vst.msk [vmem:[%s699_s26 + $0x78] sm:$0xf] %vm444_vm0, %v608_v35  ;;  %476 = vst.msk [vmem:[%s699_s26 + $0x7c] sm:$0xf] %vm444_vm0, %v609_v1 }
  0x38 PF: > { %s13_s12 = sadd.s32 1, %s624_s12  }
  0x39   : > { %p10_p4 = scmp.ge.s32.totalorder %s13_s12, 6  }
  0x3b   :  { %12 = sbr.rel (!%p10_p4) target bundleno = 1 (0x1), region = 62 }

// kernel: downsample_block.4
= control target key start
LH: loop header
LB: loop body
LE: loop exit
PB: predicated region body
PF: predicated region fallthrough
CT: control target
= control target key end

     0   :  { %s6674_s15 = smov 0   ;;  %s11524_s0 = inlined_call_operand.vmem [shape: bf16[1024,128], index: 0, kind: input, shape index: {}]   ;;  %s11525_s1 = inlined_call_operand.vmem [shape: bf16[128,128], index: 1, kind: input, shape index: {}]   ;;  %s11526_s2 = inlined_call_operand.vmem [shape: f32[1024,128], index: 2, kind: output, shape index: {0}]   ;;  %s11527_s3 = inlined_call_operand.vmem [shape: f32[1024,4], index: 3, kind: output, shape index: {1}]   ;;  %s11528_s4 = inlined_call_operand.vmem [shape: f32[32,128], index: 4, kind: output, shape index: {2}]  }
   0x1 LB: > { %s6680_s16 = sadd.s32 4294967295, %s6621_s15   ;;  %p4339_p0 = scmp.ge.s32.totalorder %s6621_s15, 1  ;;  %s6621_s15 = sphi %s6674_s15, %s15_s15  }
   0x2   : > { %p168_p1 = scmp.lt.s32.totalorder %s6621_s15, 5 }
   0x4   : > { %p169_p2 = pnand %p4339_p0, %p168_p1 }
   0x6   : > { %172 = sbr.rel (%p169_p2) target bundleno = 973 (0x3cd), region = 28 }
   0xd   : > { %s4340_s17 = sshll.u32 %s6680_s16, 5  ;;  %s6623_s22 = smov 124  }
   0xe   : > { %p204_p3 = scmp.lt.s32.totalorder %s4340_s17, 127  ;;  %s6624_s23 = smov 120  }
   0xf   : > { %s6625_s24 = smov 116   ;;  %s6626_s25 = smov 112  }
  0x10   : > { %s12635_s17 = smov (!%p204_p3, %s4340_s17), 127  ;;  %s6627_s26 = smov 108  }
  0x11   : > { %s4341_s18 = sshll.u32 %s12635_s17, 2  ;;  %s6628_s27 = smov 104  }
  0x12   : > { %s6691_s21 = scalar_lea.vmem %s11524_s0, %s4341_s18  ;;  %s6629_s28 = smov 100  }
  0x13   : > { %v6694_v0 = vld [vmem:[%s6691_s21 + $0x10] sm:$0xf]  ;;  %v6697_v1 = vld [vmem:[%s6691_s21 + $0x14] sm:$0xf]  ;;  %v6700_v2 = vld [vmem:[%s6691_s21] sm:$0xf] }
  0x14   : > { %v11559_v3 = vunpack.c.l.bf16 %v6694_v0  ;;  %v11560_v4 = vunpack.c.l.bf16 %v6697_v1  ;;  %v6705_v5 = vld [vmem:[%s6691_s21 + $0x4] sm:$0xf]  ;;  %v11557_v6 = vunpack.c.l.bf16 %v6700_v2  ;;  %v6709_v7 = vld [vmem:[%s6691_s21 + $0x18] sm:$0xf]  ;;  %v6712_v8 = vld [vmem:[%s6691_s21 + $0x1c] sm:$0xf] }
  0x15   : > { %v11558_v9 = vunpack.c.l.bf16 %v6705_v5  ;;  %v11555_v10 = vunpack.c.l.bf16 %v6709_v7  ;;  %v11556_v11 = vunpack.c.l.bf16 %v6712_v8  ;;  %v6718_v12 = vld [vmem:[%s6691_s21 + $0x8] sm:$0xf]  ;;  %v6721_v13 = vld [vmem:[%s6691_s21 + $0xc] sm:$0xf]  ;;  %v6738_v19 = vld [vmem:[%s6691_s21 + $0x20] sm:$0xf] }
  0x16   : > { %v6724_v14 = vld [vmem:[%s6691_s21 + $0x28] sm:$0xf]  ;;  %v6730_v15 = vpack.i.bf16 %v11560_v4, %v11559_v3  ;;  %v11553_v16 = vunpack.c.l.bf16 %v6718_v12  ;;  %v11554_v17 = vunpack.c.l.bf16 %v6721_v13  ;;  %v6735_v18 = vld [vmem:[%s6691_s21 + $0x2c] sm:$0xf]  ;;  %v6741_v20 = vld [vmem:[%s6691_s21 + $0x24] sm:$0xf]  ;;  %v11541_v26 = vunpack.c.l.bf16 %v6738_v19 }
  0x17   : > { %v6747_v21 = vpack.i.bf16 %v11558_v9, %v11557_v6  ;;  %v6755_v22 = vpack.i.bf16 %v11556_v11, %v11555_v10  ;;  %v11551_v23 = vunpack.c.l.bf16 %v6724_v14  ;;  %v11552_v24 = vunpack.c.l.bf16 %v6735_v18  ;;  %v6770_v28 = vld [vmem:[%s6691_s21 + $0x38] sm:$0xf]  ;;  %v6773_v29 = vld [vmem:[%s6691_s21 + $0x3c] sm:$0xf]  ;;  %v6776_v30 = vld [vmem:[%s6691_s21 + $0x30] sm:$0xf] }
  0x18   : > { %11902 = vst [vmem:[#allocation2_spill] sm:$0xff] %v6730_v15  ;;  %4506 = vrot.lane.b32.xlu1 %v6730_v15, %s6623_s22  ;;  %v6765_v25 = vpack.i.bf16 %v11554_v17, %v11553_v16  ;;  %v11542_v27 = vunpack.c.l.bf16 %v6741_v20  ;;  %v6779_v31 = vld [vmem:[%s6691_s21 + $0x34] sm:$0xf]  ;;  %v11539_v33 = vunpack.c.l.bf16 %v6770_v28  ;;  %v11540_v34 = vunpack.c.l.bf16 %v6773_v29  ;;  %v6802_v38 = vld [vmem:[%s6691_s21 + $0x48] sm:$0xf]  ;;  %s6630_s29 = smov 96  }
  0x19   : > { %11903 = vst [vmem:[#allocation3_spill] sm:$0xff] %v6747_v21  ;;  %11904 = vst [vmem:[#allocation4_spill] sm:$0xff] %v6755_v22  ;;  %4496 = vrot.lane.b32.xlu0 %v6747_v21, %s6623_s22  ;;  %v6787_v32 = vpack.i.bf16 %v11552_v24, %v11551_v23  ;;  %v11533_v36 = vunpack.c.l.bf16 %v6776_v30  ;;  %v11536_v37 = vunpack.c.l.bf16 %v6779_v31  ;;  %v6805_v39 = vld [vmem:[%s6691_s21 + $0x4c] sm:$0xf]  ;;  %v6808_v40 = vld [vmem:[%s6691_s21 + $0x40] sm:$0xf]  ;;  %v11531_v43 = vunpack.c.l.bf16 %v6802_v38 }
  0x1a   : > { %11905 = vst [vmem:[#allocation5_spill] sm:$0xff] %v6765_v25  ;;  %v6797_v35 = vpack.i.bf16 %v11542_v27, %v11541_v26  ;;  %v6811_v41 = vld [vmem:[%s6691_s21 + $0x44] sm:$0xf]  ;;  %v6819_v42 = vpack.i.bf16 %v11540_v34, %v11539_v33  ;;  %v11532_v44 = vunpack.c.l.bf16 %v6805_v39  ;;  %v11529_v46 = vunpack.c.l.bf16 %v6808_v40  ;;  %v6834_v48 = vld [vmem:[%s6691_s21 + $0x58] sm:$0xf]  ;;  %s6631_s30 = smov 92  }
  0x1b   : > { %11906 = vst [vmem:[#allocation6_spill] sm:$0xff] %v6787_v32  ;;  %v6829_v45 = vpack.i.bf16 %v11536_v37, %v11533_v36  ;;  %v11530_v47 = vunpack.c.l.bf16 %v6811_v41  ;;  %v6837_v49 = vld [vmem:[%s6691_s21 + $0x5c] sm:$0xf]  ;;  %v6840_v50 = vld [vmem:[%s6691_s21 + $0x50] sm:$0xf]  ;;  %v11534_v53 = vunpack.c.l.bf16 %v6834_v48  ;;  %s6632_s5 = smov 88  }
  0x1c   : > { %4511 = vrot.lane.b32.xlu1 %v6755_v22, %s6623_s22  ;;  %11907 = vst [vmem:[#allocation7_spill] sm:$0xff] %v6797_v35  ;;  %11908 = vst [vmem:[#allocation8_spill] sm:$0xff] %v6819_v42  ;;  %v6843_v51 = vld [vmem:[%s6691_s21 + $0x54] sm:$0xf]  ;;  %v6851_v52 = vpack.i.bf16 %v11532_v44, %v11531_v43  ;;  %v11535_v54 = vunpack.c.l.bf16 %v6837_v49  ;;  %v11537_v56 = vunpack.c.l.bf16 %v6840_v50  ;;  %v6866_v58 = vld [vmem:[%s6691_s21 + $0x68] sm:$0xf] }
  0x1d   : > { %4501 = vrot.lane.b32.xlu0 %v6765_v25, %s6623_s22  ;;  %11909 = vst [vmem:[#allocation9_spill] sm:$0xff] %v6829_v45  ;;  %v6861_v55 = vpack.i.bf16 %v11530_v47, %v11529_v46  ;;  %v11538_v57 = vunpack.c.l.bf16 %v6843_v51  ;;  %v6869_v59 = vld [vmem:[%s6691_s21 + $0x6c] sm:$0xf]  ;;  %v6872_v60 = vld [vmem:[%s6691_s21 + $0x60] sm:$0xf]  ;;  %v11543_v63 = vunpack.c.l.bf16 %v6866_v58  ;;  %s6633_s6 = smov 84  }
  0x1e   : > { %11910 = vst [vmem:[#allocation10_spill] sm:$0xff] %v6851_v52  ;;  %11912 = vst [vmem:[#allocation12_spill] sm:$0xff] %v6872_v60  ;;  %v6875_v61 = vld [vmem:[%s6691_s21 + $0x64] sm:$0xf]  ;;  %v6883_v62 = vpack.i.bf16 %v11535_v54, %v11534_v53  ;;  %v11550_v46 = vunpack.c.l.bf16 %v6869_v59  ;;  %v11544_v43 = vunpack.c.l.bf16 %v6872_v60  ;;  %v6898_v36 = vld [vmem:[%s6691_s21 + $0x78] sm:$0xf] }
  0x1f   : > { %11911 = vst [vmem:[#allocation11_spill] sm:$0xff] %v6861_v55  ;;  %11913 = vst [vmem:[#allocation13_spill] sm:$0xff] %v6875_v61  ;;  %v6893_v47 = vpack.i.bf16 %v11538_v57, %v11537_v56  ;;  %v11549_v44 = vunpack.c.l.bf16 %v6875_v61  ;;  %v6901_v53 = vld [vmem:[%s6691_s21 + $0x7c] sm:$0xf]  ;;  %v6904_v54 = vld [vmem:[%s6691_s21 + $0x70] sm:$0xf]  ;;  %v11547_v57 = vunpack.c.l.bf16 %v6898_v36 }
  0x20   : > { %4521 = vrot.lane.b32.xlu1 %v6787_v32, %s6623_s22  ;;  %11914 = vst [vmem:[#allocation14_spill] sm:$0xff] %v6883_v62  ;;  %11916 = vst [vmem:[#allocation16_spill] sm:$0xff] %v6898_v36  ;;  %v6907_v37 = vld [vmem:[%s6691_s21 + $0x74] sm:$0xf]  ;;  %v6915_v56 = vpack.i.bf16 %v11550_v46, %v11543_v63  ;;  %v11548_v33 = vunpack.c.l.bf16 %v6901_v53  ;;  %v11545_v26 = vunpack.c.l.bf16 %v6904_v54  ;;  %s6634_s7 = smov 80   ;;  %s6635_s8 = smov 76  }
  0x21   : > { %4516 = vrot.lane.b32.xlu0 %v6797_v35, %s6623_s22  ;;  %11915 = vst [vmem:[#allocation15_spill] sm:$0xff] %v6893_v47  ;;  %11917 = vst [vmem:[#allocation17_spill] sm:$0xff] %v6901_v53  ;;  %v6925_v34 = vpack.i.bf16 %v11549_v44, %v11544_v43  ;;  %v11546_v27 = vunpack.c.l.bf16 %v6907_v37  ;;  %s6636_s9 = smov 72   ;;  %s6637_s10 = smov 68  }
  0x22   : > { %11918 = vst [vmem:[#allocation18_spill] sm:$0xff] %v6904_v54  ;;  %11919 = vst [vmem:[#allocation19_spill] sm:$0xff] %v6907_v37  ;;  %v6935_v63 = vpack.i.bf16 %v11548_v33, %v11547_v57  ;;  %s6638_s13 = smov 64   ;;  %s6645_s11 = smov 36  }
  0x23   : > { %11920 = vst [vmem:[#allocation20_spill] sm:$0xff] %v6915_v56  ;;  %11921 = vst [vmem:[#allocation21_spill] sm:$0xff] %v6925_v34  ;;  %v6943_v43 = vpack.i.bf16 %v11546_v27, %v11545_v26  ;;  %s4343_s12 = sshll.u32 %s12635_s17, 3  ;;  %s6646_s19 = smov 32  }
  0x24   : > { %4531 = vrot.lane.b32.xlu1 %v6819_v42, %s6623_s22  ;;  %11922 = vst [vmem:[#allocation22_spill] sm:$0xff] %v6935_v63  ;;  %s10484_s18 = scalar_lea.vmem %s11526_s2, %s4343_s12  ;;  %s6647_s20 = smov 28  }
  0x25   : > { %4526 = vrot.lane.b32.xlu0 %v6829_v45, %s6623_s22  ;;  %11923 = vst [vmem:[#allocation23_spill] sm:$0xff] %v6943_v43  ;;  %p221_p4 = scmp.lt.s32.totalorder %s6680_s16, 3 }
  0x27   : > { %s12637_s16 = smov (!%p221_p4, %s6680_s16), 3 }
  0x28   : > { %4541 = vrot.lane.b32.xlu1 %v6851_v52, %s6623_s22 }
  0x29   : > { %4536 = vrot.lane.b32.xlu0 %v6861_v55, %s6623_s22 }
  0x2c   : > { %4551 = vrot.lane.b32.xlu1 %v6883_v62, %s6623_s22 }
  0x2d   : > { %4546 = vrot.lane.b32.xlu0 %v6893_v47, %s6623_s22 }
  0x30   : > { %4561 = vrot.lane.b32.xlu1 %v6915_v56, %s6623_s22 }
  0x31   : > { %4556 = vrot.lane.b32.xlu0 %v6925_v34, %s6623_s22 }
  0x34   : > { %4571 = vrot.lane.b32.xlu1 %v6935_v63, %s6623_s22 }
  0x35   : > { %4566 = vrot.lane.b32.xlu0 %v6943_v43, %s6623_s22  ;;  %s6648_s22 = smov 24  }
  0x38   : > { %4581 = vrot.lane.b32.xlu1 %v6765_v25, %s6624_s23 }
  0x39   : > { %4576 = vrot.lane.b32.xlu0 %v6747_v21, %s6624_s23 }
  0x3c   : > { %4591 = vrot.lane.b32.xlu1 %v6755_v22, %s6624_s23 }
  0x3d   : > { %4586 = vrot.lane.b32.xlu0 %v6730_v15, %s6624_s23 }
  0x40   : > { %4601 = vrot.lane.b32.xlu1 %v6787_v32, %s6624_s23 }
  0x41   : > { %4596 = vrot.lane.b32.xlu0 %v6797_v35, %s6624_s23 }
  0x44   : > { %4611 = vrot.lane.b32.xlu1 %v6819_v42, %s6624_s23 }
  0x45   : > { %4606 = vrot.lane.b32.xlu0 %v6829_v45, %s6624_s23 }
  0x48   : > { %4621 = vrot.lane.b32.xlu1 %v6851_v52, %s6624_s23 }
  0x49   : > { %4616 = vrot.lane.b32.xlu0 %v6861_v55, %s6624_s23 }
  0x4c   : > { %4631 = vrot.lane.b32.xlu1 %v6883_v62, %s6624_s23 }
  0x4d   : > { %4626 = vrot.lane.b32.xlu0 %v6893_v47, %s6624_s23 }
  0x50   : > { %4641 = vrot.lane.b32.xlu1 %v6915_v56, %s6624_s23 }
  0x51   : > { %4636 = vrot.lane.b32.xlu0 %v6925_v34, %s6624_s23 }
  0x54   : > { %4651 = vrot.lane.b32.xlu1 %v6935_v63, %s6624_s23 }
  0x55   : > { %4646 = vrot.lane.b32.xlu0 %v6943_v43, %s6624_s23  ;;  %s4346_s23 = sshll.u32 %s12637_s16, 3 }
  0x58   : > { %4661 = vrot.lane.b32.xlu1 %v6765_v25, %s6625_s24 }
  0x59   : > { %4656 = vrot.lane.b32.xlu0 %v6747_v21, %s6625_s24 }
  0x5c   : > { %4671 = vrot.lane.b32.xlu1 %v6755_v22, %s6625_s24 }
  0x5d   : > { %4666 = vrot.lane.b32.xlu0 %v6730_v15, %s6625_s24 }
  0x60   : > { %4681 = vrot.lane.b32.xlu1 %v6787_v32, %s6625_s24 }
  0x61   : > { %4676 = vrot.lane.b32.xlu0 %v6797_v35, %s6625_s24 }
  0x64   : > { %4691 = vrot.lane.b32.xlu1 %v6819_v42, %s6625_s24 }
  0x65   : > { %4686 = vrot.lane.b32.xlu0 %v6829_v45, %s6625_s24 }
  0x68   : > { %4701 = vrot.lane.b32.xlu1 %v6851_v52, %s6625_s24 }
  0x69   : > { %4696 = vrot.lane.b32.xlu0 %v6861_v55, %s6625_s24 }
  0x6c   : > { %4711 = vrot.lane.b32.xlu1 %v6883_v62, %s6625_s24 }
  0x6d   : > { %4706 = vrot.lane.b32.xlu0 %v6893_v47, %s6625_s24 }
  0x70   : > { %4721 = vrot.lane.b32.xlu1 %v6915_v56, %s6625_s24 }
  0x71   : > { %4716 = vrot.lane.b32.xlu0 %v6925_v34, %s6625_s24 }
  0x74   : > { %4731 = vrot.lane.b32.xlu1 %v6935_v63, %s6625_s24 }
  0x75   : > { %4726 = vrot.lane.b32.xlu0 %v6943_v43, %s6625_s24 }
  0x78   : > { %4741 = vrot.lane.b32.xlu1 %v6765_v25, %s6626_s25 }
  0x79   : > { %4736 = vrot.lane.b32.xlu0 %v6747_v21, %s6626_s25 }
  0x7c   : > { %4751 = vrot.lane.b32.xlu1 %v6755_v22, %s6626_s25 }
  0x7d   : > { %4746 = vrot.lane.b32.xlu0 %v6730_v15, %s6626_s25 }
  0x80   : > { %4761 = vrot.lane.b32.xlu1 %v6787_v32, %s6626_s25 }
  0x81   : > { %4756 = vrot.lane.b32.xlu0 %v6797_v35, %s6626_s25 }
  0x84   : > { %4771 = vrot.lane.b32.xlu1 %v6819_v42, %s6626_s25 }
  0x85   : > { %4766 = vrot.lane.b32.xlu0 %v6829_v45, %s6626_s25 }
  0x88   : > { %4781 = vrot.lane.b32.xlu1 %v6851_v52, %s6626_s25 }
  0x89   : > { %4776 = vrot.lane.b32.xlu0 %v6861_v55, %s6626_s25 }
  0x8a   : > { %v6991_v26 = vpop.permute.xlu1 %4506 }
  0x8b   : > { %v6993_v27 = vpop.permute.xlu0 %4496 }
  0x8c   : > { %4791 = vrot.lane.b32.xlu1 %v6883_v62, %s6626_s25 }
  0x8d   : > { %4786 = vrot.lane.b32.xlu0 %v6893_v47, %s6626_s25 }
  0x8e   : > { %v6997_v57 = vpop.permute.xlu1 %4511 }
  0x8f   : > { %v6999_v33 = vpop.permute.xlu0 %4501 }
  0x90   : > { %4801 = vrot.lane.b32.xlu1 %v6915_v56, %s6626_s25 }
  0x91   : > { %4796 = vrot.lane.b32.xlu0 %v6925_v34, %s6626_s25 }
  0x92   : > { %v7003_v44 = vpop.permute.xlu1 %4521 }
  0x93   : > { %v7005_v46 = vpop.permute.xlu0 %4516 }
  0x94   : > { %4811 = vrot.lane.b32.xlu1 %v6935_v63, %s6626_s25 }
  0x95   : > { %4806 = vrot.lane.b32.xlu0 %v6943_v43, %s6626_s25  ;;  %s224_s25 = scalar_lea.vmem %s11528_s4, %s4346_s23 }
  0x96   : > { %v7009_v23 = vpop.permute.xlu1 %4531 }
  0x97   : > { %v7011_v24 = vpop.permute.xlu0 %4526 }
  0x98   : > { %4821 = vrot.lane.b32.xlu1 %v6765_v25, %s6627_s26 }
  0x99   : > { %4816 = vrot.lane.b32.xlu0 %v6747_v21, %s6627_s26 }
  0x9a   : > { %v7015_v16 = vpop.permute.xlu1 %4541 }
  0x9b   : > { %v7017_v17 = vpop.permute.xlu0 %4536 }
  0x9c   : > { %4831 = vrot.lane.b32.xlu1 %v6755_v22, %s6627_s26 }
  0x9d   : > { %4826 = vrot.lane.b32.xlu0 %v6730_v15, %s6627_s26 }
  0x9e   : > { %v7021_v10 = vpop.permute.xlu1 %4551 }
  0x9f   : > { %v7023_v11 = vpop.permute.xlu0 %4546 }
  0xa0   : > { %4841 = vrot.lane.b32.xlu1 %v6787_v32, %s6627_s26 }
  0xa1   : > { %4836 = vrot.lane.b32.xlu0 %v6797_v35, %s6627_s26 }
  0xa2   : > { %v7027_v6 = vpop.permute.xlu1 %4561 }
  0xa3   : > { %v7029_v9 = vpop.permute.xlu0 %4556 }
  0xa4   : > { %4851 = vrot.lane.b32.xlu1 %v6819_v42, %s6627_s26 }
  0xa5   : > { %4846 = vrot.lane.b32.xlu0 %v6829_v45, %s6627_s26 }
  0xa6   : > { %v7033_v3 = vpop.permute.xlu1 %4571 }
  0xa7   : > { %v7035_v4 = vpop.permute.xlu0 %4566 }
  0xa8   : > { %4861 = vrot.lane.b32.xlu1 %v6851_v52, %s6627_s26 }
  0xa9   : > { %4856 = vrot.lane.b32.xlu0 %v6861_v55, %s6627_s26 }
  0xaa   : > { %v7039_v54 = vpop.permute.xlu1 %4581 }
  0xab   : > { %11924 = vst [vmem:[#allocation24_spill] sm:$0xff] %v7039_v54  ;;  %v7041_v37 = vpop.permute.xlu0 %4576 }
  0xac   : > { %11925 = vst [vmem:[#allocation25_spill] sm:$0xff] %v7041_v37  ;;  %4871 = vrot.lane.b32.xlu1 %v6883_v62, %s6627_s26 }
  0xad   : > { %4866 = vrot.lane.b32.xlu0 %v6893_v47, %s6627_s26 }
  0xae   : > { %v7045_v36 = vpop.permute.xlu1 %4591 }
  0xaf   : > { %11926 = vst [vmem:[#allocation26_spill] sm:$0xff] %v7045_v36  ;;  %v7047_v53 = vpop.permute.xlu0 %4586 }
  0xb0   : > { %11927 = vst [vmem:[#allocation27_spill] sm:$0xff] %v7047_v53  ;;  %4881 = vrot.lane.b32.xlu1 %v6915_v56, %s6627_s26 }
  0xb1   : > { %4876 = vrot.lane.b32.xlu0 %v6925_v34, %s6627_s26 }
  0xb2   : > { %v7051_v60 = vpop.permute.xlu1 %4601 }
  0xb3   : > { %11928 = vst [vmem:[#allocation28_spill] sm:$0xff] %v7051_v60  ;;  %v7053_v61 = vpop.permute.xlu0 %4596 }
  0xb4   : > { %11929 = vst [vmem:[#allocation29_spill] sm:$0xff] %v7053_v61  ;;  %4891 = vrot.lane.b32.xlu1 %v6935_v63, %s6627_s26 }
  0xb5   : > { %4886 = vrot.lane.b32.xlu0 %v6943_v43, %s6627_s26 }
  0xb6   : > { %v7057_v37 = vpop.permute.xlu1 %4611 }
  0xb7   : > { %11930 = vst [vmem:[#allocation30_spill] sm:$0xff] %v7057_v37  ;;  %v7059_v54 = vpop.permute.xlu0 %4606 }
  0xb8   : > { %11931 = vst [vmem:[#allocation31_spill] sm:$0xff] %v7059_v54  ;;  %4901 = vrot.lane.b32.xlu1 %v6765_v25, %s6628_s27 }
  0xb9   : > { %4896 = vrot.lane.b32.xlu0 %v6747_v21, %s6628_s27 }
  0xba   : > { %v7063_v53 = vpop.permute.xlu1 %4621 }
  0xbb   : > { %11932 = vst [vmem:[#allocation32_spill] sm:$0xff] %v7063_v53  ;;  %v7065_v36 = vpop.permute.xlu0 %4616 }
  0xbc   : > { %11933 = vst [vmem:[#allocation33_spill] sm:$0xff] %v7065_v36  ;;  %4911 = vrot.lane.b32.xlu1 %v6755_v22, %s6628_s27 }
  0xbd   : > { %4906 = vrot.lane.b32.xlu0 %v6730_v15, %s6628_s27 }
  0xbe   : > { %v7069_v61 = vpop.permute.xlu1 %4631 }
  0xbf   : > { %11934 = vst [vmem:[#allocation34_spill] sm:$0xff] %v7069_v61  ;;  %v7071_v60 = vpop.permute.xlu0 %4626 }
  0xc0   : > { %11935 = vst [vmem:[#allocation35_spill] sm:$0xff] %v7071_v60  ;;  %4921 = vrot.lane.b32.xlu1 %v6787_v32, %s6628_s27 }
  0xc1   : > { %4916 = vrot.lane.b32.xlu0 %v6797_v35, %s6628_s27 }
  0xc2   : > { %v7075_v54 = vpop.permute.xlu1 %4641 }
  0xc3   : > { %11936 = vst [vmem:[#allocation36_spill] sm:$0xff] %v7075_v54  ;;  %v7077_v37 = vpop.permute.xlu0 %4636 }
  0xc4   : > { %11937 = vst [vmem:[#allocation37_spill] sm:$0xff] %v7077_v37  ;;  %4931 = vrot.lane.b32.xlu1 %v6819_v42, %s6628_s27 }
  0xc5   : > { %4926 = vrot.lane.b32.xlu0 %v6829_v45, %s6628_s27 }
  0xc6   : > { %v7081_v36 = vpop.permute.xlu1 %4651 }
  0xc7   : > { %11938 = vst [vmem:[#allocation38_spill] sm:$0xff] %v7081_v36  ;;  %v7083_v53 = vpop.permute.xlu0 %4646 }
  0xc8   : > { %11939 = vst [vmem:[#allocation39_spill] sm:$0xff] %v7083_v53  ;;  %4941 = vrot.lane.b32.xlu1 %v6851_v52, %s6628_s27 }
  0xc9   : > { %4936 = vrot.lane.b32.xlu0 %v6861_v55, %s6628_s27 }
  0xca   : > { %v7087_v60 = vpop.permute.xlu1 %4661 }
  0xcb   : > { %11940 = vst [vmem:[#allocation40_spill] sm:$0xff] %v7087_v60  ;;  %v7089_v61 = vpop.permute.xlu0 %4656 }
  0xcc   : > { %11941 = vst [vmem:[#allocation41_spill] sm:$0xff] %v7089_v61  ;;  %4951 = vrot.lane.b32.xlu1 %v6883_v62, %s6628_s27 }
  0xcd   : > { %4946 = vrot.lane.b32.xlu0 %v6893_v47, %s6628_s27 }
  0xce   : > { %v7093_v37 = vpop.permute.xlu1 %4671 }
  0xcf   : > { %11942 = vst [vmem:[#allocation42_spill] sm:$0xff] %v7093_v37  ;;  %v7095_v54 = vpop.permute.xlu0 %4666 }
  0xd0   : > { %11943 = vst [vmem:[#allocation43_spill] sm:$0xff] %v7095_v54  ;;  %4961 = vrot.lane.b32.xlu1 %v6915_v56, %s6628_s27 }
  0xd1   : > { %4956 = vrot.lane.b32.xlu0 %v6925_v34, %s6628_s27 }
  0xd2   : > { %v7099_v53 = vpop.permute.xlu1 %4681 }
  0xd3   : > { %11944 = vst [vmem:[#allocation44_spill] sm:$0xff] %v7099_v53  ;;  %v7101_v36 = vpop.permute.xlu0 %4676 }
  0xd4   : > { %11945 = vst [vmem:[#allocation45_spill] sm:$0xff] %v7101_v36  ;;  %4971 = vrot.lane.b32.xlu1 %v6935_v63, %s6628_s27 }
  0xd5   : > { %4966 = vrot.lane.b32.xlu0 %v6943_v43, %s6628_s27 }
  0xd6   : > { %v7105_v61 = vpop.permute.xlu1 %4691 }
  0xd7   : > { %11946 = vst [vmem:[#allocation46_spill] sm:$0xff] %v7105_v61  ;;  %v7107_v60 = vpop.permute.xlu0 %4686 }
  0xd8   : > { %11947 = vst [vmem:[#allocation47_spill] sm:$0xff] %v7107_v60  ;;  %4981 = vrot.lane.b32.xlu1 %v6765_v25, %s6629_s28 }
  0xd9   : > { %4976 = vrot.lane.b32.xlu0 %v6747_v21, %s6629_s28 }
  0xda   : > { %v7111_v54 = vpop.permute.xlu1 %4701 }
  0xdb   : > { %11948 = vst [vmem:[#allocation48_spill] sm:$0xff] %v7111_v54  ;;  %v7113_v37 = vpop.permute.xlu0 %4696 }
  0xdc   : > { %11949 = vst [vmem:[#allocation49_spill] sm:$0xff] %v7113_v37  ;;  %4991 = vrot.lane.b32.xlu1 %v6755_v22, %s6629_s28 }
  0xdd   : > { %4986 = vrot.lane.b32.xlu0 %v6730_v15, %s6629_s28 }
  0xde   : > { %v7117_v36 = vpop.permute.xlu1 %4711 }
  0xdf   : > { %11950 = vst [vmem:[#allocation50_spill] sm:$0xff] %v7117_v36  ;;  %v7119_v53 = vpop.permute.xlu0 %4706 }
  0xe0   : > { %11951 = vst [vmem:[#allocation51_spill] sm:$0xff] %v7119_v53  ;;  %5001 = vrot.lane.b32.xlu1 %v6787_v32, %s6629_s28 }
  0xe1   : > { %4996 = vrot.lane.b32.xlu0 %v6797_v35, %s6629_s28 }
  0xe2   : > { %v7123_v60 = vpop.permute.xlu1 %4721 }
  0xe3   : > { %11952 = vst [vmem:[#allocation52_spill] sm:$0xff] %v7123_v60  ;;  %v7125_v61 = vpop.permute.xlu0 %4716 }
  0xe4   : > { %11953 = vst [vmem:[#allocation53_spill] sm:$0xff] %v7125_v61  ;;  %5011 = vrot.lane.b32.xlu1 %v6819_v42, %s6629_s28 }
  0xe5   : > { %5006 = vrot.lane.b32.xlu0 %v6829_v45, %s6629_s28 }
  0xe6   : > { %v7129_v37 = vpop.permute.xlu1 %4731 }
  0xe7   : > { %11954 = vst [vmem:[#allocation54_spill] sm:$0xff] %v7129_v37  ;;  %v7131_v54 = vpop.permute.xlu0 %4726 }
  0xe8   : > { %11955 = vst [vmem:[#allocation55_spill] sm:$0xff] %v7131_v54  ;;  %5021 = vrot.lane.b32.xlu1 %v6851_v52, %s6629_s28 }
  0xe9   : > { %5016 = vrot.lane.b32.xlu0 %v6861_v55, %s6629_s28 }
  0xea   : > { %v7135_v53 = vpop.permute.xlu1 %4741 }
  0xeb   : > { %11956 = vst [vmem:[#allocation56_spill] sm:$0xff] %v7135_v53  ;;  %v7137_v36 = vpop.permute.xlu0 %4736 }
  0xec   : > { %11957 = vst [vmem:[#allocation57_spill] sm:$0xff] %v7137_v36  ;;  %5031 = vrot.lane.b32.xlu1 %v6883_v62, %s6629_s28 }
  0xed   : > { %5026 = vrot.lane.b32.xlu0 %v6893_v47, %s6629_s28 }
  0xee   : > { %v7141_v61 = vpop.permute.xlu1 %4751 }
  0xef   : > { %11958 = vst [vmem:[#allocation58_spill] sm:$0xff] %v7141_v61  ;;  %v7143_v60 = vpop.permute.xlu0 %4746 }
  0xf0   : > { %11959 = vst [vmem:[#allocation59_spill] sm:$0xff] %v7143_v60  ;;  %5041 = vrot.lane.b32.xlu1 %v6915_v56, %s6629_s28 }
  0xf1   : > { %5036 = vrot.lane.b32.xlu0 %v6925_v34, %s6629_s28 }
  0xf2   : > { %v7147_v54 = vpop.permute.xlu1 %4761 }
  0xf3   : > { %11960 = vst [vmem:[#allocation60_spill] sm:$0xff] %v7147_v54  ;;  %v7149_v37 = vpop.permute.xlu0 %4756 }
  0xf4   : > { %11961 = vst [vmem:[#allocation61_spill] sm:$0xff] %v7149_v37  ;;  %5051 = vrot.lane.b32.xlu1 %v6935_v63, %s6629_s28 }
  0xf5   : > { %5046 = vrot.lane.b32.xlu0 %v6943_v43, %s6629_s28  ;;  %s11393_s28 = scalar_lea.vmem %s11527_s3, %s4343_s12 }
  0xf6   : > { %v7153_v36 = vpop.permute.xlu1 %4771 }
  0xf7   : > { %11962 = vst [vmem:[#allocation62_spill] sm:$0xff] %v7153_v36  ;;  %v7155_v53 = vpop.permute.xlu0 %4766 }
  0xf8   : > { %11963 = vst [vmem:[#allocation63_spill] sm:$0xff] %v7155_v53  ;;  %5061 = vrot.lane.b32.xlu1 %v6765_v25, %s6630_s29 }
  0xf9   : > { %5056 = vrot.lane.b32.xlu0 %v6747_v21, %s6630_s29 }
  0xfa   : > { %v7159_v60 = vpop.permute.xlu1 %4781 }
  0xfb   : > { %11964 = vst [vmem:[#allocation64_spill] sm:$0xff] %v7159_v60  ;;  %v7161_v61 = vpop.permute.xlu0 %4776 }
  0xfc   : > { %11965 = vst [vmem:[#allocation65_spill] sm:$0xff] %v7161_v61  ;;  %5071 = vrot.lane.b32.xlu1 %v6755_v22, %s6630_s29 }
  0xfd   : > { %5066 = vrot.lane.b32.xlu0 %v6730_v15, %s6630_s29 }
  0xfe   : > { %v7165_v37 = vpop.permute.xlu1 %4791 }
  0xff   : > { %11966 = vst [vmem:[#allocation66_spill] sm:$0xff] %v7165_v37  ;;  %v7167_v54 = vpop.permute.xlu0 %4786 }
 0x100   : > { %11967 = vst [vmem:[#allocation67_spill] sm:$0xff] %v7167_v54  ;;  %5081 = vrot.lane.b32.xlu1 %v6787_v32, %s6630_s29 }
 0x101   : > { %5076 = vrot.lane.b32.xlu0 %v6797_v35, %s6630_s29 }
 0x102   : > { %v7171_v53 = vpop.permute.xlu1 %4801 }
 0x103   : > { %11968 = vst [vmem:[#allocation68_spill] sm:$0xff] %v7171_v53  ;;  %v7173_v36 = vpop.permute.xlu0 %4796 }
 0x104   : > { %11969 = vst [vmem:[#allocation69_spill] sm:$0xff] %v7173_v36  ;;  %5091 = vrot.lane.b32.xlu1 %v6819_v42, %s6630_s29 }
 0x105   : > { %5086 = vrot.lane.b32.xlu0 %v6829_v45, %s6630_s29 }
 0x106   : > { %v7177_v61 = vpop.permute.xlu1 %4811 }
 0x107   : > { %11970 = vst [vmem:[#allocation70_spill] sm:$0xff] %v7177_v61  ;;  %v7179_v60 = vpop.permute.xlu0 %4806 }
 0x108   : > { %11971 = vst [vmem:[#allocation71_spill] sm:$0xff] %v7179_v60  ;;  %5101 = vrot.lane.b32.xlu1 %v6851_v52, %s6630_s29 }
 0x109   : > { %5096 = vrot.lane.b32.xlu0 %v6861_v55, %s6630_s29 }
 0x10a   : > { %v7183_v54 = vpop.permute.xlu1 %4821 }
 0x10b   : > { %11972 = vst [vmem:[#allocation72_spill] sm:$0xff] %v7183_v54  ;;  %v7185_v37 = vpop.permute.xlu0 %4816 }
 0x10c   : > { %11973 = vst [vmem:[#allocation73_spill] sm:$0xff] %v7185_v37  ;;  %5111 = vrot.lane.b32.xlu1 %v6883_v62, %s6630_s29 }
 0x10d   : > { %5106 = vrot.lane.b32.xlu0 %v6893_v47, %s6630_s29 }
 0x10e   : > { %v7189_v36 = vpop.permute.xlu1 %4831 }
 0x10f   : > { %11974 = vst [vmem:[#allocation74_spill] sm:$0xff] %v7189_v36  ;;  %v7191_v53 = vpop.permute.xlu0 %4826 }
 0x110   : > { %11975 = vst [vmem:[#allocation75_spill] sm:$0xff] %v7191_v53  ;;  %5121 = vrot.lane.b32.xlu1 %v6915_v56, %s6630_s29 }
 0x111   : > { %5116 = vrot.lane.b32.xlu0 %v6925_v34, %s6630_s29 }
 0x112   : > { %v7195_v60 = vpop.permute.xlu1 %4841 }
 0x113   : > { %11976 = vst [vmem:[#allocation76_spill] sm:$0xff] %v7195_v60  ;;  %v7197_v61 = vpop.permute.xlu0 %4836 }
 0x114   : > { %11977 = vst [vmem:[#allocation77_spill] sm:$0xff] %v7197_v61  ;;  %5131 = vrot.lane.b32.xlu1 %v6935_v63, %s6630_s29 }
 0x115   : > { %5126 = vrot.lane.b32.xlu0 %v6943_v43, %s6630_s29 }
 0x116   : > { %v7201_v37 = vpop.permute.xlu1 %4851 }
 0x117   : > { %11978 = vst [vmem:[#allocation78_spill] sm:$0xff] %v7201_v37  ;;  %v7203_v54 = vpop.permute.xlu0 %4846 }
 0x118   : > { %11979 = vst [vmem:[#allocation79_spill] sm:$0xff] %v7203_v54  ;;  %5141 = vrot.lane.b32.xlu1 %v6765_v25, %s6631_s30 }
 0x119   : > { %5136 = vrot.lane.b32.xlu0 %v6747_v21, %s6631_s30 }
 0x11a   : > { %v7207_v53 = vpop.permute.xlu1 %4861 }
 0x11b   : > { %11980 = vst [vmem:[#allocation80_spill] sm:$0xff] %v7207_v53  ;;  %v7209_v36 = vpop.permute.xlu0 %4856 }
 0x11c   : > { %11981 = vst [vmem:[#allocation81_spill] sm:$0xff] %v7209_v36  ;;  %5151 = vrot.lane.b32.xlu1 %v6755_v22, %s6631_s30 }
 0x11d   : > { %5146 = vrot.lane.b32.xlu0 %v6730_v15, %s6631_s30 }
 0x11e   : > { %v7213_v61 = vpop.permute.xlu1 %4871 }
 0x11f   : > { %11982 = vst [vmem:[#allocation82_spill] sm:$0xff] %v7213_v61  ;;  %v7215_v60 = vpop.permute.xlu0 %4866 }
 0x120   : > { %11983 = vst [vmem:[#allocation83_spill] sm:$0xff] %v7215_v60  ;;  %5161 = vrot.lane.b32.xlu1 %v6787_v32, %s6631_s30 }
 0x121   : > { %5156 = vrot.lane.b32.xlu0 %v6797_v35, %s6631_s30 }
 0x122   : > { %v7219_v54 = vpop.permute.xlu1 %4881 }
 0x123   : > { %11984 = vst [vmem:[#allocation84_spill] sm:$0xff] %v7219_v54  ;;  %v7221_v37 = vpop.permute.xlu0 %4876 }
 0x124   : > { %11985 = vst [vmem:[#allocation85_spill] sm:$0xff] %v7221_v37  ;;  %5171 = vrot.lane.b32.xlu1 %v6819_v42, %s6631_s30 }
 0x125   : > { %5166 = vrot.lane.b32.xlu0 %v6829_v45, %s6631_s30 }
 0x126   : > { %v7225_v36 = vpop.permute.xlu1 %4891 }
 0x127   : > { %11986 = vst [vmem:[#allocation86_spill] sm:$0xff] %v7225_v36  ;;  %v7227_v53 = vpop.permute.xlu0 %4886 }
 0x128   : > { %11987 = vst [vmem:[#allocation87_spill] sm:$0xff] %v7227_v53  ;;  %5181 = vrot.lane.b32.xlu1 %v6851_v52, %s6631_s30 }
 0x129   : > { %5176 = vrot.lane.b32.xlu0 %v6861_v55, %s6631_s30 }
 0x12a   : > { %v7231_v60 = vpop.permute.xlu1 %4901 }
 0x12b   : > { %11988 = vst [vmem:[#allocation88_spill] sm:$0xff] %v7231_v60  ;;  %v7233_v61 = vpop.permute.xlu0 %4896 }
 0x12c   : > { %11989 = vst [vmem:[#allocation89_spill] sm:$0xff] %v7233_v61  ;;  %5191 = vrot.lane.b32.xlu1 %v6883_v62, %s6631_s30 }
 0x12d   : > { %5186 = vrot.lane.b32.xlu0 %v6893_v47, %s6631_s30 }
 0x12e   : > { %v7237_v37 = vpop.permute.xlu1 %4911 }
 0x12f   : > { %11990 = vst [vmem:[#allocation90_spill] sm:$0xff] %v7237_v37  ;;  %v7239_v54 = vpop.permute.xlu0 %4906 }
 0x130   : > { %11991 = vst [vmem:[#allocation91_spill] sm:$0xff] %v7239_v54  ;;  %5201 = vrot.lane.b32.xlu1 %v6915_v56, %s6631_s30 }
 0x131   : > { %5196 = vrot.lane.b32.xlu0 %v6925_v34, %s6631_s30 }
 0x132   : > { %v7243_v53 = vpop.permute.xlu1 %4921 }
 0x133   : > { %11992 = vst [vmem:[#allocation92_spill] sm:$0xff] %v7243_v53  ;;  %v7245_v36 = vpop.permute.xlu0 %4916 }
 0x134   : > { %11993 = vst [vmem:[#allocation93_spill] sm:$0xff] %v7245_v36  ;;  %5211 = vrot.lane.b32.xlu1 %v6935_v63, %s6631_s30 }
 0x135   : > { %5206 = vrot.lane.b32.xlu0 %v6943_v43, %s6631_s30 }
 0x136   : > { %v7249_v61 = vpop.permute.xlu1 %4931 }
 0x137   : > { %11994 = vst [vmem:[#allocation94_spill] sm:$0xff] %v7249_v61  ;;  %v7251_v60 = vpop.permute.xlu0 %4926 }
 0x138   : > { %11995 = vst [vmem:[#allocation95_spill] sm:$0xff] %v7251_v60  ;;  %5221 = vrot.lane.b32.xlu1 %v6765_v25, %s6632_s5 }
 0x139   : > { %5216 = vrot.lane.b32.xlu0 %v6747_v21, %s6632_s5 }
 0x13a   : > { %v7255_v54 = vpop.permute.xlu1 %4941 }
 0x13b   : > { %11996 = vst [vmem:[#allocation96_spill] sm:$0xff] %v7255_v54  ;;  %v7257_v37 = vpop.permute.xlu0 %4936 }
 0x13c   : > { %11997 = vst [vmem:[#allocation97_spill] sm:$0xff] %v7257_v37  ;;  %5231 = vrot.lane.b32.xlu1 %v6755_v22, %s6632_s5 }
 0x13d   : > { %5226 = vrot.lane.b32.xlu0 %v6730_v15, %s6632_s5 }
 0x13e   : > { %v7261_v36 = vpop.permute.xlu1 %4951 }
 0x13f   : > { %11998 = vst [vmem:[#allocation98_spill] sm:$0xff] %v7261_v36  ;;  %v7263_v53 = vpop.permute.xlu0 %4946 }
 0x140   : > { %11999 = vst [vmem:[#allocation99_spill] sm:$0xff] %v7263_v53  ;;  %5241 = vrot.lane.b32.xlu1 %v6787_v32, %s6632_s5 }
 0x141   : > { %5236 = vrot.lane.b32.xlu0 %v6797_v35, %s6632_s5 }
 0x142   : > { %v7267_v60 = vpop.permute.xlu1 %4961 }
 0x143   : > { %12000 = vst [vmem:[#allocation100_spill] sm:$0xff] %v7267_v60  ;;  %v7269_v61 = vpop.permute.xlu0 %4956 }
 0x144   : > { %12001 = vst [vmem:[#allocation101_spill] sm:$0xff] %v7269_v61  ;;  %5251 = vrot.lane.b32.xlu1 %v6819_v42, %s6632_s5 }
 0x145   : > { %5246 = vrot.lane.b32.xlu0 %v6829_v45, %s6632_s5 }
 0x146   : > { %v7273_v37 = vpop.permute.xlu1 %4971 }
 0x147   : > { %12002 = vst [vmem:[#allocation102_spill] sm:$0xff] %v7273_v37  ;;  %v7275_v54 = vpop.permute.xlu0 %4966 }
 0x148   : > { %12003 = vst [vmem:[#allocation103_spill] sm:$0xff] %v7275_v54  ;;  %5261 = vrot.lane.b32.xlu1 %v6851_v52, %s6632_s5 }
 0x149   : > { %5256 = vrot.lane.b32.xlu0 %v6861_v55, %s6632_s5 }
 0x14a   : > { %v7279_v53 = vpop.permute.xlu1 %4981 }
 0x14b   : > { %12004 = vst [vmem:[#allocation104_spill] sm:$0xff] %v7279_v53  ;;  %v7281_v36 = vpop.permute.xlu0 %4976 }
 0x14c   : > { %12005 = vst [vmem:[#allocation105_spill] sm:$0xff] %v7281_v36  ;;  %5271 = vrot.lane.b32.xlu1 %v6883_v62, %s6632_s5 }
 0x14d   : > { %5266 = vrot.lane.b32.xlu0 %v6893_v47, %s6632_s5 }
 0x14e   : > { %v7285_v61 = vpop.permute.xlu1 %4991 }
 0x14f   : > { %12006 = vst [vmem:[#allocation106_spill] sm:$0xff] %v7285_v61  ;;  %v7287_v60 = vpop.permute.xlu0 %4986 }
 0x150   : > { %12007 = vst [vmem:[#allocation107_spill] sm:$0xff] %v7287_v60  ;;  %5281 = vrot.lane.b32.xlu1 %v6915_v56, %s6632_s5 }
 0x151   : > { %5276 = vrot.lane.b32.xlu0 %v6925_v34, %s6632_s5 }
 0x152   : > { %v7291_v54 = vpop.permute.xlu1 %5001 }
 0x153   : > { %12008 = vst [vmem:[#allocation108_spill] sm:$0xff] %v7291_v54  ;;  %v7293_v37 = vpop.permute.xlu0 %4996 }
 0x154   : > { %12009 = vst [vmem:[#allocation109_spill] sm:$0xff] %v7293_v37  ;;  %5291 = vrot.lane.b32.xlu1 %v6935_v63, %s6632_s5 }
 0x155   : > { %5286 = vrot.lane.b32.xlu0 %v6943_v43, %s6632_s5 }
 0x156   : > { %v7297_v36 = vpop.permute.xlu1 %5011 }
 0x157   : > { %12010 = vst [vmem:[#allocation110_spill] sm:$0xff] %v7297_v36  ;;  %v7299_v53 = vpop.permute.xlu0 %5006 }
 0x158   : > { %12011 = vst [vmem:[#allocation111_spill] sm:$0xff] %v7299_v53  ;;  %5301 = vrot.lane.b32.xlu1 %v6765_v25, %s6633_s6 }
 0x159   : > { %5296 = vrot.lane.b32.xlu0 %v6747_v21, %s6633_s6 }
 0x15a   : > { %v7303_v60 = vpop.permute.xlu1 %5021 }
 0x15b   : > { %12012 = vst [vmem:[#allocation112_spill] sm:$0xff] %v7303_v60  ;;  %v7305_v61 = vpop.permute.xlu0 %5016 }
 0x15c   : > { %12013 = vst [vmem:[#allocation113_spill] sm:$0xff] %v7305_v61  ;;  %5311 = vrot.lane.b32.xlu1 %v6755_v22, %s6633_s6 }
 0x15d   : > { %5306 = vrot.lane.b32.xlu0 %v6730_v15, %s6633_s6 }
 0x15e   : > { %v7309_v37 = vpop.permute.xlu1 %5031 }
 0x15f   : > { %12014 = vst [vmem:[#allocation114_spill] sm:$0xff] %v7309_v37  ;;  %v7311_v54 = vpop.permute.xlu0 %5026 }
 0x160   : > { %12015 = vst [vmem:[#allocation115_spill] sm:$0xff] %v7311_v54  ;;  %5321 = vrot.lane.b32.xlu1 %v6787_v32, %s6633_s6 }
 0x161   : > { %5316 = vrot.lane.b32.xlu0 %v6797_v35, %s6633_s6 }
 0x162   : > { %v7315_v53 = vpop.permute.xlu1 %5041 }
 0x163   : > { %12016 = vst [vmem:[#allocation116_spill] sm:$0xff] %v7315_v53  ;;  %v7317_v36 = vpop.permute.xlu0 %5036 }
 0x164   : > { %12017 = vst [vmem:[#allocation117_spill] sm:$0xff] %v7317_v36  ;;  %5331 = vrot.lane.b32.xlu1 %v6819_v42, %s6633_s6 }
 0x165   : > { %5326 = vrot.lane.b32.xlu0 %v6829_v45, %s6633_s6 }
 0x166   : > { %v7321_v61 = vpop.permute.xlu1 %5051 }
 0x167   : > { %12018 = vst [vmem:[#allocation118_spill] sm:$0xff] %v7321_v61  ;;  %v7323_v60 = vpop.permute.xlu0 %5046 }
 0x168   : > { %12019 = vst [vmem:[#allocation119_spill] sm:$0xff] %v7323_v60  ;;  %5341 = vrot.lane.b32.xlu1 %v6851_v52, %s6633_s6 }
 0x169   : > { %5336 = vrot.lane.b32.xlu0 %v6861_v55, %s6633_s6 }
 0x16a   : > { %v7327_v54 = vpop.permute.xlu1 %5061 }
 0x16b   : > { %12020 = vst [vmem:[#allocation120_spill] sm:$0xff] %v7327_v54  ;;  %v7329_v37 = vpop.permute.xlu0 %5056 }
 0x16c   : > { %12021 = vst [vmem:[#allocation121_spill] sm:$0xff] %v7329_v37  ;;  %5351 = vrot.lane.b32.xlu1 %v6883_v62, %s6633_s6 }
 0x16d   : > { %5346 = vrot.lane.b32.xlu0 %v6893_v47, %s6633_s6 }
 0x16e   : > { %v7333_v36 = vpop.permute.xlu1 %5071 }
 0x16f   : > { %12022 = vst [vmem:[#allocation122_spill] sm:$0xff] %v7333_v36  ;;  %v7335_v53 = vpop.permute.xlu0 %5066  ;;  %v4508_v36 = vunpack.i.l.bf16 %v6991_v26 }
 0x170   : > { %12023 = vst [vmem:[#allocation123_spill] sm:$0xff] %v7335_v53  ;;  %5361 = vrot.lane.b32.xlu1 %v6915_v56, %s6633_s6 }
 0x171   : > { %5356 = vrot.lane.b32.xlu0 %v6925_v34, %s6633_s6 }
 0x172   : > { %v7339_v60 = vpop.permute.xlu1 %5081 }
 0x173   : > { %12024 = vst [vmem:[#allocation124_spill] sm:$0xff] %v7339_v60  ;;  %v7341_v61 = vpop.permute.xlu0 %5076 }
 0x174   : > { %12025 = vst [vmem:[#allocation125_spill] sm:$0xff] %v7341_v61  ;;  %5371 = vrot.lane.b32.xlu1 %v6935_v63, %s6633_s6  ;;  %v4509_v61 = vunpack.i.h.bf16 %v6991_v26  ;;  %v12033_v26 = vunpack.c.l.bf16 %v6694_v0  ;;  %v4513_v63 = vunpack.i.l.bf16 %v6997_v57  ;;  %v4503_v0 = vunpack.i.l.bf16 %v6999_v33 }
 0x175   : > { %5366 = vrot.lane.b32.xlu0 %v6943_v43, %s6633_s6  ;;  %s6639_s6 = smov 60  }
 0x176   : > { %v7345_v37 = vpop.permute.xlu1 %5091 }
 0x177   : > { %12026 = vst [vmem:[#allocation126_spill] sm:$0xff] %v7345_v37  ;;  %v7347_v54 = vpop.permute.xlu0 %5086  ;;  %v4498_v37 = vunpack.i.l.bf16 %v6993_v27 }
 0x178   : > { %12027 = vst [vmem:[#allocation127_spill] sm:$0xff] %v7347_v54  ;;  %5381 = vrot.lane.b32.xlu1 %v6765_v25, %s6634_s7  ;;  %v4499_v54 = vunpack.i.h.bf16 %v6993_v27  ;;  %v12034_v27 = vunpack.c.l.bf16 %v6705_v5 }
 0x179   : > { %5376 = vrot.lane.b32.xlu0 %v6747_v21, %s6634_s7 }
 0x17a   : > { %v7353_v53 = vpop.permute.xlu1 %5101 }
 0x17b   : > { %12028 = vst [vmem:[#allocation128_spill] sm:$0xff] %v7353_v53  ;;  %v7355_v60 = vpop.permute.xlu0 %5096  ;;  %v4514_v53 = vunpack.i.h.bf16 %v6997_v57  ;;  %v4523_v57 = vunpack.i.l.bf16 %v7003_v44 }
 0x17c   : > { %12029 = vst [vmem:[#allocation129_spill] sm:$0xff] %v7355_v60  ;;  %5391 = vrot.lane.b32.xlu1 %v6755_v22, %s6634_s7  ;;  %v12032_v60 = vunpack.c.l.bf16 %v6697_v1  ;;  %v7376_v22 = vmax.f32 %v12033_v26, %v4508_v36  ;;  %v4504_v1 = vunpack.i.h.bf16 %v6999_v33  ;;  %v4524_v36 = vunpack.i.h.bf16 %v7003_v44 }
 0x17d   : > { %5386 = vrot.lane.b32.xlu0 %v6730_v15, %s6634_s7  ;;  %v12035_v15 = vunpack.c.l.bf16 %v6700_v2  ;;  %v12039_v33 = vunpack.c.l.bf16 %v6709_v7  ;;  %v4529_v44 = vunpack.i.h.bf16 %v7011_v24  ;;  %v12041_v7 = vunpack.c.l.bf16 %v6718_v12 }
 0x17e   : > { %v7365_v25 = vpop.permute.xlu1 %5111  ;;  %v7372_v43 = vmax.f32 %v12032_v60, %v4509_v61  ;;  %v4519_v60 = vunpack.i.h.bf16 %v7005_v46  ;;  %v4533_v61 = vunpack.i.l.bf16 %v7009_v23  ;;  %v12047_v12 = vunpack.c.l.bf16 %v6773_v29 }
 0x17f   : > { %12030 = vst [vmem:[#allocation130_spill] sm:$0xff] %v7365_v25  ;;  %v7368_v21 = vpop.permute.xlu0 %5106  ;;  %v7383_v25 = vmax.f32 %v12034_v27, %v4499_v54  ;;  %v12037_v54 = vunpack.c.l.bf16 %v6712_v8  ;;  %v7409_v27 = vmax.f32 %v12039_v33, %v4513_v63  ;;  %v12040_v8 = vunpack.c.l.bf16 %v6721_v13 }
 0x180   : > { %12031 = vst [vmem:[#allocation131_spill] sm:$0xff] %v7368_v21  ;;  %5401 = vrot.lane.b32.xlu1 %v6787_v32, %s6634_s7  ;;  %v7387_v21 = vmax.f32 %v12035_v15, %v4498_v37  ;;  %v4518_v15 = vunpack.i.l.bf16 %v7005_v46  ;;  %v4534_v37 = vunpack.i.h.bf16 %v7009_v23  ;;  %v4543_v23 = vunpack.i.l.bf16 %v7015_v16 }
 0x181   : > { %5396 = vrot.lane.b32.xlu0 %v6797_v35, %s6634_s7  ;;  %v7400_v2 = vmax.f32 %v12037_v54, %v4514_v53  ;;  %v7417_v46 = vmax.f32 %v12040_v8, %v4504_v1  ;;  %v4544_v53 = vunpack.i.h.bf16 %v7015_v16  ;;  %v7425_v63 = vmax.f32 %v12041_v7, %v4503_v0 }
 0x182   : > { %v7396_v5 = vpop.permute.xlu1 %5121  ;;  %v12043_v33 = vunpack.c.l.bf16 %v6724_v14  ;;  %v12044_v1 = vunpack.c.l.bf16 %v6741_v20  ;;  %v7447_v0 = vmax.f32 %v12047_v12, %v4534_v37  ;;  %v4539_v14 = vunpack.i.h.bf16 %v7017_v17 }
 0x183   : > { %12036 = vst [vmem:[#allocation132_spill] sm:$0xff] %v7396_v5  ;;  %v7405_v26 = vpop.permute.xlu0 %5116  ;;  %v4528_v5 = vunpack.i.l.bf16 %v7011_v24  ;;  %v12042_v24 = vunpack.c.l.bf16 %v6735_v18  ;;  %v12048_v18 = vunpack.c.l.bf16 %v6770_v28  ;;  %v12050_v20 = vunpack.c.l.bf16 %v6779_v31 }
 0x184   : > { %12038 = vst [vmem:[#allocation133_spill] sm:$0xff] %v7405_v26  ;;  %5411 = vrot.lane.b32.xlu1 %v6819_v42, %s6634_s7  ;;  %v7433_v13 = vmax.f32 %v12043_v33, %v4523_v57  ;;  %v7437_v8 = vmax.f32 %v12044_v1, %v4519_v60  ;;  %v12046_v26 = vunpack.c.l.bf16 %v6738_v19  ;;  %v12051_v19 = vunpack.c.l.bf16 %v6776_v30 }
 0x185   : > { %5406 = vrot.lane.b32.xlu0 %v6829_v45, %s6634_s7  ;;  %v7429_v54 = vmax.f32 %v12042_v24, %v4524_v36  ;;  %v7451_v36 = vmax.f32 %v12048_v18, %v4533_v61  ;;  %v7458_v60 = vmax.f32 %v12050_v20, %v4529_v44  ;;  %v4538_v29 = vunpack.i.l.bf16 %v7017_v17 }
 0x186   : > { %v7439_v16 = vpop.permute.xlu1 %5131  ;;  %v7443_v45 = vmax.f32 %v12046_v26, %v4518_v15  ;;  %v7462_v15 = vmax.f32 %v12051_v19, %v4528_v5  ;;  %v12052_v28 = vunpack.c.l.bf16 %v6805_v39  ;;  %v12053_v61 = vunpack.c.l.bf16 %v6802_v38 }
 0x187   : > { %12045 = vst [vmem:[#allocation134_spill] sm:$0xff] %v7439_v16  ;;  %v7454_v57 = vpop.permute.xlu0 %5126  ;;  %v4554_v31 = vunpack.i.h.bf16 %v7021_v10  ;;  %v4553_v30 = vunpack.i.l.bf16 %v7021_v10  ;;  %v4549_v17 = vunpack.i.h.bf16 %v7023_v11  ;;  %v4548_v5 = vunpack.i.l.bf16 %v7023_v11 }
 0x188   : > { %12049 = vst [vmem:[#allocation135_spill] sm:$0xff] %v7454_v57  ;;  %5421 = vrot.lane.b32.xlu1 %v6851_v52, %s6634_s7  ;;  %v7469_v37 = vmax.f32 %v12052_v28, %v4544_v53  ;;  %v7473_v26 = vmax.f32 %v12053_v61, %v4543_v23  ;;  %v4564_v44 = vunpack.i.h.bf16 %v7027_v6  ;;  %v12055_v53 = vunpack.c.l.bf16 %v6811_v41  ;;  %v12100_v57 = vld [vmem:[#allocation36_spill] sm:$0xff] }
 0x189   : > { %5416 = vrot.lane.b32.xlu0 %v6861_v55, %s6634_s7  ;;  %v4563_v23 = vunpack.i.l.bf16 %v7027_v6  ;;  %v4559_v7 = vunpack.i.h.bf16 %v7029_v9  ;;  %v4558_v24 = vunpack.i.l.bf16 %v7029_v9  ;;  %v12057_v10 = vunpack.c.l.bf16 %v6808_v40 }
 0x18a   : > { %v7482_v39 = vpop.permute.xlu1 %5141  ;;  %v7486_v38 = vmax.f32 %v12055_v53, %v4539_v14  ;;  %v4574_v11 = vunpack.i.h.bf16 %v7033_v3  ;;  %v4573_v12 = vunpack.i.l.bf16 %v7033_v3  ;;  %v12058_v41 = vunpack.c.l.bf16 %v6837_v49 }
 0x18b   : > { %12054 = vst [vmem:[#allocation136_spill] sm:$0xff] %v7482_v39  ;;  %v7491_v33 = vpop.permute.xlu0 %5136  ;;  %v7495_v1 = vmax.f32 %v12057_v10, %v4538_v29  ;;  %v4569_v18 = vunpack.i.h.bf16 %v7035_v4  ;;  %v4568_v9 = vunpack.i.l.bf16 %v7035_v4  ;;  %v12059_v40 = vunpack.c.l.bf16 %v6834_v48  ;;  %v12065_v48 = vld [vmem:[#allocation13_spill] sm:$0xff] }
 0x18c   : > { %12056 = vst [vmem:[#allocation137_spill] sm:$0xff] %v7491_v33  ;;  %5431 = vrot.lane.b32.xlu1 %v6883_v62, %s6634_s7  ;;  %v7503_v6 = vmax.f32 %v12058_v41, %v4554_v31  ;;  %v12060_v3 = vunpack.c.l.bf16 %v6843_v51  ;;  %v12061_v19 = vunpack.c.l.bf16 %v6840_v50  ;;  %v12062_v29 = vunpack.c.l.bf16 %v6869_v59  ;;  %v12067_v51 = vld [vmem:[#allocation12_spill] sm:$0xff]  ;;  %v12071_v59 = vld [vmem:[#allocation17_spill] sm:$0xff] }
 0x18d   : > { %5426 = vrot.lane.b32.xlu0 %v6893_v47, %s6634_s7  ;;  %v7511_v14 = vmax.f32 %v12059_v40, %v4553_v30  ;;  %v12064_v61 = vunpack.c.l.bf16 %v6866_v58  ;;  %v12066_v30 = vunpack.c.l.bf16 %v12065_v48  ;;  %v12069_v50 = vld [vmem:[#allocation24_spill] sm:$0xff]  ;;  %v4643_v16 = vunpack.i.l.bf16 %v12100_v57 }
 0x18e   : > { %v7515_v20 = vmax.f32 %v12060_v3, %v4549_v17  ;;  %v7519_v49 = vmax.f32 %v12061_v19, %v4548_v5  ;;  %v7523_v28 = vmax.f32 %v12062_v29, %v4564_v44  ;;  %v7525_v4 = vpop.permute.xlu1 %5151  ;;  %v12068_v17 = vunpack.c.l.bf16 %v12067_v51  ;;  %v12073_v3 = vld [vmem:[#allocation16_spill] sm:$0xff]  ;;  %v12079_v51 = vld [vmem:[#allocation25_spill] sm:$0xff] }
 0x18f   : > { %12063 = vst [vmem:[#allocation138_spill] sm:$0xff] %v7525_v4  ;;  %v7529_v31 = vmax.f32 %v12064_v61, %v4563_v23  ;;  %v7533_v53 = vmax.f32 %v12066_v30, %v4559_v7  ;;  %v4584_v5 = vunpack.i.h.bf16 %v12069_v50  ;;  %v7540_v41 = vpop.permute.xlu0 %5146  ;;  %v12072_v44 = vunpack.c.l.bf16 %v12071_v59  ;;  %v12075_v7 = vld [vmem:[#allocation19_spill] sm:$0xff]  ;;  %v12077_v61 = vld [vmem:[#allocation18_spill] sm:$0xff] }
 0x190   : > { %v7537_v10 = vmax.f32 %v12068_v17, %v4558_v24  ;;  %12070 = vst [vmem:[#allocation13_spill] sm:$0xff] %v7540_v41  ;;  %v12074_v58 = vunpack.c.l.bf16 %v12073_v3  ;;  %v4583_v19 = vunpack.i.l.bf16 %v12069_v50  ;;  %5441 = vrot.lane.b32.xlu1 %v6915_v56, %s6634_s7  ;;  %v12076_v24 = vunpack.c.l.bf16 %v12075_v7  ;;  %v12080_v17 = vld [vmem:[#allocation26_spill] sm:$0xff]  ;;  %v12083_v7 = vld [vmem:[#allocation28_spill] sm:$0xff]  ;;  %v12085_v41 = vld [vmem:[#allocation29_spill] sm:$0xff] }
 0x191   : > { %v7544_v40 = vmax.f32 %v12072_v44, %v4574_v11  ;;  %v12078_v48 = vunpack.c.l.bf16 %v12077_v61  ;;  %v4579_v11 = vunpack.i.h.bf16 %v12079_v51  ;;  %5436 = vrot.lane.b32.xlu0 %v6925_v34, %s6634_s7  ;;  %v4594_v50 = vunpack.i.h.bf16 %v12080_v17  ;;  %v12081_v44 = vld [vmem:[#allocation27_spill] sm:$0xff] }
 0x192   : > { %v7548_v23 = vmax.f32 %v12074_v58, %v4573_v12  ;;  %v7555_v29 = vmax.f32 %v12076_v24, %v4569_v18  ;;  %v4578_v12 = vunpack.i.l.bf16 %v12079_v51  ;;  %v4593_v59 = vunpack.i.l.bf16 %v12080_v17  ;;  %v7568_v58 = vpop.permute.xlu1 %5161 }
 0x193   : > { %v7559_v30 = vmax.f32 %v12078_v48, %v4568_v9  ;;  %v4589_v3 = vunpack.i.h.bf16 %v12081_v44  ;;  %12082 = vst [vmem:[#allocation12_spill] sm:$0xff] %v7568_v58  ;;  %v7571_v18 = vmax.f32 %v7417_v46, %v4584_v5  ;;  %v4588_v9 = vunpack.i.l.bf16 %v12081_v44  ;;  %v7576_v48 = vpop.permute.xlu0 %5156  ;;  %v12086_v58 = vld [vmem:[#allocation22_spill] sm:$0xff] }
 0x194   : > { %v4604_v24 = vunpack.i.h.bf16 %v12083_v7  ;;  %v4603_v61 = vunpack.i.l.bf16 %v12083_v7  ;;  %12084 = vst [vmem:[#allocation24_spill] sm:$0xff] %v7576_v48  ;;  %v7579_v51 = vmax.f32 %v7425_v63, %v4583_v19  ;;  %v4599_v17 = vunpack.i.h.bf16 %v12085_v41  ;;  %5451 = vrot.lane.b32.xlu1 %v12086_v58, %s6634_s7  ;;  %v12087_v5 = vld [vmem:[#allocation30_spill] sm:$0xff]  ;;  %v12088_v7 = vld [vmem:[#allocation23_spill] sm:$0xff] }
 0x195   : > { %v4598_v4 = vunpack.i.l.bf16 %v12085_v41  ;;  %v7586_v46 = vmax.f32 %v7383_v25, %v4579_v11  ;;  %v4614_v44 = vunpack.i.h.bf16 %v12087_v5  ;;  %v4613_v33 = vunpack.i.l.bf16 %v12087_v5  ;;  %5446 = vrot.lane.b32.xlu0 %v12088_v7, %s6634_s7  ;;  %s6640_s7 = smov 56  }
 0x196   : > { %v7593_v63 = vmax.f32 %v7387_v21, %v4578_v12  ;;  %v7596_v19 = vmax.f32 %v7400_v2, %v4594_v50  ;;  %v7599_v41 = vmax.f32 %v7409_v27, %v4593_v59  ;;  %v7602_v48 = vmax.f32 %v7372_v43, %v4589_v3  ;;  %v7604_v25 = vpop.permute.xlu1 %5171  ;;  %v12090_v12 = vld [vmem:[#allocation31_spill] sm:$0xff]  ;;  %v12093_v3 = vld [vmem:[#allocation32_spill] sm:$0xff] }
 0x197   : > { %12089 = vst [vmem:[#allocation17_spill] sm:$0xff] %v7604_v25  ;;  %v7607_v11 = vmax.f32 %v7376_v22, %v4588_v9  ;;  %v7610_v5 = vmax.f32 %v7429_v54, %v4604_v24  ;;  %v7613_v21 = vmax.f32 %v7433_v13, %v4603_v61  ;;  %v4609_v2 = vunpack.i.h.bf16 %v12090_v12  ;;  %v7616_v50 = vpop.permute.xlu0 %5166  ;;  %v12092_v22 = vld [vmem:[#allocation5_spill] sm:$0xff] }
 0x198   : > { %12091 = vst [vmem:[#allocation16_spill] sm:$0xff] %v7616_v50  ;;  %v7619_v27 = vmax.f32 %v7437_v8, %v4599_v17  ;;  %v7622_v43 = vmax.f32 %v7443_v45, %v4598_v4  ;;  %v4608_v59 = vunpack.i.l.bf16 %v12090_v12  ;;  %5461 = vrot.lane.b32.xlu1 %v12092_v22, %s6635_s8  ;;  %v7628_v54 = vmax.f32 %v7447_v0, %v4614_v44  ;;  %v12094_v8 = vld [vmem:[#allocation3_spill] sm:$0xff]  ;;  %v12095_v4 = vld [vmem:[#allocation33_spill] sm:$0xff]  ;;  %v12096_v17 = vld [vmem:[#allocation34_spill] sm:$0xff] }
 0x199   : > { %v7631_v13 = vmax.f32 %v7451_v36, %v4613_v33  ;;  %v4624_v9 = vunpack.i.h.bf16 %v12093_v3  ;;  %5456 = vrot.lane.b32.xlu0 %v12094_v8, %s6635_s8  ;;  %v4623_v45 = vunpack.i.l.bf16 %v12093_v3  ;;  %v4619_v24 = vunpack.i.h.bf16 %v12095_v4  ;;  %v12098_v33 = vld [vmem:[#allocation35_spill] sm:$0xff] }
 0x19a   : > { %v4618_v61 = vunpack.i.l.bf16 %v12095_v4  ;;  %v4634_v12 = vunpack.i.h.bf16 %v12096_v17  ;;  %v7640_v50 = vpop.permute.xlu1 %5181  ;;  %v7643_v0 = vmax.f32 %v7458_v60, %v4609_v2  ;;  %v4633_v36 = vunpack.i.l.bf16 %v12096_v17  ;;  %v12102_v2 = vld [vmem:[#allocation37_spill] sm:$0xff] }
 0x19b   : > { %12097 = vst [vmem:[#allocation19_spill] sm:$0xff] %v7640_v50  ;;  %v4629_v44 = vunpack.i.h.bf16 %v12098_v33  ;;  %v4628_v25 = vunpack.i.l.bf16 %v12098_v33  ;;  %v7648_v39 = vpop.permute.xlu0 %5176  ;;  %v7651_v3 = vmax.f32 %v7462_v15, %v4608_v59  ;;  %v4644_v4 = vunpack.i.h.bf16 %v12100_v57  ;;  %v12101_v50 = vld [vmem:[#allocation4_spill] sm:$0xff]  ;;  %v12103_v33 = vld [vmem:[#allocation2_spill] sm:$0xff] }
 0x19c   : > { %12099 = vst [vmem:[#allocation18_spill] sm:$0xff] %v7648_v39  ;;  %5471 = vrot.lane.b32.xlu1 %v12101_v50, %s6635_s8  ;;  %v7658_v60 = vmax.f32 %v7469_v37, %v4624_v9  ;;  %v4639_v17 = vunpack.i.h.bf16 %v12102_v2  ;;  %v4638_v8 = vunpack.i.l.bf16 %v12102_v2  ;;  %v7665_v15 = vmax.f32 %v7473_v26, %v4623_v45  ;;  %v12105_v45 = vld [vmem:[#allocation38_spill] sm:$0xff] }
 0x19d   : > { %5466 = vrot.lane.b32.xlu0 %v12103_v33, %s6635_s8  ;;  %v7668_v59 = vmax.f32 %v7486_v38, %v4619_v24  ;;  %v7671_v57 = vmax.f32 %v7495_v1, %v4618_v61  ;;  %v7674_v39 = vmax.f32 %v7503_v6, %v4634_v12  ;;  %v7679_v9 = vmax.f32 %v7511_v14, %v4633_v36  ;;  %v12109_v36 = vld [vmem:[#allocation41_spill] sm:$0xff] }
 0x19e   : > { %v7676_v37 = vpop.permute.xlu1 %5191  ;;  %v7682_v2 = vmax.f32 %v7515_v20, %v4629_v44  ;;  %v7685_v26 = vmax.f32 %v7519_v49, %v4628_v25  ;;  %v4654_v38 = vunpack.i.h.bf16 %v12105_v45  ;;  %v7691_v1 = vmax.f32 %v7523_v28, %v4644_v4  ;;  %v12107_v49 = vld [vmem:[#allocation39_spill] sm:$0xff] }
 0x19f   : > { %12104 = vst [vmem:[#allocation25_spill] sm:$0xff] %v7676_v37  ;;  %v7688_v24 = vpop.permute.xlu0 %5186  ;;  %v7694_v6 = vmax.f32 %v7529_v31, %v4643_v16  ;;  %v4653_v61 = vunpack.i.l.bf16 %v12105_v45  ;;  %v7700_v14 = vmax.f32 %v7533_v53, %v4639_v17  ;;  %v7703_v20 = vmax.f32 %v7537_v10, %v4638_v8  ;;  %v12108_v16 = vld [vmem:[#allocation40_spill] sm:$0xff]  ;;  %v12111_v8 = vld [vmem:[#allocation42_spill] sm:$0xff]  ;;  %v12113_v37 = vld [vmem:[#allocation43_spill] sm:$0xff] }
 0x1a0   : > { %12106 = vst [vmem:[#allocation26_spill] sm:$0xff] %v7688_v24  ;;  %5481 = vrot.lane.b32.xlu1 %v6787_v32, %s6635_s8  ;;  %v4649_v25 = vunpack.i.h.bf16 %v12107_v49  ;;  %v4648_v28 = vunpack.i.l.bf16 %v12107_v49  ;;  %v4664_v31 = vunpack.i.h.bf16 %v12108_v16  ;;  %v4663_v12 = vunpack.i.l.bf16 %v12108_v16 }
 0x1a1   : > { %5476 = vrot.lane.b32.xlu0 %v6797_v35, %s6635_s8  ;;  %v4659_v44 = vunpack.i.h.bf16 %v12109_v36  ;;  %v7715_v53 = vmax.f32 %v7544_v40, %v4654_v38  ;;  %v4658_v10 = vunpack.i.l.bf16 %v12109_v36  ;;  %v4674_v17 = vunpack.i.h.bf16 %v12111_v8  ;;  %v12114_v38 = vld [vmem:[#allocation44_spill] sm:$0xff] }
 0x1a2   : > { %v7712_v4 = vpop.permute.xlu1 %5201  ;;  %v4673_v45 = vunpack.i.l.bf16 %v12111_v8  ;;  %v7723_v49 = vmax.f32 %v7548_v23, %v4653_v61  ;;  %v4669_v16 = vunpack.i.h.bf16 %v12113_v37  ;;  %v4668_v35 = vunpack.i.l.bf16 %v12113_v37  ;;  %v12115_v8 = vld [vmem:[#allocation9_spill] sm:$0xff] }
 0x1a3   : > { %12110 = vst [vmem:[#allocation27_spill] sm:$0xff] %v7712_v4  ;;  %v7720_v24 = vpop.permute.xlu0 %5196  ;;  %v7730_v40 = vmax.f32 %v7555_v29, %v4649_v25  ;;  %v4684_v36 = vunpack.i.h.bf16 %v12114_v38  ;;  %v4683_v4 = vunpack.i.l.bf16 %v12114_v38  ;;  %v7737_v23 = vmax.f32 %v7559_v30, %v4648_v28  ;;  %v12117_v28 = vld [vmem:[#allocation45_spill] sm:$0xff] }
 0x1a4   : > { %12112 = vst [vmem:[#allocation28_spill] sm:$0xff] %v7720_v24  ;;  %5491 = vrot.lane.b32.xlu1 %v6819_v42, %s6635_s8  ;;  %v7740_v61 = vmax.f32 %v7571_v18, %v4664_v31  ;;  %v7743_v37 = vmax.f32 %v7579_v51, %v4663_v12  ;;  %v7746_v24 = vmax.f32 %v7586_v46, %v4659_v44  ;;  %v4679_v18 = vunpack.i.h.bf16 %v12117_v28 }
 0x1a5   : > { %5486 = vrot.lane.b32.xlu0 %v12115_v8, %s6635_s8  ;;  %v7751_v25 = vmax.f32 %v7593_v63, %v4658_v10  ;;  %v7754_v38 = vmax.f32 %v7596_v19, %v4674_v17  ;;  %v7757_v30 = vmax.f32 %v7599_v41, %v4673_v45  ;;  %v7763_v51 = vmax.f32 %v7602_v48, %v4669_v16  ;;  %v12119_v41 = vld [vmem:[#allocation46_spill] sm:$0xff]  ;;  %v12121_v17 = vld [vmem:[#allocation48_spill] sm:$0xff] }
 0x1a6   : > { %v7748_v29 = vpop.permute.xlu1 %5211  ;;  %v7766_v46 = vmax.f32 %v7607_v11, %v4668_v35  ;;  %v4678_v12 = vunpack.i.l.bf16 %v12117_v28  ;;  %v7772_v63 = vmax.f32 %v7610_v5, %v4684_v36  ;;  %v7775_v19 = vmax.f32 %v7613_v21, %v4683_v4  ;;  %v12120_v35 = vld [vmem:[#allocation47_spill] sm:$0xff]  ;;  %v12123_v4 = vld [vmem:[#allocation49_spill] sm:$0xff] }
 0x1a7   : > { %12116 = vst [vmem:[#allocation29_spill] sm:$0xff] %v7748_v29  ;;  %v7760_v31 = vpop.permute.xlu0 %5206  ;;  %v4694_v44 = vunpack.i.h.bf16 %v12119_v41  ;;  %v4693_v48 = vunpack.i.l.bf16 %v12119_v41  ;;  %v4689_v11 = vunpack.i.h.bf16 %v12120_v35  ;;  %v4688_v10 = vunpack.i.l.bf16 %v12120_v35  ;;  %v12125_v29 = vld [vmem:[#allocation50_spill] sm:$0xff] }
 0x1a8   : > { %12118 = vst [vmem:[#allocation30_spill] sm:$0xff] %v7760_v31  ;;  %5501 = vrot.lane.b32.xlu1 %v6851_v52, %s6635_s8  ;;  %v4704_v45 = vunpack.i.h.bf16 %v12121_v17  ;;  %v7787_v5 = vmax.f32 %v7619_v27, %v4679_v18  ;;  %v4703_v21 = vunpack.i.l.bf16 %v12121_v17  ;;  %v4699_v36 = vunpack.i.h.bf16 %v12123_v4  ;;  %v12126_v18 = vld [vmem:[#allocation51_spill] sm:$0xff] }
 0x1a9   : > { %5496 = vrot.lane.b32.xlu0 %v6861_v55, %s6635_s8  ;;  %v4698_v28 = vunpack.i.l.bf16 %v12123_v4  ;;  %v7795_v41 = vmax.f32 %v7622_v43, %v4678_v12  ;;  %v4714_v35 = vunpack.i.h.bf16 %v12125_v29  ;;  %v4713_v55 = vunpack.i.l.bf16 %v12125_v29 }
 0x1aa   : > { %v7784_v16 = vpop.permute.xlu1 %5221  ;;  %v7802_v27 = vmax.f32 %v7628_v54, %v4694_v44  ;;  %v4709_v17 = vunpack.i.h.bf16 %v12126_v18  ;;  %v7809_v43 = vmax.f32 %v7631_v13, %v4693_v48  ;;  %v7812_v12 = vmax.f32 %v7643_v0, %v4689_v11  ;;  %v12128_v48 = vld [vmem:[#allocation52_spill] sm:$0xff] }
 0x1ab   : > { %12122 = vst [vmem:[#allocation31_spill] sm:$0xff] %v7784_v16  ;;  %v7792_v31 = vpop.permute.xlu0 %5216  ;;  %v4708_v16 = vunpack.i.l.bf16 %v12126_v18  ;;  %v7815_v29 = vmax.f32 %v7651_v3, %v4688_v10  ;;  %v7818_v4 = vmax.f32 %v7658_v60, %v4704_v45  ;;  %v7823_v44 = vmax.f32 %v7665_v15, %v4703_v21 }
 0x1ac   : > { %12124 = vst [vmem:[#allocation32_spill] sm:$0xff] %v7792_v31  ;;  %5511 = vrot.lane.b32.xlu1 %v6883_v62, %s6635_s8  ;;  %v7826_v18 = vmax.f32 %v7668_v59, %v4699_v36  ;;  %v7829_v13 = vmax.f32 %v7671_v57, %v4698_v28  ;;  %v4724_v0 = vunpack.i.h.bf16 %v12128_v48  ;;  %v7835_v3 = vmax.f32 %v7674_v39, %v4714_v35  ;;  %v12130_v57 = vld [vmem:[#allocation53_spill] sm:$0xff]  ;;  %v12132_v36 = vld [vmem:[#allocation55_spill] sm:$0xff] }
 0x1ad   : > { %5506 = vrot.lane.b32.xlu0 %v6893_v47, %s6635_s8  ;;  %v7838_v60 = vmax.f32 %v7679_v9, %v4713_v55  ;;  %v4723_v10 = vunpack.i.l.bf16 %v12128_v48  ;;  %v7844_v15 = vmax.f32 %v7682_v2, %v4709_v17  ;;  %v7847_v59 = vmax.f32 %v7685_v26, %v4708_v16  ;;  %v12131_v55 = vld [vmem:[#allocation54_spill] sm:$0xff]  ;;  %v12134_v16 = vld [vmem:[#allocation56_spill] sm:$0xff] }
 0x1ae   : > { %v7820_v54 = vpop.permute.xlu1 %5231  ;;  %v4719_v45 = vunpack.i.h.bf16 %v12130_v57  ;;  %v4718_v39 = vunpack.i.l.bf16 %v12130_v57  ;;  %v4734_v9 = vunpack.i.h.bf16 %v12131_v55  ;;  %v4733_v21 = vunpack.i.l.bf16 %v12131_v55 }
 0x1af   : > { %12127 = vst [vmem:[#allocation33_spill] sm:$0xff] %v7820_v54  ;;  %v7832_v11 = vpop.permute.xlu0 %5226  ;;  %v4729_v28 = vunpack.i.h.bf16 %v12132_v36  ;;  %v7859_v2 = vmax.f32 %v7691_v1, %v4724_v0  ;;  %v4728_v26 = vunpack.i.l.bf16 %v12132_v36  ;;  %v4744_v17 = vunpack.i.h.bf16 %v12134_v16  ;;  %v12136_v54 = vld [vmem:[#allocation57_spill] sm:$0xff]  ;;  %v12137_v0 = vld [vmem:[#allocation58_spill] sm:$0xff] }
 0x1b0   : > { %12129 = vst [vmem:[#allocation34_spill] sm:$0xff] %v7832_v11  ;;  %5521 = vrot.lane.b32.xlu1 %v6915_v56, %s6635_s8  ;;  %v4743_v48 = vunpack.i.l.bf16 %v12134_v16  ;;  %v7867_v57 = vmax.f32 %v7694_v6, %v4723_v10  ;;  %v4739_v55 = vunpack.i.h.bf16 %v12136_v54  ;;  %v4738_v31 = vunpack.i.l.bf16 %v12136_v54 }
 0x1b1   : > { %5516 = vrot.lane.b32.xlu0 %v6925_v34, %s6635_s8  ;;  %v7874_v1 = vmax.f32 %v7700_v14, %v4719_v45  ;;  %v4754_v36 = vunpack.i.h.bf16 %v12137_v0  ;;  %v7881_v6 = vmax.f32 %v7703_v20, %v4718_v39  ;;  %v7884_v10 = vmax.f32 %v7715_v53, %v4734_v9  ;;  %v12139_v39 = vld [vmem:[#allocation59_spill] sm:$0xff] }
 0x1b2   : > { %v7856_v35 = vpop.permute.xlu1 %5241  ;;  %v7887_v54 = vmax.f32 %v7723_v49, %v4733_v21  ;;  %v7890_v16 = vmax.f32 %v7730_v40, %v4729_v28  ;;  %v7895_v45 = vmax.f32 %v7737_v23, %v4728_v26  ;;  %v7901_v20 = vmax.f32 %v7743_v37, %v4743_v48  ;;  %v12141_v37 = vld [vmem:[#allocation60_spill] sm:$0xff]  ;;  %v12144_v48 = vld [vmem:[#allocation62_spill] sm:$0xff] }
 0x1b3   : > { %12133 = vst [vmem:[#allocation35_spill] sm:$0xff] %v7856_v35  ;;  %v7864_v11 = vpop.permute.xlu0 %5236  ;;  %v4753_v35 = vunpack.i.l.bf16 %v12137_v0  ;;  %v7898_v0 = vmax.f32 %v7740_v61, %v4744_v17  ;;  %v4749_v53 = vunpack.i.h.bf16 %v12139_v39  ;;  %v7907_v49 = vmax.f32 %v7746_v24, %v4739_v55  ;;  %v12142_v24 = vld [vmem:[#allocation3_spill] sm:$0xff] }
 0x1b4   : > { %12135 = vst [vmem:[#allocation36_spill] sm:$0xff] %v7864_v11  ;;  %5531 = vrot.lane.b32.xlu1 %v12086_v58, %s6635_s8  ;;  %v7910_v40 = vmax.f32 %v7751_v25, %v4738_v31  ;;  %v4748_v21 = vunpack.i.l.bf16 %v12139_v39  ;;  %v7916_v23 = vmax.f32 %v7754_v38, %v4754_v36  ;;  %v4764_v28 = vunpack.i.h.bf16 %v12141_v37  ;;  %v12143_v31 = vld [vmem:[#allocation61_spill] sm:$0xff]  ;;  %v12148_v11 = vld [vmem:[#allocation64_spill] sm:$0xff] }
 0x1b5   : > { %5526 = vrot.lane.b32.xlu0 %v12088_v7, %s6635_s8  ;;  %v7919_v61 = vmax.f32 %v7757_v30, %v4753_v35  ;;  %v4763_v25 = vunpack.i.l.bf16 %v12141_v37  ;;  %v4759_v26 = vunpack.i.h.bf16 %v12143_v31  ;;  %v4758_v17 = vunpack.i.l.bf16 %v12143_v31  ;;  %v12146_v35 = vld [vmem:[#allocation63_spill] sm:$0xff]  ;;  %s6642_s8 = smov 48  }
 0x1b6   : > { %v7892_v14 = vpop.permute.xlu1 %5251  ;;  %v4774_v55 = vunpack.i.h.bf16 %v12144_v48  ;;  %v7931_v38 = vmax.f32 %v7763_v51, %v4749_v53  ;;  %v4773_v30 = vunpack.i.l.bf16 %v12144_v48  ;;  %v4769_v36 = vunpack.i.h.bf16 %v12146_v35  ;;  %v12149_v53 = vld [vmem:[#allocation65_spill] sm:$0xff] }
 0x1b7   : > { %12138 = vst [vmem:[#allocation37_spill] sm:$0xff] %v7892_v14  ;;  %v7904_v9 = vpop.permute.xlu0 %5246  ;;  %v7939_v37 = vmax.f32 %v7766_v46, %v4748_v21  ;;  %v4784_v31 = vunpack.i.h.bf16 %v12148_v11  ;;  %v7946_v51 = vmax.f32 %v7772_v63, %v4764_v28  ;;  %v4779_v48 = vunpack.i.h.bf16 %v12149_v53 }
 0x1b8   : > { %12140 = vst [vmem:[#allocation38_spill] sm:$0xff] %v7904_v9  ;;  %5541 = vrot.lane.b32.xlu1 %v12092_v22, %s6636_s9  ;;  %v4768_v9 = vunpack.i.l.bf16 %v12146_v35  ;;  %v7953_v46 = vmax.f32 %v7775_v19, %v4763_v25  ;;  %v7956_v21 = vmax.f32 %v7787_v5, %v4759_v26  ;;  %v7962_v35 = vmax.f32 %v7802_v27, %v4774_v55  ;;  %v12151_v25 = vld [vmem:[#allocation66_spill] sm:$0xff]  ;;  %v12154_v55 = vld [vmem:[#allocation7_spill] sm:$0xff] }
 0x1b9   : > { %5536 = vrot.lane.b32.xlu0 %v12142_v24, %s6636_s9  ;;  %v4783_v24 = vunpack.i.l.bf16 %v12148_v11  ;;  %v7959_v11 = vmax.f32 %v7795_v41, %v4758_v17  ;;  %v7967_v28 = vmax.f32 %v7809_v43, %v4773_v30  ;;  %v4794_v5 = vunpack.i.h.bf16 %v12151_v25 }
 0x1ba   : > { %v7928_v39 = vpop.permute.xlu1 %5261  ;;  %v7973_v19 = vmax.f32 %v7815_v29, %v4768_v9  ;;  %v7979_v41 = vmax.f32 %v7818_v4, %v4784_v31  ;;  %v4793_v17 = vunpack.i.l.bf16 %v12151_v25  ;;  %v7988_v43 = vmax.f32 %v7826_v18, %v4779_v48  ;;  %v12153_v29 = vld [vmem:[#allocation67_spill] sm:$0xff] }
 0x1bb   : > { %12145 = vst [vmem:[#allocation39_spill] sm:$0xff] %v7928_v39  ;;  %v7936_v14 = vpop.permute.xlu0 %5256  ;;  %v4778_v39 = vunpack.i.l.bf16 %v12149_v53  ;;  %v7970_v53 = vmax.f32 %v7812_v12, %v4769_v36  ;;  %v7982_v27 = vmax.f32 %v7823_v44, %v4783_v24  ;;  %v4789_v9 = vunpack.i.h.bf16 %v12153_v29  ;;  %v12155_v44 = vld [vmem:[#allocation68_spill] sm:$0xff]  ;;  %v12156_v36 = vld [vmem:[#allocation69_spill] sm:$0xff] }
 0x1bc   : > { %12147 = vst [vmem:[#allocation40_spill] sm:$0xff] %v7936_v14  ;;  %5551 = vrot.lane.b32.xlu1 %v12101_v50, %s6636_s9  ;;  %v4788_v4 = vunpack.i.l.bf16 %v12153_v29  ;;  %v4804_v24 = vunpack.i.h.bf16 %v12155_v44  ;;  %v4803_v30 = vunpack.i.l.bf16 %v12155_v44  ;;  %v4799_v31 = vunpack.i.h.bf16 %v12156_v36  ;;  %v12160_v14 = vld [vmem:[#allocation71_spill] sm:$0xff] }
 0x1bd   : > { %5546 = vrot.lane.b32.xlu0 %v12103_v33, %s6636_s9  ;;  %v7991_v12 = vmax.f32 %v7829_v13, %v4778_v39  ;;  %v8003_v18 = vmax.f32 %v7835_v3, %v4794_v5  ;;  %v4798_v13 = vunpack.i.l.bf16 %v12156_v36  ;;  %v12158_v39 = vld [vmem:[#allocation70_spill] sm:$0xff]  ;;  %v8011_v29 = vmax.f32 %v7838_v60, %v4793_v17  ;;  %v12161_v5 = vld [vmem:[#allocation72_spill] sm:$0xff] }
 0x1be   : > { %v7964_v63 = vpop.permute.xlu1 %5271  ;;  %v4814_v48 = vunpack.i.h.bf16 %v12158_v39  ;;  %v4809_v44 = vunpack.i.h.bf16 %v12160_v14  ;;  %v8018_v3 = vmax.f32 %v7844_v15, %v4789_v9  ;;  %v4824_v36 = vunpack.i.h.bf16 %v12161_v5 }
 0x1bf   : > { %12150 = vst [vmem:[#allocation41_spill] sm:$0xff] %v7964_v63  ;;  %v7976_v26 = vpop.permute.xlu0 %5266  ;;  %v8025_v60 = vmax.f32 %v7847_v59, %v4788_v4  ;;  %v8028_v17 = vmax.f32 %v7859_v2, %v4804_v24  ;;  %v8039_v9 = vmax.f32 %v7881_v6, %v4798_v13  ;;  %v12163_v4 = vld [vmem:[#allocation73_spill] sm:$0xff] }
 0x1c0   : > { %12152 = vst [vmem:[#allocation42_spill] sm:$0xff] %v7976_v26  ;;  %5561 = vrot.lane.b32.xlu1 %v6787_v32, %s6636_s9  ;;  %v4813_v26 = vunpack.i.l.bf16 %v12158_v39  ;;  %v8034_v39 = vmax.f32 %v7874_v1, %v4799_v31  ;;  %v4819_v2 = vunpack.i.h.bf16 %v12163_v4  ;;  %v8060_v6 = vmax.f32 %v7898_v0, %v4824_v36  ;;  %v12166_v31 = vld [vmem:[#allocation11_spill] sm:$0xff] }
 0x1c1   : > { %5556 = vrot.lane.b32.xlu0 %v12154_v55, %s6636_s9  ;;  %v4808_v55 = vunpack.i.l.bf16 %v12160_v14  ;;  %v8031_v14 = vmax.f32 %v7867_v57, %v4803_v30  ;;  %v8051_v57 = vmax.f32 %v7890_v16, %v4809_v44  ;;  %v4818_v30 = vunpack.i.l.bf16 %v12163_v4 }
 0x1c2   : > { %v8000_v25 = vpop.permute.xlu1 %5281  ;;  %v8045_v59 = vmax.f32 %v7887_v54, %v4813_v26  ;;  %v12165_v54 = vld [vmem:[#allocation74_spill] sm:$0xff]  ;;  %v8075_v0 = vmax.f32 %v7907_v49, %v4819_v2  ;;  %v12173_v2 = vld [vmem:[#allocation79_spill] sm:$0xff] }
 0x1c3   : > { %12157 = vst [vmem:[#allocation43_spill] sm:$0xff] %v8000_v25  ;;  %v8008_v63 = vpop.permute.xlu0 %5276  ;;  %v4823_v25 = vunpack.i.l.bf16 %v12161_v5  ;;  %v8042_v5 = vmax.f32 %v7884_v10, %v4814_v48  ;;  %v8054_v1 = vmax.f32 %v7895_v45, %v4808_v55  ;;  %v4834_v26 = vunpack.i.h.bf16 %v12165_v54  ;;  %v12167_v45 = vld [vmem:[#allocation75_spill] sm:$0xff]  ;;  %v12168_v48 = vld [vmem:[#allocation76_spill] sm:$0xff] }
 0x1c4   : > { %12159 = vst [vmem:[#allocation44_spill] sm:$0xff] %v8008_v63  ;;  %5571 = vrot.lane.b32.xlu1 %v6819_v42, %s6636_s9  ;;  %v4833_v16 = vunpack.i.l.bf16 %v12165_v54  ;;  %v4829_v55 = vunpack.i.h.bf16 %v12167_v45  ;;  %v4828_v13 = vunpack.i.l.bf16 %v12167_v45  ;;  %v4844_v44 = vunpack.i.h.bf16 %v12168_v48  ;;  %v12172_v63 = vld [vmem:[#allocation78_spill] sm:$0xff] }
 0x1c5   : > { %5566 = vrot.lane.b32.xlu0 %v12115_v8, %s6636_s9  ;;  %v8063_v10 = vmax.f32 %v7901_v20, %v4823_v25  ;;  %v4843_v20 = vunpack.i.l.bf16 %v12168_v48  ;;  %v12170_v25 = vld [vmem:[#allocation77_spill] sm:$0xff]  ;;  %v8083_v54 = vmax.f32 %v7910_v40, %v4818_v30  ;;  %v4854_v45 = vunpack.i.h.bf16 %v12172_v63 }
 0x1c6   : > { %v8036_v15 = vpop.permute.xlu1 %5291  ;;  %v4839_v36 = vunpack.i.h.bf16 %v12170_v25  ;;  %v8090_v49 = vmax.f32 %v7916_v23, %v4834_v26  ;;  %v4849_v48 = vunpack.i.h.bf16 %v12173_v2  ;;  %v8097_v40 = vmax.f32 %v7919_v61, %v4833_v16  ;;  %v12175_v16 = vld [vmem:[#allocation80_spill] sm:$0xff] }
 0x1c7   : > { %12162 = vst [vmem:[#allocation45_spill] sm:$0xff] %v8036_v15  ;;  %v8048_v24 = vpop.permute.xlu0 %5286  ;;  %v8100_v30 = vmax.f32 %v7931_v38, %v4829_v55  ;;  %v8111_v26 = vmax.f32 %v7953_v46, %v4843_v20  ;;  %v4864_v38 = vunpack.i.h.bf16 %v12175_v16  ;;  %v12179_v20 = vld [vmem:[#allocation83_spill] sm:$0xff] }
 0x1c8   : > { %12164 = vst [vmem:[#allocation46_spill] sm:$0xff] %v8048_v24  ;;  %5581 = vrot.lane.b32.xlu1 %v6851_v52, %s6636_s9  ;;  %v4838_v24 = vunpack.i.l.bf16 %v12170_v25  ;;  %v8106_v25 = vmax.f32 %v7946_v51, %v4844_v44  ;;  %v8132_v46 = vmax.f32 %v7970_v53, %v4849_v48 }
 0x1c9   : > { %5576 = vrot.lane.b32.xlu0 %v12166_v31, %s6636_s9  ;;  %v4853_v31 = vunpack.i.l.bf16 %v12172_v63  ;;  %v8103_v63 = vmax.f32 %v7939_v37, %v4828_v13  ;;  %v8123_v37 = vmax.f32 %v7962_v35, %v4854_v45  ;;  %v4863_v13 = vunpack.i.l.bf16 %v12175_v16 }
 0x1ca   : > { %v8072_v4 = vpop.permute.xlu1 %5301  ;;  %v8117_v61 = vmax.f32 %v7959_v11, %v4838_v24  ;;  %v12177_v11 = vld [vmem:[#allocation81_spill] sm:$0xff]  ;;  %v8147_v53 = vmax.f32 %v7979_v41, %v4864_v38  ;;  %v12184_v38 = vld [vmem:[#allocation86_spill] sm:$0xff] }
 0x1cb   : > { %12169 = vst [vmem:[#allocation47_spill] sm:$0xff] %v8072_v4  ;;  %v8080_v15 = vpop.permute.xlu0 %5296  ;;  %v4848_v4 = vunpack.i.l.bf16 %v12173_v2  ;;  %v8114_v2 = vmax.f32 %v7956_v21, %v4839_v36  ;;  %v8126_v51 = vmax.f32 %v7967_v28, %v4853_v31  ;;  %v4859_v24 = vunpack.i.h.bf16 %v12177_v11  ;;  %v12178_v28 = vld [vmem:[#allocation82_spill] sm:$0xff] }
 0x1cc   : > { %12171 = vst [vmem:[#allocation48_spill] sm:$0xff] %v8080_v15  ;;  %5591 = vrot.lane.b32.xlu1 %v6883_v62, %s6636_s9  ;;  %v4858_v35 = vunpack.i.l.bf16 %v12177_v11  ;;  %v4874_v31 = vunpack.i.h.bf16 %v12178_v28  ;;  %v4873_v44 = vunpack.i.l.bf16 %v12178_v28  ;;  %v4869_v36 = vunpack.i.h.bf16 %v12179_v20 }
 0x1cd   : > { %5586 = vrot.lane.b32.xlu0 %v6893_v47, %s6636_s9  ;;  %v8135_v21 = vmax.f32 %v7973_v19, %v4848_v4  ;;  %v4868_v19 = vunpack.i.l.bf16 %v12179_v20  ;;  %v12181_v4 = vld [vmem:[#allocation84_spill] sm:$0xff]  ;;  %v8155_v11 = vmax.f32 %v7982_v27, %v4863_v13  ;;  %v8162_v41 = vmax.f32 %v7988_v43, %v4859_v24 }
 0x1ce   : > { %v8108_v23 = vpop.permute.xlu1 %5311  ;;  %v4884_v48 = vunpack.i.h.bf16 %v12181_v4  ;;  %v4883_v16 = vunpack.i.l.bf16 %v12181_v4  ;;  %v4894_v20 = vunpack.i.h.bf16 %v12184_v38  ;;  %v8169_v27 = vmax.f32 %v7991_v12, %v4858_v35  ;;  %v12186_v35 = vld [vmem:[#allocation87_spill] sm:$0xff] }
 0x1cf   : > { %12174 = vst [vmem:[#allocation49_spill] sm:$0xff] %v8108_v23  ;;  %v8120_v55 = vpop.permute.xlu0 %5306  ;;  %v12183_v23 = vld [vmem:[#allocation85_spill] sm:$0xff]  ;;  %v8172_v13 = vmax.f32 %v8003_v18, %v4874_v31  ;;  %v8178_v4 = vmax.f32 %v8018_v3, %v4869_v36  ;;  %v8183_v24 = vmax.f32 %v8025_v60, %v4868_v19  ;;  %v4889_v18 = vunpack.i.h.bf16 %v12186_v35 }
 0x1d0   : > { %12176 = vst [vmem:[#allocation50_spill] sm:$0xff] %v8120_v55  ;;  %5601 = vrot.lane.b32.xlu1 %v6915_v56, %s6636_s9  ;;  %v4879_v28 = vunpack.i.h.bf16 %v12183_v23  ;;  %v4878_v15 = vunpack.i.l.bf16 %v12183_v23  ;;  %v8175_v23 = vmax.f32 %v8011_v29, %v4873_v44  ;;  %v8189_v12 = vmax.f32 %v8031_v14, %v4883_v16  ;;  %v12188_v14 = vld [vmem:[#allocation88_spill] sm:$0xff]  ;;  %v12191_v16 = vld [vmem:[#allocation90_spill] sm:$0xff] }
 0x1d1   : > { %5596 = vrot.lane.b32.xlu0 %v6925_v34, %s6636_s9  ;;  %v4888_v44 = vunpack.i.l.bf16 %v12186_v35  ;;  %v8204_v60 = vmax.f32 %v8042_v5, %v4894_v20  ;;  %v4904_v36 = vunpack.i.h.bf16 %v12188_v14  ;;  %v8219_v5 = vmax.f32 %v8051_v57, %v4889_v18  ;;  %v12196_v18 = vld [vmem:[#allocation93_spill] sm:$0xff] }
 0x1d2   : > { %v8144_v45 = vpop.permute.xlu1 %5321  ;;  %v8195_v29 = vmax.f32 %v8034_v39, %v4879_v28  ;;  %v8198_v3 = vmax.f32 %v8039_v9, %v4878_v15  ;;  %v12189_v39 = vld [vmem:[#allocation3_spill] sm:$0xff]  ;;  %v4903_v15 = vunpack.i.l.bf16 %v12188_v14  ;;  %v12190_v9 = vld [vmem:[#allocation89_spill] sm:$0xff]  ;;  %v4914_v28 = vunpack.i.h.bf16 %v12191_v16 }
 0x1d3   : > { %12180 = vst [vmem:[#allocation51_spill] sm:$0xff] %v8144_v45  ;;  %v8152_v55 = vpop.permute.xlu0 %5316  ;;  %v4893_v45 = vunpack.i.l.bf16 %v12184_v38  ;;  %v8186_v38 = vmax.f32 %v8028_v17, %v4884_v48  ;;  %v4899_v19 = vunpack.i.h.bf16 %v12190_v9  ;;  %v4898_v48 = vunpack.i.l.bf16 %v12190_v9 }
 0x1d4   : > { %12182 = vst [vmem:[#allocation52_spill] sm:$0xff] %v8152_v55  ;;  %5611 = vrot.lane.b32.xlu1 %v12086_v58, %s6636_s9  ;;  %v8227_v14 = vmax.f32 %v8054_v1, %v4888_v44  ;;  %v12195_v55 = vld [vmem:[#allocation92_spill] sm:$0xff]  ;;  %v8234_v57 = vmax.f32 %v8060_v6, %v4904_v36  ;;  %v8241_v1 = vmax.f32 %v8063_v10, %v4903_v15  ;;  %v12198_v15 = vld [vmem:[#allocation94_spill] sm:$0xff] }
 0x1d5   : > { %5606 = vrot.lane.b32.xlu0 %v12088_v7, %s6636_s9  ;;  %v8207_v17 = vmax.f32 %v8045_v59, %v4893_v45  ;;  %v4913_v59 = vunpack.i.l.bf16 %v12191_v16  ;;  %v12193_v45 = vld [vmem:[#allocation91_spill] sm:$0xff]  ;;  %v4924_v9 = vunpack.i.h.bf16 %v12195_v55  ;;  %v4919_v16 = vunpack.i.h.bf16 %v12196_v18  ;;  %s6643_s9 = smov 44  }
 0x1d6   : > { %v8180_v43 = vpop.permute.xlu1 %5331  ;;  %v4909_v20 = vunpack.i.h.bf16 %v12193_v45  ;;  %v8244_v44 = vmax.f32 %v8075_v0, %v4899_v19  ;;  %v4934_v0 = vunpack.i.h.bf16 %v12198_v15 }
 0x1d7   : > { %12185 = vst [vmem:[#allocation53_spill] sm:$0xff] %v8180_v43  ;;  %v8192_v31 = vpop.permute.xlu0 %5326  ;;  %v8255_v36 = vmax.f32 %v8097_v40, %v4913_v59  ;;  %v8276_v40 = vmax.f32 %v8114_v2, %v4919_v16 }
 0x1d8   : > { %12187 = vst [vmem:[#allocation54_spill] sm:$0xff] %v8192_v31  ;;  %5621 = vrot.lane.b32.xlu1 %v12092_v22, %s6637_s10  ;;  %v4908_v31 = vunpack.i.l.bf16 %v12193_v45  ;;  %v8250_v45 = vmax.f32 %v8090_v49, %v4914_v28  ;;  %v12201_v28 = vld [vmem:[#allocation7_spill] sm:$0xff]  ;;  %v8291_v2 = vmax.f32 %v8123_v37, %v4934_v0  ;;  %v12208_v0 = vld [vmem:[#allocation100_spill] sm:$0xff] }
 0x1d9   : > { %5616 = vrot.lane.b32.xlu0 %v12189_v39, %s6637_s10  ;;  %v4923_v39 = vunpack.i.l.bf16 %v12195_v55  ;;  %v8247_v55 = vmax.f32 %v8083_v54, %v4898_v48  ;;  %v8267_v54 = vmax.f32 %v8106_v25, %v4924_v9  ;;  %v4933_v48 = vunpack.i.l.bf16 %v12198_v15 }
 0x1da   : > { %v8216_v35 = vpop.permute.xlu1 %5341  ;;  %v8261_v10 = vmax.f32 %v8103_v63, %v4908_v31  ;;  %v12200_v63 = vld [vmem:[#allocation95_spill] sm:$0xff] }
 0x1db   : > { %12192 = vst [vmem:[#allocation55_spill] sm:$0xff] %v8216_v35  ;;  %v8224_v43 = vpop.permute.xlu0 %5336  ;;  %v4918_v35 = vunpack.i.l.bf16 %v12196_v18  ;;  %v8258_v18 = vmax.f32 %v8100_v30, %v4909_v20  ;;  %v8270_v49 = vmax.f32 %v8111_v26, %v4923_v39  ;;  %v4929_v31 = vunpack.i.h.bf16 %v12200_v63  ;;  %v12202_v26 = vld [vmem:[#allocation96_spill] sm:$0xff]  ;;  %v12203_v20 = vld [vmem:[#allocation97_spill] sm:$0xff] }
 0x1dc   : > { %12194 = vst [vmem:[#allocation56_spill] sm:$0xff] %v8224_v43  ;;  %5631 = vrot.lane.b32.xlu1 %v12101_v50, %s6637_s10  ;;  %v4928_v25 = vunpack.i.l.bf16 %v12200_v63  ;;  %v4944_v39 = vunpack.i.h.bf16 %v12202_v26  ;;  %v4943_v59 = vunpack.i.l.bf16 %v12202_v26  ;;  %v4939_v9 = vunpack.i.h.bf16 %v12203_v20  ;;  %v12207_v43 = vld [vmem:[#allocation99_spill] sm:$0xff] }
 0x1dd   : > { %5626 = vrot.lane.b32.xlu0 %v12103_v33, %s6637_s10  ;;  %v8279_v30 = vmax.f32 %v8117_v61, %v4918_v35  ;;  %v4938_v61 = vunpack.i.l.bf16 %v12203_v20  ;;  %v12205_v35 = vld [vmem:[#allocation98_spill] sm:$0xff]  ;;  %v8299_v63 = vmax.f32 %v8126_v51, %v4933_v48  ;;  %v4949_v26 = vunpack.i.h.bf16 %v12207_v43 }
 0x1de   : > { %v8252_v6 = vpop.permute.xlu1 %5351  ;;  %v4954_v16 = vunpack.i.h.bf16 %v12205_v35  ;;  %v8306_v37 = vmax.f32 %v8132_v46, %v4929_v31  ;;  %v4964_v20 = vunpack.i.h.bf16 %v12208_v0  ;;  %v8313_v51 = vmax.f32 %v8135_v21, %v4928_v25  ;;  %v12210_v25 = vld [vmem:[#allocation101_spill] sm:$0xff] }
 0x1df   : > { %12197 = vst [vmem:[#allocation57_spill] sm:$0xff] %v8252_v6  ;;  %v8264_v19 = vpop.permute.xlu0 %5346  ;;  %v8316_v48 = vmax.f32 %v8147_v53, %v4944_v39  ;;  %v8327_v31 = vmax.f32 %v8169_v27, %v4938_v61  ;;  %v4959_v53 = vunpack.i.h.bf16 %v12210_v25 }
 0x1e0   : > { %12199 = vst [vmem:[#allocation58_spill] sm:$0xff] %v8264_v19  ;;  %5641 = vrot.lane.b32.xlu1 %v6787_v32, %s6637_s10  ;;  %v4953_v19 = vunpack.i.l.bf16 %v12205_v35  ;;  %v8322_v35 = vmax.f32 %v8162_v41, %v4939_v9  ;;  %v8348_v27 = vmax.f32 %v8186_v38, %v4964_v20  ;;  %v12213_v9 = vld [vmem:[#allocation11_spill] sm:$0xff] }
 0x1e1   : > { %5636 = vrot.lane.b32.xlu0 %v12201_v28, %s6637_s10  ;;  %v4948_v28 = vunpack.i.l.bf16 %v12207_v43  ;;  %v8319_v43 = vmax.f32 %v8155_v11, %v4943_v59  ;;  %v8339_v11 = vmax.f32 %v8178_v4, %v4949_v26  ;;  %v4958_v59 = vunpack.i.l.bf16 %v12210_v25 }
 0x1e2   : > { %v8288_v15 = vpop.permute.xlu1 %5361  ;;  %v8333_v21 = vmax.f32 %v8175_v23, %v4953_v19  ;;  %v12212_v23 = vld [vmem:[#allocation102_spill] sm:$0xff]  ;;  %v8363_v38 = vmax.f32 %v8195_v29, %v4959_v53  ;;  %v12220_v53 = vld [vmem:[#allocation107_spill] sm:$0xff] }
 0x1e3   : > { %12204 = vst [vmem:[#allocation59_spill] sm:$0xff] %v8288_v15  ;;  %v8296_v6 = vpop.permute.xlu0 %5356  ;;  %v4963_v15 = vunpack.i.l.bf16 %v12208_v0  ;;  %v8330_v0 = vmax.f32 %v8172_v13, %v4954_v16  ;;  %v8342_v41 = vmax.f32 %v8183_v24, %v4948_v28  ;;  %v4974_v19 = vunpack.i.h.bf16 %v12212_v23  ;;  %v12214_v24 = vld [vmem:[#allocation103_spill] sm:$0xff]  ;;  %v12215_v16 = vld [vmem:[#allocation104_spill] sm:$0xff] }
 0x1e4   : > { %12206 = vst [vmem:[#allocation60_spill] sm:$0xff] %v8296_v6  ;;  %5651 = vrot.lane.b32.xlu1 %v6819_v42, %s6637_s10  ;;  %v4973_v4 = vunpack.i.l.bf16 %v12212_v23  ;;  %v4969_v28 = vunpack.i.h.bf16 %v12214_v24  ;;  %v4968_v61 = vunpack.i.l.bf16 %v12214_v24  ;;  %v4984_v26 = vunpack.i.h.bf16 %v12215_v16  ;;  %v12219_v6 = vld [vmem:[#allocation106_spill] sm:$0xff] }
 0x1e5   : > { %5646 = vrot.lane.b32.xlu0 %v12115_v8, %s6637_s10  ;;  %v8351_v13 = vmax.f32 %v8189_v12, %v4963_v15  ;;  %v4983_v12 = vunpack.i.l.bf16 %v12215_v16  ;;  %v12217_v15 = vld [vmem:[#allocation105_spill] sm:$0xff]  ;;  %v8371_v23 = vmax.f32 %v8198_v3, %v4958_v59  ;;  %v4994_v24 = vunpack.i.h.bf16 %v12219_v6 }
 0x1e6   : > { %v8324_v46 = vpop.permute.xlu1 %5371  ;;  %v4979_v20 = vunpack.i.h.bf16 %v12217_v15  ;;  %v8378_v29 = vmax.f32 %v8204_v60, %v4974_v19  ;;  %v4989_v16 = vunpack.i.h.bf16 %v12220_v53  ;;  %v8385_v3 = vmax.f32 %v8207_v17, %v4973_v4  ;;  %v12222_v4 = vld [vmem:[#allocation108_spill] sm:$0xff] }
 0x1e7   : > { %12209 = vst [vmem:[#allocation61_spill] sm:$0xff] %v8324_v46  ;;  %v8336_v39 = vpop.permute.xlu0 %5366  ;;  %v8388_v59 = vmax.f32 %v8219_v5, %v4969_v28  ;;  %v8399_v19 = vmax.f32 %v8241_v1, %v4983_v12  ;;  %v5004_v5 = vunpack.i.h.bf16 %v12222_v4  ;;  %v12226_v12 = vld [vmem:[#allocation111_spill] sm:$0xff] }
 0x1e8   : > { %12211 = vst [vmem:[#allocation62_spill] sm:$0xff] %v8336_v39  ;;  %5661 = vrot.lane.b32.xlu1 %v6851_v52, %s6637_s10  ;;  %v4978_v39 = vunpack.i.l.bf16 %v12217_v15  ;;  %v8394_v15 = vmax.f32 %v8234_v57, %v4984_v26  ;;  %v8420_v1 = vmax.f32 %v8258_v18, %v4989_v16 }
 0x1e9   : > { %5656 = vrot.lane.b32.xlu0 %v12213_v9, %s6637_s10  ;;  %v4993_v9 = vunpack.i.l.bf16 %v12219_v6  ;;  %v8391_v6 = vmax.f32 %v8227_v14, %v4968_v61  ;;  %v8411_v14 = vmax.f32 %v8250_v45, %v4994_v24  ;;  %v5003_v61 = vunpack.i.l.bf16 %v12222_v4 }
 0x1ea   : > { %v8360_v25 = vpop.permute.xlu1 %5381  ;;  %v8405_v17 = vmax.f32 %v8247_v55, %v4978_v39  ;;  %v12224_v55 = vld [vmem:[#allocation109_spill] sm:$0xff]  ;;  %v8435_v18 = vmax.f32 %v8267_v54, %v5004_v5  ;;  %v12231_v5 = vld [vmem:[#allocation114_spill] sm:$0xff] }
 0x1eb   : > { %12216 = vst [vmem:[#allocation63_spill] sm:$0xff] %v8360_v25  ;;  %v8368_v46 = vpop.permute.xlu0 %5376  ;;  %v4988_v25 = vunpack.i.l.bf16 %v12220_v53  ;;  %v8402_v53 = vmax.f32 %v8244_v44, %v4979_v20  ;;  %v8414_v57 = vmax.f32 %v8255_v36, %v4993_v9  ;;  %v4999_v39 = vunpack.i.h.bf16 %v12224_v55  ;;  %v12225_v36 = vld [vmem:[#allocation110_spill] sm:$0xff] }
 0x1ec   : > { %12218 = vst [vmem:[#allocation64_spill] sm:$0xff] %v8368_v46  ;;  %5671 = vrot.lane.b32.xlu1 %v6883_v62, %s6637_s10  ;;  %v4998_v45 = vunpack.i.l.bf16 %v12224_v55  ;;  %v5014_v9 = vunpack.i.h.bf16 %v12225_v36  ;;  %v5013_v26 = vunpack.i.l.bf16 %v12225_v36  ;;  %v5009_v20 = vunpack.i.h.bf16 %v12226_v12 }
 0x1ed   : > { %5666 = vrot.lane.b32.xlu0 %v6893_v47, %s6637_s10  ;;  %v8423_v44 = vmax.f32 %v8261_v10, %v4988_v25  ;;  %v5008_v10 = vunpack.i.l.bf16 %v12226_v12  ;;  %v12228_v25 = vld [vmem:[#allocation112_spill] sm:$0xff]  ;;  %v8443_v55 = vmax.f32 %v8270_v49, %v5003_v61  ;;  %v8450_v54 = vmax.f32 %v8276_v40, %v4999_v39  ;;  %v6575_v49 = vld [vmem:[%s11525_s1] sm:$0xff]  }
 0x1ee   : > { %v8396_v60 = vpop.permute.xlu1 %5391  ;;  %v5024_v16 = vunpack.i.h.bf16 %v12228_v25  ;;  %v5023_v4 = vunpack.i.l.bf16 %v12228_v25  ;;  %v5034_v12 = vunpack.i.h.bf16 %v12231_v5  ;;  %v8460_v61 = vmax.f32 %v8279_v30, %v4998_v45  ;;  %v12233_v45 = vld [vmem:[#allocation115_spill] sm:$0xff]  ;;  %4397 = vmatprep.subr.bf16.mxu0 %v6575_v49  ;;  %4445 = vmatprep.subr.bf16.mxu1 %v6575_v49 }
 0x1ef   : > { %12221 = vst [vmem:[#allocation65_spill] sm:$0xff] %v8396_v60  ;;  %v8408_v28 = vpop.permute.xlu0 %5386  ;;  %v12230_v60 = vld [vmem:[#allocation113_spill] sm:$0xff]  ;;  %v8466_v40 = vmax.f32 %v8299_v63, %v5013_v26  ;;  %v8469_v39 = vmax.f32 %v8306_v37, %v5009_v20  ;;  %4398 = vmatpush3.bf16.msra.mxu0 %v6575_v49  ;;  %v12235_v26 = vld [vmem:[#allocation116_spill] sm:$0xff]  ;;  %4453 = vmatpush3.bf16.msra.mxu1 %v6575_v49 }
 0x1f0   : > { %12223 = vst [vmem:[#allocation66_spill] sm:$0xff] %v8408_v28  ;;  %5681 = vrot.lane.b32.xlu1 %v6915_v56, %s6637_s10  ;;  %v5019_v36 = vunpack.i.h.bf16 %v12230_v60  ;;  %v5018_v46 = vunpack.i.l.bf16 %v12230_v60  ;;  %v8463_v60 = vmax.f32 %v8291_v2, %v5014_v9  ;;  %v8480_v30 = vmax.f32 %v8319_v43, %v5023_v4  ;;  %v12238_v4 = vld [vmem:[#allocation118_spill] sm:$0xff] }
 0x1f1   : > { %5676 = vrot.lane.b32.xlu0 %v6925_v34, %s6637_s10  ;;  %v5029_v2 = vunpack.i.h.bf16 %v12233_v45  ;;  %v5044_v20 = vunpack.i.h.bf16 %v12235_v26 }
 0x1f2   : > { %v8432_v24 = vpop.permute.xlu1 %5401  ;;  %v8486_v63 = vmax.f32 %v8322_v35, %v5019_v36  ;;  %v8489_v37 = vmax.f32 %v8327_v31, %v5018_v46  ;;  %v12236_v35 = vld [vmem:[#allocation3_spill] sm:$0xff]  ;;  %v5043_v31 = vunpack.i.l.bf16 %v12235_v26  ;;  %v5054_v36 = vunpack.i.h.bf16 %v12238_v4 }
 0x1f3   : > { %12227 = vst [vmem:[#allocation67_spill] sm:$0xff] %v8432_v24  ;;  %v8440_v28 = vpop.permute.xlu0 %5396  ;;  %v5033_v24 = vunpack.i.l.bf16 %v12231_v5  ;;  %v8474_v5 = vmax.f32 %v8313_v51, %v5008_v10  ;;  %v5028_v51 = vunpack.i.l.bf16 %v12233_v45  ;;  %v6576_v46 = vld [vmem:[%s11525_s1 + $0x8] sm:$0xff]   ;;  %v12237_v10 = vld [vmem:[#allocation117_spill] sm:$0xff] }
 0x1f4   : > { %12229 = vst [vmem:[#allocation68_spill] sm:$0xff] %v8440_v28  ;;  %5691 = vrot.lane.b32.xlu1 %v12086_v58, %s6637_s10  ;;  %v8477_v28 = vmax.f32 %v8316_v48, %v5024_v16  ;;  %v8495_v48 = vmax.f32 %v8330_v0, %v5034_v12  ;;  %v5039_v16 = vunpack.i.h.bf16 %v12237_v10  ;;  %v5038_v0 = vunpack.i.l.bf16 %v12237_v10  ;;  %v12240_v45 = vld [vmem:[#allocation119_spill] sm:$0xff]  ;;  %4399 = vmatprep.subr.bf16.mxu0 %v6576_v46  ;;  %v12242_v10 = vld [vmem:[#allocation120_spill] sm:$0xff] }
 0x1f5   : > { %5686 = vrot.lane.b32.xlu0 %v12088_v7, %s6637_s10  ;;  %v8498_v43 = vmax.f32 %v8333_v21, %v5033_v24  ;;  %v8513_v24 = vmax.f32 %v8339_v11, %v5029_v2  ;;  %v5053_v12 = vunpack.i.l.bf16 %v12238_v4  ;;  %4446 = vmatprep.subr.bf16.mxu1 %v6576_v46  ;;  %v8521_v26 = vmax.f32 %v8342_v41, %v5028_v51  ;;  %v12243_v2 = vld [vmem:[#allocation121_spill] sm:$0xff]  ;;  %v6577_v41 = vld [vmem:[%s11525_s1 + $0x10] sm:$0xff]   ;;  %s6644_s10 = smov 40  }
 0x1f6   : > { %v8471_v25 = vpop.permute.xlu1 %5411  ;;  %4400 = vmatpush3.bf16.msra.mxu0 %v6576_v46  ;;  %v8528_v11 = vmax.f32 %v8348_v27, %v5044_v20  ;;  %v5059_v4 = vunpack.i.h.bf16 %v12243_v2  ;;  %4454 = vmatpush3.bf16.msra.mxu1 %v6576_v46  ;;  %v8538_v51 = vmax.f32 %v8351_v13, %v5043_v31  ;;  %v8544_v27 = vmax.f32 %v8371_v23, %v5038_v0  ;;  %v12245_v46 = vld [vmem:[#allocation122_spill] sm:$0xff] }
 0x1f7   : > { %12232 = vst [vmem:[#allocation69_spill] sm:$0xff] %v8471_v25  ;;  %v8483_v9 = vpop.permute.xlu0 %5406  ;;  %v5048_v25 = vunpack.i.l.bf16 %v12240_v45  ;;  %v8547_v20 = vmax.f32 %v8378_v29, %v5054_v36  ;;  %4401 = vmatprep.subr.bf16.mxu0 %v6577_v41  ;;  %4447 = vmatprep.subr.bf16.mxu1 %v6577_v41  ;;  %v12250_v36 = vld [vmem:[#allocation125_spill] sm:$0xff] }
 0x1f8   : > { %12234 = vst [vmem:[#allocation70_spill] sm:$0xff] %v8483_v9  ;;  %5701 = vrot.lane.b32.xlu1 %v12092_v22, %s6638_s13  ;;  %v5049_v9 = vunpack.i.h.bf16 %v12240_v45  ;;  %v5058_v45 = vunpack.i.l.bf16 %v12243_v2 }
 0x1f9   : > { %5696 = vrot.lane.b32.xlu0 %v12236_v35, %s6638_s13  ;;  %v5064_v35 = vunpack.i.h.bf16 %v12242_v10  ;;  %v8558_v13 = vmax.f32 %v8391_v6, %v5048_v25  ;;  %v12247_v25 = vld [vmem:[#allocation123_spill] sm:$0xff] }
 0x1fa   : > { %v8510_v21 = vpop.permute.xlu1 %5421  ;;  %4402 = vmatpush3.bf16.msra.mxu0 %v6577_v41  ;;  %v8576_v6 = vmax.f32 %v8405_v17, %v5058_v45  ;;  %4455 = vmatpush3.bf16.msra.mxu1 %v6577_v41  ;;  %v12252_v45 = vld [vmem:[#allocation126_spill] sm:$0xff] }
 0x1fb   : > { %12239 = vst [vmem:[#allocation71_spill] sm:$0xff] %v8510_v21  ;;  %v8518_v49 = vpop.permute.xlu0 %5416  ;;  %v5063_v21 = vunpack.i.l.bf16 %v12242_v10  ;;  %v8541_v10 = vmax.f32 %v8363_v38, %v5039_v16  ;;  %v5074_v38 = vunpack.i.h.bf16 %v12245_v46  ;;  %v8564_v23 = vmax.f32 %v8394_v15, %v5064_v35  ;;  %v12248_v15 = vld [vmem:[#allocation7_spill] sm:$0xff]  ;;  %v12249_v16 = vld [vmem:[#allocation124_spill] sm:$0xff] }
 0x1fc   : > { %12241 = vst [vmem:[#allocation72_spill] sm:$0xff] %v8518_v49  ;;  %5711 = vrot.lane.b32.xlu1 %v12101_v50, %s6638_s13  ;;  %v8552_v49 = vmax.f32 %v8385_v3, %v5053_v12  ;;  %v5073_v3 = vunpack.i.l.bf16 %v12245_v46  ;;  %v5068_v35 = vunpack.i.l.bf16 %v12247_v25  ;;  %v5084_v0 = vunpack.i.h.bf16 %v12249_v16 }
 0x1fd   : > { %5706 = vrot.lane.b32.xlu0 %v12103_v33, %s6638_s13  ;;  %v8555_v33 = vmax.f32 %v8388_v59, %v5049_v9  ;;  %v8567_v29 = vmax.f32 %v8399_v19, %v5063_v21  ;;  %v8573_v59 = vmax.f32 %v8402_v53, %v5059_v4  ;;  %v5069_v9 = vunpack.i.h.bf16 %v12247_v25  ;;  %v6578_v19 = vld [vmem:[%s11525_s1 + $0x18] sm:$0xff]  }
 0x1fe   : > { %v8549_v2 = vpop.permute.xlu1 %5431  ;;  %v5083_v53 = vunpack.i.l.bf16 %v12249_v16  ;;  %v5079_v21 = vunpack.i.h.bf16 %v12250_v36  ;;  %v8591_v12 = vmax.f32 %v8411_v14, %v5074_v38  ;;  %v5078_v4 = vunpack.i.l.bf16 %v12250_v36  ;;  %4403 = vmatprep.subr.bf16.mxu0 %v6578_v19  ;;  %4448 = vmatprep.subr.bf16.mxu1 %v6578_v19  ;;  %v12254_v16 = vld [vmem:[#allocation127_spill] sm:$0xff]  ;;  %v12255_v38 = vld [vmem:[#allocation128_spill] sm:$0xff] }
 0x1ff   : > { %12244 = vst [vmem:[#allocation73_spill] sm:$0xff] %v8549_v2  ;;  %v8561_v31 = vpop.permute.xlu0 %5426  ;;  %v5094_v46 = vunpack.i.h.bf16 %v12252_v45  ;;  %v8599_v25 = vmax.f32 %v8414_v57, %v5073_v3  ;;  %v5089_v2 = vunpack.i.h.bf16 %v12254_v16  ;;  %4404 = vmatpush3.bf16.msra.mxu0 %v6578_v19  ;;  %v8606_v14 = vmax.f32 %v8420_v1, %v5069_v9  ;;  %v6579_v57 = vld [vmem:[%s11525_s1 + $0x20] sm:$0xff]   ;;  %4456 = vmatpush3.bf16.msra.mxu1 %v6578_v19  ;;  %v12257_v19 = vld [vmem:[#allocation129_spill] sm:$0xff] }
 0x200   : > { %12246 = vst [vmem:[#allocation74_spill] sm:$0xff] %v8561_v31  ;;  %5721 = vrot.lane.b32.xlu1 %v6787_v32, %s6638_s13  ;;  %v5093_v31 = vunpack.i.l.bf16 %v12252_v45  ;;  %v5104_v36 = vunpack.i.h.bf16 %v12255_v38  ;;  %v5103_v45 = vunpack.i.l.bf16 %v12255_v38  ;;  %v8616_v3 = vmax.f32 %v8423_v44, %v5068_v35  ;;  %4405 = vmatprep.subr.bf16.mxu0 %v6579_v57 }
 0x201   : > { %5716 = vrot.lane.b32.xlu0 %v12248_v15, %s6638_s13  ;;  %v8622_v1 = vmax.f32 %v8443_v55, %v5083_v53  ;;  %v8625_v9 = vmax.f32 %v8450_v54, %v5079_v21  ;;  %4449 = vmatprep.subr.bf16.mxu1 %v6579_v57  ;;  %v8642_v55 = vmax.f32 %v8469_v39, %v5089_v2  ;;  %v12260_v39 = vld [vmem:[#allocation11_spill] sm:$0xff] }
 0x202   : > { %v8588_v17 = vpop.permute.xlu1 %5441  ;;  %v8636_v44 = vmax.f32 %v8466_v40, %v5093_v31  ;;  %v8654_v40 = vmax.f32 %v8480_v30, %v5103_v45  ;;  %v12259_v31 = vld [vmem:[#allocation130_spill] sm:$0xff]  ;;  %v12261_v53 = vld [vmem:[#allocation131_spill] sm:$0xff]  ;;  %v12264_v45 = vld [vmem:[#allocation133_spill] sm:$0xff] }
 0x203   : > { %12251 = vst [vmem:[#allocation75_spill] sm:$0xff] %v8588_v17  ;;  %v8596_v41 = vpop.permute.xlu0 %5436  ;;  %v5088_v17 = vunpack.i.l.bf16 %v12254_v16  ;;  %v8619_v16 = vmax.f32 %v8435_v18, %v5084_v0  ;;  %v5099_v18 = vunpack.i.h.bf16 %v12257_v19  ;;  %4406 = vmatpush3.bf16.msra.mxu0 %v6579_v57  ;;  %v5114_v0 = vunpack.i.h.bf16 %v12259_v31  ;;  %4457 = vmatpush3.bf16.msra.mxu1 %v6579_v57 }
 0x204   : > { %12253 = vst [vmem:[#allocation76_spill] sm:$0xff] %v8596_v41  ;;  %5731 = vrot.lane.b32.xlu1 %v6819_v42, %s6638_s13  ;;  %v8630_v41 = vmax.f32 %v8460_v61, %v5078_v4  ;;  %v5098_v61 = vunpack.i.l.bf16 %v12257_v19  ;;  %v5113_v2 = vunpack.i.l.bf16 %v12259_v31  ;;  %v5109_v21 = vunpack.i.h.bf16 %v12261_v53 }
 0x205   : > { %5726 = vrot.lane.b32.xlu0 %v12115_v8, %s6638_s13  ;;  %v8633_v8 = vmax.f32 %v8463_v60, %v5094_v46  ;;  %v8645_v54 = vmax.f32 %v8474_v5, %v5088_v17  ;;  %v8651_v60 = vmax.f32 %v8477_v28, %v5104_v36  ;;  %v6580_v5 = vld [vmem:[%s11525_s1 + $0x28] sm:$0xff]   ;;  %v5108_v28 = vunpack.i.l.bf16 %v12261_v53  ;;  %v12262_v17 = vld [vmem:[#allocation132_spill] sm:$0xff]  ;;  %v12266_v53 = vld [vmem:[#allocation134_spill] sm:$0xff] }
 0x206   : > { %v8627_v38 = vpop.permute.xlu1 %5451  ;;  %v5124_v4 = vunpack.i.h.bf16 %v12262_v17  ;;  %v8669_v46 = vmax.f32 %v8486_v63, %v5099_v18  ;;  %v5123_v36 = vunpack.i.l.bf16 %v12262_v17  ;;  %v5119_v19 = vunpack.i.h.bf16 %v12264_v45  ;;  %4407 = vmatprep.subr.bf16.mxu0 %v6580_v5  ;;  %4450 = vmatprep.subr.bf16.mxu1 %v6580_v5  ;;  %v12267_v18 = vld [vmem:[#allocation135_spill] sm:$0xff] }
 0x207   : > { %12256 = vst [vmem:[#allocation77_spill] sm:$0xff] %v8627_v38  ;;  %v8639_v35 = vpop.permute.xlu0 %5446  ;;  %v8677_v31 = vmax.f32 %v8489_v37, %v5098_v61  ;;  %v5134_v38 = vunpack.i.h.bf16 %v12266_v53  ;;  %4408 = vmatpush3.bf16.msra.mxu0 %v6580_v5  ;;  %v8684_v63 = vmax.f32 %v8495_v48, %v5114_v0  ;;  %v5129_v17 = vunpack.i.h.bf16 %v12267_v18  ;;  %v6581_v37 = vld [vmem:[%s11525_s1 + $0x30] sm:$0xff]   ;;  %4458 = vmatpush3.bf16.msra.mxu1 %v6580_v5 }
 0x208   : > { %12258 = vst [vmem:[#allocation78_spill] sm:$0xff] %v8639_v35  ;;  %5741 = vrot.lane.b32.xlu1 %v6851_v52, %s6638_s13  ;;  %v5118_v35 = vunpack.i.l.bf16 %v12264_v45  ;;  %v5128_v45 = vunpack.i.l.bf16 %v12267_v18  ;;  %v8694_v61 = vmax.f32 %v8498_v43, %v5113_v2  ;;  %v8700_v48 = vmax.f32 %v8521_v26, %v5108_v28  ;;  %v12269_v5 = vld [vmem:[#allocation136_spill] sm:$0xff]  ;;  %4409 = vmatprep.subr.bf16.mxu0 %v6581_v37 }
 0x209   : > { %5736 = vrot.lane.b32.xlu0 %v12260_v39, %s6638_s13  ;;  %v8703_v0 = vmax.f32 %v8528_v11, %v5124_v4  ;;  %4451 = vmatprep.subr.bf16.mxu1 %v6581_v37  ;;  %v8720_v26 = vmax.f32 %v8547_v20, %v5134_v38  ;;  %v12271_v20 = vld [vmem:[#allocation137_spill] sm:$0xff]  ;;  %v12273_v4 = vld [vmem:[#allocation138_spill] sm:$0xff] }
 0x20a   : > { %v8666_v30 = vpop.permute.xlu1 %5461  ;;  %v8714_v43 = vmax.f32 %v8544_v27, %v5118_v35  ;;  %v6582_v27 = vld [vmem:[%s11525_s1 + $0x38] sm:$0xff]   ;;  %v5139_v38 = vunpack.i.h.bf16 %v12271_v20  ;;  %v5138_v28 = vunpack.i.l.bf16 %v12271_v20  ;;  %v6585_v20 = vld [vmem:[%s6691_s21 + $0x8] sm:$0xf] }
 0x20b   : > { %12263 = vst [vmem:[#allocation79_spill] sm:$0xff] %v8666_v30  ;;  %v8674_v57 = vpop.permute.xlu0 %5456  ;;  %v5133_v30 = vunpack.i.l.bf16 %v12266_v53  ;;  %v8697_v53 = vmax.f32 %v8513_v24, %v5109_v21  ;;  %v5144_v24 = vunpack.i.h.bf16 %v12269_v5  ;;  %4410 = vmatpush3.bf16.msra.mxu0 %v6581_v37  ;;  %4459 = vmatpush3.bf16.msra.mxu1 %v6581_v37  ;;  %v6583_v21 = vld [vmem:[%s6691_s21] sm:$0xf]  ;;  %vm261_vm2 = vcmp.lt.bf16.partialorder %v6585_v20, 4020432802 }
 0x20c   : > { %12265 = vst [vmem:[#allocation80_spill] sm:$0xff] %v8674_v57  ;;  %5751 = vrot.lane.b32.xlu1 %v6883_v62, %s6638_s13  ;;  %v8708_v57 = vmax.f32 %v8538_v51, %v5123_v36  ;;  %v8728_v51 = vmax.f32 %v8555_v33, %v5129_v17  ;;  %vm259_vm0 = vcmp.lt.bf16.partialorder %v6583_v21, 4020432802  ;;  %v6584_v33 = vld [vmem:[%s6691_s21 + $0x4] sm:$0xf]  ;;  %v5153_v36 = vunpack.i.l.bf16 %v12273_v4  ;;  %4411 = vmatprep.subr.bf16.mxu0 %v6582_v27  ;;  %v12275_v17 = vld [vmem:[#allocation13_spill] sm:$0xff] }
 0x20d   : > { %5746 = vrot.lane.b32.xlu0 %v6893_v47, %s6638_s13  ;;  %v8711_v47 = vmax.f32 %v8541_v10, %v5119_v19  ;;  %v8723_v11 = vmax.f32 %v8552_v49, %v5133_v30  ;;  %v8731_v10 = vmax.f32 %v8558_v13, %v5128_v45  ;;  %v5143_v49 = vunpack.i.l.bf16 %v12269_v5  ;;  %4452 = vmatprep.subr.bf16.mxu1 %v6582_v27 }
 0x20e   : > { %v8705_v18 = vpop.permute.xlu1 %5471  ;;  %vm260_vm1 = vcmp.lt.bf16.partialorder %v6584_v33, 4020432802  ;;  %v8745_v13 = vmax.f32 %v8564_v23, %v5144_v24  ;;  %v5154_v30 = vunpack.i.h.bf16 %v12273_v4  ;;  %v5149_v45 = vunpack.i.h.bf16 %v12275_v17 }
 0x20f   : > { %12268 = vst [vmem:[#allocation81_spill] sm:$0xff] %v8705_v18  ;;  %v8717_v2 = vpop.permute.xlu0 %5466  ;;  %4412 = vmatpush3.bf16.msra.mxu0 %v6582_v27  ;;  %v291_v37 = vsel %vm259_vm0, 0, %v6583_v21  ;;  %v292_v23 = vsel %vm260_vm1, 0, %v6584_v33  ;;  %v5148_v5 = vunpack.i.l.bf16 %v12275_v17  ;;  %4460 = vmatpush3.bf16.msra.mxu1 %v6582_v27  ;;  %v8760_v4 = vmax.f32 %v8567_v29, %v5143_v49  ;;  %v6586_v18 = vld [vmem:[%s6691_s21 + $0xc] sm:$0xf] }
 0x210   : > { %12270 = vst [vmem:[#allocation82_spill] sm:$0xff] %v8717_v2  ;;  %5761 = vrot.lane.b32.xlu1 %v6915_v56, %s6638_s13  ;;  %v4347_v24 = vcombine.low %v291_v37, %v292_v23  ;;  %vm262_vm3 = vcmp.lt.bf16.partialorder %v6586_v18, 4020432802  ;;  %v293_v21 = vsel %vm261_vm2, 0, %v6585_v20  ;;  %v8767_v33 = vmax.f32 %v8573_v59, %v5139_v38 }
 0x211   : > { %5756 = vrot.lane.b32.xlu0 %v6925_v34, %s6638_s13  ;;  %v8770_v17 = vmax.f32 %v8576_v6, %v5138_v28  ;;  %v294_v29 = vsel %vm262_vm3, 0, %v6586_v18  ;;  %v8776_v27 = vmax.f32 %v8591_v12, %v5154_v30  ;;  %v8779_v49 = vmax.f32 %v8599_v25, %v5153_v36  ;;  %v12279_v28 = vld [vmem:[#allocation24_spill] sm:$0xff] }
 0x212   : > { %v8740_v35 = vpop.permute.xlu1 %5481  ;;  %4413 = vmatprep.mubr.bf16.mxu0 %v4347_v24  ;;  %v4348_v59 = vcombine.low %v293_v21, %v294_v29  ;;  %v8784_v6 = vmax.f32 %v8606_v14, %v5149_v45  ;;  %v8787_v38 = vmax.f32 %v8616_v3, %v5148_v5  ;;  %v5159_v18 = vunpack.i.h.bf16 %v12279_v28  ;;  %v6587_v36 = vld [vmem:[%s6691_s21 + $0x10] sm:$0xf]  ;;  %v6588_v14 = vld [vmem:[%s6691_s21 + $0x14] sm:$0xf]  ;;  %v12282_v45 = vld [vmem:[#allocation17_spill] sm:$0xff] }
 0x213   : > { %12272 = vst [vmem:[#allocation83_spill] sm:$0xff] %v8740_v35  ;;  %v8750_v19 = vpop.permute.xlu0 %5476  ;;  %v5158_v25 = vunpack.i.l.bf16 %v12279_v28  ;;  %vm263_vm4 = vcmp.lt.bf16.partialorder %v6587_v36, 4020432802  ;;  %vm264_vm5 = vcmp.lt.bf16.partialorder %v6588_v14, 4020432802  ;;  %v5174_v5 = vunpack.i.h.bf16 %v12282_v45  ;;  %v12285_v28 = vld [vmem:[#allocation19_spill] sm:$0xff] }
 0x214   : > { %12274 = vst [vmem:[#allocation84_spill] sm:$0xff] %v8750_v19  ;;  %5771 = vrot.lane.b32.xlu1 %v12086_v58, %s6638_s13  ;;  %v12276_v19 = vld [vmem:[#allocation12_spill] sm:$0xff]  ;;  %4414 = vmatmul.mubr.bf16.vlgmr.msra.gmra.mrb[0].mxu0 %v4348_v59  ;;  %v5173_v24 = vunpack.i.l.bf16 %v12282_v45  ;;  %v295_v29 = vsel %vm263_vm4, 0, %v6587_v36  ;;  %v296_v59 = vsel %vm264_vm5, 0, %v6588_v14  ;;  %v8816_v45 = vmax.f32 %v8625_v9, %v5159_v18 }
 0x215   : > { %5766 = vrot.lane.b32.xlu0 %v12088_v7, %s6638_s13  ;;  %v5164_v35 = vunpack.i.h.bf16 %v12276_v19  ;;  %v5163_v37 = vunpack.i.l.bf16 %v12276_v19  ;;  %v12280_v19 = vld [vmem:[#allocation3_spill] sm:$0xff]  ;;  %v8823_v36 = vmax.f32 %v8630_v41, %v5158_v25  ;;  %v8826_v14 = vmax.f32 %v8633_v8, %v5174_v5 }
 0x216   : > { %v8763_v2 = vpop.permute.xlu1 %5491 }
 0x217   : > { %12277 = vst [vmem:[#allocation85_spill] sm:$0xff] %v8763_v2  ;;  %v8773_v23 = vpop.permute.xlu0 %5486  ;;  %v8793_v12 = vmax.f32 %v8619_v16, %v5164_v35  ;;  %v8801_v3 = vmax.f32 %v8622_v1, %v5163_v37  ;;  %v12283_v16 = vld [vmem:[#allocation16_spill] sm:$0xff]  ;;  %v12286_v1 = vld [vmem:[#allocation2_spill] sm:$0xff]  ;;  %v4349_v37 = vcombine.low %v295_v29, %v296_v59  ;;  %v8829_v29 = vmax.f32 %v8636_v44, %v5173_v24  ;;  %v12290_v24 = vld [vmem:[#allocation25_spill] sm:$0xff] }
 0x218   : > { %12278 = vst [vmem:[#allocation86_spill] sm:$0xff] %v8773_v23  ;;  %5781 = vrot.lane.b32.xlu1 %v12092_v22, %s6639_s6  ;;  %v5169_v35 = vunpack.i.h.bf16 %v12283_v16  ;;  %v5168_v21 = vunpack.i.l.bf16 %v12283_v16  ;;  %v6589_v23 = vld [vmem:[%s6691_s21 + $0x18] sm:$0xf]  ;;  %v6590_v16 = vld [vmem:[%s6691_s21 + $0x1c] sm:$0xf]  ;;  %v12289_v44 = vld [vmem:[#allocation18_spill] sm:$0xff] }
 0x219   : > { %5776 = vrot.lane.b32.xlu0 %v12280_v19, %s6639_s6  ;;  %vm265_vm6 = vcmp.lt.bf16.partialorder %v6589_v23, 4020432802  ;;  %vm266_vm7 = vcmp.lt.bf16.partialorder %v6590_v16, 4020432802  ;;  %4417 = vmatprep.mubr.bf16.mxu0 %v4349_v37  ;;  %v5179_v25 = vunpack.i.h.bf16 %v12289_v44  ;;  %v5178_v5 = vunpack.i.l.bf16 %v12289_v44 }
 0x21a   : > { %v8796_v30 = vpop.permute.xlu1 %5501  ;;  %v298_v9 = vsel %vm266_vm7, 0, %v6590_v16  ;;  %v8834_v18 = vmax.f32 %v8642_v55, %v5169_v35  ;;  %v12293_v16 = vld [vmem:[#allocation27_spill] sm:$0xff] }
 0x21b   : > { %12281 = vst [vmem:[#allocation87_spill] sm:$0xff] %v8796_v30  ;;  %v8806_v20 = vpop.permute.xlu0 %5496  ;;  %v5184_v30 = vunpack.i.h.bf16 %v12285_v28 }
 0x21c   : > { %12284 = vst [vmem:[#allocation88_spill] sm:$0xff] %v8806_v20  ;;  %5791 = vrot.lane.b32.xlu1 %v12101_v50, %s6639_s6  ;;  %v5183_v20 = vunpack.i.l.bf16 %v12285_v28  ;;  %v297_v50 = vsel %vm265_vm6, 0, %v6589_v23  ;;  %v8837_v23 = vmax.f32 %v8645_v54, %v5168_v21  ;;  %v5194_v54 = vunpack.i.h.bf16 %v12290_v24  ;;  %v6591_v21 = vld [vmem:[%s6691_s21 + $0x20] sm:$0xf] }
 0x21d   : > { %5786 = vrot.lane.b32.xlu0 %v12286_v1, %s6639_s6  ;;  %v4350_v8 = vcombine.low %v297_v50, %v298_v9  ;;  %v8842_v41 = vmax.f32 %v8651_v60, %v5184_v30  ;;  %vm267_vm8 = vcmp.lt.bf16.partialorder %v6591_v21, 4020432802  ;;  %v6592_v50 = vld [vmem:[%s6691_s21 + $0x24] sm:$0xf]  ;;  %v5193_v60 = vunpack.i.l.bf16 %v12290_v24  ;;  %v12296_v24 = vld [vmem:[#allocation9_spill] sm:$0xff] }
 0x21e   : > { %v8819_v2 = vpop.permute.xlu1 %5511  ;;  %v8849_v55 = vmax.f32 %v8654_v40, %v5183_v20  ;;  %vm268_vm9 = vcmp.lt.bf16.partialorder %v6592_v50, 4020432802  ;;  %v12292_v30 = vld [vmem:[#allocation26_spill] sm:$0xff]  ;;  %v5204_v40 = vunpack.i.h.bf16 %v12293_v16  ;;  %v5203_v9 = vunpack.i.l.bf16 %v12293_v16 }
 0x21f   : > { %12287 = vst [vmem:[#allocation89_spill] sm:$0xff] %v8819_v2  ;;  %v8831_v59 = vpop.permute.xlu0 %5506  ;;  %4418 = vmatmul.mubr.bf16.gmra.mrb[4].mxu0 %v4350_v8  ;;  %v5189_v28 = vunpack.i.h.bf16 %v12292_v30  ;;  %v5188_v37 = vunpack.i.l.bf16 %v12292_v30  ;;  %v299_v8 = vsel %vm267_vm8, 0, %v6591_v21  ;;  %v300_v44 = vsel %vm268_vm9, 0, %v6592_v50 }
 0x220   : > { %12288 = vst [vmem:[#allocation90_spill] sm:$0xff] %v8831_v59  ;;  %5801 = vrot.lane.b32.xlu1 %v6787_v32, %s6639_s6  ;;  %v4351_v2 = vcombine.low %v299_v8, %v300_v44  ;;  %v8870_v30 = vmax.f32 %v8669_v46, %v5179_v25  ;;  %v6594_v32 = vld [vmem:[%s6691_s21 + $0x2c] sm:$0xf]  ;;  %v8879_v50 = vmax.f32 %v8684_v63, %v5194_v54 }
 0x221   : > { %5796 = vrot.lane.b32.xlu0 %v12248_v15, %s6639_s6  ;;  %v6593_v15 = vld [vmem:[%s6691_s21 + $0x28] sm:$0xf]  ;;  %vm270_vm11 = vcmp.lt.bf16.partialorder %v6594_v32, 4020432802  ;;  %v8885_v8 = vmax.f32 %v8697_v53, %v5189_v28  ;;  %v8890_v25 = vmax.f32 %v8700_v48, %v5188_v37  ;;  %v8899_v53 = vmax.f32 %v8708_v57, %v5203_v9  ;;  %v12301_v57 = vld [vmem:[#allocation30_spill] sm:$0xff]  ;;  %v12304_v9 = vld [vmem:[#allocation32_spill] sm:$0xff] }
 0x222   : > { %v8852_v35 = vpop.permute.xlu1 %5521  ;;  %vm269_vm10 = vcmp.lt.bf16.partialorder %v6593_v15, 4020432802  ;;  %4421 = vmatprep.mubr.bf16.mxu0 %v4351_v2  ;;  %v5219_v44 = vunpack.i.h.bf16 %v12304_v9 }
 0x223   : > { %12291 = vst [vmem:[#allocation91_spill] sm:$0xff] %v8852_v35  ;;  %v8860_v20 = vpop.permute.xlu0 %5516  ;;  %v12295_v35 = vld [vmem:[#allocation28_spill] sm:$0xff]  ;;  %v301_v21 = vsel %vm269_vm10, 0, %v6593_v15 }
 0x224   : > { %12294 = vst [vmem:[#allocation92_spill] sm:$0xff] %v8860_v20  ;;  %5811 = vrot.lane.b32.xlu1 %v6819_v42, %s6639_s6  ;;  %v5199_v59 = vunpack.i.h.bf16 %v12295_v35  ;;  %v8873_v20 = vmax.f32 %v8677_v31, %v5178_v5  ;;  %v8882_v42 = vmax.f32 %v8694_v61, %v5193_v60  ;;  %v302_v31 = vsel %vm270_vm11, 0, %v6594_v32  ;;  %v12299_v32 = vld [vmem:[#allocation29_spill] sm:$0xff] }
 0x225   : > { %5806 = vrot.lane.b32.xlu0 %v12296_v24, %s6639_s6  ;;  %v5198_v15 = vunpack.i.l.bf16 %v12295_v35  ;;  %v4352_v63 = vcombine.low %v301_v21, %v302_v31  ;;  %v8896_v61 = vmax.f32 %v8703_v0, %v5204_v40  ;;  %v5214_v48 = vunpack.i.h.bf16 %v12299_v32  ;;  %v6595_v35 = vld [vmem:[%s6691_s21 + $0x30] sm:$0xf]  ;;  %v6596_v0 = vld [vmem:[%s6691_s21 + $0x34] sm:$0xf] }
 0x226   : > { %v8875_v16 = vpop.permute.xlu1 %5531  ;;  %v8902_v5 = vmax.f32 %v8711_v47, %v5199_v59  ;;  %v5213_v2 = vunpack.i.l.bf16 %v12299_v32  ;;  %vm271_vm12 = vcmp.lt.bf16.partialorder %v6595_v35, 4020432802  ;;  %vm272_vm13 = vcmp.lt.bf16.partialorder %v6596_v0, 4020432802  ;;  %v12302_v59 = vld [vmem:[#allocation31_spill] sm:$0xff] }
 0x227   : > { %12297 = vst [vmem:[#allocation93_spill] sm:$0xff] %v8875_v16  ;;  %v8887_v46 = vpop.permute.xlu0 %5526  ;;  %4422 = vmatmul.mubr.bf16.gmra.mrb[8].mxu0 %v4352_v63  ;;  %v5209_v60 = vunpack.i.h.bf16 %v12301_v57  ;;  %v5208_v47 = vunpack.i.l.bf16 %v12301_v57  ;;  %v5224_v28 = vunpack.i.h.bf16 %v12302_v59  ;;  %v5223_v37 = vunpack.i.l.bf16 %v12302_v59  ;;  %v12305_v32 = vld [vmem:[#allocation15_spill] sm:$0xff]  ;;  %v6598_v16 = vld [vmem:[%s6691_s21 + $0x3c] sm:$0xf] }
 0x228   : > { %12298 = vst [vmem:[#allocation94_spill] sm:$0xff] %v8887_v46  ;;  %5821 = vrot.lane.b32.xlu1 %v6851_v52, %s6639_s6  ;;  %v303_v21 = vsel %vm271_vm12, 0, %v6595_v35  ;;  %v304_v31 = vsel %vm272_vm13, 0, %v6596_v0  ;;  %v5218_v63 = vunpack.i.l.bf16 %v12304_v9  ;;  %v8926_v46 = vmax.f32 %v8714_v43, %v5198_v15 }
 0x229   : > { %5816 = vrot.lane.b32.xlu0 %v12260_v39, %s6639_s6  ;;  %v4353_v57 = vcombine.low %v303_v21, %v304_v31  ;;  %v8929_v59 = vmax.f32 %v8720_v26, %v5214_v48  ;;  %vm274_vm15 = vcmp.lt.bf16.partialorder %v6598_v16, 4020432802  ;;  %v8935_v0 = vmax.f32 %v8723_v11, %v5213_v2  ;;  %v12307_v21 = vld [vmem:[#allocation33_spill] sm:$0xff] }
 0x22a   : > { %v8908_v54 = vpop.permute.xlu1 %5541  ;;  %v8938_v9 = vmax.f32 %v8728_v51, %v5209_v60  ;;  %v5234_v31 = vunpack.i.h.bf16 %v12307_v21  ;;  %v306_v43 = vsel %vm274_vm15, 0, %v6598_v16  ;;  %v8944_v26 = vmax.f32 %v8731_v10, %v5208_v47  ;;  %v6599_v60 = vld [vmem:[%s6691_s21 + $0x40] sm:$0xf]  ;;  %v12311_v47 = vld [vmem:[#allocation35_spill] sm:$0xff] }
 0x22b   : > { %12300 = vst [vmem:[#allocation95_spill] sm:$0xff] %v8908_v54  ;;  %v8916_v40 = vpop.permute.xlu0 %5536  ;;  %v6597_v54 = vld [vmem:[%s6691_s21 + $0x38] sm:$0xf]  ;;  %4425 = vmatprep.mubr.bf16.mxu0 %v4353_v57  ;;  %v8947_v15 = vmax.f32 %v8745_v13, %v5224_v28  ;;  %v8952_v51 = vmax.f32 %v8760_v4, %v5223_v37  ;;  %v8955_v48 = vmax.f32 %v8767_v33, %v5219_v44  ;;  %v5233_v10 = vunpack.i.l.bf16 %v12307_v21  ;;  %v12309_v13 = vld [vmem:[#allocation34_spill] sm:$0xff] }
 0x22c   : > { %12303 = vst [vmem:[#allocation96_spill] sm:$0xff] %v8916_v40  ;;  %5831 = vrot.lane.b32.xlu1 %v6883_v62, %s6639_s6  ;;  %vm273_vm14 = vcmp.lt.bf16.partialorder %v6597_v54, 4020432802  ;;  %v8958_v2 = vmax.f32 %v8770_v17, %v5218_v63  ;;  %v5229_v16 = vunpack.i.h.bf16 %v12309_v13  ;;  %vm275_vm0 = vcmp.lt.bf16.partialorder %v6599_v60, 4020432802  ;;  %v12313_v63 = vld [vmem:[#allocation36_spill] sm:$0xff] }
 0x22d   : > { %5826 = vrot.lane.b32.xlu0 %v12305_v32, %s6639_s6  ;;  %v305_v35 = vsel %vm273_vm14, 0, %v6597_v54  ;;  %v6600_v4 = vld [vmem:[%s6691_s21 + $0x44] sm:$0xf]  ;;  %v8969_v33 = vmax.f32 %v8776_v27, %v5234_v31  ;;  %v5228_v17 = vunpack.i.l.bf16 %v12309_v13  ;;  %v5244_v28 = vunpack.i.h.bf16 %v12311_v47  ;;  %v6601_v31 = vld [vmem:[%s6691_s21 + $0x48] sm:$0xf]  ;;  %v12314_v13 = vld [vmem:[#allocation37_spill] sm:$0xff] }
 0x22e   : > { %v8931_v40 = vpop.permute.xlu1 %5551  ;;  %v4354_v11 = vcombine.low %v305_v35, %v306_v43  ;;  %vm276_vm1 = vcmp.lt.bf16.partialorder %v6600_v4, 4020432802  ;;  %v5243_v37 = vunpack.i.l.bf16 %v12311_v47  ;;  %v5239_v57 = vunpack.i.h.bf16 %v12313_v63 }
 0x22f   : > { %12306 = vst [vmem:[#allocation97_spill] sm:$0xff] %v8931_v40  ;;  %v8941_v32 = vpop.permute.xlu0 %5546  ;;  %v307_v35 = vsel %vm275_vm0, 0, %v6599_v60  ;;  %v308_v21 = vsel %vm276_vm1, 0, %v6600_v4  ;;  %v5238_v43 = vunpack.i.l.bf16 %v12313_v63  ;;  %vm277_vm2 = vcmp.lt.bf16.partialorder %v6601_v31, 4020432802  ;;  %v12325_v40 = vld [vmem:[#allocation42_spill] sm:$0xff] }
 0x230   : > { %12308 = vst [vmem:[#allocation98_spill] sm:$0xff] %v8941_v32  ;;  %5841 = vrot.lane.b32.xlu1 %v6915_v56, %s6639_s6  ;;  %4426 = vmatmul.mubr.bf16.gmra.mrb[12].mxu0 %v4354_v11  ;;  %v4355_v27 = vcombine.low %v307_v35, %v308_v21  ;;  %v8984_v11 = vmax.f32 %v8779_v49, %v5233_v10  ;;  %v5254_v47 = vunpack.i.h.bf16 %v12314_v13  ;;  %v309_v32 = vsel %vm277_vm2, 0, %v6601_v31 }
 0x231   : > { %5836 = vrot.lane.b32.xlu0 %v6925_v34, %s6639_s6  ;;  %v8991_v60 = vmax.f32 %v8784_v6, %v5229_v16  ;;  %v8994_v4 = vmax.f32 %v8787_v38, %v5228_v17  ;;  %v5253_v63 = vunpack.i.l.bf16 %v12314_v13  ;;  %v9000_v10 = vmax.f32 %v8793_v12, %v5244_v28  ;;  %v12317_v17 = vld [vmem:[#allocation38_spill] sm:$0xff] }
 0x232   : > { %v8964_v54 = vpop.permute.xlu1 %5561  ;;  %4429 = vmatprep.mubr.bf16.mxu1 %v4355_v27  ;;  %v9003_v21 = vmax.f32 %v8801_v3, %v5243_v37  ;;  %v9008_v38 = vmax.f32 %v8816_v45, %v5239_v57  ;;  %v9011_v16 = vmax.f32 %v8823_v36, %v5238_v43  ;;  %v9017_v12 = vmax.f32 %v8826_v14, %v5254_v47  ;;  %v6604_v45 = vld [vmem:[%s6691_s21 + $0x54] sm:$0xf]  ;;  %v12319_v37 = vld [vmem:[#allocation39_spill] sm:$0xff] }
 0x233   : > { %12310 = vst [vmem:[#allocation99_spill] sm:$0xff] %v8964_v54  ;;  %v8974_v44 = vpop.permute.xlu0 %5556  ;;  %v6602_v54 = vld [vmem:[%s6691_s21 + $0x4c] sm:$0xf]  ;;  %v5248_v3 = vunpack.i.l.bf16 %v12317_v17  ;;  %vm280_vm5 = vcmp.lt.bf16.partialorder %v6604_v45, 4020432802  ;;  %v9025_v36 = vmax.f32 %v8829_v29, %v5253_v63  ;;  %v5264_v57 = vunpack.i.h.bf16 %v12319_v37  ;;  %v12320_v14 = vld [vmem:[#allocation40_spill] sm:$0xff] }
 0x234   : > { %12312 = vst [vmem:[#allocation100_spill] sm:$0xff] %v8974_v44  ;;  %5851 = vrot.lane.b32.xlu1 %v12086_v58, %s6639_s6  ;;  %vm278_vm3 = vcmp.lt.bf16.partialorder %v6602_v54, 4020432802  ;;  %v5263_v43 = vunpack.i.l.bf16 %v12319_v37  ;;  %v5259_v27 = vunpack.i.h.bf16 %v12320_v14  ;;  %v5258_v13 = vunpack.i.l.bf16 %v12320_v14  ;;  %v12322_v47 = vld [vmem:[#allocation4_spill] sm:$0xff]  ;;  %v6605_v63 = vld [vmem:[%s6691_s21 + $0x58] sm:$0xf] }
 0x235   : > { %5846 = vrot.lane.b32.xlu0 %v12088_v7, %s6639_s6  ;;  %v310_v49 = vsel %vm278_vm3, 0, %v6602_v54  ;;  %v5249_v54 = vunpack.i.h.bf16 %v12317_v17  ;;  %v12323_v17 = vld [vmem:[#allocation41_spill] sm:$0xff]  ;;  %vm281_vm6 = vcmp.lt.bf16.partialorder %v6605_v63, 4020432802  ;;  %vm4181_vm2 = vcmask 31744  }
 0x236   : > { %v8987_v44 = vpop.permute.xlu1 %5571  ;;  %v4356_v6 = vcombine.low %v309_v32, %v310_v49  ;;  %v6603_v32 = vld [vmem:[%s6691_s21 + $0x50] sm:$0xf]  ;;  %v6606_v14 = vld [vmem:[%s6691_s21 + $0x5c] sm:$0xf] }
 0x237   : > { %12315 = vst [vmem:[#allocation101_spill] sm:$0xff] %v8987_v44  ;;  %v8997_v35 = vpop.permute.xlu0 %5566  ;;  %vm279_vm4 = vcmp.lt.bf16.partialorder %v6603_v32, 4020432802  ;;  %v9040_v37 = vmax.f32 %v8834_v18, %v5249_v54  ;;  %vm282_vm7 = vcmp.lt.bf16.partialorder %v6606_v14, 4020432802  ;;  %v313_v44 = vsel %vm281_vm6, 0, %v6605_v63 }
 0x238   : > { %12316 = vst [vmem:[#allocation102_spill] sm:$0xff] %v8997_v35  ;;  %5861 = vrot.lane.b32.xlu1 %v12092_v22, %s6640_s7  ;;  %4430 = vmatmul.mubr.bf16.vlgmr.msra.gmra.mrb[0].mxu1 %v4356_v6  ;;  %v311_v49 = vsel %vm279_vm4, 0, %v6603_v32  ;;  %v312_v6 = vsel %vm280_vm5, 0, %v6604_v45  ;;  %v9047_v32 = vmax.f32 %v8837_v23, %v5248_v3  ;;  %v9050_v45 = vmax.f32 %v8842_v41, %v5264_v57  ;;  %v12327_v23 = vld [vmem:[#allocation6_spill] sm:$0xff]  ;;  %v12328_v63 = vld [vmem:[#allocation7_spill] sm:$0xff] }
 0x239   : > { %5856 = vrot.lane.b32.xlu0 %v12280_v19, %s6640_s7  ;;  %v4357_v29 = vcombine.low %v311_v49, %v312_v6  ;;  %v5269_v49 = vunpack.i.h.bf16 %v12325_v40  ;;  %v314_v18 = vsel %vm282_vm7, 0, %v6606_v14  ;;  %v9056_v54 = vmax.f32 %v8849_v55, %v5263_v43  ;;  %v12333_v14 = vld [vmem:[#allocation45_spill] sm:$0xff] }
 0x23a   : > { %v9020_v28 = vpop.permute.xlu1 %5581  ;;  %v4358_v3 = vcombine.low %v313_v44, %v314_v18  ;;  %v9064_v41 = vmax.f32 %v8873_v20, %v5258_v13  ;;  %v6607_v44 = vld [vmem:[%s6691_s21 + $0x60] sm:$0xf]  ;;  %v6608_v20 = vld [vmem:[%s6691_s21 + $0x64] sm:$0xf]  ;;  %v5294_v18 = vunpack.i.h.bf16 %v12333_v14 }
 0x23b   : > { %12318 = vst [vmem:[#allocation103_spill] sm:$0xff] %v9020_v28  ;;  %v9030_v31 = vpop.permute.xlu0 %5576  ;;  %v5274_v28 = vunpack.i.h.bf16 %v12323_v17  ;;  %4433 = vmatprep.mubr.bf16.mxu1 %v4357_v29  ;;  %v5268_v29 = vunpack.i.l.bf16 %v12325_v40  ;;  %vm283_vm8 = vcmp.lt.bf16.partialorder %v6607_v44, 4020432802  ;;  %vm284_vm9 = vcmp.lt.bf16.partialorder %v6608_v20, 4020432802 }
 0x23c   : > { %12321 = vst [vmem:[#allocation104_spill] sm:$0xff] %v9030_v31  ;;  %5871 = vrot.lane.b32.xlu1 %v12322_v47, %s6640_s7  ;;  %v5273_v31 = vunpack.i.l.bf16 %v12323_v17  ;;  %v9059_v17 = vmax.f32 %v8870_v30, %v5259_v27  ;;  %v12329_v30 = vld [vmem:[#allocation43_spill] sm:$0xff] }
 0x23d   : > { %5866 = vrot.lane.b32.xlu0 %v12286_v1, %s6640_s7  ;;  %v9067_v57 = vmax.f32 %v8879_v50, %v5274_v28  ;;  %v5284_v43 = vunpack.i.h.bf16 %v12329_v30  ;;  %v9081_v50 = vmax.f32 %v8885_v8, %v5269_v49  ;;  %v5283_v40 = vunpack.i.l.bf16 %v12329_v30  ;;  %v12331_v28 = vld [vmem:[#allocation44_spill] sm:$0xff]  ;;  %v6609_v49 = vld [vmem:[%s6691_s21 + $0x68] sm:$0xf] }
 0x23e   : > { %v9043_v35 = vpop.permute.xlu1 %5591  ;;  %v9073_v55 = vmax.f32 %v8882_v42, %v5273_v31  ;;  %v5279_v13 = vunpack.i.h.bf16 %v12331_v28  ;;  %v5278_v42 = vunpack.i.l.bf16 %v12331_v28  ;;  %vm285_vm10 = vcmp.lt.bf16.partialorder %v6609_v49, 4020432802 }
 0x23f   : > { %12324 = vst [vmem:[#allocation105_spill] sm:$0xff] %v9043_v35  ;;  %v9053_v6 = vpop.permute.xlu0 %5586  ;;  %v5293_v35 = vunpack.i.l.bf16 %v12333_v14  ;;  %v9096_v30 = vmax.f32 %v8890_v25, %v5268_v29  ;;  %v9099_v28 = vmax.f32 %v8896_v61, %v5284_v43  ;;  %v9110_v61 = vmax.f32 %v8899_v53, %v5283_v40 }
 0x240   : > { %12326 = vst [vmem:[#allocation106_spill] sm:$0xff] %v9053_v6  ;;  %5881 = vrot.lane.b32.xlu1 %v12327_v23, %s6640_s7  ;;  %4434 = vmatmul.mubr.bf16.gmra.mrb[4].mxu1 %v4358_v3  ;;  %v12334_v3 = vld [vmem:[#allocation8_spill] sm:$0xff]  ;;  %v316_v6 = vsel %vm284_vm9, 0, %v6608_v20  ;;  %v12336_v20 = vld [vmem:[#allocation46_spill] sm:$0xff]  ;;  %v12337_v23 = vld [vmem:[#allocation47_spill] sm:$0xff]  ;;  %v9113_v29 = vmax.f32 %v8902_v5, %v5279_v13 }
 0x241   : > { %5876 = vrot.lane.b32.xlu0 %v12328_v63, %s6640_s7  ;;  %v6610_v63 = vld [vmem:[%s6691_s21 + $0x6c] sm:$0xf]  ;;  %v5288_v14 = vunpack.i.l.bf16 %v12336_v20  ;;  %v5303_v53 = vunpack.i.l.bf16 %v12337_v23  ;;  %v12339_v5 = vld [vmem:[#allocation48_spill] sm:$0xff] }
 0x242   : > { %v9076_v27 = vpop.permute.xlu1 %5601  ;;  %vm286_vm11 = vcmp.lt.bf16.partialorder %v6610_v63, 4020432802  ;;  %v6611_v13 = vld [vmem:[%s6691_s21 + $0x70] sm:$0xf] }
 0x243   : > { %12330 = vst [vmem:[#allocation107_spill] sm:$0xff] %v9076_v27  ;;  %v9086_v31 = vpop.permute.xlu0 %5596  ;;  %v315_v27 = vsel %vm283_vm8, 0, %v6607_v44  ;;  %v317_v44 = vsel %vm285_vm10, 0, %v6609_v49  ;;  %v318_v25 = vsel %vm286_vm11, 0, %v6610_v63  ;;  %v9121_v49 = vmax.f32 %v8929_v59, %v5294_v18  ;;  %v12342_v18 = vld [vmem:[#allocation49_spill] sm:$0xff] }
 0x244   : > { %12332 = vst [vmem:[#allocation108_spill] sm:$0xff] %v9086_v31  ;;  %5891 = vrot.lane.b32.xlu1 %v12334_v3, %s6640_s7  ;;  %v4359_v8 = vcombine.low %v315_v27, %v316_v6  ;;  %v5289_v3 = vunpack.i.h.bf16 %v12336_v20  ;;  %v4360_v43 = vcombine.low %v317_v44, %v318_v25  ;;  %v9118_v27 = vmax.f32 %v8926_v46, %v5278_v42  ;;  %v6612_v46 = vld [vmem:[%s6691_s21 + $0x74] sm:$0xf] }
 0x245   : > { %5886 = vrot.lane.b32.xlu0 %v12296_v24, %s6640_s7  ;;  %v5304_v24 = vunpack.i.h.bf16 %v12337_v23  ;;  %v5299_v63 = vunpack.i.h.bf16 %v12339_v5  ;;  %vm287_vm12 = vcmp.lt.bf16.partialorder %v6611_v13, 4020432802  ;;  %vm288_vm13 = vcmp.lt.bf16.partialorder %v6612_v46, 4020432802 }
 0x246   : > { %v9101_v31 = vpop.permute.xlu1 %5611  ;;  %4437 = vmatprep.mubr.bf16.mxu1 %v4359_v8  ;;  %v9124_v8 = vmax.f32 %v8935_v0, %v5293_v35  ;;  %v9135_v59 = vmax.f32 %v8938_v9, %v5289_v3  ;;  %v9138_v0 = vmax.f32 %v8944_v26, %v5288_v14  ;;  %v5298_v23 = vunpack.i.l.bf16 %v12339_v5  ;;  %v12343_v26 = vld [vmem:[#allocation15_spill] sm:$0xff]  ;;  %v6613_v14 = vld [vmem:[%s6691_s21 + $0x78] sm:$0xf]  ;;  %v6614_v5 = vld [vmem:[%s6691_s21 + $0x7c] sm:$0xf]  ;;  %s6641_s21 = smov 52  }
 0x247   : > { %12335 = vst [vmem:[#allocation109_spill] sm:$0xff] %v9101_v31  ;;  %v9107_v6 = vpop.permute.xlu0 %5606  ;;  %v9141_v35 = vmax.f32 %v8947_v15, %v5304_v24  ;;  %v5314_v44 = vunpack.i.h.bf16 %v12342_v18  ;;  %v319_v20 = vsel %vm287_vm12, 0, %v6611_v13  ;;  %v320_v25 = vsel %vm288_vm13, 0, %v6612_v46  ;;  %v12345_v46 = vld [vmem:[#allocation50_spill] sm:$0xff] }
 0x248   : > { %12338 = vst [vmem:[#allocation110_spill] sm:$0xff] %v9107_v6  ;;  %5901 = vrot.lane.b32.xlu1 %v6851_v52, %s6640_s7  ;;  %4438 = vmatmul.mubr.bf16.gmra.mrb[8].mxu1 %v4360_v43  ;;  %v5313_v9 = vunpack.i.l.bf16 %v12342_v18  ;;  %v4361_v3 = vcombine.low %v319_v20, %v320_v25  ;;  %vm289_vm14 = vcmp.lt.bf16.partialorder %v6613_v14, 4020432802  ;;  %v9154_v24 = vmax.f32 %v8952_v51, %v5303_v53  ;;  %v12348_v53 = vld [vmem:[#allocation52_spill] sm:$0xff]  ;;  %v12350_v31 = vld [vmem:[#allocation54_spill] sm:$0xff] }
 0x249   : > { %5896 = vrot.lane.b32.xlu0 %v12260_v39, %s6640_s7  ;;  %v9157_v15 = vmax.f32 %v8955_v48, %v5299_v63  ;;  %vm290_vm15 = vcmp.lt.bf16.partialorder %v6614_v5, 4020432802  ;;  %v321_v13 = vsel %vm289_vm14, 0, %v6613_v14  ;;  %v5308_v18 = vunpack.i.l.bf16 %v12345_v46 }
 0x24a   : > { %v9130_v40 = vpop.permute.xlu1 %5621  ;;  %4441 = vmatprep.mubr.bf16.mxu1 %v4361_v3  ;;  %v322_v25 = vsel %vm290_vm15, 0, %v6614_v5  ;;  %v5319_v48 = vunpack.i.h.bf16 %v12348_v53  ;;  %v9172_v14 = vmax.f32 %v8958_v2, %v5298_v23  ;;  %v12349_v3 = vld [vmem:[#allocation53_spill] sm:$0xff]  ;;  %v5328_v23 = vunpack.i.l.bf16 %v12350_v31 }
 0x24b   : > { %12340 = vst [vmem:[#allocation111_spill] sm:$0xff] %v9130_v40  ;;  %v9144_v42 = vpop.permute.xlu0 %5616  ;;  %v12346_v40 = vld [vmem:[#allocation51_spill] sm:$0xff]  ;;  %v4362_v63 = vcombine.low %v321_v13, %v322_v25  ;;  %v5334_v5 = vunpack.i.h.bf16 %v12349_v3  ;;  %v5329_v13 = vunpack.i.h.bf16 %v12350_v31 }
 0x24c   : > { %12341 = vst [vmem:[#allocation112_spill] sm:$0xff] %v9144_v42  ;;  %5911 = vrot.lane.b32.xlu1 %v6883_v62, %s6640_s7  ;;  %v5309_v42 = vunpack.i.h.bf16 %v12345_v46  ;;  %v5324_v6 = vunpack.i.h.bf16 %v12346_v40  ;;  %v5323_v51 = vunpack.i.l.bf16 %v12346_v40  ;;  %v9178_v46 = vmax.f32 %v8984_v11, %v5313_v9 }
 0x24d   : > { %5906 = vrot.lane.b32.xlu0 %v12343_v26, %s6640_s7  ;;  %v5318_v40 = vunpack.i.l.bf16 %v12348_v53  ;;  %v9204_v53 = vmax.f32 %v9008_v38, %v5319_v48  ;;  %v9218_v38 = vmax.f32 %v9017_v12, %v5334_v5  ;;  %v12356_v48 = vld [vmem:[#allocation57_spill] sm:$0xff]  ;;  %v12359_v5 = vld [vmem:[#allocation59_spill] sm:$0xff] }
 0x24e   : > { %v9159_v43 = vpop.permute.xlu1 %5631  ;;  %v9189_v2 = vmax.f32 %v8991_v60, %v5309_v42  ;;  %v9195_v11 = vmax.f32 %v9000_v10, %v5324_v6  ;;  %v9201_v9 = vmax.f32 %v9003_v21, %v5323_v51  ;;  %v9224_v42 = vmax.f32 %v9040_v37, %v5329_v13 }
 0x24f   : > { %12344 = vst [vmem:[#allocation113_spill] sm:$0xff] %v9159_v43  ;;  %v9165_v20 = vpop.permute.xlu0 %5626  ;;  %v9175_v43 = vmax.f32 %v8969_v33, %v5314_v44  ;;  %v9192_v33 = vmax.f32 %v8994_v4, %v5308_v18  ;;  %v12354_v4 = vld [vmem:[#allocation56_spill] sm:$0xff]  ;;  %v9215_v21 = vmax.f32 %v9011_v16, %v5318_v40  ;;  %v9229_v51 = vmax.f32 %v9047_v32, %v5328_v23  ;;  %v12357_v16 = vld [vmem:[#allocation58_spill] sm:$0xff] }
 0x250   : > { %12347 = vst [vmem:[#allocation114_spill] sm:$0xff] %v9165_v20  ;;  %5921 = vrot.lane.b32.xlu1 %v6915_v56, %s6640_s7  ;;  %v5333_v20 = vunpack.i.l.bf16 %v12349_v3  ;;  %4442 = vmatmul.mubr.bf16.gmra.mrb[12].mxu1 %v4362_v63  ;;  %v12353_v63 = vld [vmem:[#allocation55_spill] sm:$0xff]  ;;  %v5339_v10 = vunpack.i.h.bf16 %v12354_v4  ;;  %v5338_v6 = vunpack.i.l.bf16 %v12354_v4  ;;  %v5353_v4 = vunpack.i.l.bf16 %v12356_v48  ;;  %v12360_v23 = vld [vmem:[#allocation60_spill] sm:$0xff] }
 0x251   : > { %5916 = vrot.lane.b32.xlu0 %v6925_v34, %s6640_s7  ;;  %v5344_v3 = vunpack.i.h.bf16 %v12353_v63  ;;  %v5343_v60 = vunpack.i.l.bf16 %v12353_v63  ;;  %v5354_v63 = vunpack.i.h.bf16 %v12356_v48  ;;  %v5349_v40 = vunpack.i.h.bf16 %v12357_v16 }
 0x252   : > { %v9186_v25 = vpop.permute.xlu1 %5641  ;;  %v9221_v31 = vmax.f32 %v9025_v36, %v5333_v20  ;;  %v5348_v36 = vunpack.i.l.bf16 %v12357_v16  ;;  %v9246_v32 = vmax.f32 %v9059_v17, %v5339_v10  ;;  %v9249_v20 = vmax.f32 %v9064_v41, %v5338_v6  ;;  %v12363_v6 = vld [vmem:[#allocation61_spill] sm:$0xff] }
 0x253   : > { %12351 = vst [vmem:[#allocation115_spill] sm:$0xff] %v9186_v25  ;;  %v9198_v44 = vpop.permute.xlu0 %5636  ;;  %v9237_v12 = vmax.f32 %v9050_v45, %v5344_v3  ;;  %v9243_v37 = vmax.f32 %v9056_v54, %v5343_v60  ;;  %v5364_v13 = vunpack.i.h.bf16 %v12359_v5  ;;  %v5363_v45 = vunpack.i.l.bf16 %v12359_v5 }
 0x254   : > { %12352 = vst [vmem:[#allocation116_spill] sm:$0xff] %v9198_v44  ;;  %5931 = vrot.lane.b32.xlu1 %v12086_v58, %s6640_s7  ;;  %v5359_v3 = vunpack.i.h.bf16 %v12360_v23  ;;  %v5358_v48 = vunpack.i.l.bf16 %v12360_v23  ;;  %v9260_v54 = vmax.f32 %v9067_v57, %v5354_v63  ;;  %v9263_v17 = vmax.f32 %v9073_v55, %v5353_v4  ;;  %v12365_v4 = vld [vmem:[#allocation63_spill] sm:$0xff] }
 0x255   : > { %5926 = vrot.lane.b32.xlu0 %v12088_v7, %s6640_s7  ;;  %v9266_v41 = vmax.f32 %v9081_v50, %v5349_v40  ;;  %v9271_v10 = vmax.f32 %v9096_v30, %v5348_v36  ;;  %v5374_v5 = vunpack.i.h.bf16 %v12363_v6  ;;  %v5373_v23 = vunpack.i.l.bf16 %v12363_v6 }
 0x256   : > { %v9226_v18 = vpop.permute.xlu1 %5651  ;;  %v9279_v57 = vmax.f32 %v9099_v28, %v5364_v13  ;;  %v9285_v50 = vmax.f32 %v9110_v61, %v5363_v45  ;;  %v9288_v30 = vmax.f32 %v9113_v29, %v5359_v3  ;;  %v9291_v63 = vmax.f32 %v9118_v27, %v5358_v48  ;;  %v12367_v13 = vld [vmem:[#allocation64_spill] sm:$0xff]  ;;  %v12369_v45 = vld [vmem:[#allocation6_spill] sm:$0xff]  ;;  %v12370_v48 = vld [vmem:[#allocation65_spill] sm:$0xff] }
 0x257   : > { %12355 = vst [vmem:[#allocation117_spill] sm:$0xff] %v9226_v18  ;;  %v9234_v44 = vpop.permute.xlu0 %5646  ;;  %v5384_v40 = vunpack.i.h.bf16 %v12365_v4  ;;  %v5383_v28 = vunpack.i.l.bf16 %v12365_v4  ;;  %v5378_v6 = vunpack.i.l.bf16 %v12367_v13  ;;  %v9302_v61 = vmax.f32 %v9121_v49, %v5374_v5  ;;  %v12372_v49 = vld [vmem:[#allocation7_spill] sm:$0xff] }
 0x258   : > { %12358 = vst [vmem:[#allocation118_spill] sm:$0xff] %v9234_v44  ;;  %5941 = vrot.lane.b32.xlu1 %v12092_v22, %s6641_s21  ;;  %v12364_v44 = vld [vmem:[#allocation62_spill] sm:$0xff]  ;;  %v9305_v29 = vmax.f32 %v9124_v8, %v5373_v23  ;;  %v5394_v4 = vunpack.i.h.bf16 %v12370_v48 }
 0x259   : > { %5936 = vrot.lane.b32.xlu0 %v12280_v19, %s6641_s21  ;;  %v5368_v55 = vunpack.i.l.bf16 %v12364_v44  ;;  %v9321_v8 = vmax.f32 %v9141_v35, %v5384_v40  ;;  %v9327_v5 = vmax.f32 %v9154_v24, %v5383_v28  ;;  %v9333_v23 = vmax.f32 %v9172_v14, %v5378_v6  ;;  %v12376_v40 = vld [vmem:[#allocation68_spill] sm:$0xff]  ;;  %v12378_v28 = vld [vmem:[#allocation9_spill] sm:$0xff] }
 0x25a   : > { %v9257_v16 = vpop.permute.xlu1 %5661  ;;  %v5399_v25 = vunpack.i.h.bf16 %v12376_v40  ;;  %v9344_v24 = vmax.f32 %v9175_v43, %v5394_v4  ;;  %v12379_v6 = vld [vmem:[#allocation69_spill] sm:$0xff] }
 0x25b   : > { %12361 = vst [vmem:[#allocation119_spill] sm:$0xff] %v9257_v16  ;;  %v9268_v60 = vpop.permute.xlu0 %5656  ;;  %v5369_v16 = vunpack.i.h.bf16 %v12364_v44  ;;  %v5379_v44 = vunpack.i.h.bf16 %v12367_v13  ;;  %v9313_v3 = vmax.f32 %v9138_v0, %v5368_v55  ;;  %v5393_v13 = vunpack.i.l.bf16 %v12370_v48  ;;  %v12374_v55 = vld [vmem:[#allocation67_spill] sm:$0xff] }
 0x25c   : > { %12362 = vst [vmem:[#allocation120_spill] sm:$0xff] %v9268_v60  ;;  %5951 = vrot.lane.b32.xlu1 %v12322_v47, %s6641_s21  ;;  %v5404_v48 = vunpack.i.h.bf16 %v12374_v55  ;;  %v5403_v35 = vunpack.i.l.bf16 %v12374_v55  ;;  %v5414_v55 = vunpack.i.h.bf16 %v12379_v6 }
 0x25d   : > { %5946 = vrot.lane.b32.xlu0 %v12286_v1, %s6641_s21  ;;  %v9308_v27 = vmax.f32 %v9135_v59, %v5369_v16  ;;  %v9330_v0 = vmax.f32 %v9157_v15, %v5379_v44  ;;  %v9347_v15 = vmax.f32 %v9178_v46, %v5393_v13 }
 0x25e   : > { %v9294_v36 = vpop.permute.xlu1 %5671  ;;  %v9363_v46 = vmax.f32 %v9195_v11, %v5404_v48  ;;  %v9369_v4 = vmax.f32 %v9201_v9, %v5403_v35  ;;  %v12384_v48 = vld [vmem:[#allocation72_spill] sm:$0xff] }
 0x25f   : > { %12366 = vst [vmem:[#allocation121_spill] sm:$0xff] %v9294_v36  ;;  %v9299_v60 = vpop.permute.xlu0 %5666 }
 0x260   : > { %12368 = vst [vmem:[#allocation122_spill] sm:$0xff] %v9299_v60  ;;  %5961 = vrot.lane.b32.xlu1 %v12369_v45, %s6641_s21  ;;  %v12371_v60 = vld [vmem:[#allocation66_spill] sm:$0xff] }
 0x261   : > { %v5389_v36 = vunpack.i.h.bf16 %v12371_v60  ;;  %5956 = vrot.lane.b32.xlu0 %v12372_v49, %s6641_s21  ;;  %v5388_v59 = vunpack.i.l.bf16 %v12371_v60  ;;  %v5398_v60 = vunpack.i.l.bf16 %v12376_v40  ;;  %v5413_v40 = vunpack.i.l.bf16 %v12379_v6 }
 0x262   : > { %v9324_v16 = vpop.permute.xlu1 %5681 }
 0x263   : > { %12373 = vst [vmem:[#allocation123_spill] sm:$0xff] %v9324_v16  ;;  %v9336_v18 = vpop.permute.xlu0 %5676  ;;  %v12377_v16 = vld [vmem:[#allocation8_spill] sm:$0xff]  ;;  %v9350_v14 = vmax.f32 %v9189_v2, %v5389_v36  ;;  %v9355_v44 = vmax.f32 %v9192_v33, %v5388_v59  ;;  %v9372_v33 = vmax.f32 %v9204_v53, %v5399_v25  ;;  %v9375_v13 = vmax.f32 %v9215_v21, %v5398_v60  ;;  %v12383_v59 = vld [vmem:[#allocation71_spill] sm:$0xff]  ;;  %v12386_v60 = vld [vmem:[#allocation73_spill] sm:$0xff] }
 0x264   : > { %12375 = vst [vmem:[#allocation124_spill] sm:$0xff] %v9336_v18  ;;  %5971 = vrot.lane.b32.xlu1 %v12377_v16, %s6641_s21  ;;  %v12380_v18 = vld [vmem:[#allocation70_spill] sm:$0xff]  ;;  %v5424_v6 = vunpack.i.h.bf16 %v12383_v59  ;;  %v5423_v11 = vunpack.i.l.bf16 %v12383_v59  ;;  %v9386_v25 = vmax.f32 %v9218_v38, %v5414_v55  ;;  %v9389_v9 = vmax.f32 %v9221_v31, %v5413_v40  ;;  %v12389_v55 = vld [vmem:[#allocation75_spill] sm:$0xff] }
 0x265   : > { %5966 = vrot.lane.b32.xlu0 %v12378_v28, %s6641_s21  ;;  %v5409_v16 = vunpack.i.h.bf16 %v12380_v18  ;;  %v5408_v2 = vunpack.i.l.bf16 %v12380_v18  ;;  %v5419_v18 = vunpack.i.h.bf16 %v12384_v48  ;;  %v5434_v59 = vunpack.i.h.bf16 %v12386_v60 }
 0x266   : > { %v9360_v43 = vpop.permute.xlu1 %5691  ;;  %v9405_v38 = vmax.f32 %v9237_v12, %v5424_v6  ;;  %v5444_v40 = vunpack.i.h.bf16 %v12389_v55  ;;  %v5443_v12 = vunpack.i.l.bf16 %v12389_v55 }
 0x267   : > { %12381 = vst [vmem:[#allocation125_spill] sm:$0xff] %v9360_v43  ;;  %v9366_v36 = vpop.permute.xlu0 %5686  ;;  %v9392_v53 = vmax.f32 %v9224_v42, %v5409_v16  ;;  %v9397_v35 = vmax.f32 %v9229_v51, %v5408_v2  ;;  %v12387_v43 = vld [vmem:[#allocation74_spill] sm:$0xff]  ;;  %v9411_v42 = vmax.f32 %v9243_v37, %v5423_v11  ;;  %v9414_v51 = vmax.f32 %v9246_v32, %v5419_v18  ;;  %v12393_v18 = vld [vmem:[#allocation77_spill] sm:$0xff] }
 0x268   : > { %12382 = vst [vmem:[#allocation126_spill] sm:$0xff] %v9366_v36  ;;  %5981 = vrot.lane.b32.xlu1 %v6851_v52, %s6641_s21  ;;  %v5418_v36 = vunpack.i.l.bf16 %v12384_v48  ;;  %v5433_v48 = vunpack.i.l.bf16 %v12386_v60  ;;  %v5428_v31 = vunpack.i.l.bf16 %v12387_v43  ;;  %v9428_v37 = vmax.f32 %v9260_v54, %v5434_v59  ;;  %v12395_v59 = vld [vmem:[#allocation79_spill] sm:$0xff] }
 0x269   : > { %5976 = vrot.lane.b32.xlu0 %v12260_v39, %s6641_s21  ;;  %v5429_v39 = vunpack.i.h.bf16 %v12387_v43  ;;  %v12390_v43 = vld [vmem:[#allocation76_spill] sm:$0xff]  ;;  %v5454_v55 = vunpack.i.h.bf16 %v12393_v18  ;;  %v9447_v54 = vmax.f32 %v9279_v57, %v5444_v40  ;;  %v5463_v57 = vunpack.i.l.bf16 %v12395_v59 }
 0x26a   : > { %v9394_v21 = vpop.permute.xlu1 %5701  ;;  %v9417_v16 = vmax.f32 %v9249_v20, %v5418_v36  ;;  %v5439_v2 = vunpack.i.h.bf16 %v12390_v43  ;;  %v5438_v6 = vunpack.i.l.bf16 %v12390_v43  ;;  %v9431_v32 = vmax.f32 %v9263_v17, %v5433_v48  ;;  %v12397_v40 = vld [vmem:[#allocation80_spill] sm:$0xff] }
 0x26b   : > { %12385 = vst [vmem:[#allocation127_spill] sm:$0xff] %v9394_v21  ;;  %v9402_v52 = vpop.permute.xlu0 %5696  ;;  %v9434_v20 = vmax.f32 %v9266_v41, %v5429_v39  ;;  %v9439_v11 = vmax.f32 %v9271_v10, %v5428_v31  ;;  %v5453_v43 = vunpack.i.l.bf16 %v12393_v18  ;;  %v9453_v17 = vmax.f32 %v9285_v50, %v5443_v12 }
 0x26c   : > { %12388 = vst [vmem:[#allocation128_spill] sm:$0xff] %v9402_v52  ;;  %5991 = vrot.lane.b32.xlu1 %v6883_v62, %s6641_s21  ;;  %v12394_v52 = vld [vmem:[#allocation78_spill] sm:$0xff]  ;;  %v9456_v41 = vmax.f32 %v9288_v30, %v5439_v2  ;;  %v9459_v10 = vmax.f32 %v9291_v63, %v5438_v6  ;;  %v5464_v48 = vunpack.i.h.bf16 %v12395_v59  ;;  %v5458_v18 = vunpack.i.l.bf16 %v12397_v40  ;;  %v12399_v2 = vld [vmem:[#allocation81_spill] sm:$0xff] }
 0x26d   : > { %5986 = vrot.lane.b32.xlu0 %v12343_v26, %s6641_s21  ;;  %v5448_v39 = vunpack.i.l.bf16 %v12394_v52  ;;  %v9470_v50 = vmax.f32 %v9302_v61, %v5454_v55  ;;  %v9473_v30 = vmax.f32 %v9305_v29, %v5453_v43  ;;  %v5474_v6 = vunpack.i.h.bf16 %v12399_v2  ;;  %v12402_v43 = vld [vmem:[#allocation83_spill] sm:$0xff] }
 0x26e   : > { %v9425_v60 = vpop.permute.xlu1 %5711  ;;  %v5473_v59 = vunpack.i.l.bf16 %v12399_v2  ;;  %v9489_v61 = vmax.f32 %v9321_v8, %v5464_v48  ;;  %v9501_v55 = vmax.f32 %v9333_v23, %v5458_v18  ;;  %v5483_v8 = vunpack.i.l.bf16 %v12402_v43  ;;  %v12404_v48 = vld [vmem:[#allocation84_spill] sm:$0xff] }
 0x26f   : > { %12391 = vst [vmem:[#allocation129_spill] sm:$0xff] %v9425_v60  ;;  %v9436_v36 = vpop.permute.xlu0 %5706  ;;  %v5449_v60 = vunpack.i.h.bf16 %v12394_v52  ;;  %v5459_v52 = vunpack.i.h.bf16 %v12397_v40  ;;  %v9481_v12 = vmax.f32 %v9313_v3, %v5448_v39  ;;  %v12400_v40 = vld [vmem:[#allocation82_spill] sm:$0xff]  ;;  %v5484_v39 = vunpack.i.h.bf16 %v12402_v43 }
 0x270   : > { %12392 = vst [vmem:[#allocation130_spill] sm:$0xff] %v9436_v36  ;;  %6001 = vrot.lane.b32.xlu1 %v6915_v56, %s6641_s21  ;;  %v5468_v29 = vunpack.i.l.bf16 %v12400_v40 }
 0x271   : > { %5996 = vrot.lane.b32.xlu0 %v6925_v34, %s6641_s21  ;;  %v9476_v63 = vmax.f32 %v9308_v27, %v5449_v60  ;;  %v9495_v60 = vmax.f32 %v9327_v5, %v5463_v57  ;;  %v9498_v3 = vmax.f32 %v9330_v0, %v5459_v52  ;;  %v9512_v5 = vmax.f32 %v9344_v24, %v5474_v6  ;;  %v12405_v52 = vld [vmem:[#allocation85_spill] sm:$0xff] }
 0x272   : > { %v9462_v31 = vpop.permute.xlu1 %5721  ;;  %v9515_v0 = vmax.f32 %v9347_v15, %v5473_v59  ;;  %v9523_v57 = vmax.f32 %v9355_v44, %v5468_v29  ;;  %v5494_v18 = vunpack.i.h.bf16 %v12405_v52  ;;  %v5493_v43 = vunpack.i.l.bf16 %v12405_v52  ;;  %v12409_v29 = vld [vmem:[#allocation87_spill] sm:$0xff] }
 0x273   : > { %12396 = vst [vmem:[#allocation131_spill] sm:$0xff] %v9462_v31  ;;  %v9467_v36 = vpop.permute.xlu0 %5716  ;;  %v5479_v31 = vunpack.i.h.bf16 %v12404_v48  ;;  %v9531_v15 = vmax.f32 %v9363_v46, %v5484_v39  ;;  %v9537_v6 = vmax.f32 %v9369_v4, %v5483_v8  ;;  %v5504_v52 = vunpack.i.h.bf16 %v12409_v29  ;;  %v12410_v39 = vld [vmem:[#allocation88_spill] sm:$0xff] }
 0x274   : > { %12398 = vst [vmem:[#allocation132_spill] sm:$0xff] %v9467_v36  ;;  %6011 = vrot.lane.b32.xlu1 %v12086_v58, %s6641_s21  ;;  %v5469_v36 = vunpack.i.h.bf16 %v12400_v40  ;;  %v5478_v40 = vunpack.i.l.bf16 %v12404_v48  ;;  %v12406_v48 = vld [vmem:[#allocation86_spill] sm:$0xff]  ;;  %v5503_v46 = vunpack.i.l.bf16 %v12409_v29  ;;  %v9554_v4 = vmax.f32 %v9386_v25, %v5494_v18  ;;  %v12415_v18 = vld [vmem:[#allocation91_spill] sm:$0xff] }
 0x275   : > { %6006 = vrot.lane.b32.xlu0 %v12088_v7, %s6641_s21  ;;  %v9540_v44 = vmax.f32 %v9372_v33, %v5479_v31  ;;  %v9557_v33 = vmax.f32 %v9389_v9, %v5493_v43  ;;  %v9573_v25 = vmax.f32 %v9405_v38, %v5504_v52  ;;  %v5524_v43 = vunpack.i.h.bf16 %v12415_v18 }
 0x276   : > { %v9492_v27 = vpop.permute.xlu1 %5731  ;;  %v9518_v23 = vmax.f32 %v9350_v14, %v5469_v36  ;;  %v5488_v14 = vunpack.i.l.bf16 %v12406_v48  ;;  %v9543_v59 = vmax.f32 %v9375_v13, %v5478_v40  ;;  %v12412_v40 = vld [vmem:[#allocation89_spill] sm:$0xff]  ;;  %v5523_v38 = vunpack.i.l.bf16 %v12415_v18 }
 0x277   : > { %12401 = vst [vmem:[#allocation133_spill] sm:$0xff] %v9492_v27  ;;  %v9504_v2 = vpop.permute.xlu0 %5726  ;;  %v5514_v29 = vunpack.i.h.bf16 %v12412_v40 }
 0x278   : > { %12403 = vst [vmem:[#allocation134_spill] sm:$0xff] %v9504_v2  ;;  %6021 = vrot.lane.b32.xlu1 %v12092_v22, %s6642_s8  ;;  %v5489_v2 = vunpack.i.h.bf16 %v12406_v48  ;;  %v5499_v48 = vunpack.i.h.bf16 %v12410_v39  ;;  %v9565_v8 = vmax.f32 %v9397_v35, %v5488_v14 }
 0x279   : > { %6016 = vrot.lane.b32.xlu0 %v12280_v19, %s6642_s8 }
 0x27a   : > { %v9528_v24 = vpop.permute.xlu1 %5741  ;;  %v9560_v13 = vmax.f32 %v9392_v53, %v5489_v2  ;;  %v9579_v53 = vmax.f32 %v9411_v42, %v5503_v46  ;;  %v9582_v35 = vmax.f32 %v9414_v51, %v5499_v48  ;;  %v9596_v42 = vmax.f32 %v9428_v37, %v5514_v29  ;;  %v12419_v48 = vld [vmem:[#allocation93_spill] sm:$0xff]  ;;  %v12421_v37 = vld [vmem:[#allocation8_spill] sm:$0xff] }
 0x27b   : > { %12407 = vst [vmem:[#allocation135_spill] sm:$0xff] %v9528_v24  ;;  %v9534_v36 = vpop.permute.xlu0 %5736  ;;  %v12413_v24 = vld [vmem:[#allocation90_spill] sm:$0xff]  ;;  %v5534_v18 = vunpack.i.h.bf16 %v12419_v48 }
 0x27c   : > { %12408 = vst [vmem:[#allocation136_spill] sm:$0xff] %v9534_v36  ;;  %6031 = vrot.lane.b32.xlu1 %v12322_v47, %s6642_s8  ;;  %v5498_v36 = vunpack.i.l.bf16 %v12410_v39  ;;  %v5513_v39 = vunpack.i.l.bf16 %v12412_v40  ;;  %v5509_v27 = vunpack.i.h.bf16 %v12413_v24  ;;  %v5508_v9 = vunpack.i.l.bf16 %v12413_v24  ;;  %v12416_v24 = vld [vmem:[#allocation92_spill] sm:$0xff] }
 0x27d   : > { %6026 = vrot.lane.b32.xlu0 %v12286_v1, %s6642_s8  ;;  %v5519_v14 = vunpack.i.h.bf16 %v12416_v24  ;;  %v5518_v52 = vunpack.i.l.bf16 %v12416_v24  ;;  %v5533_v24 = vunpack.i.l.bf16 %v12419_v48 }
 0x27e   : > { %v9562_v31 = vpop.permute.xlu1 %5751  ;;  %v9585_v2 = vmax.f32 %v9417_v16, %v5498_v36  ;;  %v9599_v51 = vmax.f32 %v9431_v32, %v5513_v39  ;;  %v9602_v16 = vmax.f32 %v9434_v20, %v5509_v27  ;;  %v9607_v46 = vmax.f32 %v9439_v11, %v5508_v9  ;;  %v12422_v39 = vld [vmem:[#allocation95_spill] sm:$0xff] }
 0x27f   : > { %12411 = vst [vmem:[#allocation137_spill] sm:$0xff] %v9562_v31  ;;  %v9570_v21 = vpop.permute.xlu0 %5746  ;;  %v9615_v32 = vmax.f32 %v9447_v54, %v5524_v43  ;;  %v9621_v11 = vmax.f32 %v9453_v17, %v5523_v38  ;;  %v9624_v27 = vmax.f32 %v9456_v41, %v5519_v14  ;;  %v9627_v29 = vmax.f32 %v9459_v10, %v5518_v52  ;;  %v12424_v43 = vld [vmem:[#allocation96_spill] sm:$0xff]  ;;  %v12426_v38 = vld [vmem:[#allocation10_spill] sm:$0xff]  ;;  %v12427_v52 = vld [vmem:[#allocation97_spill] sm:$0xff] }
 0x280   : > { %12414 = vst [vmem:[#allocation138_spill] sm:$0xff] %v9570_v21  ;;  %6041 = vrot.lane.b32.xlu1 %v12369_v45, %s6642_s8  ;;  %v12420_v21 = vld [vmem:[#allocation94_spill] sm:$0xff]  ;;  %v5544_v9 = vunpack.i.h.bf16 %v12422_v39  ;;  %v5543_v54 = vunpack.i.l.bf16 %v12422_v39  ;;  %v9638_v17 = vmax.f32 %v9470_v50, %v5534_v18  ;;  %v9641_v41 = vmax.f32 %v9473_v30, %v5533_v24  ;;  %v12429_v50 = vld [vmem:[#allocation11_spill] sm:$0xff] }
 0x281   : > { %6036 = vrot.lane.b32.xlu0 %v12372_v49, %s6642_s8  ;;  %v5528_v20 = vunpack.i.l.bf16 %v12420_v21  ;;  %v5554_v39 = vunpack.i.h.bf16 %v12427_v52 }
 0x282   : > { %v9593_v40 = vpop.permute.xlu1 %5761  ;;  %v9657_v30 = vmax.f32 %v9489_v61, %v5544_v9  ;;  %v9663_v18 = vmax.f32 %v9495_v60, %v5543_v54  ;;  %v12433_v9 = vld [vmem:[#allocation100_spill] sm:$0xff]  ;;  %v12434_v54 = vld [vmem:[#allocation101_spill] sm:$0xff] }
 0x283   : > { %12417 = vst [vmem:[#allocation13_spill] sm:$0xff] %v9593_v40  ;;  %v9604_v36 = vpop.permute.xlu0 %5756  ;;  %v5529_v40 = vunpack.i.h.bf16 %v12420_v21  ;;  %v5539_v21 = vunpack.i.h.bf16 %v12424_v43  ;;  %v9649_v14 = vmax.f32 %v9481_v12, %v5528_v20  ;;  %v12431_v20 = vld [vmem:[#allocation99_spill] sm:$0xff]  ;;  %v9680_v60 = vmax.f32 %v9512_v5, %v5554_v39 }
 0x284   : > { %12418 = vst [vmem:[#allocation12_spill] sm:$0xff] %v9604_v36  ;;  %6051 = vrot.lane.b32.xlu1 %v12421_v37, %s6642_s8  ;;  %v5538_v36 = vunpack.i.l.bf16 %v12424_v43  ;;  %v5553_v43 = vunpack.i.l.bf16 %v12427_v52  ;;  %v5564_v52 = vunpack.i.h.bf16 %v12431_v20  ;;  %v5563_v61 = vunpack.i.l.bf16 %v12431_v20 }
 0x285   : > { %6046 = vrot.lane.b32.xlu0 %v12378_v28, %s6642_s8  ;;  %v9644_v10 = vmax.f32 %v9476_v63, %v5529_v40  ;;  %v9666_v12 = vmax.f32 %v9498_v3, %v5539_v21  ;;  %v5574_v21 = vunpack.i.h.bf16 %v12434_v54  ;;  %v5573_v20 = vunpack.i.l.bf16 %v12434_v54 }
 0x286   : > { %v9630_v48 = vpop.permute.xlu1 %5771  ;;  %v9669_v24 = vmax.f32 %v9501_v55, %v5538_v36  ;;  %v9683_v3 = vmax.f32 %v9515_v0, %v5553_v43  ;;  %v9699_v0 = vmax.f32 %v9531_v15, %v5564_v52  ;;  %v9705_v39 = vmax.f32 %v9537_v6, %v5563_v61  ;;  %v12439_v52 = vld [vmem:[#allocation104_spill] sm:$0xff] }
 0x287   : > { %12423 = vst [vmem:[#allocation24_spill] sm:$0xff] %v9630_v48  ;;  %v9635_v31 = vpop.permute.xlu0 %5766  ;;  %v9722_v6 = vmax.f32 %v9554_v4, %v5574_v21  ;;  %v12444_v21 = vld [vmem:[#allocation107_spill] sm:$0xff] }
 0x288   : > { %12425 = vst [vmem:[#allocation17_spill] sm:$0xff] %v9635_v31  ;;  %6061 = vrot.lane.b32.xlu1 %v12426_v38, %s6642_s8  ;;  %v12428_v31 = vld [vmem:[#allocation98_spill] sm:$0xff] }
 0x289   : > { %v5549_v48 = vunpack.i.h.bf16 %v12428_v31  ;;  %6056 = vrot.lane.b32.xlu0 %v12429_v50, %s6642_s8  ;;  %v5548_v63 = vunpack.i.l.bf16 %v12428_v31  ;;  %v5559_v50 = vunpack.i.h.bf16 %v12433_v9  ;;  %v5558_v31 = vunpack.i.l.bf16 %v12433_v9  ;;  %v12435_v9 = vld [vmem:[#allocation102_spill] sm:$0xff] }
 0x28a   : > { %v9660_v40 = vpop.permute.xlu1 %5781 }
 0x28b   : > { %12430 = vst [vmem:[#allocation16_spill] sm:$0xff] %v9660_v40  ;;  %v9672_v38 = vpop.permute.xlu0 %5776  ;;  %v9686_v55 = vmax.f32 %v9518_v23, %v5549_v48  ;;  %v9691_v36 = vmax.f32 %v9523_v57, %v5548_v63  ;;  %v5568_v23 = vunpack.i.l.bf16 %v12435_v9  ;;  %v9708_v57 = vmax.f32 %v9540_v44, %v5559_v50  ;;  %v12438_v63 = vld [vmem:[#allocation103_spill] sm:$0xff] }
 0x28c   : > { %12432 = vst [vmem:[#allocation19_spill] sm:$0xff] %v9672_v38  ;;  %6071 = vrot.lane.b32.xlu1 %v6883_v62, %s6642_s8  ;;  %v5569_v38 = vunpack.i.h.bf16 %v12435_v9  ;;  %v9711_v43 = vmax.f32 %v9543_v59, %v5558_v31  ;;  %v5584_v54 = vunpack.i.h.bf16 %v12438_v63  ;;  %v5583_v15 = vunpack.i.l.bf16 %v12438_v63  ;;  %v12441_v31 = vld [vmem:[#allocation105_spill] sm:$0xff] }
 0x28d   : > { %6066 = vrot.lane.b32.xlu0 %v12343_v26, %s6642_s8  ;;  %v5579_v9 = vunpack.i.h.bf16 %v12439_v52  ;;  %v9725_v44 = vmax.f32 %v9557_v33, %v5573_v20  ;;  %v9733_v61 = vmax.f32 %v9565_v8, %v5568_v23  ;;  %v5594_v63 = vunpack.i.h.bf16 %v12441_v31 }
 0x28e   : > { %v9696_v5 = vpop.permute.xlu1 %5791  ;;  %v9728_v59 = vmax.f32 %v9560_v13, %v5569_v38  ;;  %v9741_v4 = vmax.f32 %v9573_v25, %v5584_v54  ;;  %v9747_v13 = vmax.f32 %v9579_v53, %v5583_v15  ;;  %v5604_v20 = vunpack.i.h.bf16 %v12444_v21 }
 0x28f   : > { %12436 = vst [vmem:[#allocation18_spill] sm:$0xff] %v9696_v5  ;;  %v9702_v48 = vpop.permute.xlu0 %5786  ;;  %v12442_v5 = vld [vmem:[#allocation106_spill] sm:$0xff]  ;;  %v9750_v8 = vmax.f32 %v9582_v35, %v5579_v9  ;;  %v5603_v25 = vunpack.i.l.bf16 %v12444_v21  ;;  %v9764_v53 = vmax.f32 %v9596_v42, %v5594_v63  ;;  %v12448_v9 = vld [vmem:[#allocation109_spill] sm:$0xff]  ;;  %v12450_v63 = vld [vmem:[#allocation111_spill] sm:$0xff] }
 0x290   : > { %12437 = vst [vmem:[#allocation25_spill] sm:$0xff] %v9702_v48  ;;  %6081 = vrot.lane.b32.xlu1 %v6915_v56, %s6642_s8  ;;  %v5578_v48 = vunpack.i.l.bf16 %v12439_v52  ;;  %v5593_v52 = vunpack.i.l.bf16 %v12441_v31  ;;  %v5589_v40 = vunpack.i.h.bf16 %v12442_v5  ;;  %v5588_v33 = vunpack.i.l.bf16 %v12442_v5  ;;  %v12445_v5 = vld [vmem:[#allocation108_spill] sm:$0xff] }
 0x291   : > { %6076 = vrot.lane.b32.xlu0 %v6925_v34, %s6642_s8  ;;  %v5599_v23 = vunpack.i.h.bf16 %v12445_v5  ;;  %v5598_v54 = vunpack.i.l.bf16 %v12445_v5  ;;  %v5614_v21 = vunpack.i.h.bf16 %v12448_v9  ;;  %v5613_v5 = vunpack.i.l.bf16 %v12448_v9 }
 0x292   : > { %v9730_v50 = vpop.permute.xlu1 %5801  ;;  %v9753_v38 = vmax.f32 %v9585_v2, %v5578_v48  ;;  %v9767_v35 = vmax.f32 %v9599_v51, %v5593_v52  ;;  %v9770_v2 = vmax.f32 %v9602_v16, %v5589_v40  ;;  %v9775_v15 = vmax.f32 %v9607_v46, %v5588_v33 }
 0x293   : > { %12440 = vst [vmem:[#allocation26_spill] sm:$0xff] %v9730_v50  ;;  %v9738_v34 = vpop.permute.xlu0 %5796  ;;  %v9783_v42 = vmax.f32 %v9615_v32, %v5604_v20  ;;  %v9789_v16 = vmax.f32 %v9621_v11, %v5603_v25  ;;  %v9792_v46 = vmax.f32 %v9624_v27, %v5599_v23  ;;  %v9795_v40 = vmax.f32 %v9627_v29, %v5598_v54  ;;  %v12452_v20 = vld [vmem:[#allocation112_spill] sm:$0xff]  ;;  %v12454_v23 = vld [vmem:[#allocation113_spill] sm:$0xff] }
 0x294   : > { %12443 = vst [vmem:[#allocation27_spill] sm:$0xff] %v9738_v34  ;;  %6091 = vrot.lane.b32.xlu1 %v12086_v58, %s6642_s8  ;;  %v12449_v34 = vld [vmem:[#allocation110_spill] sm:$0xff]  ;;  %v5624_v52 = vunpack.i.h.bf16 %v12450_v63  ;;  %v5623_v32 = vunpack.i.l.bf16 %v12450_v63  ;;  %v5618_v9 = vunpack.i.l.bf16 %v12452_v20  ;;  %v9806_v11 = vmax.f32 %v9638_v17, %v5614_v21 }
 0x295   : > { %6086 = vrot.lane.b32.xlu0 %v12088_v7, %s6642_s8  ;;  %v5608_v51 = vunpack.i.l.bf16 %v12449_v34  ;;  %v9809_v27 = vmax.f32 %v9641_v41, %v5613_v5  ;;  %v5634_v54 = vunpack.i.h.bf16 %v12454_v23  ;;  %v5633_v63 = vunpack.i.l.bf16 %v12454_v23  ;;  %v12457_v5 = vld [vmem:[#allocation115_spill] sm:$0xff] }
 0x296   : > { %v9761_v31 = vpop.permute.xlu1 %5811  ;;  %v9825_v17 = vmax.f32 %v9657_v30, %v5624_v52  ;;  %v9837_v21 = vmax.f32 %v9669_v24, %v5618_v9  ;;  %v5643_v30 = vunpack.i.l.bf16 %v12457_v5  ;;  %v12459_v52 = vld [vmem:[#allocation116_spill] sm:$0xff] }
 0x297   : > { %12446 = vst [vmem:[#allocation28_spill] sm:$0xff] %v9761_v31  ;;  %v9772_v48 = vpop.permute.xlu0 %5806  ;;  %v5609_v31 = vunpack.i.h.bf16 %v12449_v34  ;;  %v5619_v34 = vunpack.i.h.bf16 %v12452_v20  ;;  %v9817_v25 = vmax.f32 %v9649_v14, %v5608_v51  ;;  %v12455_v20 = vld [vmem:[#allocation114_spill] sm:$0xff]  ;;  %v5644_v51 = vunpack.i.h.bf16 %v12457_v5 }
 0x298   : > { %12447 = vst [vmem:[#allocation29_spill] sm:$0xff] %v9772_v48  ;;  %6101 = vrot.lane.b32.xlu1 %v12092_v22, %s6643_s9  ;;  %v5628_v41 = vunpack.i.l.bf16 %v12455_v20 }
 0x299   : > { %6096 = vrot.lane.b32.xlu0 %v12280_v19, %s6643_s9  ;;  %v9812_v29 = vmax.f32 %v9644_v10, %v5609_v31  ;;  %v9831_v31 = vmax.f32 %v9663_v18, %v5623_v32  ;;  %v9834_v14 = vmax.f32 %v9666_v12, %v5619_v34  ;;  %v9848_v18 = vmax.f32 %v9680_v60, %v5634_v54  ;;  %v12460_v34 = vld [vmem:[#allocation117_spill] sm:$0xff] }
 0x29a   : > { %v9798_v33 = vpop.permute.xlu1 %5821  ;;  %v9851_v12 = vmax.f32 %v9683_v3, %v5633_v63  ;;  %v9859_v32 = vmax.f32 %v9691_v36, %v5628_v41  ;;  %v5654_v9 = vunpack.i.h.bf16 %v12460_v34  ;;  %v5653_v5 = vunpack.i.l.bf16 %v12460_v34  ;;  %v12464_v41 = vld [vmem:[#allocation119_spill] sm:$0xff] }
 0x29b   : > { %12451 = vst [vmem:[#allocation30_spill] sm:$0xff] %v9798_v33  ;;  %v9803_v48 = vpop.permute.xlu0 %5816  ;;  %v5639_v33 = vunpack.i.h.bf16 %v12459_v52  ;;  %v9867_v3 = vmax.f32 %v9699_v0, %v5644_v51  ;;  %v9873_v54 = vmax.f32 %v9705_v39, %v5643_v30  ;;  %v5664_v34 = vunpack.i.h.bf16 %v12464_v41  ;;  %v12465_v51 = vld [vmem:[#allocation120_spill] sm:$0xff] }
 0x29c   : > { %12453 = vst [vmem:[#allocation31_spill] sm:$0xff] %v9803_v48  ;;  %6111 = vrot.lane.b32.xlu1 %v12322_v47, %s6643_s9  ;;  %v5629_v48 = vunpack.i.h.bf16 %v12455_v20  ;;  %v5638_v20 = vunpack.i.l.bf16 %v12459_v52  ;;  %v12461_v52 = vld [vmem:[#allocation118_spill] sm:$0xff]  ;;  %v5663_v0 = vunpack.i.l.bf16 %v12464_v41  ;;  %v9890_v39 = vmax.f32 %v9722_v6, %v5654_v9 }
 0x29d   : > { %6106 = vrot.lane.b32.xlu0 %v12286_v1, %s6643_s9  ;;  %v9876_v36 = vmax.f32 %v9708_v57, %v5639_v33  ;;  %v9893_v57 = vmax.f32 %v9725_v44, %v5653_v5  ;;  %v9909_v6 = vmax.f32 %v9741_v4, %v5664_v34  ;;  %v12471_v5 = vld [vmem:[#allocation123_spill] sm:$0xff] }
 0x29e   : > { %v9828_v10 = vpop.permute.xlu1 %5831  ;;  %v9854_v24 = vmax.f32 %v9686_v55, %v5629_v48  ;;  %v5648_v55 = vunpack.i.l.bf16 %v12461_v52  ;;  %v9879_v63 = vmax.f32 %v9711_v43, %v5638_v20  ;;  %v12467_v20 = vld [vmem:[#allocation121_spill] sm:$0xff]  ;;  %v5683_v4 = vunpack.i.l.bf16 %v12471_v5 }
 0x29f   : > { %12456 = vst [vmem:[#allocation32_spill] sm:$0xff] %v9828_v10  ;;  %v9840_v23 = vpop.permute.xlu0 %5826  ;;  %v5674_v41 = vunpack.i.h.bf16 %v12467_v20 }
 0x2a0   : > { %12458 = vst [vmem:[#allocation33_spill] sm:$0xff] %v9840_v23  ;;  %6121 = vrot.lane.b32.xlu1 %v12369_v45, %s6643_s9  ;;  %v5649_v23 = vunpack.i.h.bf16 %v12461_v52  ;;  %v5659_v52 = vunpack.i.h.bf16 %v12465_v51  ;;  %v9901_v30 = vmax.f32 %v9733_v61, %v5648_v55  ;;  %v5684_v55 = vunpack.i.h.bf16 %v12471_v5 }
 0x2a1   : > { %6116 = vrot.lane.b32.xlu0 %v12372_v49, %s6643_s9 }
 0x2a2   : > { %v9864_v60 = vpop.permute.xlu1 %5841  ;;  %v9896_v43 = vmax.f32 %v9728_v59, %v5649_v23  ;;  %v12470_v59 = vld [vmem:[#allocation10_spill] sm:$0xff]  ;;  %v9915_v23 = vmax.f32 %v9747_v13, %v5663_v0  ;;  %v9918_v61 = vmax.f32 %v9750_v8, %v5659_v52  ;;  %v9932_v13 = vmax.f32 %v9764_v53, %v5674_v41  ;;  %v12476_v52 = vld [vmem:[#allocation125_spill] sm:$0xff]  ;;  %v12478_v41 = vld [vmem:[#allocation127_spill] sm:$0xff] }
 0x2a3   : > { %12462 = vst [vmem:[#allocation34_spill] sm:$0xff] %v9864_v60  ;;  %v9870_v48 = vpop.permute.xlu0 %5836  ;;  %v12468_v60 = vld [vmem:[#allocation122_spill] sm:$0xff]  ;;  %v5694_v5 = vunpack.i.h.bf16 %v12476_v52  ;;  %v9951_v53 = vmax.f32 %v9783_v42, %v5684_v55  ;;  %v5703_v42 = vunpack.i.l.bf16 %v12478_v41  ;;  %v12480_v55 = vld [vmem:[#allocation128_spill] sm:$0xff] }
 0x2a4   : > { %12463 = vst [vmem:[#allocation35_spill] sm:$0xff] %v9870_v48  ;;  %6131 = vrot.lane.b32.xlu1 %v12421_v37, %s6643_s9  ;;  %v5658_v48 = vunpack.i.l.bf16 %v12465_v51  ;;  %v5673_v51 = vunpack.i.l.bf16 %v12467_v20  ;;  %v5669_v10 = vunpack.i.h.bf16 %v12468_v60  ;;  %v5668_v44 = vunpack.i.l.bf16 %v12468_v60  ;;  %v12472_v20 = vld [vmem:[#allocation11_spill] sm:$0xff]  ;;  %v12473_v60 = vld [vmem:[#allocation124_spill] sm:$0xff] }
 0x2a5   : > { %6126 = vrot.lane.b32.xlu0 %v12378_v28, %s6643_s9  ;;  %v5679_v34 = vunpack.i.h.bf16 %v12473_v60 }
 0x2a6   : > { %v9898_v33 = vpop.permute.xlu1 %5851  ;;  %v9921_v9 = vmax.f32 %v9753_v38, %v5658_v48  ;;  %v9935_v8 = vmax.f32 %v9767_v35, %v5673_v51  ;;  %v9938_v38 = vmax.f32 %v9770_v2, %v5669_v10  ;;  %v9943_v0 = vmax.f32 %v9775_v15, %v5668_v44 }
 0x2a7   : > { %12466 = vst [vmem:[#allocation36_spill] sm:$0xff] %v9898_v33  ;;  %v9906_v50 = vpop.permute.xlu0 %5846  ;;  %v9957_v2 = vmax.f32 %v9789_v16, %v5683_v4  ;;  %v9960_v15 = vmax.f32 %v9792_v46, %v5679_v34  ;;  %v5704_v51 = vunpack.i.h.bf16 %v12478_v41  ;;  %v9974_v16 = vmax.f32 %v9806_v11, %v5694_v5  ;;  %v12482_v4 = vld [vmem:[#allocation129_spill] sm:$0xff] }
 0x2a8   : > { %12469 = vst [vmem:[#allocation37_spill] sm:$0xff] %v9906_v50  ;;  %6141 = vrot.lane.b32.xlu1 %v12470_v59, %s6643_s9  ;;  %v5678_v50 = vunpack.i.l.bf16 %v12473_v60  ;;  %v5693_v60 = vunpack.i.l.bf16 %v12476_v52  ;;  %v5698_v52 = vunpack.i.l.bf16 %v12480_v55  ;;  %v5714_v34 = vunpack.i.h.bf16 %v12482_v4  ;;  %v12484_v11 = vld [vmem:[#allocation21_spill] sm:$0xff] }
 0x2a9   : > { %6136 = vrot.lane.b32.xlu0 %v12472_v20, %s6643_s9  ;;  %v12477_v20 = vld [vmem:[#allocation126_spill] sm:$0xff]  ;;  %v5713_v41 = vunpack.i.l.bf16 %v12482_v4  ;;  %v9999_v5 = vmax.f32 %v9831_v31, %v5703_v42 }
 0x2aa   : > { %v9929_v33 = vpop.permute.xlu1 %5861  ;;  %v5688_v35 = vunpack.i.l.bf16 %v12477_v20  ;;  %v9963_v10 = vmax.f32 %v9795_v40, %v5678_v50  ;;  %v9977_v46 = vmax.f32 %v9809_v27, %v5693_v60  ;;  %v9993_v27 = vmax.f32 %v9825_v17, %v5704_v51  ;;  %v12488_v51 = vld [vmem:[#allocation132_spill] sm:$0xff] }
 0x2ab   : > { %12474 = vst [vmem:[#allocation38_spill] sm:$0xff] %v9929_v33  ;;  %v9940_v48 = vpop.permute.xlu0 %5856  ;;  %v5689_v33 = vunpack.i.h.bf16 %v12477_v20  ;;  %v5699_v20 = vunpack.i.h.bf16 %v12480_v55  ;;  %v12483_v55 = vld [vmem:[#allocation130_spill] sm:$0xff]  ;;  %v10005_v60 = vmax.f32 %v9837_v21, %v5698_v52  ;;  %v10016_v31 = vmax.f32 %v9848_v18, %v5714_v34 }
 0x2ac   : > { %12475 = vst [vmem:[#allocation39_spill] sm:$0xff] %v9940_v48  ;;  %6151 = vrot.lane.b32.xlu1 %v6883_v62, %s6643_s9  ;;  %v9985_v40 = vmax.f32 %v9817_v25, %v5688_v35  ;;  %v12486_v35 = vld [vmem:[#allocation131_spill] sm:$0xff] }
 0x2ad   : > { %6146 = vrot.lane.b32.xlu0 %v12343_v26, %s6643_s9  ;;  %v9980_v50 = vmax.f32 %v9812_v29, %v5689_v33  ;;  %v5708_v29 = vunpack.i.l.bf16 %v12483_v55  ;;  %v10002_v25 = vmax.f32 %v9834_v14, %v5699_v20  ;;  %v5724_v4 = vunpack.i.h.bf16 %v12486_v35  ;;  %v12489_v20 = vld [vmem:[#allocation133_spill] sm:$0xff] }
 0x2ae   : > { %v9966_v44 = vpop.permute.xlu1 %5871  ;;  %v5723_v17 = vunpack.i.l.bf16 %v12486_v35  ;;  %v10019_v14 = vmax.f32 %v9851_v12, %v5713_v41  ;;  %v5734_v52 = vunpack.i.h.bf16 %v12489_v20  ;;  %v5733_v35 = vunpack.i.l.bf16 %v12489_v20 }
 0x2af   : > { %12479 = vst [vmem:[#allocation40_spill] sm:$0xff] %v9966_v44  ;;  %v9971_v48 = vpop.permute.xlu0 %5866  ;;  %v10027_v42 = vmax.f32 %v9859_v32, %v5708_v29  ;;  %v10035_v12 = vmax.f32 %v9867_v3, %v5724_v4  ;;  %v12493_v29 = vld [vmem:[#allocation135_spill] sm:$0xff]  ;;  %v12494_v4 = vld [vmem:[#allocation136_spill] sm:$0xff] }
 0x2b0   : > { %12481 = vst [vmem:[#allocation41_spill] sm:$0xff] %v9971_v48  ;;  %6161 = vrot.lane.b32.xlu1 %v6915_v56, %s6643_s9  ;;  %v5709_v48 = vunpack.i.h.bf16 %v12483_v55  ;;  %v5718_v55 = vunpack.i.l.bf16 %v12488_v51  ;;  %v10041_v34 = vmax.f32 %v9873_v54, %v5723_v17  ;;  %v5744_v20 = vunpack.i.h.bf16 %v12493_v29 }
 0x2b1   : > { %6156 = vrot.lane.b32.xlu0 %v12484_v11, %s6643_s9  ;;  %v5719_v11 = vunpack.i.h.bf16 %v12488_v51  ;;  %v12490_v51 = vld [vmem:[#allocation134_spill] sm:$0xff]  ;;  %v5743_v3 = vunpack.i.l.bf16 %v12493_v29  ;;  %v10058_v54 = vmax.f32 %v9890_v39, %v5734_v52  ;;  %v12498_v52 = vld [vmem:[#allocation13_spill] sm:$0xff] }
 0x2b2   : > { %v9996_v33 = vpop.permute.xlu1 %5881  ;;  %v10022_v21 = vmax.f32 %v9854_v24, %v5709_v48  ;;  %v5728_v24 = vunpack.i.l.bf16 %v12490_v51  ;;  %v10047_v41 = vmax.f32 %v9879_v63, %v5718_v55  ;;  %v12495_v55 = vld [vmem:[#allocation137_spill] sm:$0xff]  ;;  %v10077_v39 = vmax.f32 %v9909_v6, %v5744_v20 }
 0x2b3   : > { %12485 = vst [vmem:[#allocation42_spill] sm:$0xff] %v9996_v33  ;;  %v10008_v44 = vpop.permute.xlu0 %5876  ;;  %v10044_v32 = vmax.f32 %v9876_v36, %v5719_v11  ;;  %v10061_v36 = vmax.f32 %v9893_v57, %v5733_v35  ;;  %v5754_v29 = vunpack.i.h.bf16 %v12495_v55  ;;  %v5764_v35 = vunpack.i.h.bf16 %v12498_v52 }
 0x2b4   : > { %12487 = vst [vmem:[#allocation43_spill] sm:$0xff] %v10008_v44  ;;  %6171 = vrot.lane.b32.xlu1 %v12086_v58, %s6643_s9  ;;  %v5729_v44 = vunpack.i.h.bf16 %v12490_v51  ;;  %v5739_v51 = vunpack.i.h.bf16 %v12494_v4  ;;  %v10069_v17 = vmax.f32 %v9901_v30, %v5728_v24  ;;  %v5763_v6 = vunpack.i.l.bf16 %v12498_v52 }
 0x2b5   : > { %6166 = vrot.lane.b32.xlu0 %v12088_v7, %s6643_s9 }
 0x2b6   : > { %v10032_v18 = vpop.permute.xlu1 %5891  ;;  %v10064_v63 = vmax.f32 %v9896_v43, %v5729_v44  ;;  %v10083_v43 = vmax.f32 %v9915_v23, %v5743_v3  ;;  %v10086_v30 = vmax.f32 %v9918_v61, %v5739_v51  ;;  %v10100_v23 = vmax.f32 %v9932_v13, %v5754_v29  ;;  %v12502_v51 = vld [vmem:[#allocation24_spill] sm:$0xff] }
 0x2b7   : > { %12491 = vst [vmem:[#allocation44_spill] sm:$0xff] %v10032_v18  ;;  %v10038_v48 = vpop.permute.xlu0 %5886  ;;  %v12496_v18 = vld [vmem:[#allocation138_spill] sm:$0xff]  ;;  %v5774_v52 = vunpack.i.h.bf16 %v12502_v51  ;;  %v10119_v13 = vmax.f32 %v9951_v53, %v5764_v35  ;;  %v12504_v29 = vld [vmem:[#allocation16_spill] sm:$0xff]  ;;  %v12506_v35 = vld [vmem:[#allocation19_spill] sm:$0xff] }
 0x2b8   : > { %12492 = vst [vmem:[#allocation45_spill] sm:$0xff] %v10038_v48  ;;  %6181 = vrot.lane.b32.xlu1 %v12092_v22, %s6644_s10  ;;  %v5738_v48 = vunpack.i.l.bf16 %v12494_v4  ;;  %v5753_v4 = vunpack.i.l.bf16 %v12495_v55  ;;  %v5749_v33 = vunpack.i.h.bf16 %v12496_v18  ;;  %v5748_v57 = vunpack.i.l.bf16 %v12496_v18  ;;  %v12499_v18 = vld [vmem:[#allocation12_spill] sm:$0xff] }
 0x2b9   : > { %6176 = vrot.lane.b32.xlu0 %v12280_v19, %s6644_s10  ;;  %v5759_v24 = vunpack.i.h.bf16 %v12499_v18  ;;  %v5758_v20 = vunpack.i.l.bf16 %v12499_v18  ;;  %v5773_v18 = vunpack.i.l.bf16 %v12502_v51  ;;  %v5783_v53 = vunpack.i.l.bf16 %v12504_v29 }
 0x2ba   : > { %v10066_v11 = vpop.permute.xlu1 %5901  ;;  %v10089_v44 = vmax.f32 %v9921_v9, %v5738_v48  ;;  %v10103_v61 = vmax.f32 %v9935_v8, %v5753_v4  ;;  %v10106_v9 = vmax.f32 %v9938_v38, %v5749_v33  ;;  %v10111_v3 = vmax.f32 %v9943_v0, %v5748_v57 }
 0x2bb   : > { %v10074_v19 = vpop.permute.xlu0 %5896  ;;  %v10125_v38 = vmax.f32 %v9957_v2, %v5763_v6  ;;  %v10128_v0 = vmax.f32 %v9960_v15, %v5759_v24  ;;  %v10131_v33 = vmax.f32 %v9963_v10, %v5758_v20  ;;  %v5784_v4 = vunpack.i.h.bf16 %v12504_v29  ;;  %v12508_v24 = vld [vmem:[#allocation18_spill] sm:$0xff] }
 0x2bc   : > { %12497 = vst [vmem:[#allocation46_spill] sm:$0xff] %v10074_v19  ;;  %6191 = vrot.lane.b32.xlu1 %v12322_v47, %s6644_s10  ;;  %v12503_v19 = vld [vmem:[#allocation17_spill] sm:$0xff]  ;;  %v5778_v51 = vunpack.i.l.bf16 %v12506_v35  ;;  %v10142_v2 = vmax.f32 %v9974_v16, %v5774_v52  ;;  %v10145_v15 = vmax.f32 %v9977_v46, %v5773_v18  ;;  %v5794_v20 = vunpack.i.h.bf16 %v12508_v24  ;;  %v12510_v18 = vld [vmem:[#allocation26_spill] sm:$0xff] }
 0x2bd   : > { %6186 = vrot.lane.b32.xlu0 %v12286_v1, %s6644_s10  ;;  %v5768_v8 = vunpack.i.l.bf16 %v12503_v19  ;;  %v5793_v29 = vunpack.i.l.bf16 %v12508_v24  ;;  %v10161_v16 = vmax.f32 %v9993_v27, %v5784_v4  ;;  %v5803_v27 = vunpack.i.l.bf16 %v12510_v18  ;;  %v12512_v4 = vld [vmem:[#allocation27_spill] sm:$0xff] }
 0x2be   : > { %v10097_v55 = vpop.permute.xlu1 %5911  ;;  %v10173_v52 = vmax.f32 %v10005_v60, %v5778_v51  ;;  %v12514_v51 = vld [vmem:[#allocation28_spill] sm:$0xff] }
 0x2bf   : > { %12500 = vst [vmem:[#allocation47_spill] sm:$0xff] %v10097_v55  ;;  %v10108_v48 = vpop.permute.xlu0 %5906  ;;  %v5769_v55 = vunpack.i.h.bf16 %v12503_v19  ;;  %v5779_v19 = vunpack.i.h.bf16 %v12506_v35  ;;  %v10153_v6 = vmax.f32 %v9985_v40, %v5768_v8  ;;  %v12509_v35 = vld [vmem:[#allocation25_spill] sm:$0xff]  ;;  %v5804_v8 = vunpack.i.h.bf16 %v12510_v18 }
 0x2c0   : > { %12501 = vst [vmem:[#allocation48_spill] sm:$0xff] %v10108_v48  ;;  %6201 = vrot.lane.b32.xlu1 %v12369_v45, %s6644_s10  ;;  %v5788_v46 = vunpack.i.l.bf16 %v12509_v35  ;;  %v5814_v18 = vunpack.i.h.bf16 %v12514_v51 }
 0x2c1   : > { %6196 = vrot.lane.b32.xlu0 %v12372_v49, %s6644_s10  ;;  %v10148_v10 = vmax.f32 %v9980_v50, %v5769_v55  ;;  %v10167_v55 = vmax.f32 %v9999_v5, %v5783_v53  ;;  %v10170_v40 = vmax.f32 %v10002_v25, %v5779_v19  ;;  %v10184_v5 = vmax.f32 %v10016_v31, %v5794_v20  ;;  %v12513_v53 = vld [vmem:[#allocation11_spill] sm:$0xff] }
 0x2c2   : > { %v10134_v57 = vpop.permute.xlu1 %5921  ;;  %v10187_v25 = vmax.f32 %v10019_v14, %v5793_v29  ;;  %v10195_v19 = vmax.f32 %v10027_v42, %v5788_v46  ;;  %v10203_v14 = vmax.f32 %v10035_v12, %v5804_v8  ;;  %v10209_v20 = vmax.f32 %v10041_v34, %v5803_v27  ;;  %v12517_v46 = vld [vmem:[#allocation30_spill] sm:$0xff]  ;;  %v12518_v8 = vld [vmem:[#allocation31_spill] sm:$0xff] }
 0x2c3   : > { %12505 = vst [vmem:[#allocation49_spill] sm:$0xff] %v10134_v57  ;;  %v10139_v48 = vpop.permute.xlu0 %5916  ;;  %v5799_v57 = vunpack.i.h.bf16 %v12512_v4  ;;  %v5823_v12 = vunpack.i.l.bf16 %v12517_v46  ;;  %v10226_v34 = vmax.f32 %v10058_v54, %v5814_v18  ;;  %v12521_v18 = vld [vmem:[#allocation34_spill] sm:$0xff] }
 0x2c4   : > { %12507 = vst [vmem:[#allocation50_spill] sm:$0xff] %v10139_v48  ;;  %6211 = vrot.lane.b32.xlu1 %v12421_v37, %s6644_s10  ;;  %v5789_v48 = vunpack.i.h.bf16 %v12509_v35  ;;  %v5798_v35 = vunpack.i.l.bf16 %v12512_v4  ;;  %v5813_v4 = vunpack.i.l.bf16 %v12514_v51  ;;  %v5824_v51 = vunpack.i.h.bf16 %v12517_v46 }
 0x2c5   : > { %6206 = vrot.lane.b32.xlu0 %v12378_v28, %s6644_s10  ;;  %v10212_v42 = vmax.f32 %v10044_v32, %v5799_v57 }
 0x2c6   : > { %v10164_v50 = vpop.permute.xlu1 %5931  ;;  %v10190_v60 = vmax.f32 %v10022_v21, %v5789_v48  ;;  %v10215_v29 = vmax.f32 %v10047_v41, %v5798_v35  ;;  %v10229_v32 = vmax.f32 %v10061_v36, %v5813_v4  ;;  %v12519_v35 = vld [vmem:[#allocation32_spill] sm:$0xff]  ;;  %v10245_v54 = vmax.f32 %v10077_v39, %v5824_v51 }
 0x2c7   : > { %v10176_v24 = vpop.permute.xlu0 %5926  ;;  %v5834_v46 = vunpack.i.h.bf16 %v12519_v35  ;;  %v5844_v4 = vunpack.i.h.bf16 %v12521_v18  ;;  %v5843_v39 = vunpack.i.l.bf16 %v12521_v18 }
 0x2c8   : > { %12511 = vst [vmem:[#allocation51_spill] sm:$0xff] %v10176_v24  ;;  %6221 = vrot.lane.b32.xlu1 %v12470_v59, %s6644_s10  ;;  %v12515_v24 = vld [vmem:[#allocation29_spill] sm:$0xff] }
 0x2c9   : > { %6216 = vrot.lane.b32.xlu0 %v12513_v53, %s6644_s10  ;;  %v5809_v59 = vunpack.i.h.bf16 %v12515_v24  ;;  %v5808_v21 = vunpack.i.l.bf16 %v12515_v24  ;;  %v5819_v24 = vunpack.i.h.bf16 %v12518_v8 }
 0x2ca   : > { %v10200_v31 = vpop.permute.xlu1 %5941 }
 0x2cb   : > { %v10206_v48 = vpop.permute.xlu0 %5936  ;;  %v10232_v41 = vmax.f32 %v10064_v63, %v5809_v59  ;;  %v10237_v27 = vmax.f32 %v10069_v17, %v5808_v21  ;;  %v10251_v59 = vmax.f32 %v10083_v43, %v5823_v12  ;;  %v10254_v63 = vmax.f32 %v10086_v30, %v5819_v24  ;;  %v12522_v21 = vld [vmem:[#allocation21_spill] sm:$0xff]  ;;  %v12525_v24 = vld [vmem:[#allocation36_spill] sm:$0xff] }
 0x2cc   : > { %12516 = vst [vmem:[#allocation52_spill] sm:$0xff] %v10206_v48  ;;  %6231 = vrot.lane.b32.xlu1 %v6883_v62, %s6644_s10  ;;  %v5818_v48 = vunpack.i.l.bf16 %v12518_v8  ;;  %v5833_v8 = vunpack.i.l.bf16 %v12519_v35  ;;  %v12520_v62 = vld [vmem:[#allocation33_spill] sm:$0xff]  ;;  %v10268_v43 = vmax.f32 %v10100_v23, %v5834_v46  ;;  %v5854_v18 = vunpack.i.h.bf16 %v12525_v24  ;;  %v12527_v46 = vld [vmem:[#allocation38_spill] sm:$0xff] }
 0x2cd   : > { %6226 = vrot.lane.b32.xlu0 %v12343_v26, %s6644_s10  ;;  %v5829_v26 = vunpack.i.h.bf16 %v12520_v62  ;;  %v5828_v36 = vunpack.i.l.bf16 %v12520_v62  ;;  %v12523_v62 = vld [vmem:[#allocation35_spill] sm:$0xff]  ;;  %v10287_v23 = vmax.f32 %v10119_v13, %v5844_v4  ;;  %v5863_v13 = vunpack.i.l.bf16 %v12527_v46 }
 0x2ce   : > { %v10234_v57 = vpop.permute.xlu1 %5951  ;;  %v10257_v17 = vmax.f32 %v10089_v44, %v5818_v48  ;;  %v5839_v51 = vunpack.i.h.bf16 %v12523_v62  ;;  %v5838_v35 = vunpack.i.l.bf16 %v12523_v62  ;;  %v10271_v30 = vmax.f32 %v10103_v61, %v5833_v8  ;;  %v12528_v4 = vld [vmem:[#allocation39_spill] sm:$0xff] }
 0x2cf   : > { %v10242_v53 = vpop.permute.xlu0 %5946  ;;  %v10274_v44 = vmax.f32 %v10106_v9, %v5829_v26  ;;  %v10279_v12 = vmax.f32 %v10111_v3, %v5828_v36  ;;  %v5853_v62 = vunpack.i.l.bf16 %v12525_v24  ;;  %v10293_v61 = vmax.f32 %v10125_v38, %v5843_v39 }
 0x2d0   : > { %6241 = vrot.lane.b32.xlu1 %v6915_v56, %s6644_s10  ;;  %v10296_v9 = vmax.f32 %v10128_v0, %v5839_v51  ;;  %v10299_v3 = vmax.f32 %v10131_v33, %v5838_v35  ;;  %v5864_v8 = vunpack.i.h.bf16 %v12527_v46  ;;  %v5858_v24 = vunpack.i.l.bf16 %v12528_v4  ;;  %v12529_v51 = vld [vmem:[#allocation40_spill] sm:$0xff] }
 0x2d1   : > { %6236 = vrot.lane.b32.xlu0 %v12522_v21, %s6644_s10  ;;  %v12526_v21 = vld [vmem:[#allocation37_spill] sm:$0xff]  ;;  %v10310_v38 = vmax.f32 %v10142_v2, %v5854_v18  ;;  %v10313_v0 = vmax.f32 %v10145_v15, %v5853_v62  ;;  %v5874_v35 = vunpack.i.h.bf16 %v12529_v51  ;;  %v5873_v46 = vunpack.i.l.bf16 %v12529_v51  ;;  %v12531_v18 = vld [vmem:[#allocation3_spill] sm:$0xff]  ;;  %v12532_v51 = vld [vmem:[#allocation42_spill] sm:$0xff] }
 0x2d2   : > { %v10265_v56 = vpop.permute.xlu1 %5961  ;;  %v5848_v26 = vunpack.i.l.bf16 %v12526_v21  ;;  %v10329_v15 = vmax.f32 %v10161_v16, %v5864_v8  ;;  %v10335_v62 = vmax.f32 %v10167_v55, %v5863_v13  ;;  %v5883_v16 = vunpack.i.l.bf16 %v12532_v51  ;;  %v12533_v8 = vld [vmem:[#allocation43_spill] sm:$0xff] }
 0x2d3   : > { %12524 = vst [vmem:[#allocation53_spill] sm:$0xff] %v10265_v56  ;;  %v10276_v48 = vpop.permute.xlu0 %5956  ;;  %v5849_v56 = vunpack.i.h.bf16 %v12526_v21  ;;  %v5859_v21 = vunpack.i.h.bf16 %v12528_v4  ;;  %v12530_v4 = vld [vmem:[#allocation41_spill] sm:$0xff]  ;;  %v10352_v55 = vmax.f32 %v10184_v5, %v5874_v35 }
 0x2d4   : > { %6251 = vrot.lane.b32.xlu1 %v12086_v58, %s6644_s10  ;;  %v10321_v39 = vmax.f32 %v10153_v6, %v5848_v26  ;;  %v5869_v2 = vunpack.i.h.bf16 %v12530_v4  ;;  %v10341_v26 = vmax.f32 %v10173_v52, %v5858_v24 }
 0x2d5   : > { %6246 = vrot.lane.b32.xlu0 %v12088_v7, %s6644_s10  ;;  %v10316_v33 = vmax.f32 %v10148_v10, %v5849_v56  ;;  %v5868_v56 = vunpack.i.l.bf16 %v12530_v4  ;;  %v10338_v6 = vmax.f32 %v10170_v40, %v5859_v21  ;;  %v5878_v4 = vunpack.i.l.bf16 %v12533_v8  ;;  %v12534_v21 = vld [vmem:[#allocation44_spill] sm:$0xff] }
 0x2d6   : > { %v10302_v36 = vpop.permute.xlu1 %5971  ;;  %v10355_v40 = vmax.f32 %v10187_v25, %v5873_v46  ;;  %v10358_v52 = vmax.f32 %v10190_v60, %v5869_v2  ;;  %v5894_v24 = vunpack.i.h.bf16 %v12534_v21  ;;  %v5893_v5 = vunpack.i.l.bf16 %v12534_v21  ;;  %v12535_v25 = vld [vmem:[#allocation45_spill] sm:$0xff]  ;;  %v12536_v21 = vld [vmem:[#allocation46_spill] sm:$0xff] }
 0x2d7   : > { %v10307_v7 = vpop.permute.xlu0 %5966  ;;  %v10363_v13 = vmax.f32 %v10195_v19, %v5868_v56  ;;  %v5889_v35 = vunpack.i.h.bf16 %v12535_v25  ;;  %v5888_v60 = vunpack.i.l.bf16 %v12535_v25  ;;  %v10377_v2 = vmax.f32 %v10209_v20, %v5883_v16 }
 0x2d8   : > { %6261 = vrot.lane.b32.xlu1 %v12092_v22, %s6645_s11  ;;  %v5884_v22 = vunpack.i.h.bf16 %v12532_v51  ;;  %v10383_v56 = vmax.f32 %v10215_v29, %v5878_v4  ;;  %v5899_v25 = vunpack.i.h.bf16 %v12536_v21  ;;  %v10394_v20 = vmax.f32 %v10226_v34, %v5894_v24 }
 0x2d9   : > { %6256 = vrot.lane.b32.xlu0 %v12531_v18, %s6645_s11  ;;  %v5879_v18 = vunpack.i.h.bf16 %v12533_v8  ;;  %v10401_v4 = vmax.f32 %v10229_v32, %v5893_v5  ;;  %v12539_v5 = vld [vmem:[#allocation49_spill] sm:$0xff] }
 0x2da   : > { %v10332_v10 = vpop.permute.xlu1 %5981  ;;  %v10369_v8 = vmax.f32 %v10203_v14, %v5884_v22  ;;  %v5904_v22 = vunpack.i.h.bf16 %v10066_v11  ;;  %v5903_v14 = vunpack.i.l.bf16 %v10066_v11  ;;  %v10404_v11 = vmax.f32 %v10232_v41, %v5889_v35 }
 0x2db   : > { %v10344_v58 = vpop.permute.xlu0 %5976  ;;  %v10380_v19 = vmax.f32 %v10212_v42, %v5879_v18  ;;  %v12537_v42 = vld [vmem:[#allocation47_spill] sm:$0xff]  ;;  %v10422_v41 = vmax.f32 %v10254_v63, %v5899_v25  ;;  %v5924_v35 = vunpack.i.h.bf16 %v12539_v5  ;;  %v5923_v63 = vunpack.i.l.bf16 %v12539_v5  ;;  %v12541_v25 = vld [vmem:[#allocation10_spill] sm:$0xff] }
 0x2dc   : > { %6271 = vrot.lane.b32.xlu1 %v12322_v47, %s6645_s11  ;;  %v5914_v29 = vunpack.i.h.bf16 %v12537_v42  ;;  %v5913_v18 = vunpack.i.l.bf16 %v12537_v42  ;;  %v10413_v34 = vmax.f32 %v10245_v54, %v5904_v22  ;;  %v10419_v32 = vmax.f32 %v10251_v59, %v5903_v14  ;;  %v12543_v5 = vld [vmem:[#allocation11_spill] sm:$0xff] }
 0x2dd   : > { %6266 = vrot.lane.b32.xlu0 %v12286_v1, %s6645_s11  ;;  %v5898_v1 = vunpack.i.l.bf16 %v12536_v21  ;;  %v10407_v21 = vmax.f32 %v10237_v27, %v5888_v60 }
 0x2de   : > { %v10366_v51 = vpop.permute.xlu1 %5991  ;;  %v10430_v54 = vmax.f32 %v10268_v43, %v5914_v29 }
 0x2df   : > { %v10374_v46 = vpop.permute.xlu0 %5986  ;;  %v10425_v27 = vmax.f32 %v10257_v17, %v5898_v1  ;;  %v12540_v1 = vld [vmem:[#allocation50_spill] sm:$0xff] }
 0x2e0   : > { %6281 = vrot.lane.b32.xlu1 %v12369_v45, %s6645_s11  ;;  %v12538_v45 = vld [vmem:[#allocation48_spill] sm:$0xff]  ;;  %v5919_v17 = vunpack.i.h.bf16 %v12540_v1  ;;  %v5918_v22 = vunpack.i.l.bf16 %v12540_v1 }
 0x2e1   : > { %6276 = vrot.lane.b32.xlu0 %v12372_v49, %s6645_s11  ;;  %v5909_v49 = vunpack.i.h.bf16 %v12538_v45  ;;  %v5908_v24 = vunpack.i.l.bf16 %v12538_v45  ;;  %v10433_v45 = vmax.f32 %v10271_v30, %v5913_v18  ;;  %v5934_v30 = vunpack.i.h.bf16 %v10164_v50  ;;  %v12544_v1 = vld [vmem:[#allocation52_spill] sm:$0xff] }
 0x2e2   : > { %v10398_v16 = vpop.permute.xlu1 %6001  ;;  %v5944_v18 = vunpack.i.h.bf16 %v10200_v31 }
 0x2e3   : > { %v10410_v47 = vpop.permute.xlu0 %5996  ;;  %v10439_v59 = vmax.f32 %v10274_v44, %v5909_v49  ;;  %v10447_v43 = vmax.f32 %v10279_v12, %v5908_v24  ;;  %v5933_v49 = vunpack.i.l.bf16 %v10164_v50  ;;  %v12542_v44 = vld [vmem:[#allocation51_spill] sm:$0xff]  ;;  %v10459_v12 = vmax.f32 %v10287_v23, %v5924_v35 }
 0x2e4   : > { %6291 = vrot.lane.b32.xlu1 %v12421_v37, %s6645_s11  ;;  %v5929_v42 = vunpack.i.h.bf16 %v12542_v44  ;;  %v5928_v29 = vunpack.i.l.bf16 %v12542_v44  ;;  %v5943_v24 = vunpack.i.l.bf16 %v10200_v31  ;;  %v10468_v37 = vmax.f32 %v10293_v61, %v5923_v63 }
 0x2e5   : > { %6286 = vrot.lane.b32.xlu0 %v12378_v28, %s6645_s11  ;;  %v5939_v28 = vunpack.i.h.bf16 %v12544_v1  ;;  %v10471_v44 = vmax.f32 %v10296_v9, %v5919_v17  ;;  %v5954_v23 = vunpack.i.h.bf16 %v10234_v57  ;;  %v10487_v31 = vmax.f32 %v10310_v38, %v5934_v30 }
 0x2e6   : > { %v10436_v60 = vpop.permute.xlu1 %6011  ;;  %v5953_v61 = vunpack.i.l.bf16 %v10234_v57  ;;  %v5949_v9 = vunpack.i.h.bf16 %v10242_v53  ;;  %v10494_v63 = vmax.f32 %v10313_v0, %v5933_v49  ;;  %v10497_v17 = vmax.f32 %v10316_v33, %v5929_v42  ;;  %v12546_v57 = vld [vmem:[#allocation15_spill] sm:$0xff] }
 0x2e7   : > { %v10444_v14 = vpop.permute.xlu0 %6006  ;;  %v10503_v38 = vmax.f32 %v10329_v15, %v5944_v18  ;;  %v4415_v30 = vpop.f32.mrb[0].mxu0  ;;  %v10511_v0 = vmax.f32 %v10338_v6, %v5939_v28  ;;  %v5948_v49 = vunpack.i.l.bf16 %v10242_v53  ;;  %v10521_v42 = vmax.f32 %v10352_v55, %v5954_v23  ;;  %v12552_v23 = vld [vmem:[#allocation20_spill] sm:$0xff] }
 0x2e8   : > { %6301 = vrot.lane.b32.xlu1 %v12541_v25, %s6645_s11  ;;  %v5938_v25 = vunpack.i.l.bf16 %v12544_v1  ;;  %v10508_v1 = vmax.f32 %v10335_v62, %v5943_v24  ;;  %646 = vst [vmem:[%s10484_s18 + $0x10] sm:$0xff] %v4415_v30  ;;  %v517_v15 = vpop.f32.mrb[1].mxu0  ;;  %v10529_v53 = vmax.f32 %v10355_v40, %v5953_v61  ;;  %v5959_v24 = vunpack.i.h.bf16 %v10276_v48 }
 0x2e9   : > { %6296 = vrot.lane.b32.xlu0 %v12543_v5, %s6645_s11  ;;  %v10474_v5 = vmax.f32 %v10299_v3, %v5918_v22  ;;  %v12545_v3 = vld [vmem:[#allocation14_spill] sm:$0xff]  ;;  %v10500_v22 = vmax.f32 %v10321_v39, %v5928_v29  ;;  %12547 = vst [vmem:[#allocation54_spill] sm:$0xff] %v10521_v42  ;;  %v12548_v29 = vld [vmem:[#allocation53_spill] sm:$0xff]  ;;  %644 = vst [vmem:[%s10484_s18] sm:$0xff] %v517_v15  ;;  %v713_v6 = vmul.f32 %v517_v15, %v517_v15 }
 0x2ea   : > { %v10464_v50 = vpop.permute.xlu1 %6021  ;;  %v10514_v33 = vmax.f32 %v10341_v26, %v5938_v25  ;;  %v5964_v18 = vunpack.i.h.bf16 %v12548_v29  ;;  %v5963_v62 = vunpack.i.l.bf16 %v12548_v29  ;;  %v4416_v26 = vpop.f32.mrb[2].mxu0  ;;  %12550 = vst [vmem:[#allocation56_spill] sm:$0xff] %v10529_v53  ;;  %v10532_v25 = vmax.f32 %v10358_v52, %v5949_v9 }
 0x2eb   : > { %v10477_v35 = vpop.permute.xlu0 %6016  ;;  %v5958_v55 = vunpack.i.l.bf16 %v10276_v48  ;;  %647 = vst [vmem:[%s10484_s18 + $0x18] sm:$0xff] %v4416_v26  ;;  %v520_v29 = vpop.f32.mrb[3].mxu0  ;;  %v715_v42 = vmul.f32 %v4415_v30, %v4415_v30  ;;  %v10544_v52 = vmax.f32 %v10363_v13, %v5948_v49  ;;  %v5973_v9 = vunpack.i.l.bf16 %v10302_v36  ;;  %v12554_v49 = vld [vmem:[#allocation22_spill] sm:$0xff] }
 0x2ec   : > { %6311 = vrot.lane.b32.xlu1 %v12545_v3, %s6645_s11  ;;  %12551 = vst [vmem:[#allocation57_spill] sm:$0xff] %v10532_v25  ;;  %v12553_v3 = vld [vmem:[#allocation21_spill] sm:$0xff]  ;;  %645 = vst [vmem:[%s10484_s18 + $0x8] sm:$0xff] %v520_v29  ;;  %v676_v40 = vadd.f32 %v520_v29, %v517_v15  ;;  %v714_v61 = vmul.f32 %v520_v29, %v520_v29  ;;  %v5969_v48 = vunpack.i.h.bf16 %v10307_v7 }
 0x2ed   : > { %6306 = vrot.lane.b32.xlu0 %v12546_v57, %s6645_s11  ;;  %v5974_v57 = vunpack.i.h.bf16 %v10302_v36  ;;  %v10552_v53 = vmax.f32 %v10369_v8, %v5964_v18  ;;  %v10560_v13 = vmax.f32 %v10380_v19, %v5959_v24  ;;  %v5984_v36 = vunpack.i.h.bf16 %v10332_v10 }
 0x2ee   : > { %v10517_v39 = vpop.permute.xlu1 %6031  ;;  %v677_v15 = vadd.f32 %v4415_v30, %v676_v40  ;;  %v745_v29 = vadd.f32 %v714_v61, %v713_v6  ;;  %v716_v8 = vmul.f32 %v4416_v26, %v4416_v26  ;;  %v10567_v18 = vmax.f32 %v10383_v56, %v5958_v55  ;;  %v12555_v30 = vld [vmem:[#allocation23_spill] sm:$0xff] }
 0x2ef   : > { %v10525_v28 = vpop.permute.xlu0 %6026  ;;  %v10575_v24 = vmax.f32 %v10401_v4, %v5973_v9  ;;  %v5979_v56 = vunpack.i.h.bf16 %v10344_v58  ;;  %v5993_v9 = vunpack.i.l.bf16 %v10366_v51 }
 0x2f0   : > { %12549 = vst [vmem:[#allocation55_spill] sm:$0xff] %v10525_v28  ;;  %6321 = vrot.lane.b32.xlu1 %v12552_v23, %s6645_s11  ;;  %v5968_v23 = vunpack.i.l.bf16 %v10307_v7  ;;  %v5983_v7 = vunpack.i.l.bf16 %v10332_v10  ;;  %v746_v19 = vadd.f32 %v745_v29, %v715_v42  ;;  %v678_v6 = vadd.f32 %v4416_v26, %v677_v15 }
 0x2f1   : > { %6316 = vrot.lane.b32.xlu0 %v12553_v3, %s6645_s11  ;;  %v10555_v3 = vmax.f32 %v10377_v2, %v5963_v62  ;;  %v10570_v2 = vmax.f32 %v10394_v20, %v5974_v57  ;;  %v10578_v10 = vmax.f32 %v10404_v11, %v5969_v48  ;;  %v5978_v57 = vunpack.i.l.bf16 %v10344_v58  ;;  %v12556_v58 = vld [vmem:[#allocation5_spill] sm:$0xff] }
 0x2f2   : > { %v10549_v25 = vpop.permute.xlu1 %6041  ;;  %v4419_v62 = vpop.f32.mrb[4].mxu0  ;;  %v10581_v40 = vmax.f32 %v10407_v21, %v5968_v23  ;;  %v5994_v42 = vunpack.i.h.bf16 %v10366_v51  ;;  %v10593_v21 = vmax.f32 %v10413_v34, %v5984_v36  ;;  %v10596_v23 = vmax.f32 %v10419_v32, %v5983_v7 }
 0x2f3   : > { %v10557_v28 = vpop.permute.xlu0 %6036  ;;  %650 = vst [vmem:[%s10484_s18 + $0x30] sm:$0xff] %v4419_v62  ;;  %v533_v20 = vpop.f32.mrb[5].mxu0  ;;  %v747_v48 = vadd.f32 %v746_v19, %v716_v8  ;;  %v5989_v29 = vunpack.i.h.bf16 %v10374_v46  ;;  %v6004_v36 = vunpack.i.h.bf16 %v10398_v16  ;;  %v6003_v51 = vunpack.i.l.bf16 %v10398_v16 }
 0x2f4   : > { %6331 = vrot.lane.b32.xlu1 %v12554_v49, %s6645_s11  ;;  %648 = vst [vmem:[%s10484_s18 + $0x20] sm:$0xff] %v533_v20  ;;  %v679_v4 = vadd.f32 %v678_v6, %v533_v20  ;;  %v717_v11 = vmul.f32 %v533_v20, %v533_v20  ;;  %v4420_v61 = vpop.f32.mrb[6].mxu0  ;;  %v5988_v6 = vunpack.i.l.bf16 %v10374_v46  ;;  %v12557_v20 = vld [vmem:[#allocation3_spill] sm:$0xff]  ;;  %v10612_v19 = vmax.f32 %v10422_v41, %v5979_v56  ;;  %v12558_v49 = vld [vmem:[#allocation4_spill] sm:$0xff] }
 0x2f5   : > { %6326 = vrot.lane.b32.xlu0 %v12555_v30, %s6645_s11  ;;  %651 = vst [vmem:[%s10484_s18 + $0x38] sm:$0xff] %v4420_v61  ;;  %v536_v15 = vpop.f32.mrb[7].mxu0  ;;  %v10615_v30 = vmax.f32 %v10425_v27, %v5978_v57  ;;  %v10618_v46 = vmax.f32 %v10430_v54, %v5994_v42  ;;  %v5998_v16 = vunpack.i.l.bf16 %v10410_v47  ;;  %v10627_v56 = vmax.f32 %v10433_v45, %v5993_v9 }
 0x2f6   : > { %v10584_v55 = vpop.permute.xlu1 %6051  ;;  %649 = vst [vmem:[%s10484_s18 + $0x28] sm:$0xff] %v536_v15  ;;  %v680_v34 = vadd.f32 %v679_v4, %v536_v15  ;;  %v718_v32 = vmul.f32 %v536_v15, %v536_v15  ;;  %v748_v8 = vadd.f32 %v747_v48, %v717_v11  ;;  %v5999_v15 = vunpack.i.h.bf16 %v10410_v47 }
 0x2f7   : > { %v10589_v26 = vpop.permute.xlu0 %6046  ;;  %v720_v11 = vmul.f32 %v4420_v61, %v4420_v61  ;;  %v10630_v27 = vmax.f32 %v10439_v59, %v5989_v29  ;;  %v10633_v54 = vmax.f32 %v10447_v43, %v5988_v6  ;;  %v10638_v42 = vmax.f32 %v10459_v12, %v6004_v36 }
 0x2f8   : > { %6341 = vrot.lane.b32.xlu1 %v12556_v58, %s6646_s19  ;;  %v719_v58 = vmul.f32 %v4419_v62, %v4419_v62  ;;  %v681_v4 = vadd.f32 %v4419_v62, %v680_v34  ;;  %v749_v41 = vadd.f32 %v748_v8, %v718_v32  ;;  %v12559_v62 = vld [vmem:[#allocation2_spill] sm:$0xff]  ;;  %v10641_v48 = vmax.f32 %v10468_v37, %v6003_v51 }
 0x2f9   : > { %6336 = vrot.lane.b32.xlu0 %v12557_v20, %s6646_s19  ;;  %12560 = vst [vmem:[#allocation58_spill] sm:$0xff] %v10638_v42  ;;  %v6014_v45 = vunpack.i.h.bf16 %v10436_v60  ;;  %v6013_v29 = vunpack.i.l.bf16 %v10436_v60  ;;  %v6009_v6 = vunpack.i.h.bf16 %v10444_v14  ;;  %v10653_v32 = vmax.f32 %v10471_v44, %v5999_v15  ;;  %v12564_v51 = vld [vmem:[#allocation6_spill] sm:$0xff]  ;;  %v12573_v42 = vld [vmem:[#allocation56_spill] sm:$0xff] }
 0x2fa   : > { %v10609_v7 = vpop.permute.xlu1 %6061  ;;  %v4423_v57 = vpop.f32.mrb[8].mxu0  ;;  %v682_v47 = vadd.f32 %v4420_v61, %v681_v4  ;;  %12561 = vst [vmem:[#allocation59_spill] sm:$0xff] %v10641_v48  ;;  %v750_v59 = vadd.f32 %v749_v41, %v719_v58  ;;  %v10656_v36 = vmax.f32 %v10474_v5, %v5998_v16  ;;  %v6008_v58 = vunpack.i.l.bf16 %v10444_v14 }
 0x2fb   : > { %v10620_v20 = vpop.permute.xlu0 %6056  ;;  %654 = vst [vmem:[%s10484_s18 + $0x50] sm:$0xff] %v4423_v57  ;;  %v549_v43 = vpop.f32.mrb[9].mxu0  ;;  %12562 = vst [vmem:[#allocation60_spill] sm:$0xff] %v10653_v32  ;;  %v6024_v4 = vunpack.i.h.bf16 %v10464_v50  ;;  %v6023_v41 = vunpack.i.l.bf16 %v10464_v50  ;;  %v6019_v5 = vunpack.i.h.bf16 %v10477_v35  ;;  %v6018_v14 = vunpack.i.l.bf16 %v10477_v35 }
 0x2fc   : > { %6351 = vrot.lane.b32.xlu1 %v12558_v49, %s6646_s19  ;;  %652 = vst [vmem:[%s10484_s18 + $0x40] sm:$0xff] %v549_v43  ;;  %v683_v12 = vadd.f32 %v682_v47, %v549_v43  ;;  %v721_v34 = vmul.f32 %v549_v43, %v549_v43  ;;  %v4424_v37 = vpop.f32.mrb[10].mxu0  ;;  %12563 = vst [vmem:[#allocation61_spill] sm:$0xff] %v10656_v36  ;;  %v751_v60 = vadd.f32 %v750_v59, %v720_v11  ;;  %v12565_v47 = vld [vmem:[#allocation7_spill] sm:$0xff] }
 0x2fd   : > { %6346 = vrot.lane.b32.xlu0 %v12559_v62, %s6646_s19  ;;  %655 = vst [vmem:[%s10484_s18 + $0x58] sm:$0xff] %v4424_v37  ;;  %v552_v8 = vpop.f32.mrb[11].mxu0  ;;  %v723_v43 = vmul.f32 %v4423_v57, %v4423_v57  ;;  %v10672_v59 = vmax.f32 %v10487_v31, %v6014_v45  ;;  %v10675_v36 = vmax.f32 %v10494_v63, %v6013_v29  ;;  %v6034_v35 = vunpack.i.h.bf16 %v10517_v39 }
 0x2fe   : > { %v10644_v9 = vpop.permute.xlu1 %6071  ;;  %653 = vst [vmem:[%s10484_s18 + $0x48] sm:$0xff] %v552_v8  ;;  %v684_v44 = vadd.f32 %v683_v12, %v552_v8  ;;  %v722_v15 = vmul.f32 %v552_v8, %v552_v8  ;;  %v752_v11 = vadd.f32 %v751_v60, %v721_v34  ;;  %v10678_v50 = vmax.f32 %v10497_v17, %v6009_v6  ;;  %v12568_v34 = vld [vmem:[#allocation8_spill] sm:$0xff] }
 0x2ff   : > { %v10649_v61 = vpop.permute.xlu0 %6066  ;;  %v10683_v8 = vmax.f32 %v10500_v22, %v6008_v58  ;;  %v724_v31 = vmul.f32 %v4424_v37, %v4424_v37  ;;  %v10689_v63 = vmax.f32 %v10503_v38, %v6024_v4  ;;  %v10692_v17 = vmax.f32 %v10508_v1, %v6023_v41  ;;  %v12569_v22 = vld [vmem:[#allocation9_spill] sm:$0xff] }
 0x300   : > { %6361 = vrot.lane.b32.xlu1 %v12564_v51, %s6646_s19  ;;  %v685_v12 = vadd.f32 %v4423_v57, %v684_v44  ;;  %v753_v45 = vadd.f32 %v752_v11, %v722_v15  ;;  %v6033_v57 = vunpack.i.l.bf16 %v10517_v39  ;;  %v10698_v58 = vmax.f32 %v10511_v0, %v6019_v5  ;;  %v12570_v44 = vld [vmem:[#allocation55_spill] sm:$0xff] }
 0x301   : > { %6356 = vrot.lane.b32.xlu0 %v12565_v47, %s6646_s19  ;;  %v10701_v60 = vmax.f32 %v10514_v33, %v6018_v14  ;;  %v6029_v38 = vunpack.i.h.bf16 %v12570_v44  ;;  %v6028_v39 = vunpack.i.l.bf16 %v12570_v44  ;;  %v6044_v15 = vunpack.i.h.bf16 %v10549_v25  ;;  %v12571_v14 = vld [vmem:[#allocation54_spill] sm:$0xff] }
 0x302   : > { %v10669_v16 = vpop.permute.xlu1 %6081  ;;  %v686_v6 = vadd.f32 %v4424_v37, %v685_v12  ;;  %v754_v1 = vadd.f32 %v753_v45, %v723_v43  ;;  %v10713_v11 = vmax.f32 %v12571_v14, %v6034_v35  ;;  %v6043_v12 = vunpack.i.l.bf16 %v10549_v25  ;;  %v12572_v45 = vld [vmem:[#allocation10_spill] sm:$0xff] }
 0x303   : > { %12566 = vst [vmem:[#allocation62_spill] sm:$0xff] %v10669_v16  ;;  %v10680_v32 = vpop.permute.xlu0 %6076  ;;  %v4427_v29 = vpop.f32.mrb[12].mxu0  ;;  %v6039_v43 = vunpack.i.h.bf16 %v10557_v28  ;;  %v6054_v25 = vunpack.i.h.bf16 %v10584_v55 }
 0x304   : > { %12567 = vst [vmem:[#allocation63_spill] sm:$0xff] %v10680_v32  ;;  %6371 = vrot.lane.b32.xlu1 %v12568_v34, %s6646_s19  ;;  %658 = vst [vmem:[%s10484_s18 + $0x70] sm:$0xff] %v4427_v29  ;;  %v565_v41 = vpop.f32.mrb[13].mxu0  ;;  %v755_v44 = vadd.f32 %v754_v1, %v724_v31  ;;  %v6053_v34 = vunpack.i.l.bf16 %v10584_v55  ;;  %v727_v31 = vmul.f32 %v4427_v29, %v4427_v29 }
 0x305   : > { %6366 = vrot.lane.b32.xlu0 %v12569_v22, %s6646_s19  ;;  %656 = vst [vmem:[%s10484_s18 + $0x60] sm:$0xff] %v565_v41  ;;  %v687_v0 = vadd.f32 %v686_v6, %v565_v41  ;;  %v725_v5 = vmul.f32 %v565_v41, %v565_v41  ;;  %v4428_v33 = vpop.f32.mrb[14].mxu0  ;;  %v10721_v22 = vmax.f32 %v12573_v42, %v6033_v57  ;;  %v6038_v6 = vunpack.i.l.bf16 %v10557_v28  ;;  %v12574_v41 = vld [vmem:[#allocation11_spill] sm:$0xff] }
 0x306   : > { %v10704_v4 = vpop.permute.xlu1 %6091  ;;  %659 = vst [vmem:[%s10484_s18 + $0x78] sm:$0xff] %v4428_v33  ;;  %v568_v48 = vpop.f32.mrb[15].mxu0  ;;  %v10735_v42 = vmax.f32 %v10544_v52, %v6028_v39  ;;  %v10738_v28 = vmax.f32 %v10552_v53, %v6044_v15  ;;  %v10746_v55 = vmax.f32 %v10560_v13, %v6039_v43  ;;  %v6049_v53 = vunpack.i.h.bf16 %v10589_v26 }
 0x307   : > { %v10709_v37 = vpop.permute.xlu0 %6086  ;;  %657 = vst [vmem:[%s10484_s18 + $0x68] sm:$0xff] %v568_v48  ;;  %v688_v35 = vadd.f32 %v687_v0, %v568_v48  ;;  %v726_v14 = vmul.f32 %v568_v48, %v568_v48  ;;  %v756_v1 = vadd.f32 %v755_v44, %v725_v5  ;;  %v10743_v0 = vmax.f32 %v10555_v3, %v6043_v12  ;;  %v12576_v5 = vld [vmem:[#allocation14_spill] sm:$0xff]  ;;  %v12577_v3 = vld [vmem:[#allocation15_spill] sm:$0xff] }
 0x308   : > { %6381 = vrot.lane.b32.xlu1 %v12572_v45, %s6646_s19  ;;  %v12575_v45 = vld [vmem:[#allocation57_spill] sm:$0xff]  ;;  %v10751_v52 = vmax.f32 %v10567_v18, %v6038_v6  ;;  %v10758_v13 = vmax.f32 %v10570_v2, %v6054_v25  ;;  %v10761_v12 = vmax.f32 %v10575_v24, %v6053_v34  ;;  %v6064_v43 = vunpack.i.h.bf16 %v10609_v7 }
 0x309   : > { %6376 = vrot.lane.b32.xlu0 %v12574_v41, %s6646_s19  ;;  %v10732_v51 = vmax.f32 %v12575_v45, %v6029_v38  ;;  %v689_v48 = vadd.f32 %v4427_v29, %v688_v35  ;;  %v728_v38 = vmul.f32 %v4428_v33, %v4428_v33  ;;  %v757_v45 = vadd.f32 %v756_v1, %v726_v14 }
 0x30a   : > { %v10729_v47 = vpop.permute.xlu1 %6101  ;;  %v6048_v29 = vunpack.i.l.bf16 %v10589_v26  ;;  %v6063_v26 = vunpack.i.l.bf16 %v10609_v7  ;;  %v6059_v35 = vunpack.i.h.bf16 %v10620_v20  ;;  %v6058_v34 = vunpack.i.l.bf16 %v10620_v20 }
 0x30b   : > { %v10740_v57 = vpop.permute.xlu0 %6096  ;;  %v4431_v39 = vpop.f32.mrb[0].mxu1  ;;  %v690_v15 = vadd.f32 %v4428_v33, %v689_v48  ;;  %v758_v44 = vadd.f32 %v757_v45, %v727_v31  ;;  %v6074_v25 = vunpack.i.h.bf16 %v10644_v9  ;;  %v6073_v1 = vunpack.i.l.bf16 %v10644_v9  ;;  %v12578_v31 = vld [vmem:[#allocation20_spill] sm:$0xff] }
 0x30c   : > { %6391 = vrot.lane.b32.xlu1 %v12576_v5, %s6646_s19  ;;  %662 = vst [vmem:[%s10484_s18 + $0x90] sm:$0xff] %v4431_v39  ;;  %v581_v6 = vpop.f32.mrb[1].mxu1  ;;  %v6069_v45 = vunpack.i.h.bf16 %v10649_v61  ;;  %v10784_v5 = vmax.f32 %v10578_v10, %v6049_v53  ;;  %v10787_v9 = vmax.f32 %v10581_v40, %v6048_v29  ;;  %v10792_v41 = vmax.f32 %v10593_v21, %v6064_v43  ;;  %v12580_v29 = vld [vmem:[#allocation22_spill] sm:$0xff] }
 0x30d   : > { %6386 = vrot.lane.b32.xlu0 %v12577_v3, %s6646_s19  ;;  %660 = vst [vmem:[%s10484_s18 + $0x80] sm:$0xff] %v581_v6  ;;  %v691_v2 = vadd.f32 %v690_v15, %v581_v6  ;;  %v729_v14 = vmul.f32 %v581_v6, %v581_v6  ;;  %v4432_v24 = vpop.f32.mrb[2].mxu1  ;;  %v759_v48 = vadd.f32 %v758_v44, %v728_v38  ;;  %v6068_v3 = vunpack.i.l.bf16 %v10649_v61  ;;  %v12579_v15 = vld [vmem:[#allocation21_spill] sm:$0xff] }
 0x30e   : > { %v10764_v18 = vpop.permute.xlu1 %6111  ;;  %663 = vst [vmem:[%s10484_s18 + $0x98] sm:$0xff] %v4432_v24  ;;  %v584_v7 = vpop.f32.mrb[3].mxu1  ;;  %v731_v38 = vmul.f32 %v4431_v39, %v4431_v39  ;;  %v10795_v61 = vmax.f32 %v10596_v23, %v6063_v26  ;;  %v10803_v53 = vmax.f32 %v10615_v30, %v6058_v34  ;;  %v10806_v40 = vmax.f32 %v10618_v46, %v6074_v25  ;;  %v12583_v30 = vld [vmem:[#allocation23_spill] sm:$0xff] }
 0x30f   : > { %v10769_v33 = vpop.permute.xlu0 %6106  ;;  %661 = vst [vmem:[%s10484_s18 + $0x88] sm:$0xff] %v584_v7  ;;  %v692_v6 = vadd.f32 %v691_v2, %v584_v7  ;;  %v730_v20 = vmul.f32 %v584_v7, %v584_v7  ;;  %v760_v44 = vadd.f32 %v759_v48, %v729_v14  ;;  %v732_v21 = vmul.f32 %v4432_v24, %v4432_v24 }
 0x310   : > { %6401 = vrot.lane.b32.xlu1 %v12578_v31, %s6646_s19  ;;  %v10811_v23 = vmax.f32 %v10627_v56, %v6073_v1  ;;  %v6098_v14 = vunpack.i.l.bf16 %v10740_v57 }
 0x311   : > { %6396 = vrot.lane.b32.xlu0 %v12579_v15, %s6646_s19  ;;  %v10798_v15 = vmax.f32 %v10612_v19, %v6059_v35  ;;  %v693_v10 = vadd.f32 %v4431_v39, %v692_v6  ;;  %v761_v43 = vadd.f32 %v760_v44, %v730_v20  ;;  %v10814_v19 = vmax.f32 %v10630_v27, %v6069_v45 }
 0x312   : > { %v10789_v31 = vpop.permute.xlu1 %6121  ;;  %v10817_v39 = vmax.f32 %v10633_v54, %v6068_v3  ;;  %v6094_v54 = vunpack.i.h.bf16 %v10704_v4  ;;  %v6093_v3 = vunpack.i.l.bf16 %v10704_v4  ;;  %v6089_v45 = vunpack.i.h.bf16 %v10709_v37 }
 0x313   : > { %v10800_v2 = vpop.permute.xlu0 %6116  ;;  %12581 = vst [vmem:[#allocation64_spill] sm:$0xff] %v10814_v19  ;;  %v4435_v46 = vpop.f32.mrb[4].mxu1  ;;  %v694_v26 = vadd.f32 %v4432_v24, %v693_v10  ;;  %v762_v25 = vadd.f32 %v761_v43, %v731_v38  ;;  %v6088_v6 = vunpack.i.l.bf16 %v10709_v37  ;;  %v6104_v20 = vunpack.i.h.bf16 %v10729_v47  ;;  %v12584_v38 = vld [vmem:[#allocation5_spill] sm:$0xff] }
 0x314   : > { %6411 = vrot.lane.b32.xlu1 %v12580_v29, %s6646_s19  ;;  %12582 = vst [vmem:[#allocation65_spill] sm:$0xff] %v10817_v39  ;;  %666 = vst [vmem:[%s10484_s18 + $0xb0] sm:$0xff] %v4435_v46  ;;  %v597_v27 = vpop.f32.mrb[5].mxu1  ;;  %v6103_v10 = vunpack.i.l.bf16 %v10729_v47  ;;  %v6099_v43 = vunpack.i.h.bf16 %v10740_v57  ;;  %v735_v16 = vmul.f32 %v4435_v46, %v4435_v46  ;;  %v10851_v47 = vmax.f32 %v10675_v36, %v6093_v3 }
 0x315   : > { %6406 = vrot.lane.b32.xlu0 %v12583_v30, %s6646_s19  ;;  %664 = vst [vmem:[%s10484_s18 + $0xa0] sm:$0xff] %v597_v27  ;;  %v695_v24 = vadd.f32 %v694_v26, %v597_v27  ;;  %v733_v48 = vmul.f32 %v597_v27, %v597_v27  ;;  %v4436_v7 = vpop.f32.mrb[6].mxu1  ;;  %v763_v44 = vadd.f32 %v762_v25, %v732_v21  ;;  %v12585_v26 = vld [vmem:[#allocation3_spill] sm:$0xff]  ;;  %v6114_v39 = vunpack.i.h.bf16 %v10764_v18 }
 0x316   : > { %v10824_v56 = vpop.permute.xlu1 %6131  ;;  %667 = vst [vmem:[%s10484_s18 + $0xb8] sm:$0xff] %v4436_v7  ;;  %v600_v4 = vpop.f32.mrb[7].mxu1  ;;  %v10848_v25 = vmax.f32 %v10672_v59, %v6094_v54  ;;  %v10860_v57 = vmax.f32 %v10683_v8, %v6088_v6  ;;  %v736_v59 = vmul.f32 %v4436_v7, %v4436_v7  ;;  %v10865_v36 = vmax.f32 %v10689_v63, %v6104_v20 }
 0x317   : > { %v10829_v1 = vpop.permute.xlu0 %6126  ;;  %665 = vst [vmem:[%s10484_s18 + $0xa8] sm:$0xff] %v600_v4  ;;  %v696_v27 = vadd.f32 %v695_v24, %v600_v4  ;;  %v734_v34 = vmul.f32 %v600_v4, %v600_v4  ;;  %v764_v21 = vadd.f32 %v763_v44, %v733_v48  ;;  %v10857_v4 = vmax.f32 %v10678_v50, %v6089_v45 }
 0x318   : > { %6421 = vrot.lane.b32.xlu1 %v12584_v38, %s6647_s20  ;;  %v10868_v3 = vmax.f32 %v10692_v17, %v6103_v10  ;;  %v10876_v48 = vmax.f32 %v10701_v60, %v6098_v14  ;;  %v6109_v63 = vunpack.i.h.bf16 %v10769_v33  ;;  %v6108_v20 = vunpack.i.l.bf16 %v10769_v33 }
 0x319   : > { %6416 = vrot.lane.b32.xlu0 %v12585_v26, %s6647_s20  ;;  %v697_v24 = vadd.f32 %v4435_v46, %v696_v27  ;;  %v765_v54 = vadd.f32 %v764_v21, %v734_v34  ;;  %v10871_v46 = vmax.f32 %v10698_v58, %v6099_v43  ;;  %v6113_v34 = vunpack.i.l.bf16 %v10764_v18  ;;  %v12586_v43 = vld [vmem:[#allocation6_spill] sm:$0xff]  ;;  %v12587_v21 = vld [vmem:[#allocation7_spill] sm:$0xff] }
 0x31a   : > { %v10845_v35 = vpop.permute.xlu1 %6141  ;;  %v10884_v58 = vmax.f32 %v10713_v11, %v6114_v39  ;;  %v6124_v44 = vunpack.i.h.bf16 %v10789_v31  ;;  %v6123_v10 = vunpack.i.l.bf16 %v10789_v31  ;;  %v6118_v33 = vunpack.i.l.bf16 %v10800_v2 }
 0x31b   : > { %v10854_v19 = vpop.permute.xlu0 %6136  ;;  %v4439_v50 = vpop.f32.mrb[8].mxu1  ;;  %v698_v8 = vadd.f32 %v4436_v7, %v697_v24  ;;  %v766_v17 = vadd.f32 %v765_v54, %v735_v16  ;;  %v6119_v16 = vunpack.i.h.bf16 %v10800_v2  ;;  %v6134_v27 = vunpack.i.h.bf16 %v10824_v56 }
 0x31c   : > { %6431 = vrot.lane.b32.xlu1 %v12558_v49, %s6647_s20  ;;  %670 = vst [vmem:[%s10484_s18 + $0xd0] sm:$0xff] %v4439_v50  ;;  %v613_v6 = vpop.f32.mrb[9].mxu1  ;;  %v6133_v31 = vunpack.i.l.bf16 %v10824_v56  ;;  %v739_v37 = vmul.f32 %v4439_v50, %v4439_v50  ;;  %v10909_v2 = vmax.f32 %v10732_v51, %v6109_v63  ;;  %v10912_v32 = vmax.f32 %v10735_v42, %v6108_v20 }
 0x31d   : > { %6426 = vrot.lane.b32.xlu0 %v12559_v62, %s6647_s20  ;;  %668 = vst [vmem:[%s10484_s18 + $0xc0] sm:$0xff] %v613_v6  ;;  %v699_v60 = vadd.f32 %v698_v8, %v613_v6  ;;  %v737_v14 = vmul.f32 %v613_v6, %v613_v6  ;;  %v4440_v18 = vpop.f32.mrb[10].mxu1  ;;  %v767_v11 = vadd.f32 %v766_v17, %v736_v59  ;;  %v6129_v8 = vunpack.i.h.bf16 %v10829_v1 }
 0x31e   : > { %v10880_v45 = vpop.permute.xlu1 %6151  ;;  %671 = vst [vmem:[%s10484_s18 + $0xd8] sm:$0xff] %v4440_v18  ;;  %v616_v39 = vpop.f32.mrb[11].mxu1  ;;  %v10906_v17 = vmax.f32 %v10721_v22, %v6113_v34  ;;  %v10917_v56 = vmax.f32 %v10738_v28, %v6124_v44  ;;  %v740_v22 = vmul.f32 %v4440_v18, %v4440_v18  ;;  %v10923_v51 = vmax.f32 %v10743_v0, %v6123_v10  ;;  %v12589_v28 = vld [vmem:[#allocation9_spill] sm:$0xff] }
 0x31f   : > { %v10887_v7 = vpop.permute.xlu0 %6146  ;;  %669 = vst [vmem:[%s10484_s18 + $0xc8] sm:$0xff] %v616_v39  ;;  %v700_v24 = vadd.f32 %v699_v60, %v616_v39  ;;  %v738_v54 = vmul.f32 %v616_v39, %v616_v39  ;;  %v768_v59 = vadd.f32 %v767_v11, %v737_v14  ;;  %v6128_v39 = vunpack.i.l.bf16 %v10829_v1  ;;  %v12588_v14 = vld [vmem:[#allocation8_spill] sm:$0xff] }
 0x320   : > { %6441 = vrot.lane.b32.xlu1 %v12586_v43, %s6647_s20  ;;  %v10926_v42 = vmax.f32 %v10746_v55, %v6119_v16  ;;  %v10934_v20 = vmax.f32 %v10758_v13, %v6134_v27  ;;  %v10937_v44 = vmax.f32 %v10761_v12, %v6133_v31  ;;  %v10940_v0 = vmax.f32 %v10784_v5, %v6129_v8  ;;  %v12590_v5 = vld [vmem:[#allocation10_spill] sm:$0xff] }
 0x321   : > { %6436 = vrot.lane.b32.xlu0 %v12587_v21, %s6647_s20  ;;  %v701_v60 = vadd.f32 %v4439_v50, %v700_v24  ;;  %v769_v34 = vadd.f32 %v768_v59, %v738_v54  ;;  %v10929_v50 = vmax.f32 %v10751_v52, %v6118_v33  ;;  %v10945_v27 = vmax.f32 %v10787_v9, %v6128_v39 }
 0x322   : > { %v10903_v6 = vpop.permute.xlu1 %6161 }
 0x323   : > { %v10914_v21 = vpop.permute.xlu0 %6156  ;;  %v4443_v63 = vpop.f32.mrb[12].mxu1  ;;  %v702_v1 = vadd.f32 %v4440_v18, %v701_v60  ;;  %v770_v55 = vadd.f32 %v769_v34, %v739_v37  ;;  %v12591_v60 = vld [vmem:[#allocation11_spill] sm:$0xff] }
 0x324   : > { %6451 = vrot.lane.b32.xlu1 %v12588_v14, %s6647_s20  ;;  %674 = vst [vmem:[%s10484_s18 + $0xf0] sm:$0xff] %v4443_v63  ;;  %v629_v52 = vpop.f32.mrb[13].mxu1 }
 0x325   : > { %6446 = vrot.lane.b32.xlu0 %v12589_v28, %s6647_s20  ;;  %672 = vst [vmem:[%s10484_s18 + $0xe0] sm:$0xff] %v629_v52  ;;  %v703_v18 = vadd.f32 %v702_v1, %v629_v52  ;;  %v741_v24 = vmul.f32 %v629_v52, %v629_v52  ;;  %v4444_v13 = vpop.f32.mrb[14].mxu1  ;;  %v771_v31 = vadd.f32 %v770_v55, %v740_v22 }
 0x326   : > { %v6172_v10 = vpop.permute.xlu1 %6171  ;;  %675 = vst [vmem:[%s10484_s18 + $0xf8] sm:$0xff] %v4444_v13  ;;  %v632_v37 = vpop.f32.mrb[15].mxu1 }
 0x327   : > { %v6174_v16 = vunpack.i.h.bf16 %v6172_v10  ;;  %v6173_v11 = vunpack.i.l.bf16 %v6172_v10  ;;  %v6167_v33 = vpop.permute.xlu0 %6166  ;;  %673 = vst [vmem:[%s10484_s18 + $0xe8] sm:$0xff] %v632_v37  ;;  %v704_v9 = vadd.f32 %v703_v18, %v632_v37  ;;  %v742_v39 = vmul.f32 %v632_v37, %v632_v37  ;;  %v12592_v18 = vld [vmem:[#allocation14_spill] sm:$0xff] }
 0x328   : > { %v6169_v12 = vunpack.i.h.bf16 %v6167_v33  ;;  %v6168_v54 = vunpack.i.l.bf16 %v6167_v33  ;;  %6461 = vrot.lane.b32.xlu1 %v12590_v5, %s6647_s20  ;;  %v743_v10 = vmul.f32 %v4443_v63, %v4443_v63  ;;  %v772_v55 = vadd.f32 %v771_v31, %v741_v24 }
 0x329   : > { %v10951_v8 = vmax.f32 %v10848_v25, %v6174_v16  ;;  %v10954_v59 = vmax.f32 %v10851_v47, %v6173_v11  ;;  %6456 = vrot.lane.b32.xlu0 %v12591_v60, %s6647_s20  ;;  %v6144_v25 = vunpack.i.h.bf16 %v10845_v35  ;;  %v705_v11 = vadd.f32 %v4443_v63, %v704_v9 }
 0x32a   : > { %v10960_v34 = vmax.f32 %v10857_v4, %v6169_v12  ;;  %v10963_v1 = vmax.f32 %v10860_v57, %v6168_v54  ;;  %v6182_v22 = vpop.permute.xlu1 %6181  ;;  %v744_v37 = vmul.f32 %v4444_v13, %v4444_v13  ;;  %v773_v4 = vadd.f32 %v772_v55, %v742_v39  ;;  %v12593_v54 = vld [vmem:[#allocation15_spill] sm:$0xff] }
 0x32b   : > { %v6184_v52 = vunpack.i.h.bf16 %v6182_v22  ;;  %v6183_v47 = vunpack.i.l.bf16 %v6182_v22  ;;  %v6177_v16 = vpop.permute.xlu0 %6176  ;;  %v6143_v12 = vunpack.i.l.bf16 %v10845_v35  ;;  %v706_v31 = vadd.f32 %v4444_v13, %v705_v11 }
 0x32c   : > { %v6179_v33 = vunpack.i.h.bf16 %v6177_v16  ;;  %v6178_v60 = vunpack.i.l.bf16 %v6177_v16  ;;  %6471 = vrot.lane.b32.xlu1 %v12592_v18, %s6647_s20  ;;  %v6139_v63 = vunpack.i.h.bf16 %v10854_v19  ;;  %v774_v35 = vadd.f32 %v773_v4, %v743_v10  ;;  %v12595_v10 = vld [vmem:[#allocation21_spill] sm:$0xff] }
 0x32d   : > { %v10970_v57 = vmax.f32 %v10865_v36, %v6184_v52  ;;  %v10973_v24 = vmax.f32 %v10868_v3, %v6183_v47  ;;  %6466 = vrot.lane.b32.xlu0 %v12593_v54, %s6647_s20  ;;  %v6138_v36 = vunpack.i.l.bf16 %v10854_v19  ;;  %v707_v47 = vrot.slane %v706_v31, 4 }
 0x32e   : > { %v10979_v9 = vmax.f32 %v10871_v46, %v6179_v33  ;;  %v10982_v22 = vmax.f32 %v10876_v48, %v6178_v60  ;;  %v6192_v39 = vpop.permute.xlu1 %6191  ;;  %v10986_v16 = vmax.f32 %v10792_v41, %v6144_v25  ;;  %v12594_v46 = vld [vmem:[#allocation20_spill] sm:$0xff]  ;;  %v775_v33 = vadd.f32 %v774_v35, %v744_v37 }
 0x32f   : > { %v6194_v55 = vunpack.i.h.bf16 %v6192_v39  ;;  %v6193_v52 = vunpack.i.l.bf16 %v6192_v39  ;;  %v6187_v3 = vpop.permute.xlu0 %6186  ;;  %v10991_v48 = vmax.f32 %v10795_v61, %v6143_v12  ;;  %v708_v41 = vadd.f32 %v707_v47, %v706_v31 }
 0x330   : > { %v6189_v13 = vunpack.i.h.bf16 %v6187_v3  ;;  %v6188_v11 = vunpack.i.l.bf16 %v6187_v3  ;;  %6481 = vrot.lane.b32.xlu1 %v12594_v46, %s6647_s20  ;;  %v11002_v25 = vmax.f32 %v10798_v15, %v6139_v63  ;;  %v3525_v31 = vmax.f32 %v10803_v53, %v6138_v36 }
 0x331   : > { %v10994_v60 = vmax.f32 %v10884_v58, %v6194_v55  ;;  %v10997_v19 = vmax.f32 %v10906_v17, %v6193_v52  ;;  %6476 = vrot.lane.b32.xlu0 %v12595_v10, %s6647_s20  ;;  %v776_v58 = vrot.slane %v775_v33, 4  ;;  %v709_v35 = vrot.slane %v708_v41, 2 }
 0x332   : > { %v11005_v4 = vmax.f32 %v10909_v2, %v6189_v13  ;;  %v11008_v37 = vmax.f32 %v10912_v32, %v6188_v11  ;;  %v6202_v61 = vpop.permute.xlu1 %6201  ;;  %v782_v55 = vlaneseq  ;;  %v6154_v32 = vunpack.i.h.bf16 %v10880_v45 }
 0x333   : > { %v6204_v12 = vunpack.i.h.bf16 %v6202_v61  ;;  %v6203_v39 = vunpack.i.l.bf16 %v6202_v61  ;;  %v6197_v17 = vpop.permute.xlu0 %6196  ;;  %v777_v2 = vadd.f32 %v776_v58, %v775_v33  ;;  %v710_v47 = vadd.f32 %v709_v35, %v708_v41 }
 0x334   : > { %v6199_v15 = vunpack.i.h.bf16 %v6197_v17  ;;  %v6198_v63 = vunpack.i.l.bf16 %v6197_v17  ;;  %6491 = vrot.lane.b32.xlu1 %v12580_v29, %s6647_s20  ;;  %v6153_v53 = vunpack.i.l.bf16 %v10880_v45  ;;  %v6149_v41 = vunpack.i.h.bf16 %v10887_v7 }
 0x335   : > { %v11016_v52 = vmax.f32 %v10917_v56, %v6204_v12  ;;  %v11019_v3 = vmax.f32 %v10923_v51, %v6203_v39  ;;  %6486 = vrot.lane.b32.xlu0 %v12583_v30, %s6647_s20  ;;  %v778_v56 = vrot.slane %v777_v2, 2  ;;  %v711_v58 = vrot.slane %v710_v47, 1 }
 0x336   : > { %v11025_v36 = vmax.f32 %v10926_v42, %v6199_v15  ;;  %v11028_v13 = vmax.f32 %v10929_v50, %v6198_v63  ;;  %v6212_v11 = vpop.permute.xlu1 %6211  ;;  %v783_v12 = vshrl.u32 %v782_v55, 7  ;;  %v3532_v50 = vmax.f32 %v10806_v40, %v6154_v32 }
 0x337   : > { %v6214_v33 = vunpack.i.h.bf16 %v6212_v11  ;;  %v6213_v51 = vunpack.i.l.bf16 %v6212_v11  ;;  %v6207_v61 = vpop.permute.xlu0 %6206  ;;  %v779_v42 = vadd.f32 %v778_v56, %v777_v2  ;;  %v6148_v17 = vunpack.i.l.bf16 %v10887_v7 }
 0x338   : > { %v6209_v45 = vunpack.i.h.bf16 %v6207_v61  ;;  %v6208_v39 = vunpack.i.l.bf16 %v6207_v61  ;;  %6501 = vrot.lane.b32.xlu1 %v12584_v38, %s6648_s22  ;;  %v3531_v55 = vmax.f32 %v10811_v23, %v6153_v53  ;;  %v712_v11 = vadd.f32 %v711_v58, %v710_v47  ;;  %v12597_v53 = vld [vmem:[#allocation65_spill] sm:$0xff] }
 0x339   : > { %v11041_v35 = vmax.f32 %v10934_v20, %v6214_v33  ;;  %v11044_v15 = vmax.f32 %v10937_v44, %v6213_v51  ;;  %6496 = vrot.lane.b32.xlu0 %v12585_v26, %s6648_s22  ;;  %v780_v7 = vrot.slane %v779_v42, 1  ;;  %vm785_vm0 = vcmp.eq.s32.totalorder %v783_v12, 1  ;;  %v12596_v26 = vld [vmem:[#allocation64_spill] sm:$0xff] }
 0x33a   : > { %v11050_v63 = vmax.f32 %v10940_v0, %v6209_v45  ;;  %v11053_v38 = vmax.f32 %v10945_v27, %v6208_v39  ;;  %v6222_v40 = vpop.permute.xlu1 %6221  ;;  %vm784_vm1 = vcmp.eq.s32.totalorder %v783_v12, 0  ;;  %v3530_v0 = vmax.f32 %v12596_v26, %v6149_v41  ;;  %v12606_v26 = vld [vmem:[#allocation60_spill] sm:$0xff] }
 0x33b   : > { %v6224_v2 = vunpack.i.h.bf16 %v6222_v40  ;;  %v6223_v20 = vunpack.i.l.bf16 %v6222_v40  ;;  %v6217_v32 = vpop.permute.xlu0 %6216  ;;  %v781_v23 = vadd.f32 %v780_v7, %v779_v42  ;;  %v3529_v27 = vmax.f32 %v12597_v53, %v6148_v17 }
 0x33c   : > { %v6219_v44 = vunpack.i.h.bf16 %v6217_v32  ;;  %v6218_v56 = vunpack.i.l.bf16 %v6217_v32  ;;  %6511 = vrot.lane.b32.xlu1 %v12558_v49, %s6648_s22  ;;  %v6164_v49 = vunpack.i.h.bf16 %v10903_v6  ;;  %v6159_v42 = vunpack.i.h.bf16 %v10914_v21  ;;  %v12602_v32 = vld [vmem:[#allocation59_spill] sm:$0xff] }
 0x33d   : > { %v11061_v33 = vmax.f32 %v10986_v16, %v6224_v2  ;;  %v11064_v51 = vmax.f32 %v10991_v48, %v6223_v20  ;;  %6506 = vrot.lane.b32.xlu0 %v12559_v62, %s6648_s22  ;;  %v786_v16 = vsel %vm785_vm0, %v781_v23, 0.0  ;;  %v6163_v48 = vunpack.i.l.bf16 %v10903_v6  ;;  %v12600_v2 = vld [vmem:[#allocation58_spill] sm:$0xff] }
 0x33e   : > { %v11073_v47 = vmax.f32 %v11002_v25, %v6219_v44  ;;  %v11075_v61 = vmax.f32 %v3525_v31, %v6218_v56  ;;  %v6232_v58 = vpop.permute.xlu1 %6231  ;;  %v787_v62 = vsel %vm784_vm1, %v712_v11, %v786_v16  ;;  %v6158_v17 = vunpack.i.l.bf16 %v10914_v21  ;;  %v12598_v25 = vld [vmem:[#allocation62_spill] sm:$0xff]  ;;  %v12603_v21 = vld [vmem:[#allocation7_spill] sm:$0xff] }
 0x33f   : > { %v6234_v41 = vunpack.i.h.bf16 %v6232_v58  ;;  %v6233_v45 = vunpack.i.l.bf16 %v6232_v58  ;;  %v6227_v39 = vpop.permute.xlu0 %6226  ;;  %788 = vst [vmem:[%s224_s25] sm:$0xff] %v787_v62  ;;  %v12599_v31 = vunpack.i.h.bf16 %v12598_v25  ;;  %v12601_v6 = vunpack.i.l.bf16 %v12598_v25  ;;  %v12604_v56 = vld [vmem:[#allocation63_spill] sm:$0xff]  ;;  %v12608_v58 = vld [vmem:[#allocation61_spill] sm:$0xff] }
 0x340   : > { %v6229_v40 = vunpack.i.h.bf16 %v6227_v39  ;;  %v6228_v7 = vunpack.i.l.bf16 %v6227_v39  ;;  %6521 = vrot.lane.b32.xlu1 %v12586_v43, %s6648_s22  ;;  %v12605_v23 = vunpack.i.h.bf16 %v12604_v56  ;;  %v12607_v53 = vunpack.i.l.bf16 %v12604_v56 }
 0x341   : > { %v3408_v20 = vmax.f32 %v12600_v2, %v12599_v31  ;;  %v3407_v44 = vmax.f32 %v12602_v32, %v12601_v6  ;;  %v11090_v12 = vmax.f32 %v3532_v50, %v6234_v41  ;;  %v11092_v11 = vmax.f32 %v3531_v55, %v6233_v45  ;;  %6516 = vrot.lane.b32.xlu0 %v12603_v21, %s6648_s22 }
 0x342   : > { %v3406_v43 = vmax.f32 %v12606_v26, %v12605_v23  ;;  %v3405_v16 = vmax.f32 %v12608_v58, %v12607_v53  ;;  %v11102_v39 = vmax.f32 %v3530_v0, %v6229_v40  ;;  %v11104_v62 = vmax.f32 %v3529_v27, %v6228_v7  ;;  %v6242_v25 = vpop.permute.xlu1 %6241 }
 0x343   : > { %v3536_v50 = vmax.f32 %v3408_v20, %v6164_v49  ;;  %v3535_v41 = vmax.f32 %v3407_v44, %v6163_v48  ;;  %v6244_v55 = vunpack.i.h.bf16 %v6242_v25  ;;  %v6243_v45 = vunpack.i.l.bf16 %v6242_v25  ;;  %v6237_v31 = vpop.permute.xlu0 %6236 }
 0x344   : > { %v3534_v2 = vmax.f32 %v3406_v43, %v6159_v42  ;;  %v3533_v6 = vmax.f32 %v3405_v16, %v6158_v17  ;;  %v6239_v32 = vunpack.i.h.bf16 %v6237_v31  ;;  %v6238_v21 = vunpack.i.l.bf16 %v6237_v31  ;;  %6531 = vrot.lane.b32.xlu1 %v12588_v14, %s6648_s22 }
 0x345   : > { %v11108_v56 = vmax.f32 %v3536_v50, %v6244_v55  ;;  %v11110_v23 = vmax.f32 %v3535_v41, %v6243_v45  ;;  %6526 = vrot.lane.b32.xlu0 %v12589_v28, %s6648_s22  ;;  %v12609_v28 = vld [vmem:[#allocation11_spill] sm:$0xff] }
 0x346   : > { %v11114_v0 = vmax.f32 %v3534_v2, %v6239_v32  ;;  %v11116_v27 = vmax.f32 %v3533_v6, %v6238_v21  ;;  %v6252_v49 = vpop.permute.xlu1 %6251 }
 0x347   : > { %v6254_v48 = vunpack.i.h.bf16 %v6252_v49  ;;  %v6253_v42 = vunpack.i.l.bf16 %v6252_v49  ;;  %v6247_v17 = vpop.permute.xlu0 %6246 }
 0x348   : > { %v6249_v40 = vunpack.i.h.bf16 %v6247_v17  ;;  %v6248_v7 = vunpack.i.l.bf16 %v6247_v17  ;;  %6541 = vrot.lane.b32.xlu1 %v12590_v5, %s6648_s22 }
 0x349   : > { %v11121_v14 = vmax.f32 %v10951_v8, %v6254_v48  ;;  %v11124_v20 = vmax.f32 %v10954_v59, %v6253_v42  ;;  %6536 = vrot.lane.b32.xlu0 %v12609_v28, %s6648_s22 }
 0x34a   : > { %v11129_v44 = vmax.f32 %v10960_v34, %v6249_v40  ;;  %v11132_v26 = vmax.f32 %v10963_v1, %v6248_v7  ;;  %v6262_v43 = vpop.permute.xlu1 %6261 }
 0x34b   : > { %v6264_v53 = vunpack.i.h.bf16 %v6262_v43  ;;  %v6263_v58 = vunpack.i.l.bf16 %v6262_v43  ;;  %v6257_v16 = vpop.permute.xlu0 %6256 }
 0x34c   : > { %v6259_v5 = vunpack.i.h.bf16 %v6257_v16  ;;  %v6258_v25 = vunpack.i.l.bf16 %v6257_v16  ;;  %6551 = vrot.lane.b32.xlu1 %v12592_v18, %s6648_s22 }
 0x34d   : > { %v11137_v8 = vmax.f32 %v10970_v57, %v6264_v53  ;;  %v11140_v59 = vmax.f32 %v10973_v24, %v6263_v58  ;;  %6546 = vrot.lane.b32.xlu0 %v12593_v54, %s6648_s22 }
 0x34e   : > { %v11145_v34 = vmax.f32 %v10979_v9, %v6259_v5  ;;  %v11148_v1 = vmax.f32 %v10982_v22, %v6258_v25  ;;  %v6272_v50 = vpop.permute.xlu1 %6271 }
 0x34f   : > { %v6274_v41 = vunpack.i.h.bf16 %v6272_v50  ;;  %v6273_v55 = vunpack.i.l.bf16 %v6272_v50  ;;  %v6267_v45 = vpop.permute.xlu0 %6266 }
 0x350   : > { %v6269_v18 = vunpack.i.h.bf16 %v6267_v45  ;;  %v6268_v31 = vunpack.i.l.bf16 %v6267_v45  ;;  %6561 = vrot.lane.b32.xlu1 %v12594_v46, %s6648_s22 }
 0x351   : > { %v11153_v57 = vmax.f32 %v10994_v60, %v6274_v41  ;;  %v11156_v24 = vmax.f32 %v10997_v19, %v6273_v55  ;;  %6556 = vrot.lane.b32.xlu0 %v12595_v10, %s6648_s22 }
 0x352   : > { %v11161_v54 = vmax.f32 %v11005_v4, %v6269_v18  ;;  %v11164_v9 = vmax.f32 %v11008_v37, %v6268_v31  ;;  %v6282_v22 = vpop.permute.xlu1 %6281 }
 0x353   : > { %v6284_v2 = vunpack.i.h.bf16 %v6282_v22  ;;  %v6283_v6 = vunpack.i.l.bf16 %v6282_v22  ;;  %v6277_v32 = vpop.permute.xlu0 %6276 }
 0x354   : > { %v6279_v46 = vunpack.i.h.bf16 %v6277_v32  ;;  %v6278_v21 = vunpack.i.l.bf16 %v6277_v32  ;;  %6571 = vrot.lane.b32.xlu1 %v12580_v29, %s6648_s22 }
 0x355   : > { %v11169_v60 = vmax.f32 %v11016_v52, %v6284_v2  ;;  %v11172_v19 = vmax.f32 %v11019_v3, %v6283_v6  ;;  %6566 = vrot.lane.b32.xlu0 %v12583_v30, %s6648_s22 }
 0x356   : > { %v11177_v10 = vmax.f32 %v11025_v36, %v6279_v46  ;;  %v11180_v4 = vmax.f32 %v11028_v13, %v6278_v21  ;;  %v6292_v37 = vpop.permute.xlu1 %6291 }
 0x357   : > { %v6294_v49 = vunpack.i.h.bf16 %v6292_v37  ;;  %v6293_v48 = vunpack.i.l.bf16 %v6292_v37  ;;  %v6287_v42 = vpop.permute.xlu0 %6286 }
 0x358   : > { %v6289_v29 = vunpack.i.h.bf16 %v6287_v42  ;;  %v6288_v17 = vunpack.i.l.bf16 %v6287_v42 }
 0x359   : > { %v11183_v52 = vmax.f32 %v11041_v35, %v6294_v49  ;;  %v11186_v3 = vmax.f32 %v11044_v15, %v6293_v48 }
 0x35a   : > { %v11189_v30 = vmax.f32 %v11050_v63, %v6289_v29  ;;  %v11192_v36 = vmax.f32 %v11053_v38, %v6288_v17  ;;  %v6302_v13 = vpop.permute.xlu1 %6301 }
 0x35b   : > { %v6304_v40 = vunpack.i.h.bf16 %v6302_v13  ;;  %v6303_v7 = vunpack.i.l.bf16 %v6302_v13  ;;  %v6297_v28 = vpop.permute.xlu0 %6296 }
 0x35c   : > { %v6299_v43 = vunpack.i.h.bf16 %v6297_v28  ;;  %v6298_v53 = vunpack.i.l.bf16 %v6297_v28 }
 0x35d   : > { %v11195_v58 = vmax.f32 %v11061_v33, %v6304_v40  ;;  %v11198_v35 = vmax.f32 %v11064_v51, %v6303_v7 }
 0x35e   : > { %v11201_v15 = vmax.f32 %v11073_v47, %v6299_v43  ;;  %v11204_v63 = vmax.f32 %v11075_v61, %v6298_v53  ;;  %v6312_v38 = vpop.permute.xlu1 %6311 }
 0x35f   : > { %v6314_v16 = vunpack.i.h.bf16 %v6312_v38  ;;  %v6313_v5 = vunpack.i.l.bf16 %v6312_v38  ;;  %v6307_v25 = vpop.permute.xlu0 %6306 }
 0x360   : > { %v6309_v50 = vunpack.i.h.bf16 %v6307_v25  ;;  %v6308_v41 = vunpack.i.l.bf16 %v6307_v25 }
 0x361   : > { %v11207_v55 = vmax.f32 %v11090_v12, %v6314_v16  ;;  %v11210_v33 = vmax.f32 %v11092_v11, %v6313_v5 }
 0x362   : > { %v11213_v51 = vmax.f32 %v11102_v39, %v6309_v50  ;;  %v11216_v47 = vmax.f32 %v11104_v62, %v6308_v41  ;;  %v6322_v61 = vpop.permute.xlu1 %6321 }
 0x363   : > { %v6324_v45 = vunpack.i.h.bf16 %v6322_v61  ;;  %v6323_v18 = vunpack.i.l.bf16 %v6322_v61  ;;  %v6317_v31 = vpop.permute.xlu0 %6316 }
 0x364   : > { %v6319_v22 = vunpack.i.h.bf16 %v6317_v31  ;;  %v6318_v2 = vunpack.i.l.bf16 %v6317_v31 }
 0x365   : > { %v11219_v6 = vmax.f32 %v11108_v56, %v6324_v45  ;;  %v11222_v12 = vmax.f32 %v11110_v23, %v6323_v18 }
 0x366   : > { %v11225_v11 = vmax.f32 %v11114_v0, %v6319_v22  ;;  %v11228_v39 = vmax.f32 %v11116_v27, %v6318_v2  ;;  %v6332_v62 = vpop.permute.xlu1 %6331 }
 0x367   : > { %v6334_v32 = vunpack.i.h.bf16 %v6332_v62  ;;  %v6333_v46 = vunpack.i.l.bf16 %v6332_v62  ;;  %v6327_v21 = vpop.permute.xlu0 %6326 }
 0x368   : > { %v6329_v37 = vunpack.i.h.bf16 %v6327_v21  ;;  %v6328_v49 = vunpack.i.l.bf16 %v6327_v21 }
 0x369   : > { %v11231_v48 = vmax.f32 %v11121_v14, %v6334_v32  ;;  %v11234_v56 = vmax.f32 %v11124_v20, %v6333_v46 }
 0x36a   : > { %v11237_v23 = vmax.f32 %v11129_v44, %v6329_v37  ;;  %v11240_v0 = vmax.f32 %v11132_v26, %v6328_v49  ;;  %v6342_v27 = vpop.permute.xlu1 %6341 }
 0x36b   : > { %12610 = vst [vmem:[#allocation66_spill] sm:$0xff] %v11231_v48  ;;  %12611 = vst [vmem:[#allocation67_spill] sm:$0xff] %v11234_v56  ;;  %v6337_v42 = vpop.permute.xlu0 %6336  ;;  %v6344_v22 = vunpack.i.h.bf16 %v6342_v27  ;;  %v6343_v2 = vunpack.i.l.bf16 %v6342_v27 }
 0x36c   : > { %12612 = vst [vmem:[#allocation68_spill] sm:$0xff] %v11237_v23  ;;  %12613 = vst [vmem:[#allocation69_spill] sm:$0xff] %v11240_v0  ;;  %v6339_v62 = vunpack.i.h.bf16 %v6337_v42  ;;  %v6338_v32 = vunpack.i.l.bf16 %v6337_v42 }
 0x36e   : > { %v6352_v29 = vpop.permute.xlu1 %6351  ;;  %v3894_v27 = vmax.f32 %v11145_v34, %v6339_v62  ;;  %v3893_v42 = vmax.f32 %v11148_v1, %v6338_v32 }
 0x36f   : > { %v6347_v17 = vpop.permute.xlu0 %6346  ;;  %v6354_v21 = vunpack.i.h.bf16 %v6352_v29  ;;  %v6353_v37 = vunpack.i.l.bf16 %v6352_v29 }
 0x370   : > { %v6349_v49 = vunpack.i.h.bf16 %v6347_v17  ;;  %v6348_v0 = vunpack.i.l.bf16 %v6347_v17 }
 0x371   : > { %v11285_v17 = vmax.f32 %v11153_v57, %v6354_v21 }
 0x372   : > { %v6362_v13 = vpop.permute.xlu1 %6361 }
 0x373   : > { %v6357_v40 = vpop.permute.xlu0 %6356  ;;  %v6364_v56 = vunpack.i.h.bf16 %v6362_v13  ;;  %v6363_v48 = vunpack.i.l.bf16 %v6362_v13  ;;  %v11288_v13 = vmax.f32 %v11156_v24, %v6353_v37 }
 0x375   : > { %v11299_v1 = vmax.f32 %v11169_v60, %v6364_v56 }
 0x376   : > { %v6372_v7 = vpop.permute.xlu1 %6371 }
 0x377   : > { %v6367_v28 = vpop.permute.xlu0 %6366 }
 0x378   : > { %v6368_v29 = vunpack.i.l.bf16 %v6367_v28 }
 0x37a   : > { %v11242_v43 = vpop.permute.xlu1 %6381 }
 0x37b   : > { %v11244_v14 = vpop.permute.xlu0 %6376 }
 0x37e   : > { %v11246_v20 = vpop.permute.xlu1 %6391 }
 0x37f   : > { %v11248_v53 = vpop.permute.xlu0 %6386  ;;  %v6394_v56 = vunpack.i.h.bf16 %v11246_v20 }
 0x382   : > { %v11250_v44 = vpop.permute.xlu1 %6401 }
 0x383   : > { %v11252_v26 = vpop.permute.xlu0 %6396 }
 0x386   : > { %v11254_v38 = vpop.permute.xlu1 %6411 }
 0x387   : > { %v11256_v16 = vpop.permute.xlu0 %6406 }
 0x388   : > { %12614 = vst [vmem:[#allocation70_spill] sm:$0xff] %v11256_v16 }
 0x38a   : > { %v11258_v5 = vpop.permute.xlu1 %6421 }
 0x38b   : > { %v11260_v25 = vpop.permute.xlu0 %6416 }
 0x38e   : > { %v11262_v50 = vpop.permute.xlu1 %6431 }
 0x38f   : > { %12615 = vst [vmem:[#allocation71_spill] sm:$0xff] %v11262_v50  ;;  %v11264_v41 = vpop.permute.xlu0 %6426  ;;  %v6369_v50 = vunpack.i.h.bf16 %v6367_v28  ;;  %v6393_v28 = vunpack.i.l.bf16 %v11246_v20  ;;  %v12622_v32 = vld [vmem:[#allocation70_spill] sm:$0xff] }
 0x390   : > { %12616 = vst [vmem:[#allocation72_spill] sm:$0xff] %v11264_v41  ;;  %v6374_v41 = vunpack.i.h.bf16 %v6372_v7  ;;  %v6408_v21 = vunpack.i.l.bf16 %v12622_v32 }
 0x392   : > { %v11266_v61 = vpop.permute.xlu1 %6441  ;;  %v11315_v60 = vmax.f32 %v11183_v52, %v6374_v41  ;;  %v6388_v52 = vunpack.i.l.bf16 %v11248_v53 }
 0x393   : > { %12617 = vst [vmem:[#allocation73_spill] sm:$0xff] %v11266_v61  ;;  %v11268_v45 = vpop.permute.xlu0 %6436  ;;  %v6359_v61 = vunpack.i.h.bf16 %v6357_v40 }
 0x394   : > { %12618 = vst [vmem:[#allocation74_spill] sm:$0xff] %v11268_v45  ;;  %v6358_v45 = vunpack.i.l.bf16 %v6357_v40  ;;  %v11302_v40 = vmax.f32 %v11172_v19, %v6363_v48 }
 0x395   : > { %v11305_v57 = vmax.f32 %v11177_v10, %v6359_v61  ;;  %v11321_v10 = vmax.f32 %v11189_v30, %v6369_v50  ;;  %v6403_v30 = vunpack.i.l.bf16 %v11250_v44  ;;  %v6399_v50 = vunpack.i.h.bf16 %v11252_v26 }
 0x396   : > { %v11270_v18 = vpop.permute.xlu1 %6451  ;;  %v11308_v24 = vmax.f32 %v11180_v4, %v6358_v45  ;;  %v11324_v4 = vmax.f32 %v11192_v36, %v6368_v29  ;;  %v6398_v36 = vunpack.i.l.bf16 %v11252_v26  ;;  %v6424_v45 = vunpack.i.h.bf16 %v11258_v5 }
 0x397   : > { %12619 = vst [vmem:[#allocation75_spill] sm:$0xff] %v11270_v18  ;;  %v11272_v31 = vpop.permute.xlu0 %6446  ;;  %v3896_v18 = vmax.f32 %v11137_v8, %v6344_v22  ;;  %v11291_v8 = vmax.f32 %v11161_v54, %v6349_v49  ;;  %v6384_v54 = vunpack.i.h.bf16 %v11242_v43  ;;  %v6419_v22 = vunpack.i.h.bf16 %v11260_v25 }
 0x398   : > { %12620 = vst [vmem:[#allocation76_spill] sm:$0xff] %v11272_v31  ;;  %v3895_v31 = vmax.f32 %v11140_v59, %v6343_v2  ;;  %v11294_v59 = vmax.f32 %v11164_v9, %v6348_v0  ;;  %v6379_v9 = vunpack.i.h.bf16 %v11244_v14  ;;  %v6378_v0 = vunpack.i.l.bf16 %v11244_v14 }
 0x399   : > { %v11339_v41 = vmax.f32 %v11195_v58, %v6384_v54  ;;  %v6418_v26 = vunpack.i.l.bf16 %v11260_v25  ;;  %v11357_v58 = vmax.f32 %v11207_v55, %v6394_v56  ;;  %v11374_v25 = vmax.f32 %v11222_v12, %v6403_v30  ;;  %v12623_v54 = vld [vmem:[#allocation71_spill] sm:$0xff]  ;;  %v12624_v56 = vld [vmem:[#allocation72_spill] sm:$0xff] }
 0x39a   : > { %v11274_v46 = vpop.permute.xlu1 %6461  ;;  %v11345_v61 = vmax.f32 %v11201_v15, %v6379_v9  ;;  %v11377_v55 = vmax.f32 %v11225_v11, %v6399_v50  ;;  %v4022_v49 = vmax.f32 %v3894_v27, %v6419_v22  ;;  %v6434_v11 = vunpack.i.h.bf16 %v12623_v54 }
 0x39b   : > { %12621 = vst [vmem:[#allocation77_spill] sm:$0xff] %v11274_v46  ;;  %v11276_v23 = vpop.permute.xlu0 %6456  ;;  %v6373_v46 = vunpack.i.l.bf16 %v6372_v7  ;;  %v6383_v7 = vunpack.i.l.bf16 %v11242_v43  ;;  %v6389_v43 = vunpack.i.h.bf16 %v11248_v53  ;;  %v11348_v53 = vmax.f32 %v11204_v63, %v6378_v0  ;;  %v12626_v50 = vld [vmem:[#allocation74_spill] sm:$0xff] }
 0x39c   : > { %v11366_v63 = vmax.f32 %v11216_v47, %v6388_v52  ;;  %v6413_v47 = vunpack.i.l.bf16 %v11254_v38  ;;  %v4021_v12 = vmax.f32 %v3893_v42, %v6418_v26 }
 0x39d   : > { %v11318_v19 = vmax.f32 %v11186_v3, %v6373_v46  ;;  %v6404_v3 = vunpack.i.h.bf16 %v11250_v44  ;;  %v11342_v20 = vmax.f32 %v11198_v35, %v6383_v7  ;;  %v6423_v44 = vunpack.i.l.bf16 %v11258_v5 }
 0x39e   : > { %v11282_v16 = vpop.permute.xlu1 %6471  ;;  %v11360_v35 = vmax.f32 %v11210_v33, %v6393_v28  ;;  %v11363_v15 = vmax.f32 %v11213_v51, %v6389_v43  ;;  %v11380_v33 = vmax.f32 %v11228_v39, %v6398_v36  ;;  %v6414_v51 = vunpack.i.h.bf16 %v11254_v38  ;;  %v12625_v28 = vld [vmem:[#allocation73_spill] sm:$0xff] }
 0x39f   : > { %v11296_v34 = vpop.permute.xlu0 %6466  ;;  %v11371_v5 = vmax.f32 %v11219_v6, %v6404_v3  ;;  %v6409_v46 = vunpack.i.h.bf16 %v12622_v32  ;;  %v4024_v6 = vmax.f32 %v3896_v18, %v6424_v45  ;;  %v4023_v37 = vmax.f32 %v3895_v31, %v6423_v44 }
 0x3a0   : > { %v6433_v7 = vunpack.i.l.bf16 %v12623_v54  ;;  %v6429_v18 = vunpack.i.h.bf16 %v12624_v56  ;;  %v6428_v31 = vunpack.i.l.bf16 %v12624_v56  ;;  %v6444_v43 = vunpack.i.h.bf16 %v12625_v28 }
 0x3a1   : > { %v6443_v52 = vunpack.i.l.bf16 %v12625_v28  ;;  %v6439_v36 = vunpack.i.h.bf16 %v12626_v50  ;;  %v6438_v45 = vunpack.i.l.bf16 %v12626_v50 }
 0x3a2   : > { %v11326_v48 = vpop.permute.xlu1 %6481  ;;  %v4027_v54 = vmax.f32 %v11288_v13, %v6433_v7  ;;  %v4032_v13 = vmax.f32 %v11299_v1, %v6444_v43  ;;  %v12629_v50 = vld [vmem:[#allocation77_spill] sm:$0xff] }
 0x3a3   : > { %v11332_v14 = vpop.permute.xlu0 %6476 }
 0x3a6   : > { %v11354_v2 = vpop.permute.xlu1 %6491 }
 0x3a7   : > { %v11368_v62 = vpop.permute.xlu0 %6486 }
 0x3aa   : > { %v6502_v29 = vpop.permute.xlu1 %6501 }
 0x3ab   : > { %v6504_v9 = vunpack.i.h.bf16 %v6502_v29  ;;  %v6503_v39 = vunpack.i.l.bf16 %v6502_v29  ;;  %v6497_v0 = vpop.permute.xlu0 %6496  ;;  %v4028_v29 = vmax.f32 %v11285_v17, %v6434_v11 }
 0x3ac   : > { %v6499_v27 = vunpack.i.h.bf16 %v6497_v0  ;;  %v6498_v42 = vunpack.i.l.bf16 %v6497_v0 }
 0x3ad   : > { %v4152_v3 = vmax.f32 %v4024_v6, %v6504_v9  ;;  %v4151_v30 = vmax.f32 %v4023_v37, %v6503_v39  ;;  %v4026_v37 = vmax.f32 %v11291_v8, %v6429_v18  ;;  %v4025_v39 = vmax.f32 %v11294_v59, %v6428_v31 }
 0x3ae   : > { %v4150_v44 = vmax.f32 %v4022_v49, %v6499_v27  ;;  %v4149_v22 = vmax.f32 %v4021_v12, %v6498_v42  ;;  %v6512_v26 = vpop.permute.xlu1 %6511  ;;  %v4031_v12 = vmax.f32 %v11302_v40, %v6443_v52  ;;  %v4030_v8 = vmax.f32 %v11305_v57, %v6439_v36  ;;  %v12627_v27 = vld [vmem:[#allocation75_spill] sm:$0xff]  ;;  %v12628_v52 = vld [vmem:[#allocation76_spill] sm:$0xff] }
 0x3af   : > { %4184 = vst.msk [vmem:[%s11393_s28 + $0x10] sm:$0xff] %vm4181_vm2, %v4151_v30  ;;  %4185 = vst.msk [vmem:[%s11393_s28 + $0x18] sm:$0xff] %vm4181_vm2, %v4152_v3  ;;  %v6514_v0 = vunpack.i.h.bf16 %v6512_v26  ;;  %v6513_v6 = vunpack.i.l.bf16 %v6512_v26  ;;  %v6507_v9 = vpop.permute.xlu0 %6506  ;;  %v4029_v59 = vmax.f32 %v11308_v24, %v6438_v45  ;;  %v6454_v42 = vunpack.i.h.bf16 %v12627_v27 }
 0x3b0   : > { %4182 = vst.msk [vmem:[%s11393_s28] sm:$0xff] %vm4181_vm2, %v4149_v22  ;;  %4183 = vst.msk [vmem:[%s11393_s28 + $0x8] sm:$0xff] %vm4181_vm2, %v4150_v44  ;;  %v6509_v17 = vunpack.i.h.bf16 %v6507_v9  ;;  %v6508_v49 = vunpack.i.l.bf16 %v6507_v9  ;;  %v6453_v28 = vunpack.i.l.bf16 %v12627_v27  ;;  %v6449_v3 = vunpack.i.h.bf16 %v12628_v52 }
 0x3b1   : > { %v4156_v11 = vmax.f32 %v4028_v29, %v6514_v0  ;;  %v4155_v7 = vmax.f32 %v4027_v54, %v6513_v6  ;;  %v6448_v57 = vunpack.i.l.bf16 %v12628_v52  ;;  %v6464_v36 = vunpack.i.h.bf16 %v12629_v50 }
 0x3b2   : > { %v4154_v56 = vmax.f32 %v4026_v37, %v6509_v17  ;;  %v4153_v18 = vmax.f32 %v4025_v39, %v6508_v49  ;;  %v6522_v31 = vpop.permute.xlu1 %6521  ;;  %v6463_v45 = vunpack.i.l.bf16 %v12629_v50  ;;  %v6459_v26 = vunpack.i.h.bf16 %v11276_v23 }
 0x3b3   : > { %4188 = vst.msk [vmem:[%s11393_s28 + $0x30] sm:$0xff] %vm4181_vm2, %v4155_v7  ;;  %4189 = vst.msk [vmem:[%s11393_s28 + $0x38] sm:$0xff] %vm4181_vm2, %v4156_v11  ;;  %v6524_v1 = vunpack.i.h.bf16 %v6522_v31  ;;  %v6523_v40 = vunpack.i.l.bf16 %v6522_v31  ;;  %v6517_v43 = vpop.permute.xlu0 %6516  ;;  %v6458_v29 = vunpack.i.l.bf16 %v11276_v23  ;;  %v4036_v9 = vmax.f32 %v11315_v60, %v6454_v42 }
 0x3b4   : > { %4186 = vst.msk [vmem:[%s11393_s28 + $0x20] sm:$0xff] %vm4181_vm2, %v4153_v18  ;;  %4187 = vst.msk [vmem:[%s11393_s28 + $0x28] sm:$0xff] %vm4181_vm2, %v4154_v56  ;;  %v6519_v24 = vunpack.i.h.bf16 %v6517_v43  ;;  %v6518_v30 = vunpack.i.l.bf16 %v6517_v43  ;;  %v4035_v37 = vmax.f32 %v11318_v19, %v6453_v28  ;;  %v4040_v19 = vmax.f32 %v11339_v41, %v6464_v36 }
 0x3b5   : > { %v4160_v44 = vmax.f32 %v4032_v13, %v6524_v1  ;;  %v4159_v22 = vmax.f32 %v4031_v12, %v6523_v40  ;;  %v4034_v13 = vmax.f32 %v11321_v10, %v6449_v3  ;;  %v4033_v12 = vmax.f32 %v11324_v4, %v6448_v57 }
 0x3b6   : > { %v4158_v54 = vmax.f32 %v4030_v8, %v6519_v24  ;;  %v4157_v0 = vmax.f32 %v4029_v59, %v6518_v30  ;;  %v6532_v6 = vpop.permute.xlu1 %6531  ;;  %v4039_v11 = vmax.f32 %v11342_v20, %v6463_v45  ;;  %v4038_v10 = vmax.f32 %v11345_v61, %v6459_v26 }
 0x3b7   : > { %4192 = vst.msk [vmem:[%s11393_s28 + $0x50] sm:$0xff] %vm4181_vm2, %v4159_v22  ;;  %4193 = vst.msk [vmem:[%s11393_s28 + $0x58] sm:$0xff] %vm4181_vm2, %v4160_v44  ;;  %v6534_v39 = vunpack.i.h.bf16 %v6532_v6  ;;  %v6533_v17 = vunpack.i.l.bf16 %v6532_v6  ;;  %v6527_v49 = vpop.permute.xlu0 %6526  ;;  %v4037_v4 = vmax.f32 %v11348_v53, %v6458_v29  ;;  %v6474_v31 = vunpack.i.h.bf16 %v11282_v16 }
 0x3b8   : > { %4190 = vst.msk [vmem:[%s11393_s28 + $0x40] sm:$0xff] %vm4181_vm2, %v4157_v0  ;;  %4191 = vst.msk [vmem:[%s11393_s28 + $0x48] sm:$0xff] %vm4181_vm2, %v4158_v54  ;;  %v6529_v23 = vunpack.i.h.bf16 %v6527_v49  ;;  %v6528_v60 = vunpack.i.l.bf16 %v6527_v49  ;;  %v6473_v27 = vunpack.i.l.bf16 %v11282_v16  ;;  %v6469_v28 = vunpack.i.h.bf16 %v11296_v34 }
 0x3b9   : > { %v4164_v7 = vmax.f32 %v4036_v9, %v6534_v39  ;;  %v4163_v8 = vmax.f32 %v4035_v37, %v6533_v17  ;;  %v6468_v61 = vunpack.i.l.bf16 %v11296_v34  ;;  %v6484_v16 = vunpack.i.h.bf16 %v11326_v48 }
 0x3ba   : > { %v4162_v59 = vmax.f32 %v4034_v13, %v6529_v23  ;;  %v4161_v56 = vmax.f32 %v4033_v12, %v6528_v60  ;;  %v6542_v18 = vpop.permute.xlu1 %6541  ;;  %v6483_v40 = vunpack.i.l.bf16 %v11326_v48  ;;  %v6479_v3 = vunpack.i.h.bf16 %v11332_v14  ;;  %v12631_v60 = vld [vmem:[#allocation67_spill] sm:$0xff] }
 0x3bb   : > { %4196 = vst.msk [vmem:[%s11393_s28 + $0x70] sm:$0xff] %vm4181_vm2, %v4163_v8  ;;  %4197 = vst.msk [vmem:[%s11393_s28 + $0x78] sm:$0xff] %vm4181_vm2, %v4164_v7  ;;  %v6544_v41 = vunpack.i.h.bf16 %v6542_v18  ;;  %v6543_v20 = vunpack.i.l.bf16 %v6542_v18  ;;  %v6537_v42 = vpop.permute.xlu0 %6536  ;;  %v6478_v34 = vunpack.i.l.bf16 %v11332_v14  ;;  %v4044_v50 = vmax.f32 %v11357_v58, %v6474_v31 }
 0x3bc   : > { %4194 = vst.msk [vmem:[%s11393_s28 + $0x60] sm:$0xff] %vm4181_vm2, %v4161_v56  ;;  %4195 = vst.msk [vmem:[%s11393_s28 + $0x68] sm:$0xff] %vm4181_vm2, %v4162_v59  ;;  %v6539_v53 = vunpack.i.h.bf16 %v6537_v42  ;;  %v6538_v1 = vunpack.i.l.bf16 %v6537_v42  ;;  %v4043_v36 = vmax.f32 %v11360_v35, %v6473_v27  ;;  %v4042_v22 = vmax.f32 %v11363_v15, %v6469_v28 }
 0x3bd   : > { %v4168_v43 = vmax.f32 %v4040_v19, %v6544_v41  ;;  %v4167_v52 = vmax.f32 %v4039_v11, %v6543_v20  ;;  %v4041_v26 = vmax.f32 %v11366_v63, %v6468_v61  ;;  %v4048_v35 = vmax.f32 %v11371_v5, %v6484_v16 }
 0x3be   : > { %v4166_v57 = vmax.f32 %v4038_v10, %v6539_v53  ;;  %v4165_v24 = vmax.f32 %v4037_v4, %v6538_v1  ;;  %v6552_v30 = vpop.permute.xlu1 %6551  ;;  %v4047_v29 = vmax.f32 %v11374_v25, %v6483_v40  ;;  %v4046_v15 = vmax.f32 %v11377_v55, %v6479_v3  ;;  %v12633_v10 = vld [vmem:[#allocation69_spill] sm:$0xff] }
 0x3bf   : > { %4200 = vst.msk [vmem:[%s11393_s28 + $0x90] sm:$0xff] %vm4181_vm2, %v4167_v52  ;;  %4201 = vst.msk [vmem:[%s11393_s28 + $0x98] sm:$0xff] %vm4181_vm2, %v4168_v43  ;;  %v6554_v48 = vunpack.i.h.bf16 %v6552_v30  ;;  %v6553_v45 = vunpack.i.l.bf16 %v6552_v30  ;;  %v6547_v44 = vpop.permute.xlu0 %6546  ;;  %v4045_v63 = vmax.f32 %v11380_v33, %v6478_v34  ;;  %v6494_v39 = vunpack.i.h.bf16 %v11354_v2 }
 0x3c0   : > { %4198 = vst.msk [vmem:[%s11393_s28 + $0x80] sm:$0xff] %vm4181_vm2, %v4165_v24  ;;  %4199 = vst.msk [vmem:[%s11393_s28 + $0x88] sm:$0xff] %vm4181_vm2, %v4166_v57  ;;  %v6549_v14 = vunpack.i.h.bf16 %v6547_v44  ;;  %v6548_v58 = vunpack.i.l.bf16 %v6547_v44  ;;  %v6493_v17 = vunpack.i.l.bf16 %v11354_v2  ;;  %v6489_v13 = vunpack.i.h.bf16 %v11368_v62  ;;  %v12630_v2 = vld [vmem:[#allocation66_spill] sm:$0xff] }
 0x3c1   : > { %v4172_v54 = vmax.f32 %v4044_v50, %v6554_v48  ;;  %v4171_v0 = vmax.f32 %v4043_v36, %v6553_v45  ;;  %v6488_v55 = vunpack.i.l.bf16 %v11368_v62  ;;  %v3924_v23 = vmax.f32 %v12630_v2, %v6414_v51  ;;  %v12632_v62 = vld [vmem:[#allocation68_spill] sm:$0xff] }
 0x3c2   : > { %v4170_v6 = vmax.f32 %v4042_v22, %v6549_v14  ;;  %v4169_v9 = vmax.f32 %v4041_v26, %v6548_v58  ;;  %v6562_v37 = vpop.permute.xlu1 %6561  ;;  %v3923_v19 = vmax.f32 %v12631_v60, %v6413_v47  ;;  %v3922_v8 = vmax.f32 %v12632_v62, %v6409_v46 }
 0x3c3   : > { %4204 = vst.msk [vmem:[%s11393_s28 + $0xb0] sm:$0xff] %vm4181_vm2, %v4171_v0  ;;  %4205 = vst.msk [vmem:[%s11393_s28 + $0xb8] sm:$0xff] %vm4181_vm2, %v4172_v54  ;;  %v6564_v5 = vunpack.i.h.bf16 %v6562_v37  ;;  %v6563_v25 = vunpack.i.l.bf16 %v6562_v37  ;;  %v6557_v49 = vpop.permute.xlu0 %6556  ;;  %v3921_v4 = vmax.f32 %v12633_v10, %v6408_v21  ;;  %v4052_v51 = vmax.f32 %v3924_v23, %v6494_v39 }
 0x3c4   : > { %4202 = vst.msk [vmem:[%s11393_s28 + $0xa0] sm:$0xff] %vm4181_vm2, %v4169_v9  ;;  %4203 = vst.msk [vmem:[%s11393_s28 + $0xa8] sm:$0xff] %vm4181_vm2, %v4170_v6  ;;  %v6559_v33 = vunpack.i.h.bf16 %v6557_v49  ;;  %v6558_v12 = vunpack.i.l.bf16 %v6557_v49  ;;  %v4051_v31 = vmax.f32 %v3923_v19, %v6493_v17  ;;  %v4050_v27 = vmax.f32 %v3922_v8, %v6489_v13 }
 0x3c5   : > { %v4176_v11 = vmax.f32 %v4048_v35, %v6564_v5  ;;  %v4175_v7 = vmax.f32 %v4047_v29, %v6563_v25  ;;  %v4049_v32 = vmax.f32 %v3921_v4, %v6488_v55 }
 0x3c6   : > { %v4174_v59 = vmax.f32 %v4046_v15, %v6559_v33  ;;  %v4173_v56 = vmax.f32 %v4045_v63, %v6558_v12  ;;  %v6572_v18 = vpop.permute.xlu1 %6571 }
 0x3c7   : > { %4208 = vst.msk [vmem:[%s11393_s28 + $0xd0] sm:$0xff] %vm4181_vm2, %v4175_v7  ;;  %4209 = vst.msk [vmem:[%s11393_s28 + $0xd8] sm:$0xff] %vm4181_vm2, %v4176_v11  ;;  %v6574_v38 = vunpack.i.h.bf16 %v6572_v18  ;;  %v6573_v47 = vunpack.i.l.bf16 %v6572_v18  ;;  %v6567_v46 = vpop.permute.xlu0 %6566 }
 0x3c8   : > { %4206 = vst.msk [vmem:[%s11393_s28 + $0xc0] sm:$0xff] %vm4181_vm2, %v4173_v56  ;;  %4207 = vst.msk [vmem:[%s11393_s28 + $0xc8] sm:$0xff] %vm4181_vm2, %v4174_v59  ;;  %v6569_v21 = vunpack.i.h.bf16 %v6567_v46  ;;  %v6568_v41 = vunpack.i.l.bf16 %v6567_v46 }
 0x3c9   : > { %v4180_v20 = vmax.f32 %v4052_v51, %v6574_v38  ;;  %v4179_v42 = vmax.f32 %v4051_v31, %v6573_v47 }
 0x3ca   : > { %v4178_v28 = vmax.f32 %v4050_v27, %v6569_v21  ;;  %v4177_v61 = vmax.f32 %v4049_v32, %v6568_v41 }
 0x3cb   : > { %4212 = vst.msk [vmem:[%s11393_s28 + $0xf0] sm:$0xff] %vm4181_vm2, %v4179_v42  ;;  %4213 = vst.msk [vmem:[%s11393_s28 + $0xf8] sm:$0xff] %vm4181_vm2, %v4180_v20 }
 0x3cc   : > { %4210 = vst.msk [vmem:[%s11393_s28 + $0xe0] sm:$0xff] %vm4181_vm2, %v4177_v61  ;;  %4211 = vst.msk [vmem:[%s11393_s28 + $0xe8] sm:$0xff] %vm4181_vm2, %v4178_v28 }
 0x3cd PF: > { %s15_s15 = sadd.s32 1, %s6621_s15  }
 0x3ce   : > { %p12_p5 = scmp.ge.s32.totalorder %s15_s15, 6  }
 0x3d0   :  { %14 = sbr.rel (!%p12_p5) target bundleno = 1 (0x1), region = 82 }

// kernel: downsample_block.6
= control target key start
LH: loop header
LB: loop body
LE: loop exit
PB: predicated region body
PF: predicated region fallthrough
CT: control target
= control target key end

     0   :  { %s1192_s12 = smov 0   ;;  %s1424_s0 = inlined_call_operand.vmem [shape: bf16[1024,256], index: 0, kind: input, shape index: {}]   ;;  %s1425_s1 = inlined_call_operand.vmem [shape: bf16[256,128], index: 1, kind: input, shape index: {}]   ;;  %s1426_s2 = inlined_call_operand.vmem [shape: f32[1024,128], index: 2, kind: output, shape index: {0}]   ;;  %s1427_s3 = inlined_call_operand.vmem [shape: f32[32,128], index: 3, kind: output, shape index: {1}]  }
   0x1 LB: > { %s1198_s13 = sadd.s32 4294967295, %s1170_s12   ;;  %p906_p0 = scmp.ge.s32.totalorder %s1170_s12, 1  ;;  %s1170_s12 = sphi %s1192_s12, %s14_s12  }
   0x2   : > { %p142_p1 = scmp.lt.s32.totalorder %s1170_s12, 5 }
   0x4   : > { %p143_p2 = pnand %p906_p0, %p142_p1 }
   0x5   : > { %v1100_v0 = vld [vmem:[%s1425_s1 + $0x40] sm:$0xff] (!%p143_p2)   ;;  %s907_s16 = sshll.u32 (!%p143_p2), %s1198_s13, 5  ;;  %v1102_v2 = vld [vmem:[%s1425_s1 + $0x48] sm:$0xff] (!%p143_p2)   ;;  %v1104_v4 = vld [vmem:[%s1425_s1 + $0x50] sm:$0xff] (!%p143_p2)   ;;  %p184_p4 = scmp.lt.s32.totalorder (!%p143_p2), %s1198_s13, 3 }
   0x6   : > { %146 = sbr.rel (%p143_p2) target bundleno = 362 (0x16a), region = 28  ;;  %v1101_v1 = vld [vmem:[%s1425_s1] sm:$0xff] (!%p143_p2)   ;;  %964 = vmatprep.subr.bf16.mxu0 (!%p143_p2), %v1100_v0  ;;  %1076 = vmatprep.subr.bf16.mxu1 (!%p143_p2), %v1100_v0  ;;  %v1103_v3 = vld [vmem:[%s1425_s1 + $0x8] sm:$0xff] (!%p143_p2)   ;;  %p172_p3 = scmp.lt.s32.totalorder (!%p143_p2), %s907_s16, 127  ;;  %v1105_v5 = vld [vmem:[%s1425_s1 + $0x10] sm:$0xff] (!%p143_p2)  }
   0x7   : > { %965 = vmatpush3.bf16.msra.mxu0 (!%p143_p2), %v1101_v1  ;;  %1084 = vmatpush3.bf16.msra.mxu1 (!%p143_p2), %v1101_v1  ;;  %v1106_v6 = vld [vmem:[%s1425_s1 + $0x58] sm:$0xff] (!%p143_p2)   ;;  %v1108_v8 = vld [vmem:[%s1425_s1 + $0x60] sm:$0xff] (!%p143_p2)   ;;  %v1110_v10 = vld [vmem:[%s1425_s1 + $0x68] sm:$0xff] (!%p143_p2)  }
   0x8   : > { %966 = vmatprep.subr.bf16.mxu0 (!%p143_p2), %v1102_v2  ;;  %1077 = vmatprep.subr.bf16.mxu1 (!%p143_p2), %v1102_v2  ;;  %v1107_v7 = vld [vmem:[%s1425_s1 + $0x18] sm:$0xff] (!%p143_p2)   ;;  %v1109_v9 = vld [vmem:[%s1425_s1 + $0x20] sm:$0xff] (!%p143_p2)   ;;  %v1111_v12 = vld [vmem:[%s1425_s1 + $0x28] sm:$0xff] (!%p143_p2)  }
   0x9   : > { %v1112_v13 = vld [vmem:[%s1425_s1 + $0x70] sm:$0xff] (!%p143_p2)   ;;  %v1114_v16 = vld [vmem:[%s1425_s1 + $0x78] sm:$0xff] (!%p143_p2)  }
   0xa   : > { %v1113_v15 = vld [vmem:[%s1425_s1 + $0x30] sm:$0xff] (!%p143_p2)   ;;  %v1115_v17 = vld [vmem:[%s1425_s1 + $0x38] sm:$0xff] (!%p143_p2)  }
   0xb   : > { %967 = vmatpush3.bf16.msra.mxu0 (!%p143_p2), %v1103_v3  ;;  %1085 = vmatpush3.bf16.msra.mxu1 (!%p143_p2), %v1103_v3 }
   0xc   : > { %968 = vmatprep.subr.bf16.mxu0 (!%p143_p2), %v1104_v4  ;;  %1078 = vmatprep.subr.bf16.mxu1 (!%p143_p2), %v1104_v4 }
   0xd   : > { %s1429_s16 = smov (!%p172_p3, %s907_s16), 127  ;;  %s1431_s13 = smov (!%p184_p4, %s1198_s13), 3 }
   0xe   : > { %s963_s4 = sshll.u32 %s1429_s16, 3  ;;  %s912_s16 = sshll.u32 %s1431_s13, 3 }
   0xf   : > { %969 = vmatpush3.bf16.msra.mxu0 %v1105_v5  ;;  %1086 = vmatpush3.bf16.msra.mxu1 %v1105_v5  ;;  %s1238_s9 = scalar_lea.vmem %s1424_s0, %s963_s4  ;;  %s1298_s29 = scalar_lea.vmem %s1426_s2, %s963_s4 }
  0x10   : > { %970 = vmatprep.subr.bf16.mxu0 %v1106_v6  ;;  %1079 = vmatprep.subr.bf16.mxu1 %v1106_v6  ;;  %v1118_v11 = vld [vmem:[%s1238_s9 + $0x4] ss:$8 sps:$4 sm:$0xff]   ;;  %v1116_v18 = vld [vmem:[%s1238_s9] ss:$8 sps:$4 sm:$0xff]   ;;  %v1119_v19 = vld [vmem:[%s1238_s9 + $0x14] ss:$8 sps:$4 sm:$0xff]   ;;  %s187_s5 = scalar_lea.vmem %s1427_s3, %s912_s16 }
  0x11   : > { %541 = vmatprep.mubr.bf16.mxu0 %v1118_v11  ;;  %v1130_v14 = vld [vmem:[%s1238_s9 + $0x84] ss:$8 sps:$4 sm:$0xff]   ;;  %v1128_v20 = vld [vmem:[%s1238_s9 + $0x80] ss:$8 sps:$4 sm:$0xff]   ;;  %v1134_v21 = vld [vmem:[%s1238_s9 + $0x94] ss:$8 sps:$4 sm:$0xff]  }
  0x12   : > { %605 = vmatprep.mubr.bf16.mxu1 %v1130_v14  ;;  %v1121_v22 = vld [vmem:[%s1238_s9 + $0x10] ss:$8 sps:$4 sm:$0xff]   ;;  %v1122_v23 = vld [vmem:[%s1238_s9 + $0x24] ss:$8 sps:$4 sm:$0xff]   ;;  %v1124_v26 = vld [vmem:[%s1238_s9 + $0x20] ss:$8 sps:$4 sm:$0xff]  }
  0x13   : > { %971 = vmatpush3.bf16.msra.mxu0 %v1107_v7  ;;  %1087 = vmatpush3.bf16.msra.mxu1 %v1107_v7  ;;  %v1136_v24 = vld [vmem:[%s1238_s9 + $0x90] ss:$8 sps:$4 sm:$0xff]   ;;  %v1140_v25 = vld [vmem:[%s1238_s9 + $0xa4] ss:$8 sps:$4 sm:$0xff]   ;;  %v1125_v27 = vld [vmem:[%s1238_s9 + $0x34] ss:$8 sps:$4 sm:$0xff]  }
  0x14   : > { %972 = vmatprep.subr.bf16.mxu0 %v1108_v8  ;;  %1080 = vmatprep.subr.bf16.mxu1 %v1108_v8  ;;  %v1142_v28 = vld [vmem:[%s1238_s9 + $0xa0] ss:$8 sps:$4 sm:$0xff]   ;;  %v1146_v29 = vld [vmem:[%s1238_s9 + $0xb4] ss:$8 sps:$4 sm:$0xff]   ;;  %v1127_v30 = vld [vmem:[%s1238_s9 + $0x30] ss:$8 sps:$4 sm:$0xff]  }
  0x15   : > { %v1131_v31 = vld [vmem:[%s1238_s9 + $0x44] ss:$8 sps:$4 sm:$0xff]   ;;  %v1148_v32 = vld [vmem:[%s1238_s9 + $0xb0] ss:$8 sps:$4 sm:$0xff]   ;;  %v1133_v34 = vld [vmem:[%s1238_s9 + $0x40] ss:$8 sps:$4 sm:$0xff]  }
  0x16   : > { %v1152_v33 = vld [vmem:[%s1238_s9 + $0xc4] ss:$8 sps:$4 sm:$0xff]   ;;  %v1137_v35 = vld [vmem:[%s1238_s9 + $0x54] ss:$8 sps:$4 sm:$0xff]   ;;  %v1154_v36 = vld [vmem:[%s1238_s9 + $0xc0] ss:$8 sps:$4 sm:$0xff]  }
  0x17   : > { %973 = vmatpush3.bf16.msra.mxu0 %v1109_v9  ;;  %1088 = vmatpush3.bf16.msra.mxu1 %v1109_v9  ;;  %v1155_v37 = vld [vmem:[%s1238_s9 + $0xd4] ss:$8 sps:$4 sm:$0xff]   ;;  %v1139_v38 = vld [vmem:[%s1238_s9 + $0x50] ss:$8 sps:$4 sm:$0xff]   ;;  %v1143_v39 = vld [vmem:[%s1238_s9 + $0x64] ss:$8 sps:$4 sm:$0xff]  }
  0x18   : > { %974 = vmatprep.subr.bf16.mxu0 %v1110_v10  ;;  %1081 = vmatprep.subr.bf16.mxu1 %v1110_v10  ;;  %v1157_v40 = vld [vmem:[%s1238_s9 + $0xd0] ss:$8 sps:$4 sm:$0xff]   ;;  %v1158_v41 = vld [vmem:[%s1238_s9 + $0xe4] ss:$8 sps:$4 sm:$0xff]   ;;  %v1145_v42 = vld [vmem:[%s1238_s9 + $0x60] ss:$8 sps:$4 sm:$0xff]  }
  0x19   : > { %v1149_v43 = vld [vmem:[%s1238_s9 + $0x74] ss:$8 sps:$4 sm:$0xff]   ;;  %v1160_v44 = vld [vmem:[%s1238_s9 + $0xe0] ss:$8 sps:$4 sm:$0xff]   ;;  %v1151_v46 = vld [vmem:[%s1238_s9 + $0x70] ss:$8 sps:$4 sm:$0xff]  }
  0x1a   : > { %v1161_v45 = vld [vmem:[%s1238_s9 + $0xf4] ss:$8 sps:$4 sm:$0xff]   ;;  %v1163_v47 = vld [vmem:[%s1238_s9 + $0xf0] ss:$8 sps:$4 sm:$0xff]  }
  0x1b   : > { %975 = vmatpush3.bf16.msra.mxu0 %v1111_v12  ;;  %1089 = vmatpush3.bf16.msra.mxu1 %v1111_v12 }
  0x1c   : > { %976 = vmatprep.subr.bf16.mxu0 %v1112_v13  ;;  %1082 = vmatprep.subr.bf16.mxu1 %v1112_v13 }
  0x1f   : > { %977 = vmatpush3.bf16.msra.mxu0 %v1113_v15  ;;  %1090 = vmatpush3.bf16.msra.mxu1 %v1113_v15 }
  0x20   : > { %978 = vmatprep.subr.bf16.mxu0 %v1114_v16  ;;  %1083 = vmatprep.subr.bf16.mxu1 %v1114_v16 }
  0x23   : > { %979 = vmatpush3.bf16.msra.mxu0 %v1115_v17  ;;  %1091 = vmatpush3.bf16.msra.mxu1 %v1115_v17 }
  0x26   : > { %542 = vmatmul.mubr.bf16.vlgmr.msra.gmra.mrb[0].mxu0 %v1116_v18  ;;  %606 = vmatmul.mubr.bf16.vlgmr.msra.gmra.mrb[0].mxu1 %v1128_v20 }
  0x27   : > { %549 = vmatprep.mubr.bf16.mxu0 %v1119_v19  ;;  %613 = vmatprep.mubr.bf16.mxu1 %v1134_v21 }
  0x2e   : > { %550 = vmatmul.mubr.bf16.gmra.mrb[4].mxu0 %v1121_v22  ;;  %614 = vmatmul.mubr.bf16.gmra.mrb[4].mxu1 %v1136_v24 }
  0x2f   : > { %557 = vmatprep.mubr.bf16.mxu0 %v1122_v23  ;;  %621 = vmatprep.mubr.bf16.mxu1 %v1140_v25 }
  0x36   : > { %558 = vmatmul.mubr.bf16.gmra.mrb[8].mxu0 %v1124_v26  ;;  %622 = vmatmul.mubr.bf16.gmra.mrb[8].mxu1 %v1142_v28 }
  0x37   : > { %565 = vmatprep.mubr.bf16.mxu0 %v1125_v27  ;;  %629 = vmatprep.mubr.bf16.mxu1 %v1146_v29 }
  0x3e   : > { %566 = vmatmul.mubr.bf16.gmra.mrb[12].mxu0 %v1127_v30  ;;  %630 = vmatmul.mubr.bf16.gmra.mrb[12].mxu1 %v1148_v32 }
  0x3f   : > { %573 = vmatprep.mubr.bf16.mxu0 %v1131_v31  ;;  %637 = vmatprep.mubr.bf16.mxu1 %v1152_v33 }
  0x46   : > { %574 = vmatmul.mubr.bf16.gmra.mrb[16].mxu0 %v1133_v34  ;;  %638 = vmatmul.mubr.bf16.gmra.mrb[16].mxu1 %v1154_v36 }
  0x47   : > { %581 = vmatprep.mubr.bf16.mxu0 %v1137_v35  ;;  %645 = vmatprep.mubr.bf16.mxu1 %v1155_v37 }
  0x4e   : > { %582 = vmatmul.mubr.bf16.gmra.mrb[20].mxu0 %v1139_v38  ;;  %646 = vmatmul.mubr.bf16.gmra.mrb[20].mxu1 %v1157_v40 }
  0x4f   : > { %589 = vmatprep.mubr.bf16.mxu0 %v1143_v39  ;;  %653 = vmatprep.mubr.bf16.mxu1 %v1158_v41 }
  0x56   : > { %590 = vmatmul.mubr.bf16.gmra.mrb[24].mxu0 %v1145_v42  ;;  %654 = vmatmul.mubr.bf16.gmra.mrb[24].mxu1 %v1160_v44 }
  0x57   : > { %597 = vmatprep.mubr.bf16.mxu0 %v1149_v43  ;;  %661 = vmatprep.mubr.bf16.mxu1 %v1161_v45 }
  0x5e   : > { %598 = vmatmul.mubr.bf16.gmra.mrb[28].mxu0 %v1151_v46  ;;  %662 = vmatmul.mubr.bf16.gmra.mrb[28].mxu1 %v1163_v47 }
  0xf9   : > { %v980_v48 = vpop.f32.mrb[0].mxu0  ;;  %v1028_v50 = vpop.f32.mrb[0].mxu1 }
  0xfa   : > { %v981_v49 = vpop.f32.mrb[1].mxu0  ;;  %v1029_v53 = vpop.f32.mrb[1].mxu1 }
  0xfb   : > { %v982_v51 = vadd.f32 %v981_v49, %v980_v48  ;;  %v983_v52 = vpop.f32.mrb[2].mxu0  ;;  %v1300_v55 = vadd.f32 %v1029_v53, %v1028_v50  ;;  %v1031_v56 = vpop.f32.mrb[2].mxu1 }
  0xfc   : > { %v984_v54 = vpop.f32.mrb[3].mxu0  ;;  %v1032_v58 = vpop.f32.mrb[3].mxu1 }
  0xfd   : > { %670 = vst [vmem:[%s1298_s29] sm:$0xff] %v982_v51  ;;  %v985_v57 = vadd.f32 %v984_v54, %v983_v52  ;;  %686 = vst [vmem:[%s1298_s29 + $0x80] sm:$0xff] %v1300_v55  ;;  %v1305_v59 = vadd.f32 %v1032_v58, %v1031_v56  ;;  %v739_v60 = vmul.f32 %v982_v51, %v982_v51 }
  0xff   : > { %671 = vst [vmem:[%s1298_s29 + $0x8] sm:$0xff] %v985_v57  ;;  %v702_v61 = vadd.f32 %v985_v57, %v982_v51  ;;  %v740_v62 = vmul.f32 %v985_v57, %v985_v57  ;;  %687 = vst [vmem:[%s1298_s29 + $0x88] sm:$0xff] %v1305_v59 }
 0x101   : > { %v771_v63 = vadd.f32 %v740_v62, %v739_v60  ;;  %v986_v0 = vpop.f32.mrb[4].mxu0  ;;  %v1034_v2 = vpop.f32.mrb[4].mxu1 }
 0x102   : > { %v987_v1 = vpop.f32.mrb[5].mxu0  ;;  %v1035_v5 = vpop.f32.mrb[5].mxu1 }
 0x103   : > { %v988_v3 = vadd.f32 %v987_v1, %v986_v0  ;;  %v989_v4 = vpop.f32.mrb[6].mxu0  ;;  %v1310_v7 = vadd.f32 %v1035_v5, %v1034_v2  ;;  %v1037_v8 = vpop.f32.mrb[6].mxu1 }
 0x104   : > { %v990_v6 = vpop.f32.mrb[7].mxu0  ;;  %v1038_v12 = vpop.f32.mrb[7].mxu1 }
 0x105   : > { %672 = vst [vmem:[%s1298_s29 + $0x10] sm:$0xff] %v988_v3  ;;  %v703_v9 = vadd.f32 %v988_v3, %v702_v61  ;;  %v741_v10 = vmul.f32 %v988_v3, %v988_v3  ;;  %v991_v11 = vadd.f32 %v990_v6, %v989_v4  ;;  %688 = vst [vmem:[%s1298_s29 + $0x90] sm:$0xff] %v1310_v7 }
 0x106   : > { %v1315_v13 = vadd.f32 %v1038_v12, %v1037_v8 }
 0x107   : > { %v772_v14 = vadd.f32 %v771_v63, %v741_v10  ;;  %673 = vst [vmem:[%s1298_s29 + $0x18] sm:$0xff] %v991_v11  ;;  %v704_v15 = vadd.f32 %v991_v11, %v703_v9  ;;  %v742_v16 = vmul.f32 %v991_v11, %v991_v11 }
 0x108   : > { %689 = vst [vmem:[%s1298_s29 + $0x98] sm:$0xff] %v1315_v13 }
 0x109   : > { %v773_v17 = vadd.f32 %v772_v14, %v742_v16  ;;  %v992_v18 = vpop.f32.mrb[8].mxu0  ;;  %v1040_v20 = vpop.f32.mrb[8].mxu1 }
 0x10a   : > { %v993_v19 = vpop.f32.mrb[9].mxu0  ;;  %v1041_v23 = vpop.f32.mrb[9].mxu1 }
 0x10b   : > { %v994_v21 = vadd.f32 %v993_v19, %v992_v18  ;;  %v995_v22 = vpop.f32.mrb[10].mxu0  ;;  %v1320_v25 = vadd.f32 %v1041_v23, %v1040_v20  ;;  %v1043_v26 = vpop.f32.mrb[10].mxu1 }
 0x10c   : > { %v996_v24 = vpop.f32.mrb[11].mxu0  ;;  %v1044_v30 = vpop.f32.mrb[11].mxu1 }
 0x10d   : > { %674 = vst [vmem:[%s1298_s29 + $0x20] sm:$0xff] %v994_v21  ;;  %v705_v27 = vadd.f32 %v994_v21, %v704_v15  ;;  %v743_v28 = vmul.f32 %v994_v21, %v994_v21  ;;  %v997_v29 = vadd.f32 %v996_v24, %v995_v22  ;;  %690 = vst [vmem:[%s1298_s29 + $0xa0] sm:$0xff] %v1320_v25 }
 0x10e   : > { %v1325_v31 = vadd.f32 %v1044_v30, %v1043_v26 }
 0x10f   : > { %v774_v32 = vadd.f32 %v773_v17, %v743_v28  ;;  %675 = vst [vmem:[%s1298_s29 + $0x28] sm:$0xff] %v997_v29  ;;  %v706_v33 = vadd.f32 %v997_v29, %v705_v27  ;;  %v744_v34 = vmul.f32 %v997_v29, %v997_v29 }
 0x110   : > { %691 = vst [vmem:[%s1298_s29 + $0xa8] sm:$0xff] %v1325_v31 }
 0x111   : > { %v775_v35 = vadd.f32 %v774_v32, %v744_v34  ;;  %v998_v36 = vpop.f32.mrb[12].mxu0  ;;  %v1046_v38 = vpop.f32.mrb[12].mxu1 }
 0x112   : > { %v999_v37 = vpop.f32.mrb[13].mxu0  ;;  %v1047_v41 = vpop.f32.mrb[13].mxu1 }
 0x113   : > { %v1000_v39 = vadd.f32 %v999_v37, %v998_v36  ;;  %v1001_v40 = vpop.f32.mrb[14].mxu0  ;;  %v1330_v43 = vadd.f32 %v1047_v41, %v1046_v38  ;;  %v1049_v44 = vpop.f32.mrb[14].mxu1 }
 0x114   : > { %v1002_v42 = vpop.f32.mrb[15].mxu0  ;;  %v1050_v48 = vpop.f32.mrb[15].mxu1 }
 0x115   : > { %676 = vst [vmem:[%s1298_s29 + $0x30] sm:$0xff] %v1000_v39  ;;  %v707_v45 = vadd.f32 %v1000_v39, %v706_v33  ;;  %v745_v46 = vmul.f32 %v1000_v39, %v1000_v39  ;;  %v1003_v47 = vadd.f32 %v1002_v42, %v1001_v40  ;;  %692 = vst [vmem:[%s1298_s29 + $0xb0] sm:$0xff] %v1330_v43 }
 0x116   : > { %v1335_v49 = vadd.f32 %v1050_v48, %v1049_v44 }
 0x117   : > { %v776_v50 = vadd.f32 %v775_v35, %v745_v46  ;;  %677 = vst [vmem:[%s1298_s29 + $0x38] sm:$0xff] %v1003_v47  ;;  %v708_v51 = vadd.f32 %v1003_v47, %v707_v45  ;;  %v746_v52 = vmul.f32 %v1003_v47, %v1003_v47 }
 0x118   : > { %693 = vst [vmem:[%s1298_s29 + $0xb8] sm:$0xff] %v1335_v49 }
 0x119   : > { %v777_v53 = vadd.f32 %v776_v50, %v746_v52  ;;  %v1004_v54 = vpop.f32.mrb[16].mxu0  ;;  %v1052_v57 = vpop.f32.mrb[16].mxu1 }
 0x11a   : > { %v1005_v56 = vpop.f32.mrb[17].mxu0  ;;  %v1053_v61 = vpop.f32.mrb[17].mxu1 }
 0x11b   : > { %v1006_v58 = vadd.f32 %v1005_v56, %v1004_v54  ;;  %v1007_v60 = vpop.f32.mrb[18].mxu0  ;;  %v1340_v63 = vadd.f32 %v1053_v61, %v1052_v57  ;;  %v1055_v0 = vpop.f32.mrb[18].mxu1 }
 0x11c   : > { %v1008_v62 = vpop.f32.mrb[19].mxu0  ;;  %v1056_v4 = vpop.f32.mrb[19].mxu1 }
 0x11d   : > { %678 = vst [vmem:[%s1298_s29 + $0x40] sm:$0xff] %v1006_v58  ;;  %v709_v1 = vadd.f32 %v1006_v58, %v708_v51  ;;  %v747_v2 = vmul.f32 %v1006_v58, %v1006_v58  ;;  %v1009_v3 = vadd.f32 %v1008_v62, %v1007_v60  ;;  %694 = vst [vmem:[%s1298_s29 + $0xc0] sm:$0xff] %v1340_v63 }
 0x11e   : > { %v1345_v5 = vadd.f32 %v1056_v4, %v1055_v0 }
 0x11f   : > { %v778_v6 = vadd.f32 %v777_v53, %v747_v2  ;;  %679 = vst [vmem:[%s1298_s29 + $0x48] sm:$0xff] %v1009_v3  ;;  %v710_v8 = vadd.f32 %v1009_v3, %v709_v1  ;;  %v748_v9 = vmul.f32 %v1009_v3, %v1009_v3 }
 0x120   : > { %695 = vst [vmem:[%s1298_s29 + $0xc8] sm:$0xff] %v1345_v5 }
 0x121   : > { %v779_v10 = vadd.f32 %v778_v6, %v748_v9  ;;  %v1010_v11 = vpop.f32.mrb[20].mxu0  ;;  %v1058_v14 = vpop.f32.mrb[20].mxu1 }
 0x122   : > { %v1011_v12 = vpop.f32.mrb[21].mxu0  ;;  %v1059_v17 = vpop.f32.mrb[21].mxu1 }
 0x123   : > { %v1012_v15 = vadd.f32 %v1011_v12, %v1010_v11  ;;  %v1013_v16 = vpop.f32.mrb[22].mxu0  ;;  %v1350_v19 = vadd.f32 %v1059_v17, %v1058_v14  ;;  %v1061_v20 = vpop.f32.mrb[22].mxu1  ;;  %v756_v14 = vmul.f32 %v1305_v59, %v1305_v59  ;;  %v757_v17 = vmul.f32 %v1310_v7, %v1310_v7 }
 0x124   : > { %v1014_v18 = vpop.f32.mrb[23].mxu0  ;;  %v1062_v24 = vpop.f32.mrb[23].mxu1 }
 0x125   : > { %680 = vst [vmem:[%s1298_s29 + $0x50] sm:$0xff] %v1012_v15  ;;  %v711_v21 = vadd.f32 %v1012_v15, %v710_v8  ;;  %v749_v22 = vmul.f32 %v1012_v15, %v1012_v15  ;;  %v1015_v23 = vadd.f32 %v1014_v18, %v1013_v16  ;;  %696 = vst [vmem:[%s1298_s29 + $0xd0] sm:$0xff] %v1350_v19 }
 0x126   : > { %v1355_v26 = vadd.f32 %v1062_v24, %v1061_v20 }
 0x127   : > { %v780_v27 = vadd.f32 %v779_v10, %v749_v22  ;;  %681 = vst [vmem:[%s1298_s29 + $0x58] sm:$0xff] %v1015_v23  ;;  %v712_v28 = vadd.f32 %v1015_v23, %v711_v21  ;;  %v750_v29 = vmul.f32 %v1015_v23, %v1015_v23  ;;  %v755_v10 = vmul.f32 %v1300_v55, %v1300_v55 }
 0x128   : > { %697 = vst [vmem:[%s1298_s29 + $0xd8] sm:$0xff] %v1355_v26  ;;  %v758_v21 = vmul.f32 %v1315_v13, %v1315_v13 }
 0x129   : > { %v781_v30 = vadd.f32 %v780_v27, %v750_v29  ;;  %v1016_v32 = vpop.f32.mrb[24].mxu0  ;;  %v1064_v34 = vpop.f32.mrb[24].mxu1 }
 0x12a   : > { %v1017_v33 = vpop.f32.mrb[25].mxu0  ;;  %v1065_v37 = vpop.f32.mrb[25].mxu1 }
 0x12b   : > { %v1018_v35 = vadd.f32 %v1017_v33, %v1016_v32  ;;  %v1019_v36 = vpop.f32.mrb[26].mxu0  ;;  %v1360_v39 = vadd.f32 %v1065_v37, %v1064_v34  ;;  %v1067_v40 = vpop.f32.mrb[26].mxu1 }
 0x12c   : > { %v1020_v38 = vpop.f32.mrb[27].mxu0  ;;  %v1068_v45 = vpop.f32.mrb[27].mxu1 }
 0x12d   : > { %682 = vst [vmem:[%s1298_s29 + $0x60] sm:$0xff] %v1018_v35  ;;  %v713_v41 = vadd.f32 %v1018_v35, %v712_v28  ;;  %v751_v42 = vmul.f32 %v1018_v35, %v1018_v35  ;;  %v1021_v44 = vadd.f32 %v1020_v38, %v1019_v36  ;;  %698 = vst [vmem:[%s1298_s29 + $0xe0] sm:$0xff] %v1360_v39 }
 0x12e   : > { %v1365_v46 = vadd.f32 %v1068_v45, %v1067_v40  ;;  %v763_v35 = vmul.f32 %v1340_v63, %v1340_v63  ;;  %v764_v38 = vmul.f32 %v1345_v5, %v1345_v5 }
 0x12f   : > { %v782_v47 = vadd.f32 %v781_v30, %v751_v42  ;;  %683 = vst [vmem:[%s1298_s29 + $0x68] sm:$0xff] %v1021_v44  ;;  %v714_v48 = vadd.f32 %v1021_v44, %v713_v41  ;;  %v752_v50 = vmul.f32 %v1021_v44, %v1021_v44  ;;  %v765_v41 = vmul.f32 %v1350_v19, %v1350_v19 }
 0x130   : > { %699 = vst [vmem:[%s1298_s29 + $0xe8] sm:$0xff] %v1365_v46 }
 0x131   : > { %v783_v51 = vadd.f32 %v782_v47, %v752_v50  ;;  %v1022_v52 = vpop.f32.mrb[28].mxu0  ;;  %v1070_v54 = vpop.f32.mrb[28].mxu1  ;;  %v767_v47 = vmul.f32 %v1360_v39, %v1360_v39 }
 0x132   : > { %v1023_v53 = vpop.f32.mrb[29].mxu0  ;;  %v1071_v58 = vpop.f32.mrb[29].mxu1 }
 0x133   : > { %v1024_v56 = vadd.f32 %v1023_v53, %v1022_v52  ;;  %v1025_v57 = vpop.f32.mrb[30].mxu0  ;;  %v1072_v61 = vadd.f32 %v1071_v58, %v1070_v54  ;;  %v1073_v62 = vpop.f32.mrb[30].mxu1 }
 0x134   : > { %v1026_v60 = vpop.f32.mrb[31].mxu0  ;;  %v1074_v3 = vpop.f32.mrb[31].mxu1 }
 0x135   : > { %684 = vst [vmem:[%s1298_s29 + $0x70] sm:$0xff] %v1024_v56  ;;  %v715_v0 = vadd.f32 %v1024_v56, %v714_v48  ;;  %v753_v1 = vmul.f32 %v1024_v56, %v1024_v56  ;;  %v1027_v2 = vadd.f32 %v1026_v60, %v1025_v57  ;;  %700 = vst [vmem:[%s1298_s29 + $0xf0] sm:$0xff] %v1072_v61 }
 0x136   : > { %v1075_v4 = vadd.f32 %v1074_v3, %v1073_v62  ;;  %v769_v50 = vmul.f32 %v1072_v61, %v1072_v61  ;;  %v808_v62 = vlaneseq }
 0x137   : > { %v784_v6 = vadd.f32 %v783_v51, %v753_v1  ;;  %685 = vst [vmem:[%s1298_s29 + $0x78] sm:$0xff] %v1027_v2  ;;  %v716_v8 = vadd.f32 %v1027_v2, %v715_v0  ;;  %v754_v9 = vmul.f32 %v1027_v2, %v1027_v2 }
 0x138   : > { %701 = vst [vmem:[%s1298_s29 + $0xf8] sm:$0xff] %v1075_v4  ;;  %v770_v56 = vmul.f32 %v1075_v4, %v1075_v4  ;;  %v809_v3 = vshrl.u32 %v808_v62, 7 }
 0x139   : > { %v717_v11 = vadd.f32 %v1300_v55, %v716_v8  ;;  %v785_v12 = vadd.f32 %v784_v6, %v754_v9  ;;  %v759_v55 = vmul.f32 %v1320_v25, %v1320_v25 }
 0x13a   : > { %vm811_vm0 = vcmp.eq.s32.totalorder %v809_v3, 1  ;;  %vm810_vm1 = vcmp.eq.s32.totalorder %v809_v3, 0 }
 0x13b   : > { %v718_v15 = vadd.f32 %v1305_v59, %v717_v11  ;;  %v786_v16 = vadd.f32 %v785_v12, %v755_v10  ;;  %v760_v59 = vmul.f32 %v1325_v31, %v1325_v31 }
 0x13d   : > { %v719_v18 = vadd.f32 %v1310_v7, %v718_v15  ;;  %v787_v20 = vadd.f32 %v786_v16, %v756_v14  ;;  %v761_v7 = vmul.f32 %v1330_v43, %v1330_v43 }
 0x13f   : > { %v720_v22 = vadd.f32 %v1315_v13, %v719_v18  ;;  %v788_v23 = vadd.f32 %v787_v20, %v757_v17  ;;  %v762_v13 = vmul.f32 %v1335_v49, %v1335_v49 }
 0x141   : > { %v789_v24 = vadd.f32 %v788_v23, %v758_v21  ;;  %v721_v27 = vadd.f32 %v1320_v25, %v720_v22 }
 0x143   : > { %v722_v28 = vadd.f32 %v1325_v31, %v721_v27  ;;  %v790_v29 = vadd.f32 %v789_v24, %v759_v55 }
 0x145   : > { %v723_v30 = vadd.f32 %v1330_v43, %v722_v28  ;;  %v791_v32 = vadd.f32 %v790_v29, %v760_v59 }
 0x147   : > { %v724_v33 = vadd.f32 %v1335_v49, %v723_v30  ;;  %v792_v34 = vadd.f32 %v791_v32, %v761_v7 }
 0x149   : > { %v725_v25 = vadd.f32 %v1340_v63, %v724_v33  ;;  %v793_v36 = vadd.f32 %v792_v34, %v762_v13  ;;  %v766_v63 = vmul.f32 %v1355_v26, %v1355_v26 }
 0x14b   : > { %v794_v31 = vadd.f32 %v793_v36, %v763_v35  ;;  %v726_v37 = vadd.f32 %v1345_v5, %v725_v25 }
 0x14d   : > { %v795_v43 = vadd.f32 %v794_v31, %v764_v38  ;;  %v727_v40 = vadd.f32 %v1350_v19, %v726_v37  ;;  %v768_v19 = vmul.f32 %v1365_v46, %v1365_v46 }
 0x14f   : > { %v796_v49 = vadd.f32 %v795_v43, %v765_v41  ;;  %v728_v42 = vadd.f32 %v1355_v26, %v727_v40 }
 0x151   : > { %v797_v44 = vadd.f32 %v796_v49, %v766_v63  ;;  %v729_v45 = vadd.f32 %v1360_v39, %v728_v42 }
 0x153   : > { %v798_v5 = vadd.f32 %v797_v44, %v767_v47  ;;  %v730_v48 = vadd.f32 %v1365_v46, %v729_v45 }
 0x155   : > { %v799_v51 = vadd.f32 %v798_v5, %v768_v19  ;;  %v731_v52 = vadd.f32 %v1072_v61, %v730_v48 }
 0x157   : > { %v800_v53 = vadd.f32 %v799_v51, %v769_v50  ;;  %v732_v54 = vadd.f32 %v1075_v4, %v731_v52 }
 0x159   : > { %v733_v26 = vrot.slane %v732_v54, 4  ;;  %v801_v57 = vadd.f32 %v800_v53, %v770_v56 }
 0x15b   : > { %v734_v58 = vadd.f32 %v733_v26, %v732_v54  ;;  %v802_v60 = vrot.slane %v801_v57, 4 }
 0x15d   : > { %v735_v39 = vrot.slane %v734_v58, 2  ;;  %v803_v0 = vadd.f32 %v802_v60, %v801_v57 }
 0x15f   : > { %v736_v1 = vadd.f32 %v735_v39, %v734_v58  ;;  %v804_v2 = vrot.slane %v803_v0, 2 }
 0x161   : > { %v805_v6 = vadd.f32 %v804_v2, %v803_v0  ;;  %v737_v46 = vrot.slane %v736_v1, 1 }
 0x163   : > { %v806_v8 = vrot.slane %v805_v6, 1  ;;  %v738_v4 = vadd.f32 %v737_v46, %v736_v1 }
 0x165   : > { %v807_v61 = vadd.f32 %v806_v8, %v805_v6 }
 0x167   : > { %v812_v9 = vsel %vm811_vm0, %v807_v61, 0.0 }
 0x168   : > { %v813_v10 = vsel %vm810_vm1, %v738_v4, %v812_v9 }
 0x169   : > { %814 = vst [vmem:[%s187_s5] sm:$0xff] %v813_v10 }
 0x16a PF: > { %s14_s12 = sadd.s32 1, %s1170_s12  }
 0x16b   : > { %p11_p5 = scmp.ge.s32.totalorder %s14_s12, 6  }
 0x16d   :  { %13 = sbr.rel (!%p11_p5) target bundleno = 1 (0x1), region = 70 }

// kernel: downsample_block.7
= control target key start
LH: loop header
LB: loop body
LE: loop exit
PB: predicated region body
PF: predicated region fallthrough
CT: control target
= control target key end

     0   :  { %s877_s15 = smov 0   ;;  %s1433_s0 = inlined_call_operand.vmem [shape: f32[1024,128], index: 0, kind: input, shape index: {}]   ;;  %s1434_s1 = inlined_call_operand.vmem [shape: f32[1,128], index: 1, kind: input, shape index: {}]   ;;  %s1435_s2 = inlined_call_operand.vmem [shape: f32[1,128], index: 2, kind: input, shape index: {}]   ;;  %s1436_s3 = inlined_call_operand.vmem [shape: f32[1024,4], index: 3, kind: input, shape index: {}]   ;;  %s1437_s4 = inlined_call_operand.vmem [shape: f32[1024,128], index: 4, kind: output, shape index: {}]  }
   0x1 LB: > { %s819_s16 = sadd.s32 4294967295, %s849_s15   ;;  %p823_p0 = scmp.ge.s32.totalorder %s849_s15, 1  ;;  %s849_s15 = sphi %s877_s15, %s14_s15  }
   0x2   : > { %p174_p1 = scmp.lt.s32.totalorder %s849_s15, 5 }
   0x4   : > { %p175_p2 = pnand %p823_p0, %p174_p1 }
   0x5   : > { %s824_s17 = sshll.u32 (!%p175_p2), %s819_s16, 5  ;;  %v893_v0 = vld [vmem:[%s1434_s1] ss:$0 sm:$0xff] (!%p175_p2)  ;;  %s851_s29 = smov (!%p175_p2), 4   ;;  %vm493_vm0 = vcmask (!%p175_p2), 31744   ;;  %vm718_vm1 = vcmask (!%p175_p2), 64544  }
   0x6   : > { %178 = sbr.rel (%p175_p2) target bundleno = 198 (0xc6), region = 36  ;;  %p206_p3 = scmp.lt.s32.totalorder (!%p175_p2), %s824_s17, 127  ;;  %v898_v1 = vld [vmem:[%s1435_s2] ss:$0 sm:$0xff] (!%p175_p2) }
   0xd   : > { %s1439_s17 = smov (!%p206_p3, %s824_s17), 127 }
   0xe   : > { %s825_s18 = sshll.u32 %s1439_s17, 3 }
   0xf   : > { %s888_s21 = scalar_lea.vmem %s1436_s3, %s825_s18  ;;  %s904_s28 = scalar_lea.vmem %s1433_s0, %s825_s18 }
  0x10   : > { %v335_v2 = vld [vmem:[%s888_s21 + $0x10] sm:$0xff]  ;;  %v333_v3 = vld [vmem:[%s888_s21] sm:$0xff]  ;;  %v336_v4 = vld [vmem:[%s888_s21 + $0x18] sm:$0xff]  ;;  %s931_s6 = scalar_lea.vmem %s1437_s4, %s825_s18 }
  0x11   : > { %562 = vrot.lane.b32.xlu1 %v335_v2, %s851_s29  ;;  %v225_v5 = vld [vmem:[%s904_s28 + $0x10] sm:$0xff]  ;;  %558 = vrot.lane.b32.xlu0 %v333_v3, %s851_s29  ;;  %v223_v6 = vld [vmem:[%s904_s28] sm:$0xff] }
  0x12   : > { %v264_v7 = vmul.f32 %v893_v0, %v225_v5  ;;  %v262_v8 = vmul.f32 %v893_v0, %v223_v6  ;;  %v226_v9 = vld [vmem:[%s904_s28 + $0x18] sm:$0xff]  ;;  %v334_v10 = vld [vmem:[%s888_s21 + $0x8] sm:$0xff]  ;;  %v227_v18 = vld [vmem:[%s904_s28 + $0x20] sm:$0xff] }
  0x13   : > { %v224_v11 = vld [vmem:[%s904_s28 + $0x8] sm:$0xff]  ;;  %v265_v12 = vmul.f32 %v893_v0, %v226_v9  ;;  %v266_v22 = vmul.f32 %v893_v0, %v227_v18  ;;  %v337_v27 = vld [vmem:[%s888_s21 + $0x20] sm:$0xff]  ;;  %v230_v28 = vld [vmem:[%s904_s28 + $0x38] sm:$0xff] }
  0x14   : > { %v263_v13 = vmul.f32 %v893_v0, %v224_v11  ;;  %v228_v14 = vld [vmem:[%s904_s28 + $0x28] sm:$0xff]  ;;  %v921_v15 = vadd.f32 %v898_v1, %v264_v7  ;;  %v924_v16 = vadd.f32 %v898_v1, %v262_v8  ;;  %v229_v29 = vld [vmem:[%s904_s28 + $0x30] sm:$0xff]  ;;  %v231_v39 = vld [vmem:[%s904_s28 + $0x40] sm:$0xff]  ;;  %v269_v42 = vmul.f32 %v893_v0, %v230_v28 }
  0x15   : > { %v267_v17 = vmul.f32 %v893_v0, %v228_v14  ;;  %564 = vrot.lane.b32.xlu1 %v336_v4, %s851_s29  ;;  %v935_v19 = vadd.f32 %v898_v1, %v265_v12  ;;  %560 = vrot.lane.b32.xlu0 %v334_v10, %s851_s29  ;;  %v338_v21 = vld [vmem:[%s888_s21 + $0x28] sm:$0xff]  ;;  %v960_v37 = vadd.f32 %v898_v1, %v266_v22  ;;  %v234_v44 = vld [vmem:[%s904_s28 + $0x58] sm:$0xff] }
  0x16   : > { %v939_v20 = vadd.f32 %v898_v1, %v263_v13  ;;  %v367_v23 = vmax.f32 %v921_v15, 0.0  ;;  %v431_v24 = vadd.f32 %v335_v2, %v921_v15  ;;  %v365_v25 = vmax.f32 %v924_v16, 0.0  ;;  %v232_v38 = vld [vmem:[%s904_s28 + $0x48] sm:$0xff]  ;;  %v233_v45 = vld [vmem:[%s904_s28 + $0x50] sm:$0xff]  ;;  %v340_v50 = vld [vmem:[%s888_s21 + $0x38] sm:$0xff] }
  0x17   : > { %v429_v26 = vadd.f32 %v333_v3, %v924_v16  ;;  %v368_v30 = vmax.f32 %v935_v19, 0.0  ;;  %v432_v31 = vadd.f32 %v336_v4, %v935_v19  ;;  %v957_v36 = vadd.f32 %v898_v1, %v267_v17  ;;  %v339_v51 = vld [vmem:[%s888_s21 + $0x30] sm:$0xff]  ;;  %v236_v60 = vld [vmem:[%s904_s28 + $0x68] sm:$0xff]  ;;  %v235_v61 = vld [vmem:[%s904_s28 + $0x60] sm:$0xff] }
  0x18   : > { %v366_v32 = vmax.f32 %v939_v20, 0.0  ;;  %v430_v33 = vadd.f32 %v334_v10, %v939_v20  ;;  %399 = vst [vmem:[%s931_s6 + $0x10] sm:$0xff] %v367_v23  ;;  %v463_v34 = vmax.f32 %v431_v24, 0.0  ;;  %397 = vst [vmem:[%s931_s6] sm:$0xff] %v365_v25  ;;  %v268_v43 = vmul.f32 %v893_v0, %v229_v29  ;;  %v342_v4 = vld [vmem:[%s888_s21 + $0x48] sm:$0xff]  ;;  %v341_v6 = vld [vmem:[%s888_s21 + $0x40] sm:$0xff] }
  0x19   : > { %v461_v35 = vmax.f32 %v429_v26, 0.0  ;;  %400 = vst [vmem:[%s931_s6 + $0x18] sm:$0xff] %v368_v30  ;;  %v464_v40 = vmax.f32 %v432_v31, 0.0  ;;  %568 = vrot.lane.b32.xlu1 %v338_v21, %s851_s29  ;;  %566 = vrot.lane.b32.xlu0 %v337_v27, %s851_s29  ;;  %v370_v46 = vmax.f32 %v957_v36, 0.0  ;;  %v434_v47 = vadd.f32 %v338_v21, %v957_v36  ;;  %v344_v12 = vld [vmem:[%s888_s21 + $0x58] sm:$0xff] }
  0x1a   : > { %398 = vst [vmem:[%s931_s6 + $0x8] sm:$0xff] %v366_v32  ;;  %v462_v41 = vmax.f32 %v430_v33, 0.0  ;;  %496 = vst.msk [vmem:[%s931_s6 + $0x10] sm:$0xff] %vm493_vm0, %v463_v34  ;;  %v369_v48 = vmax.f32 %v960_v37, 0.0  ;;  %v433_v49 = vadd.f32 %v337_v27, %v960_v37  ;;  %v987_v52 = vadd.f32 %v898_v1, %v269_v42  ;;  %v343_v23 = vld [vmem:[%s888_s21 + $0x50] sm:$0xff]  ;;  %v238_v24 = vld [vmem:[%s904_s28 + $0x78] sm:$0xff] }
  0x1b   : > { %494 = vst.msk [vmem:[%s931_s6] sm:$0xff] %vm493_vm0, %v461_v35  ;;  %497 = vst.msk [vmem:[%s931_s6 + $0x18] sm:$0xff] %vm493_vm0, %v464_v40  ;;  %v990_v53 = vadd.f32 %v898_v1, %v268_v43  ;;  %v271_v54 = vmul.f32 %v893_v0, %v232_v38  ;;  %v270_v55 = vmul.f32 %v893_v0, %v231_v39  ;;  %v466_v56 = vmax.f32 %v434_v47, 0.0  ;;  %v237_v25 = vld [vmem:[%s904_s28 + $0x70] sm:$0xff]  ;;  %v346_v32 = vld [vmem:[%s888_s21 + $0x68] sm:$0xff] }
  0x1c   : > { %495 = vst.msk [vmem:[%s931_s6 + $0x8] sm:$0xff] %vm493_vm0, %v462_v41  ;;  %402 = vst [vmem:[%s931_s6 + $0x28] sm:$0xff] %v370_v46  ;;  %v465_v57 = vmax.f32 %v433_v49, 0.0  ;;  %v273_v58 = vmul.f32 %v893_v0, %v234_v44  ;;  %v272_v59 = vmul.f32 %v893_v0, %v233_v45  ;;  %v372_v62 = vmax.f32 %v987_v52, 0.0  ;;  %v240_v35 = vld [vmem:[%s904_s28 + $0x88] sm:$0xff]  ;;  %v345_v40 = vld [vmem:[%s888_s21 + $0x60] sm:$0xff] }
  0x1d   : > { %401 = vst [vmem:[%s931_s6 + $0x20] sm:$0xff] %v369_v48  ;;  %572 = vrot.lane.b32.xlu1 %v340_v50, %s851_s29  ;;  %v436_v63 = vadd.f32 %v340_v50, %v987_v52  ;;  %570 = vrot.lane.b32.xlu0 %v339_v51, %s851_s29  ;;  %v371_v2 = vmax.f32 %v990_v53, 0.0  ;;  %v435_v3 = vadd.f32 %v339_v51, %v990_v53  ;;  %499 = vst.msk [vmem:[%s931_s6 + $0x28] sm:$0xff] %vm493_vm0, %v466_v56 }
  0x1e   : > { %498 = vst.msk [vmem:[%s931_s6 + $0x20] sm:$0xff] %vm493_vm0, %v465_v57  ;;  %v1012_v5 = vadd.f32 %v898_v1, %v271_v54  ;;  %v1016_v7 = vadd.f32 %v898_v1, %v270_v55  ;;  %v1019_v8 = vadd.f32 %v898_v1, %v273_v58  ;;  %v1022_v9 = vadd.f32 %v898_v1, %v272_v59  ;;  %v239_v43 = vld [vmem:[%s904_s28 + $0x80] sm:$0xff]  ;;  %v242_v44 = vld [vmem:[%s904_s28 + $0x98] sm:$0xff]  ;;  %v241_v55 = vld [vmem:[%s904_s28 + $0x90] sm:$0xff] }
  0x1f   : > { %404 = vst [vmem:[%s931_s6 + $0x38] sm:$0xff] %v372_v62  ;;  %v468_v10 = vmax.f32 %v436_v63, 0.0  ;;  %403 = vst [vmem:[%s931_s6 + $0x30] sm:$0xff] %v371_v2  ;;  %v467_v11 = vmax.f32 %v435_v3, 0.0  ;;  %v275_v13 = vmul.f32 %v893_v0, %v236_v60  ;;  %v274_v14 = vmul.f32 %v893_v0, %v235_v61  ;;  %v348_v49 = vld [vmem:[%s888_s21 + $0x78] sm:$0xff]  ;;  %v347_v58 = vld [vmem:[%s888_s21 + $0x70] sm:$0xff] }
  0x20   : > { %v374_v17 = vmax.f32 %v1012_v5, 0.0  ;;  %v438_v18 = vadd.f32 %v342_v4, %v1012_v5  ;;  %v373_v21 = vmax.f32 %v1016_v7, 0.0  ;;  %v437_v22 = vadd.f32 %v341_v6, %v1016_v7  ;;  %v244_v61 = vld [vmem:[%s904_s28 + $0xa8] sm:$0xff]  ;;  %v243_v62 = vld [vmem:[%s904_s28 + $0xa0] sm:$0xff] }
  0x21   : > { %501 = vst.msk [vmem:[%s931_s6 + $0x38] sm:$0xff] %vm493_vm0, %v468_v10  ;;  %500 = vst.msk [vmem:[%s931_s6 + $0x30] sm:$0xff] %vm493_vm0, %v467_v11  ;;  %576 = vrot.lane.b32.xlu1 %v342_v4, %s851_s29  ;;  %574 = vrot.lane.b32.xlu0 %v341_v6, %s851_s29  ;;  %v376_v26 = vmax.f32 %v1019_v8, 0.0  ;;  %v440_v27 = vadd.f32 %v344_v12, %v1019_v8  ;;  %v375_v28 = vmax.f32 %v1022_v9, 0.0 }
  0x22   : > { %v439_v29 = vadd.f32 %v343_v23, %v1022_v9  ;;  %406 = vst [vmem:[%s931_s6 + $0x48] sm:$0xff] %v374_v17  ;;  %v470_v30 = vmax.f32 %v438_v18, 0.0  ;;  %405 = vst [vmem:[%s931_s6 + $0x40] sm:$0xff] %v373_v21  ;;  %v469_v31 = vmax.f32 %v437_v22, 0.0  ;;  %v1050_v33 = vadd.f32 %v898_v1, %v275_v13  ;;  %v1102_v6 = vld [vmem:[%s888_s21 + $0x88] sm:$0xff]  ;;  %v349_v18 = vld [vmem:[%s888_s21 + $0x80] sm:$0xff] }
  0x23   : > { %v1053_v34 = vadd.f32 %v898_v1, %v274_v14  ;;  %408 = vst [vmem:[%s931_s6 + $0x58] sm:$0xff] %v376_v26  ;;  %v472_v38 = vmax.f32 %v440_v27, 0.0  ;;  %407 = vst [vmem:[%s931_s6 + $0x50] sm:$0xff] %v375_v28  ;;  %v277_v41 = vmul.f32 %v893_v0, %v238_v24  ;;  %v276_v42 = vmul.f32 %v893_v0, %v237_v25  ;;  %v1128_v28 = vld [vmem:[%s888_s21 + $0x98] sm:$0xff] }
  0x24   : > { %v471_v39 = vmax.f32 %v439_v29, 0.0  ;;  %503 = vst.msk [vmem:[%s931_s6 + $0x48] sm:$0xff] %vm493_vm0, %v470_v30  ;;  %502 = vst.msk [vmem:[%s931_s6 + $0x40] sm:$0xff] %vm493_vm0, %v469_v31  ;;  %v378_v45 = vmax.f32 %v1050_v33, 0.0  ;;  %v442_v46 = vadd.f32 %v346_v32, %v1050_v33  ;;  %v279_v54 = vmul.f32 %v893_v0, %v240_v35  ;;  %v1138_v31 = vld [vmem:[%s888_s21 + $0x90] sm:$0xff] }
  0x25   : > { %v377_v47 = vmax.f32 %v1053_v34, 0.0  ;;  %v441_v48 = vadd.f32 %v345_v40, %v1053_v34  ;;  %580 = vrot.lane.b32.xlu1 %v344_v12, %s851_s29  ;;  %505 = vst.msk [vmem:[%s931_s6 + $0x58] sm:$0xff] %vm493_vm0, %v472_v38  ;;  %578 = vrot.lane.b32.xlu0 %v343_v23, %s851_s29  ;;  %v1079_v50 = vadd.f32 %v898_v1, %v277_v41  ;;  %v246_v23 = vld [vmem:[%s904_s28 + $0xb8] sm:$0xff] }
  0x26   : > { %504 = vst.msk [vmem:[%s931_s6 + $0x50] sm:$0xff] %vm493_vm0, %v471_v39  ;;  %v1082_v51 = vadd.f32 %v898_v1, %v276_v42  ;;  %410 = vst [vmem:[%s931_s6 + $0x68] sm:$0xff] %v378_v45  ;;  %v474_v56 = vmax.f32 %v442_v46, 0.0  ;;  %v278_v59 = vmul.f32 %v893_v0, %v239_v43  ;;  %v281_v60 = vmul.f32 %v893_v0, %v242_v44  ;;  %v245_v42 = vld [vmem:[%s904_s28 + $0xb0] sm:$0xff]  ;;  %v248_v43 = vld [vmem:[%s904_s28 + $0xc8] sm:$0xff] }
  0x27   : > { %409 = vst [vmem:[%s931_s6 + $0x60] sm:$0xff] %v377_v47  ;;  %v473_v57 = vmax.f32 %v441_v48, 0.0  ;;  %v380_v63 = vmax.f32 %v1079_v50, 0.0  ;;  %v444_v2 = vadd.f32 %v348_v49, %v1079_v50  ;;  %v1105_v10 = vadd.f32 %v898_v1, %v279_v54  ;;  %v247_v44 = vld [vmem:[%s904_s28 + $0xc0] sm:$0xff]  ;;  %v1162_v48 = vld [vmem:[%s888_s21 + $0xa8] sm:$0xff] }
  0x28   : > { %v379_v3 = vmax.f32 %v1082_v51, 0.0  ;;  %v443_v4 = vadd.f32 %v347_v58, %v1082_v51  ;;  %507 = vst.msk [vmem:[%s931_s6 + $0x68] sm:$0xff] %vm493_vm0, %v474_v56  ;;  %v1108_v11 = vadd.f32 %v898_v1, %v278_v59  ;;  %v1111_v12 = vadd.f32 %v898_v1, %v281_v60 }
  0x29   : > { %506 = vst.msk [vmem:[%s931_s6 + $0x60] sm:$0xff] %vm493_vm0, %v473_v57  ;;  %v280_v13 = vmul.f32 %v893_v0, %v241_v55  ;;  %584 = vrot.lane.b32.xlu1 %v346_v32, %s851_s29  ;;  %582 = vrot.lane.b32.xlu0 %v345_v40, %s851_s29  ;;  %412 = vst [vmem:[%s931_s6 + $0x78] sm:$0xff] %v380_v63  ;;  %v476_v14 = vmax.f32 %v444_v2, 0.0  ;;  %v283_v21 = vmul.f32 %v893_v0, %v244_v61 }
  0x2a   : > { %411 = vst [vmem:[%s931_s6 + $0x70] sm:$0xff] %v379_v3  ;;  %v475_v17 = vmax.f32 %v443_v4, 0.0  ;;  %v282_v22 = vmul.f32 %v893_v0, %v243_v62  ;;  %v382_v24 = vmax.f32 %v1105_v10, 0.0  ;;  %v446_v25 = vadd.f32 %v1102_v6, %v1105_v10  ;;  %v1166_v55 = vld [vmem:[%s888_s21 + $0xa0] sm:$0xff]  ;;  %v250_v2 = vld [vmem:[%s904_s28 + $0xd8] sm:$0xff]  ;;  %v249_v3 = vld [vmem:[%s904_s28 + $0xd0] sm:$0xff] }
  0x2b   : > { %v381_v26 = vmax.f32 %v1108_v11, 0.0  ;;  %v445_v27 = vadd.f32 %v349_v18, %v1108_v11  ;;  %509 = vst.msk [vmem:[%s931_s6 + $0x78] sm:$0xff] %vm493_vm0, %v476_v14  ;;  %v384_v29 = vmax.f32 %v1111_v12, 0.0  ;;  %v448_v30 = vadd.f32 %v1128_v28, %v1111_v12  ;;  %v252_v4 = vld [vmem:[%s904_s28 + $0xe8] sm:$0xff] }
  0x2c   : > { %508 = vst.msk [vmem:[%s931_s6 + $0x70] sm:$0xff] %vm493_vm0, %v475_v17  ;;  %v1141_v32 = vadd.f32 %v898_v1, %v280_v13  ;;  %v1144_v35 = vadd.f32 %v898_v1, %v283_v21  ;;  %414 = vst [vmem:[%s931_s6 + $0x88] sm:$0xff] %v382_v24  ;;  %v478_v38 = vmax.f32 %v446_v25, 0.0  ;;  %v1149_v40 = vadd.f32 %v898_v1, %v282_v22  ;;  %v1220_v25 = vld [vmem:[%s888_s21 + $0xc8] sm:$0xff] }
  0x2d   : > { %413 = vst [vmem:[%s931_s6 + $0x80] sm:$0xff] %v381_v26  ;;  %v477_v39 = vmax.f32 %v445_v27, 0.0  ;;  %v285_v41 = vmul.f32 %v893_v0, %v246_v23  ;;  %588 = vrot.lane.b32.xlu1 %v348_v49, %s851_s29  ;;  %586 = vrot.lane.b32.xlu0 %v347_v58, %s851_s29  ;;  %416 = vst [vmem:[%s931_s6 + $0x98] sm:$0xff] %v384_v29  ;;  %v480_v45 = vmax.f32 %v448_v30, 0.0 }
  0x2e   : > { %v383_v46 = vmax.f32 %v1141_v32, 0.0  ;;  %v447_v47 = vadd.f32 %v1138_v31, %v1141_v32  ;;  %v386_v54 = vmax.f32 %v1144_v35, 0.0  ;;  %511 = vst.msk [vmem:[%s931_s6 + $0x88] sm:$0xff] %vm493_vm0, %v478_v38  ;;  %v450_v49 = vadd.f32 %v1162_v48, %v1144_v35  ;;  %v1178_v58 = vld [vmem:[%s888_s21 + $0xb8] sm:$0xff]  ;;  %v251_v30 = vld [vmem:[%s904_s28 + $0xe0] sm:$0xff] }
  0x2f   : > { %510 = vst.msk [vmem:[%s931_s6 + $0x80] sm:$0xff] %vm493_vm0, %v477_v39  ;;  %v385_v56 = vmax.f32 %v1149_v40, 0.0  ;;  %v449_v57 = vadd.f32 %v1166_v55, %v1149_v40  ;;  %v1181_v59 = vadd.f32 %v898_v1, %v285_v41  ;;  %513 = vst.msk [vmem:[%s931_s6 + $0x98] sm:$0xff] %vm493_vm0, %v480_v45  ;;  %v284_v61 = vmul.f32 %v893_v0, %v245_v42 }
  0x30   : > { %415 = vst [vmem:[%s931_s6 + $0x90] sm:$0xff] %v383_v46  ;;  %v479_v60 = vmax.f32 %v447_v47, 0.0  ;;  %418 = vst [vmem:[%s931_s6 + $0xa8] sm:$0xff] %v386_v54  ;;  %v287_v62 = vmul.f32 %v893_v0, %v248_v43  ;;  %v286_v63 = vmul.f32 %v893_v0, %v247_v44  ;;  %v482_v13 = vmax.f32 %v450_v49, 0.0  ;;  %v1233_v43 = vld [vmem:[%s888_s21 + $0xc0] sm:$0xff]  ;;  %v1241_v46 = vld [vmem:[%s888_s21 + $0xd8] sm:$0xff] }
  0x31   : > { %417 = vst [vmem:[%s931_s6 + $0xa0] sm:$0xff] %v385_v56  ;;  %v481_v14 = vmax.f32 %v449_v57, 0.0  ;;  %v388_v17 = vmax.f32 %v1181_v59, 0.0  ;;  %v452_v21 = vadd.f32 %v1178_v58, %v1181_v59  ;;  %592 = vrot.lane.b32.xlu1 %v1102_v6, %s851_s29  ;;  %590 = vrot.lane.b32.xlu0 %v349_v18, %s851_s29  ;;  %v1203_v22 = vadd.f32 %v898_v1, %v284_v61  ;;  %v1217_v18 = vld [vmem:[%s888_s21 + $0xb0] sm:$0xff] }
  0x32   : > { %512 = vst.msk [vmem:[%s931_s6 + $0x90] sm:$0xff] %vm493_vm0, %v479_v60  ;;  %v1206_v23 = vadd.f32 %v898_v1, %v287_v62  ;;  %v1209_v24 = vadd.f32 %v898_v1, %v286_v63  ;;  %515 = vst.msk [vmem:[%s931_s6 + $0xa8] sm:$0xff] %vm493_vm0, %v482_v13  ;;  %v289_v26 = vmul.f32 %v893_v0, %v250_v2  ;;  %v254_v61 = vld [vmem:[%s904_s28 + $0xf8] sm:$0xff]  ;;  %v253_v62 = vld [vmem:[%s904_s28 + $0xf0] sm:$0xff] }
  0x33   : > { %514 = vst.msk [vmem:[%s931_s6 + $0xa0] sm:$0xff] %vm493_vm0, %v481_v14  ;;  %420 = vst [vmem:[%s931_s6 + $0xb8] sm:$0xff] %v388_v17  ;;  %v484_v6 = vmax.f32 %v452_v21, 0.0  ;;  %v288_v27 = vmul.f32 %v893_v0, %v249_v3  ;;  %v291_v29 = vmul.f32 %v893_v0, %v252_v4  ;;  %v387_v38 = vmax.f32 %v1203_v22, 0.0  ;;  %v359_v2 = vld [vmem:[%s888_s21 + $0xd0] sm:$0xff]  ;;  %v362_v4 = vld [vmem:[%s888_s21 + $0xe8] sm:$0xff] }
  0x34   : > { %v451_v39 = vadd.f32 %v1217_v18, %v1203_v22  ;;  %v390_v41 = vmax.f32 %v1206_v23, 0.0  ;;  %v454_v42 = vadd.f32 %v1220_v25, %v1206_v23  ;;  %v389_v44 = vmax.f32 %v1209_v24, 0.0 }
  0x35   : > { %517 = vst.msk [vmem:[%s931_s6 + $0xb8] sm:$0xff] %vm493_vm0, %v484_v6  ;;  %v453_v45 = vadd.f32 %v1233_v43, %v1209_v24  ;;  %v1244_v47 = vadd.f32 %v898_v1, %v289_v26  ;;  %v1247_v54 = vadd.f32 %v898_v1, %v288_v27  ;;  %596 = vrot.lane.b32.xlu1 %v1128_v28, %s851_s29  ;;  %419 = vst [vmem:[%s931_s6 + $0xb0] sm:$0xff] %v387_v38  ;;  %v361_v26 = vld [vmem:[%s888_s21 + $0xe0] sm:$0xff] }
  0x36   : > { %594 = vrot.lane.b32.xlu0 %v1138_v31, %s851_s29  ;;  %v483_v49 = vmax.f32 %v451_v39, 0.0  ;;  %422 = vst [vmem:[%s931_s6 + $0xc8] sm:$0xff] %v390_v41  ;;  %v486_v56 = vmax.f32 %v454_v42, 0.0  ;;  %v1256_v57 = vadd.f32 %v898_v1, %v291_v29  ;;  %v290_v60 = vmul.f32 %v893_v0, %v251_v30  ;;  %421 = vst [vmem:[%s931_s6 + $0xc0] sm:$0xff] %v389_v44  ;;  %v363_v44 = vld [vmem:[%s888_s21 + $0xf0] sm:$0xff] }
  0x37   : > { %v485_v28 = vmax.f32 %v453_v45, 0.0  ;;  %v392_v31 = vmax.f32 %v1244_v47, 0.0  ;;  %v456_v63 = vadd.f32 %v1241_v46, %v1244_v47  ;;  %v391_v3 = vmax.f32 %v1247_v54, 0.0 }
  0x38   : > { %516 = vst.msk [vmem:[%s931_s6 + $0xb0] sm:$0xff] %vm493_vm0, %v483_v49  ;;  %519 = vst.msk [vmem:[%s931_s6 + $0xc8] sm:$0xff] %vm493_vm0, %v486_v56  ;;  %v455_v13 = vadd.f32 %v359_v2, %v1247_v54  ;;  %v394_v14 = vmax.f32 %v1256_v57, 0.0  ;;  %v458_v17 = vadd.f32 %v362_v4, %v1256_v57  ;;  %v1276_v21 = vadd.f32 %v898_v1, %v290_v60 }
  0x39   : > { %518 = vst.msk [vmem:[%s931_s6 + $0xc0] sm:$0xff] %vm493_vm0, %v485_v28  ;;  %424 = vst [vmem:[%s931_s6 + $0xd8] sm:$0xff] %v392_v31  ;;  %v488_v6 = vmax.f32 %v456_v63, 0.0  ;;  %v293_v27 = vmul.f32 %v893_v0, %v254_v61  ;;  %v292_v29 = vmul.f32 %v893_v0, %v253_v62  ;;  %600 = vrot.lane.b32.xlu1 %v1162_v48, %s851_s29 }
  0x3a   : > { %423 = vst [vmem:[%s931_s6 + $0xd0] sm:$0xff] %v391_v3  ;;  %598 = vrot.lane.b32.xlu0 %v1166_v55, %s851_s29  ;;  %v487_v30 = vmax.f32 %v455_v13, 0.0  ;;  %426 = vst [vmem:[%s931_s6 + $0xe8] sm:$0xff] %v394_v14  ;;  %v490_v38 = vmax.f32 %v458_v17, 0.0  ;;  %v393_v39 = vmax.f32 %v1276_v21, 0.0  ;;  %v457_v41 = vadd.f32 %v361_v26, %v1276_v21  ;;  %v364_v55 = vld [vmem:[%s888_s21 + $0xf8] sm:$0xff] }
  0x3b   : > { %521 = vst.msk [vmem:[%s931_s6 + $0xd8] sm:$0xff] %vm493_vm0, %v488_v6  ;;  %v1295_v0 = vadd.f32 %v898_v1, %v293_v27  ;;  %v1298_v42 = vadd.f32 %v898_v1, %v292_v29 }
  0x3c   : > { %520 = vst.msk [vmem:[%s931_s6 + $0xd0] sm:$0xff] %vm493_vm0, %v487_v30  ;;  %523 = vst.msk [vmem:[%s931_s6 + $0xe8] sm:$0xff] %vm493_vm0, %v490_v38  ;;  %v489_v48 = vmax.f32 %v457_v41, 0.0 }
  0x3d   : > { %425 = vst [vmem:[%s931_s6 + $0xe0] sm:$0xff] %v393_v39  ;;  %v396_v45 = vmax.f32 %v1295_v0, 0.0  ;;  %v460_v49 = vadd.f32 %v364_v55, %v1295_v0  ;;  %v395_v56 = vmax.f32 %v1298_v42, 0.0  ;;  %v459_v1 = vadd.f32 %v363_v44, %v1298_v42  ;;  %604 = vrot.lane.b32.xlu1 %v1178_v58, %s851_s29 }
  0x3e   : > { %602 = vrot.lane.b32.xlu0 %v1217_v18, %s851_s29  ;;  %522 = vst.msk [vmem:[%s931_s6 + $0xe0] sm:$0xff] %vm493_vm0, %v489_v48 }
  0x3f   : > { %428 = vst [vmem:[%s931_s6 + $0xf8] sm:$0xff] %v396_v45  ;;  %v492_v60 = vmax.f32 %v460_v49, 0.0  ;;  %427 = vst [vmem:[%s931_s6 + $0xf0] sm:$0xff] %v395_v56  ;;  %v491_v61 = vmax.f32 %v459_v1, 0.0 }
  0x41   : > { %525 = vst.msk [vmem:[%s931_s6 + $0xf8] sm:$0xff] %vm493_vm0, %v492_v60  ;;  %524 = vst.msk [vmem:[%s931_s6 + $0xf0] sm:$0xff] %vm493_vm0, %v491_v61  ;;  %608 = vrot.lane.b32.xlu1 %v1220_v25, %s851_s29 }
  0x42   : > { %606 = vrot.lane.b32.xlu0 %v1233_v43, %s851_s29 }
  0x45   : > { %612 = vrot.lane.b32.xlu1 %v1241_v46, %s851_s29 }
  0x46   : > { %610 = vrot.lane.b32.xlu0 %v359_v2, %s851_s29 }
  0x49   : > { %616 = vrot.lane.b32.xlu1 %v362_v4, %s851_s29 }
  0x4a   : > { %614 = vrot.lane.b32.xlu0 %v361_v26, %s851_s29 }
  0x4d   : > { %620 = vrot.lane.b32.xlu1 %v364_v55, %s851_s29 }
  0x4e   : > { %618 = vrot.lane.b32.xlu0 %v363_v44, %s851_s29 }
  0x83   : > { %v563_v58 = vpop.permute.xlu1 %562  ;;  %v559_v18 = vpop.permute.xlu0 %558 }
  0x84   : > { %v656_v25 = vadd.f32 %v563_v58, %v921_v15  ;;  %v654_v43 = vadd.f32 %v559_v18, %v924_v16 }
  0x86   : > { %v688_v46 = vmax.f32 %v656_v25, 0.0  ;;  %v686_v62 = vmax.f32 %v654_v43, 0.0 }
  0x87   : > { %v565_v28 = vpop.permute.xlu1 %564  ;;  %v561_v31 = vpop.permute.xlu0 %560 }
  0x88   : > { %721 = vst.msk [vmem:[%s931_s6 + $0x10] sm:$0xff] %vm718_vm1, %v688_v46  ;;  %719 = vst.msk [vmem:[%s931_s6] sm:$0xff] %vm718_vm1, %v686_v62  ;;  %v657_v63 = vadd.f32 %v565_v28, %v935_v19  ;;  %v655_v2 = vadd.f32 %v561_v31, %v939_v20 }
  0x8a   : > { %v689_v3 = vmax.f32 %v657_v63, 0.0  ;;  %v687_v15 = vmax.f32 %v655_v2, 0.0 }
  0x8b   : > { %v569_v4 = vpop.permute.xlu1 %568  ;;  %v567_v13 = vpop.permute.xlu0 %566 }
  0x8c   : > { %722 = vst.msk [vmem:[%s931_s6 + $0x18] sm:$0xff] %vm718_vm1, %v689_v3  ;;  %720 = vst.msk [vmem:[%s931_s6 + $0x8] sm:$0xff] %vm718_vm1, %v687_v15  ;;  %v659_v16 = vadd.f32 %v569_v4, %v957_v36  ;;  %v658_v14 = vadd.f32 %v567_v13, %v960_v37 }
  0x8e   : > { %v691_v17 = vmax.f32 %v659_v16, 0.0  ;;  %v690_v6 = vmax.f32 %v658_v14, 0.0 }
  0x8f   : > { %v573_v26 = vpop.permute.xlu1 %572  ;;  %v571_v19 = vpop.permute.xlu0 %570 }
  0x90   : > { %724 = vst.msk [vmem:[%s931_s6 + $0x28] sm:$0xff] %vm718_vm1, %v691_v17  ;;  %723 = vst.msk [vmem:[%s931_s6 + $0x20] sm:$0xff] %vm718_vm1, %v690_v6  ;;  %v661_v20 = vadd.f32 %v573_v26, %v987_v52  ;;  %v660_v27 = vadd.f32 %v571_v19, %v990_v53 }
  0x92   : > { %v693_v29 = vmax.f32 %v661_v20, 0.0  ;;  %v692_v30 = vmax.f32 %v660_v27, 0.0 }
  0x93   : > { %v577_v38 = vpop.permute.xlu1 %576  ;;  %v575_v36 = vpop.permute.xlu0 %574 }
  0x94   : > { %726 = vst.msk [vmem:[%s931_s6 + $0x38] sm:$0xff] %vm718_vm1, %v693_v29  ;;  %725 = vst.msk [vmem:[%s931_s6 + $0x30] sm:$0xff] %vm718_vm1, %v692_v30  ;;  %v663_v37 = vadd.f32 %v577_v38, %v1012_v5  ;;  %v662_v39 = vadd.f32 %v575_v36, %v1016_v7 }
  0x96   : > { %v695_v41 = vmax.f32 %v663_v37, 0.0  ;;  %v694_v48 = vmax.f32 %v662_v39, 0.0 }
  0x97   : > { %v581_v55 = vpop.permute.xlu1 %580  ;;  %v579_v52 = vpop.permute.xlu0 %578 }
  0x98   : > { %728 = vst.msk [vmem:[%s931_s6 + $0x48] sm:$0xff] %vm718_vm1, %v695_v41  ;;  %727 = vst.msk [vmem:[%s931_s6 + $0x40] sm:$0xff] %vm718_vm1, %v694_v48  ;;  %v665_v53 = vadd.f32 %v581_v55, %v1019_v8  ;;  %v664_v44 = vadd.f32 %v579_v52, %v1022_v9 }
  0x9a   : > { %v697_v45 = vmax.f32 %v665_v53, 0.0  ;;  %v696_v49 = vmax.f32 %v664_v44, 0.0 }
  0x9b   : > { %v585_v56 = vpop.permute.xlu1 %584  ;;  %v583_v5 = vpop.permute.xlu0 %582 }
  0x9c   : > { %730 = vst.msk [vmem:[%s931_s6 + $0x58] sm:$0xff] %vm718_vm1, %v697_v45  ;;  %729 = vst.msk [vmem:[%s931_s6 + $0x50] sm:$0xff] %vm718_vm1, %v696_v49  ;;  %v667_v7 = vadd.f32 %v585_v56, %v1050_v33  ;;  %v666_v1 = vadd.f32 %v583_v5, %v1053_v34 }
  0x9e   : > { %v699_v60 = vmax.f32 %v667_v7, 0.0  ;;  %v698_v61 = vmax.f32 %v666_v1, 0.0 }
  0x9f   : > { %v589_v58 = vpop.permute.xlu1 %588  ;;  %v587_v8 = vpop.permute.xlu0 %586 }
  0xa0   : > { %732 = vst.msk [vmem:[%s931_s6 + $0x68] sm:$0xff] %vm718_vm1, %v699_v60  ;;  %731 = vst.msk [vmem:[%s931_s6 + $0x60] sm:$0xff] %vm718_vm1, %v698_v61  ;;  %v669_v9 = vadd.f32 %v589_v58, %v1079_v50  ;;  %v668_v18 = vadd.f32 %v587_v8, %v1082_v51 }
  0xa2   : > { %v701_v25 = vmax.f32 %v669_v9, 0.0  ;;  %v700_v43 = vmax.f32 %v668_v18, 0.0 }
  0xa3   : > { %v593_v46 = vpop.permute.xlu1 %592  ;;  %v591_v33 = vpop.permute.xlu0 %590 }
  0xa4   : > { %734 = vst.msk [vmem:[%s931_s6 + $0x78] sm:$0xff] %vm718_vm1, %v701_v25  ;;  %733 = vst.msk [vmem:[%s931_s6 + $0x70] sm:$0xff] %vm718_vm1, %v700_v43  ;;  %v671_v34 = vadd.f32 %v593_v46, %v1105_v10  ;;  %v670_v62 = vadd.f32 %v591_v33, %v1108_v11 }
  0xa6   : > { %v703_v28 = vmax.f32 %v671_v34, 0.0  ;;  %v702_v31 = vmax.f32 %v670_v62, 0.0 }
  0xa7   : > { %v597_v63 = vpop.permute.xlu1 %596 }
  0xa8   : > { %v595_v50 = vpop.permute.xlu0 %594  ;;  %736 = vst.msk [vmem:[%s931_s6 + $0x88] sm:$0xff] %vm718_vm1, %v703_v28  ;;  %735 = vst.msk [vmem:[%s931_s6 + $0x80] sm:$0xff] %vm718_vm1, %v702_v31  ;;  %v673_v51 = vadd.f32 %v597_v63, %v1111_v12 }
  0xa9   : > { %v672_v2 = vadd.f32 %v595_v50, %v1141_v32 }
  0xaa   : > { %v705_v3 = vmax.f32 %v673_v51, 0.0 }
  0xab   : > { %v704_v15 = vmax.f32 %v672_v2, 0.0  ;;  %v601_v4 = vpop.permute.xlu1 %600 }
  0xac   : > { %v599_v10 = vpop.permute.xlu0 %598  ;;  %738 = vst.msk [vmem:[%s931_s6 + $0x98] sm:$0xff] %vm718_vm1, %v705_v3  ;;  %v675_v11 = vadd.f32 %v601_v4, %v1144_v35 }
  0xad   : > { %737 = vst.msk [vmem:[%s931_s6 + $0x90] sm:$0xff] %vm718_vm1, %v704_v15  ;;  %v674_v13 = vadd.f32 %v599_v10, %v1149_v40 }
  0xae   : > { %v707_v16 = vmax.f32 %v675_v11, 0.0 }
  0xaf   : > { %v706_v14 = vmax.f32 %v674_v13, 0.0  ;;  %v605_v17 = vpop.permute.xlu1 %604 }
  0xb0   : > { %v603_v12 = vpop.permute.xlu0 %602  ;;  %740 = vst.msk [vmem:[%s931_s6 + $0xa8] sm:$0xff] %vm718_vm1, %v707_v16  ;;  %v677_v32 = vadd.f32 %v605_v17, %v1181_v59 }
  0xb1   : > { %739 = vst.msk [vmem:[%s931_s6 + $0xa0] sm:$0xff] %vm718_vm1, %v706_v14  ;;  %v676_v6 = vadd.f32 %v603_v12, %v1203_v22 }
  0xb2   : > { %v709_v26 = vmax.f32 %v677_v32, 0.0 }
  0xb3   : > { %v708_v19 = vmax.f32 %v676_v6, 0.0  ;;  %v609_v20 = vpop.permute.xlu1 %608 }
  0xb4   : > { %v607_v35 = vpop.permute.xlu0 %606  ;;  %742 = vst.msk [vmem:[%s931_s6 + $0xb8] sm:$0xff] %vm718_vm1, %v709_v26  ;;  %v679_v40 = vadd.f32 %v609_v20, %v1206_v23 }
  0xb5   : > { %741 = vst.msk [vmem:[%s931_s6 + $0xb0] sm:$0xff] %vm718_vm1, %v708_v19  ;;  %v678_v27 = vadd.f32 %v607_v35, %v1209_v24 }
  0xb6   : > { %v711_v29 = vmax.f32 %v679_v40, 0.0 }
  0xb7   : > { %v710_v30 = vmax.f32 %v678_v27, 0.0  ;;  %v613_v38 = vpop.permute.xlu1 %612 }
  0xb8   : > { %v611_v59 = vpop.permute.xlu0 %610  ;;  %744 = vst.msk [vmem:[%s931_s6 + $0xc8] sm:$0xff] %vm718_vm1, %v711_v29  ;;  %v681_v22 = vadd.f32 %v613_v38, %v1244_v47 }
  0xb9   : > { %743 = vst.msk [vmem:[%s931_s6 + $0xc0] sm:$0xff] %vm718_vm1, %v710_v30  ;;  %v680_v36 = vadd.f32 %v611_v59, %v1247_v54 }
  0xba   : > { %v713_v37 = vmax.f32 %v681_v22, 0.0 }
  0xbb   : > { %v712_v39 = vmax.f32 %v680_v36, 0.0  ;;  %v617_v41 = vpop.permute.xlu1 %616 }
  0xbc   : > { %v615_v23 = vpop.permute.xlu0 %614  ;;  %746 = vst.msk [vmem:[%s931_s6 + $0xd8] sm:$0xff] %vm718_vm1, %v713_v37  ;;  %v683_v24 = vadd.f32 %v617_v41, %v1256_v57 }
  0xbd   : > { %745 = vst.msk [vmem:[%s931_s6 + $0xd0] sm:$0xff] %vm718_vm1, %v712_v39  ;;  %v682_v48 = vadd.f32 %v615_v23, %v1276_v21 }
  0xbe   : > { %v715_v55 = vmax.f32 %v683_v24, 0.0 }
  0xbf   : > { %v714_v52 = vmax.f32 %v682_v48, 0.0  ;;  %v621_v53 = vpop.permute.xlu1 %620 }
  0xc0   : > { %v619_v47 = vpop.permute.xlu0 %618  ;;  %748 = vst.msk [vmem:[%s931_s6 + $0xe8] sm:$0xff] %vm718_vm1, %v715_v55  ;;  %v685_v54 = vadd.f32 %v621_v53, %v1295_v0 }
  0xc1   : > { %747 = vst.msk [vmem:[%s931_s6 + $0xe0] sm:$0xff] %vm718_vm1, %v714_v52  ;;  %v684_v44 = vadd.f32 %v619_v47, %v1298_v42 }
  0xc2   : > { %v717_v45 = vmax.f32 %v685_v54, 0.0 }
  0xc3   : > { %v716_v49 = vmax.f32 %v684_v44, 0.0 }
  0xc4   : > { %750 = vst.msk [vmem:[%s931_s6 + $0xf8] sm:$0xff] %vm718_vm1, %v717_v45 }
  0xc5   : > { %749 = vst.msk [vmem:[%s931_s6 + $0xf0] sm:$0xff] %vm718_vm1, %v716_v49 }
  0xc6 PF: > { %s14_s15 = sadd.s32 1, %s849_s15  }
  0xc7   : > { %p11_p4 = scmp.ge.s32.totalorder %s14_s15, 6  }
  0xc9   :  { %13 = sbr.rel (!%p11_p4) target bundleno = 1 (0x1), region = 69 }

</bundles_post_ra>
